<compile_context>
chip_gen: v7x
topology: tpu7x:2x2x1
jax: 0.10.0
libtpu: 0.0.40
codegen_flags: <defaults>
</compile_context>

<pallas_src>
import functools

import jax
import jax.numpy as jnp
from jax.experimental import pallas as pl
from jax.experimental.pallas import tpu as pltpu

BN_EPS = 1e-4
LANES = 128


def _round_up(x, m):
    return ((x + m - 1) // m) * m


def _vmem_capacity_bytes():
    try:
        info = pltpu.get_tpu_info()
        cap = getattr(info, "vmem_capacity_bytes", None)
        if cap:
            return int(cap)
    except Exception:
        pass
    return 64 * 1024 * 1024  # conservative (v7x-sized) fallback


def _pick_tile_h(h, w_img, cin, co, with_pool, pad_w_out, budget):
    """Largest even divisor of H whose per-step VMEM estimate fits the budget."""
    wp2 = w_img + 2

    def est(t):
        in_blk = t * wp2 * cin * 2                               # bf16 main input block
        halo = 2 * wp2 * cin * 2                                 # two 1-row halo blocks
        out_w = wp2 if pad_w_out else w_img
        out_elt = 2 if pad_w_out else 4                          # bf16 intermediate / f32 final
        out_blk = t * out_w * co * out_elt
        pool_blk = (t // 2) * (w_img // 2) * co * 4 if with_pool else 0
        acc = t * w_img * co * 4                                 # f32 accumulator scratch
        weights = 9 * cin * co * 2 + co * 4                      # resident weights + shift
        # rough allowance for materialized width-shifted slices / dot + relu temporaries
        interm = 6 * t * max(w_img * cin * 2, w_img * co * 4)
        return 2 * (in_blk + halo + out_blk + pool_blk) + acc + weights + interm

    for t in range(h, 1, -2):          # largest even divisor first (amortize per-step overhead)
        if h % t:
            continue
        if est(t) <= budget:
            return t
    return 2


# -----------------------------------------------------------------------------
# Fused kernel: 3x3 conv (per-tap dots) + folded-BN shift + ReLU (+ optional 2x2 maxpool)
# -----------------------------------------------------------------------------
def _conv_bn_relu_kernel(x_ref, xt_ref, xb_ref, w_ref, shift_ref, *rest,
                         with_pool, pad_w_out):
    if with_pool:
        o_ref, o_small_ref, acc_ref = rest
    else:
        o_ref, acc_ref = rest
        o_small_ref = None

    i = pl.program_id(1)
    n_t = pl.num_programs(1)
    th, w_out, co = acc_ref.shape

    x = x_ref[0]                      # (th, W+2, Cin) bf16, zero border columns
    wt = w_ref[...]                   # (3, 3, Cin, Co) bf16, BN scale already folded in

    def dg(a, w_tap):
        return jax.lax.dot_general(
            a, w_tap, dimension_numbers=(((2,), (0,)), ((), ())),
            preferred_element_type=jnp.float32)

    # width-shifted views of the main tile (the W padding columns supply the dw halo)
    xs0 = x[:, 0:w_out, :]
    xs1 = x[:, 1:w_out + 1, :]
    xs2 = x[:, 2:w_out + 2, :]

    # center-row taps (dh = 1): every output row reads its own input row
    acc_ref[...] = dg(xs0, wt[1, 0]) + dg(xs1, wt[1, 1]) + dg(xs2, wt[1, 2])

    # row-above taps (dh = 0): main-tile rows 0..th-2 feed output rows 1..th-1
    acc_ref[1:, :, :] += (dg(xs0[:th - 1], wt[0, 0]) + dg(xs1[:th - 1], wt[0, 1])
                          + dg(xs2[:th - 1], wt[0, 2]))

    # row-below taps (dh = 2): main-tile rows 1..th-1 feed output rows 0..th-2
    acc_ref[:th - 1, :, :] += (dg(xs0[1:], wt[2, 0]) + dg(xs1[1:], wt[2, 1])
                               + dg(xs2[1:], wt[2, 2]))

    # halo-row contributions (conv zero padding along H handled by skipping at the borders)
    @pl.when(i > 0)
    def _():
        xt = xt_ref[0]                # (1, W+2, Cin) = image row just above this tile
        acc_ref[0:1, :, :] += (dg(xt[:, 0:w_out, :], wt[0, 0])
                               + dg(xt[:, 1:w_out + 1, :], wt[0, 1])
                               + dg(xt[:, 2:w_out + 2, :], wt[0, 2]))

    @pl.when(i < n_t - 1)
    def _():
        xb = xb_ref[0]                # (1, W+2, Cin) = image row just below this tile
        acc_ref[th - 1:th, :, :] += (dg(xb[:, 0:w_out, :], wt[2, 0])
                                     + dg(xb[:, 1:w_out + 1, :], wt[2, 1])
                                     + dg(xb[:, 2:w_out + 2, :], wt[2, 2]))

    # folded BN shift + ReLU in f32 (scale already folded into the weights)
    y = jnp.maximum(acc_ref[...] + shift_ref[0], 0.0)       # (th, W, Co)

    if pad_w_out:
        # write the W-padded inter-block layout: interior + explicit zero edge columns
        o_ref[0, :, 1:w_out + 1, :] = y.astype(o_ref.dtype)
        zcol = jnp.zeros((th, 1, co), o_ref.dtype)
        o_ref[0, :, 0:1, :] = zcol
        o_ref[0, :, w_out + 1:w_out + 2, :] = zcol
    else:
        o_ref[0] = y.astype(o_ref.dtype)

    if with_pool:
        # fused 2x2 / stride-2 max pool: row-pair max first (cheap leading-dim split),
        # then column-pair max on the already-halved tensor.
        y2 = y.reshape(th // 2, 2, w_out, co)
        rmax = jnp.maximum(y2[:, 0], y2[:, 1])               # (th//2, W, Co)
        r2 = rmax.reshape(th // 2, w_out // 2, 2, co)
        p = jnp.maximum(r2[:, :, 0, :], r2[:, :, 1, :])      # (th//2, W//2, Co)
        o_small_ref[0] = p.astype(o_small_ref.dtype)


# -----------------------------------------------------------------------------
# Wrapper for one ConvBnRelu2d block (optionally fusing the trailing max-pool)
# -----------------------------------------------------------------------------
def _conv_bn_relu_block(x_wpad, w_hwio, gamma, beta, mean, var, *,
                        cout_store, with_pool, pad_w_out):
    n, h, wp2, cin = x_wpad.shape       # input is already width-padded: wp2 = W + 2
    w_img = wp2 - 2
    kh, kw, cin_w, cout = w_hwio.shape
    assert (kh, kw) == (3, 3)
    assert cin >= cin_w
    assert h % 2 == 0 and w_img % 2 == 0  # TODO(synk): odd spatial sizes (pool floor) unsupported

    # Fold BN (eval mode): scale goes into the weights, only shift stays in the kernel.
    scale = (gamma / jnp.sqrt(var + BN_EPS)).astype(jnp.float32)
    shift = (beta - mean * scale).astype(jnp.float32)
    w_scaled = w_hwio.astype(jnp.float32) * scale[None, None, None, :]
    w_pad = jnp.pad(w_scaled, ((0, 0), (0, 0), (0, cin - cin_w), (0, cout_store - cout)))
    w_bf = w_pad.astype(jnp.bfloat16)                          # (3, 3, cin, cout_store)
    shift_p = jnp.pad(shift, (0, cout_store - cout)).reshape(1, cout_store)

    vmem_limit = int(0.75 * _vmem_capacity_bytes())
    tile_h = _pick_tile_h(h, w_img, cin, cout_store, with_pool, pad_w_out,
                          budget=int(0.7 * vmem_limit))
    n_t = h // tile_h

    in_specs = [
        # main row tile (width-padded)
        pl.BlockSpec((1, tile_h, wp2, cin), lambda b, i: (b, i, 0, 0)),
        # 1-row halo above (clamped at the top border; contribution gated by pl.when)
        pl.BlockSpec((1, 1, wp2, cin),
                     lambda b, i: (b, jnp.maximum(i * tile_h - 1, 0), 0, 0)),
        # 1-row halo below (clamped at the bottom border; contribution gated by pl.when)
        pl.BlockSpec((1, 1, wp2, cin),
                     lambda b, i: (b, jnp.minimum((i + 1) * tile_h, h - 1), 0, 0)),
        # weights / BN shift: resident (constant block index)
        pl.BlockSpec((3, 3, cin, cout_store), lambda b, i: (0, 0, 0, 0)),
        pl.BlockSpec((1, cout_store), lambda b, i: (0, 0)),
    ]

    if pad_w_out:
        # intermediate carry: bf16, width-padded, lane-dense channels
        out_shape = jax.ShapeDtypeStruct((n, h, wp2, cout_store), jnp.bfloat16)
        out_specs = pl.BlockSpec((1, tile_h, wp2, cout_store), lambda b, i: (b, i, 0, 0))
    else:
        # final outputs: true channel width, f32
        out_shape = (jax.ShapeDtypeStruct((n, h, w_img, cout_store), jnp.float32),
                     jax.ShapeDtypeStruct((n, h // 2, w_img // 2, cout_store), jnp.float32))
        out_specs = (pl.BlockSpec((1, tile_h, w_img, cout_store), lambda b, i: (b, i, 0, 0)),
                     pl.BlockSpec((1, tile_h // 2, w_img // 2, cout_store),
                                  lambda b, i: (b, i, 0, 0)))

    kernel = functools.partial(_conv_bn_relu_kernel,
                               with_pool=with_pool, pad_w_out=pad_w_out)

    return pl.pallas_call(
        kernel,
        out_shape=out_shape,
        grid=(n, n_t),
        in_specs=in_specs,
        out_specs=out_specs,
        scratch_shapes=[pltpu.VMEM((tile_h, w_img, cout_store), jnp.float32)],
        compiler_params=pltpu.CompilerParams(
            dimension_semantics=("parallel", "parallel"),
            vmem_limit_bytes=vmem_limit),
    )(x_wpad, x_wpad, x_wpad, w_bf, shift_p)


# -----------------------------------------------------------------------------
# StackEncoder forward
# -----------------------------------------------------------------------------
def stack_encoder_forward_nhwc(x_nhwc, params):
    """NHWC entry point; returns f32 (x, x_small) in NHWC at the true channel width."""
    p1, p2 = params["block1"], params["block2"]
    cout = p2["w"].shape[-1]
    cp = _round_up(cout, LANES)  # lane-dense channel count for the intermediate h1 only

    # pad block1's (tiny) input once along W; padded lanes/columns stay exactly zero
    x_wpad = jnp.pad(x_nhwc.astype(jnp.bfloat16), ((0, 0), (0, 0), (1, 1), (0, 0)))

    h1 = _conv_bn_relu_block(x_wpad, p1["w"], p1["gamma"], p1["beta"], p1["mean"], p1["var"],
                             cout_store=cp, with_pool=False, pad_w_out=True)
    x_full, x_small = _conv_bn_relu_block(h1, p2["w"], p2["gamma"], p2["beta"], p2["mean"],
                                          p2["var"], cout_store=cout, with_pool=True,
                                          pad_w_out=False)
    return x_full, x_small


@jax.jit
def stack_encoder_forward(x_nchw, params):
    """StackEncoder.forward: returns (x, x_small) in NCHW, matching the PyTorch module."""
    x = jnp.transpose(x_nchw, (0, 2, 3, 1))
    xf, xs = stack_encoder_forward_nhwc(x, params)
    x_out = jnp.transpose(xf, (0, 3, 1, 2)).astype(x_nchw.dtype)
    x_small_out = jnp.transpose(xs, (0, 3, 1, 2)).astype(x_nchw.dtype)
    return x_out, x_small_out


# -----------------------------------------------------------------------------
# Deterministic parameter construction (shapes from the module's __init__)
# -----------------------------------------------------------------------------
def make_params(key, x_channels, y_channels):
    def conv_bn_params(key, cin, cout):
        kw, kg, kb, km, kv = jax.random.split(key, 5)
        fan_in = cin * 3 * 3
        # PyTorch Conv2d weight layout is (Cout, Cin, kH, kW); transpose to HWIO for NHWC kernels.
        w_oihw = jax.random.normal(kw, (cout, cin, 3, 3), jnp.float32) / jnp.sqrt(fan_in)
        w_hwio = jnp.transpose(w_oihw, (2, 3, 1, 0))
        return dict(
            w=w_hwio,
            gamma=jax.random.uniform(kg, (cout,), jnp.float32, 0.5, 1.5),
            beta=0.1 * jax.random.normal(kb, (cout,), jnp.float32),
            mean=0.1 * jax.random.normal(km, (cout,), jnp.float32),
            var=jax.random.uniform(kv, (cout,), jnp.float32, 0.5, 1.5),
        )

    k1, k2 = jax.random.split(key)
    return {
        "block1": conv_bn_params(k1, x_channels, y_channels),
        "block2": conv_bn_params(k2, y_channels, y_channels),
    }


# -----------------------------------------------------------------------------
# Plain-JAX f32 reference (for correctness check)
# -----------------------------------------------------------------------------
def ref_conv_bn_relu(x_nhwc, w_hwio, gamma, beta, mean, var):
    scale = gamma / jnp.sqrt(var + BN_EPS)
    shift = beta - mean * scale
    y = jax.lax.conv_general_dilated(
        x_nhwc, w_hwio, window_strides=(1, 1), padding="SAME",
        dimension_numbers=("NHWC", "HWIO", "NHWC"),
        precision=jax.lax.Precision.HIGHEST)
    return jnp.maximum(y * scale + shift, 0.0)


def ref_stack_encoder(x_nchw, params):
    x = jnp.transpose(x_nchw, (0, 2, 3, 1))
    p1, p2 = params["block1"], params["block2"]
    x = ref_conv_bn_relu(x, p1["w"], p1["gamma"], p1["beta"], p1["mean"], p1["var"])
    x = ref_conv_bn_relu(x, p2["w"], p2["gamma"], p2["beta"], p2["mean"], p2["var"])
    x_small = jax.lax.reduce_window(
        x, -jnp.inf, jax.lax.max,
        window_dimensions=(1, 2, 2, 1), window_strides=(1, 2, 2, 1), padding="VALID")
    return jnp.transpose(x, (0, 3, 1, 2)), jnp.transpose(x_small, (0, 3, 1, 2))


# -----------------------------------------------------------------------------
if __name__ == "__main__":
    key = jax.random.PRNGKey(0)
    kx, kp = jax.random.split(key)

    N, x_channels, y_channels, S = 2, 4, 8, 16
    x = jax.random.normal(kx, (N, x_channels, S, S), jnp.float32)   # NCHW like PyTorch
    params = make_params(kp, x_channels, y_channels)

    out, out_small = stack_encoder_forward(x, params)
    out = jax.block_until_ready(out)
    out_small = jax.block_until_ready(out_small)

    assert out.shape == (N, y_channels, S, S)
    assert out_small.shape == (N, y_channels, S // 2, S // 2)

    ref_out, ref_out_small = ref_stack_encoder(x, params)
    # bf16 matmul operands / bf16 intermediate activation (f32 accumulation) => loosened tolerance
    # against the pure-f32 reference.
    assert jnp.allclose(out, ref_out, atol=5e-2, rtol=5e-2), "conv output mismatch"
    assert jnp.allclose(out_small, ref_out_small, atol=5e-2, rtol=5e-2), "pool output mismatch"

    print("KERNEL_OK")
</pallas_src>

<mosaic_0001>
module attributes {stable_mosaic.version = 11 : i64} {
  func.func @_conv_bn_relu_kernel(%arg0: i32, %arg1: i32, %arg2: memref<1x16x18x4xbf16, #tpu.memory_space<vmem>>, %arg3: memref<1x1x18x4xbf16, #tpu.memory_space<vmem>>, %arg4: memref<1x1x18x4xbf16, #tpu.memory_space<vmem>>, %arg5: memref<3x3x4x128xbf16, #tpu.memory_space<vmem>>, %arg6: memref<1x128xf32, #tpu.memory_space<vmem>>, %arg7: memref<1x16x18x128xbf16, #tpu.memory_space<vmem>>, %arg8: memref<16x16x128xf32, #tpu.memory_space<vmem>>) attributes {dimension_semantics = [#tpu.dimension_semantics<parallel>, #tpu.dimension_semantics<parallel>], iteration_bounds = array<i64: 2, 1>, scalar_prefetch = 0 : i64, scratch_operands = 1 : i64, tpu.core_type = #tpu.core_type<tc>, window_params = [{transform_indices = @transform_0, window_bounds = array<i64: 1, 16, 18, 4>}, {transform_indices = @transform_1, window_bounds = array<i64: 1, 1, 18, 4>}, {transform_indices = @transform_2, window_bounds = array<i64: 1, 1, 18, 4>}, {pipeline_mode = #tpu.pipeline_mode<synchronous>, transform_indices = @transform_3, window_bounds = array<i64: 3, 3, 4, 128>}, {pipeline_mode = #tpu.pipeline_mode<synchronous>, transform_indices = @transform_4, window_bounds = array<i64: 1, 128>}, {transform_indices = @transform_5, window_bounds = array<i64: 1, 16, 18, 128>}]} {
    %c0 = arith.constant 0 : index
    %c0_0 = arith.constant 0 : index
    %c0_1 = arith.constant 0 : index
    %c0_2 = arith.constant 0 : index
    %0 = vector.load %arg2[%c0, %c0_0, %c0_1, %c0_2] : memref<1x16x18x4xbf16, #tpu.memory_space<vmem>>, vector<1x16x18x4xbf16>
    %1 = vector.shape_cast %0 : vector<1x16x18x4xbf16> to vector<16x18x4xbf16>
    %c0_3 = arith.constant 0 : index
    %c0_4 = arith.constant 0 : index
    %c0_5 = arith.constant 0 : index
    %c0_6 = arith.constant 0 : index
    %2 = vector.load %arg5[%c0_3, %c0_4, %c0_5, %c0_6] : memref<3x3x4x128xbf16, #tpu.memory_space<vmem>>, vector<3x3x4x128xbf16>
    %3 = vector.extract_strided_slice %1 {offsets = [0, 0, 0], sizes = [16, 16, 4], strides = [1, 1, 1]} : vector<16x18x4xbf16> to vector<16x16x4xbf16>
    %4 = vector.extract_strided_slice %1 {offsets = [0, 1, 0], sizes = [16, 16, 4], strides = [1, 1, 1]} : vector<16x18x4xbf16> to vector<16x16x4xbf16>
    %5 = vector.extract_strided_slice %1 {offsets = [0, 2, 0], sizes = [16, 16, 4], strides = [1, 1, 1]} : vector<16x18x4xbf16> to vector<16x16x4xbf16>
    %6 = vector.extract_strided_slice %2 {offsets = [1, 0, 0, 0], sizes = [1, 1, 4, 128], strides = [1, 1, 1, 1]} : vector<3x3x4x128xbf16> to vector<1x1x4x128xbf16>
    %7 = vector.shape_cast %6 : vector<1x1x4x128xbf16> to vector<4x128xbf16>
    %cst = arith.constant dense<0.000000e+00> : vector<16x16x128xf32>
    %8 = tpu.matmul %3, %7, %cst {dimension_numbers = #tpu.dot_dimension_numbers<[2], [0], [0, 1], [1], [0, 0, 0, 1, 1, 1], [], []>} : vector<16x16x4xbf16>, vector<4x128xbf16>, vector<16x16x128xf32> -> vector<16x16x128xf32>
    %9 = vector.extract_strided_slice %2 {offsets = [1, 1, 0, 0], sizes = [1, 1, 4, 128], strides = [1, 1, 1, 1]} : vector<3x3x4x128xbf16> to vector<1x1x4x128xbf16>
    %10 = vector.shape_cast %9 : vector<1x1x4x128xbf16> to vector<4x128xbf16>
    %cst_7 = arith.constant dense<0.000000e+00> : vector<16x16x128xf32>
    %11 = tpu.matmul %4, %10, %cst_7 {dimension_numbers = #tpu.dot_dimension_numbers<[2], [0], [0, 1], [1], [0, 0, 0, 1, 1, 1], [], []>} : vector<16x16x4xbf16>, vector<4x128xbf16>, vector<16x16x128xf32> -> vector<16x16x128xf32>
    %12 = arith.addf %8, %11 : vector<16x16x128xf32>
    %13 = vector.extract_strided_slice %2 {offsets = [1, 2, 0, 0], sizes = [1, 1, 4, 128], strides = [1, 1, 1, 1]} : vector<3x3x4x128xbf16> to vector<1x1x4x128xbf16>
    %14 = vector.shape_cast %13 : vector<1x1x4x128xbf16> to vector<4x128xbf16>
    %cst_8 = arith.constant dense<0.000000e+00> : vector<16x16x128xf32>
    %15 = tpu.matmul %5, %14, %cst_8 {dimension_numbers = #tpu.dot_dimension_numbers<[2], [0], [0, 1], [1], [0, 0, 0, 1, 1, 1], [], []>} : vector<16x16x4xbf16>, vector<4x128xbf16>, vector<16x16x128xf32> -> vector<16x16x128xf32>
    %16 = arith.addf %12, %15 : vector<16x16x128xf32>
    %c0_9 = arith.constant 0 : index
    %c0_10 = arith.constant 0 : index
    %c0_11 = arith.constant 0 : index
    %17 = vector.load %arg8[%c0_9, %c0_10, %c0_11] : memref<16x16x128xf32, #tpu.memory_space<vmem>>, vector<16x16x128xf32>
    tpu.vector_store %arg8[%c0_9, %c0_10, %c0_11], %16 {strides = array<i32>} : memref<16x16x128xf32, #tpu.memory_space<vmem>>, vector<16x16x128xf32>,
    %c1 = arith.constant 1 : index
    %c0_12 = arith.constant 0 : index
    %c0_13 = arith.constant 0 : index
    %18 = vector.load %arg8[%c1, %c0_12, %c0_13] : memref<16x16x128xf32, #tpu.memory_space<vmem>>, vector<15x16x128xf32>
    %19 = vector.extract_strided_slice %3 {offsets = [0, 0, 0], sizes = [15, 16, 4], strides = [1, 1, 1]} : vector<16x16x4xbf16> to vector<15x16x4xbf16>
    %20 = vector.extract_strided_slice %2 {offsets = [0, 0, 0, 0], sizes = [1, 1, 4, 128], strides = [1, 1, 1, 1]} : vector<3x3x4x128xbf16> to vector<1x1x4x128xbf16>
    %21 = vector.shape_cast %20 : vector<1x1x4x128xbf16> to vector<4x128xbf16>
    %cst_14 = arith.constant dense<0.000000e+00> : vector<15x16x128xf32>
    %22 = tpu.matmul %19, %21, %cst_14 {dimension_numbers = #tpu.dot_dimension_numbers<[2], [0], [0, 1], [1], [0, 0, 0, 1, 1, 1], [], []>} : vector<15x16x4xbf16>, vector<4x128xbf16>, vector<15x16x128xf32> -> vector<15x16x128xf32>
    %23 = vector.extract_strided_slice %4 {offsets = [0, 0, 0], sizes = [15, 16, 4], strides = [1, 1, 1]} : vector<16x16x4xbf16> to vector<15x16x4xbf16>
    %24 = vector.extract_strided_slice %2 {offsets = [0, 1, 0, 0], sizes = [1, 1, 4, 128], strides = [1, 1, 1, 1]} : vector<3x3x4x128xbf16> to vector<1x1x4x128xbf16>
    %25 = vector.shape_cast %24 : vector<1x1x4x128xbf16> to vector<4x128xbf16>
    %cst_15 = arith.constant dense<0.000000e+00> : vector<15x16x128xf32>
    %26 = tpu.matmul %23, %25, %cst_15 {dimension_numbers = #tpu.dot_dimension_numbers<[2], [0], [0, 1], [1], [0, 0, 0, 1, 1, 1], [], []>} : vector<15x16x4xbf16>, vector<4x128xbf16>, vector<15x16x128xf32> -> vector<15x16x128xf32>
    %27 = arith.addf %22, %26 : vector<15x16x128xf32>
    %28 = vector.extract_strided_slice %5 {offsets = [0, 0, 0], sizes = [15, 16, 4], strides = [1, 1, 1]} : vector<16x16x4xbf16> to vector<15x16x4xbf16>
    %29 = vector.extract_strided_slice %2 {offsets = [0, 2, 0, 0], sizes = [1, 1, 4, 128], strides = [1, 1, 1, 1]} : vector<3x3x4x128xbf16> to vector<1x1x4x128xbf16>
    %30 = vector.shape_cast %29 : vector<1x1x4x128xbf16> to vector<4x128xbf16>
    %cst_16 = arith.constant dense<0.000000e+00> : vector<15x16x128xf32>
    %31 = tpu.matmul %28, %30, %cst_16 {dimension_numbers = #tpu.dot_dimension_numbers<[2], [0], [0, 1], [1], [0, 0, 0, 1, 1, 1], [], []>} : vector<15x16x4xbf16>, vector<4x128xbf16>, vector<15x16x128xf32> -> vector<15x16x128xf32>
    %32 = arith.addf %27, %31 : vector<15x16x128xf32>
    %33 = arith.addf %18, %32 : vector<15x16x128xf32>
    %c1_17 = arith.constant 1 : index
    %c0_18 = arith.constant 0 : index
    %c0_19 = arith.constant 0 : index
    %34 = vector.load %arg8[%c1_17, %c0_18, %c0_19] : memref<16x16x128xf32, #tpu.memory_space<vmem>>, vector<15x16x128xf32>
    tpu.vector_store %arg8[%c1_17, %c0_18, %c0_19], %33 {strides = array<i32>} : memref<16x16x128xf32, #tpu.memory_space<vmem>>, vector<15x16x128xf32>,
    %c0_20 = arith.constant 0 : index
    %c0_21 = arith.constant 0 : index
    %c0_22 = arith.constant 0 : index
    %35 = vector.load %arg8[%c0_20, %c0_21, %c0_22] : memref<16x16x128xf32, #tpu.memory_space<vmem>>, vector<15x16x128xf32>
    %36 = vector.extract_strided_slice %3 {offsets = [1, 0, 0], sizes = [15, 16, 4], strides = [1, 1, 1]} : vector<16x16x4xbf16> to vector<15x16x4xbf16>
    %37 = vector.extract_strided_slice %2 {offsets = [2, 0, 0, 0], sizes = [1, 1, 4, 128], strides = [1, 1, 1, 1]} : vector<3x3x4x128xbf16> to vector<1x1x4x128xbf16>
    %38 = vector.shape_cast %37 : vector<1x1x4x128xbf16> to vector<4x128xbf16>
    %cst_23 = arith.constant dense<0.000000e+00> : vector<15x16x128xf32>
    %39 = tpu.matmul %36, %38, %cst_23 {dimension_numbers = #tpu.dot_dimension_numbers<[2], [0], [0, 1], [1], [0, 0, 0, 1, 1, 1], [], []>} : vector<15x16x4xbf16>, vector<4x128xbf16>, vector<15x16x128xf32> -> vector<15x16x128xf32>
    %40 = vector.extract_strided_slice %4 {offsets = [1, 0, 0], sizes = [15, 16, 4], strides = [1, 1, 1]} : vector<16x16x4xbf16> to vector<15x16x4xbf16>
    %41 = vector.extract_strided_slice %2 {offsets = [2, 1, 0, 0], sizes = [1, 1, 4, 128], strides = [1, 1, 1, 1]} : vector<3x3x4x128xbf16> to vector<1x1x4x128xbf16>
    %42 = vector.shape_cast %41 : vector<1x1x4x128xbf16> to vector<4x128xbf16>
    %cst_24 = arith.constant dense<0.000000e+00> : vector<15x16x128xf32>
    %43 = tpu.matmul %40, %42, %cst_24 {dimension_numbers = #tpu.dot_dimension_numbers<[2], [0], [0, 1], [1], [0, 0, 0, 1, 1, 1], [], []>} : vector<15x16x4xbf16>, vector<4x128xbf16>, vector<15x16x128xf32> -> vector<15x16x128xf32>
    %44 = arith.addf %39, %43 : vector<15x16x128xf32>
    %45 = vector.extract_strided_slice %5 {offsets = [1, 0, 0], sizes = [15, 16, 4], strides = [1, 1, 1]} : vector<16x16x4xbf16> to vector<15x16x4xbf16>
    %46 = vector.extract_strided_slice %2 {offsets = [2, 2, 0, 0], sizes = [1, 1, 4, 128], strides = [1, 1, 1, 1]} : vector<3x3x4x128xbf16> to vector<1x1x4x128xbf16>
    %47 = vector.shape_cast %46 : vector<1x1x4x128xbf16> to vector<4x128xbf16>
    %cst_25 = arith.constant dense<0.000000e+00> : vector<15x16x128xf32>
    %48 = tpu.matmul %45, %47, %cst_25 {dimension_numbers = #tpu.dot_dimension_numbers<[2], [0], [0, 1], [1], [0, 0, 0, 1, 1, 1], [], []>} : vector<15x16x4xbf16>, vector<4x128xbf16>, vector<15x16x128xf32> -> vector<15x16x128xf32>
    %49 = arith.addf %44, %48 : vector<15x16x128xf32>
    %50 = arith.addf %35, %49 : vector<15x16x128xf32>
    %c0_26 = arith.constant 0 : index
    %c0_27 = arith.constant 0 : index
    %c0_28 = arith.constant 0 : index
    %51 = vector.load %arg8[%c0_26, %c0_27, %c0_28] : memref<16x16x128xf32, #tpu.memory_space<vmem>>, vector<15x16x128xf32>
    tpu.vector_store %arg8[%c0_26, %c0_27, %c0_28], %50 {strides = array<i32>} : memref<16x16x128xf32, #tpu.memory_space<vmem>>, vector<15x16x128xf32>,
    %c0_i32 = arith.constant 0 : i32
    %52 = arith.cmpi sgt, %arg1, %c0_i32 : i32
    %53 = arith.extui %52 : i1 to i32
    %c0_i32_29 = arith.constant 0 : i32
    %54 = arith.cmpi ne, %53, %c0_i32_29 : i32
    scf.if %54 {
      %c0_50 = arith.constant 0 : index
      %c0_51 = arith.constant 0 : index
      %c0_52 = arith.constant 0 : index
      %c0_53 = arith.constant 0 : index
      %77 = vector.load %arg3[%c0_50, %c0_51, %c0_52, %c0_53] : memref<1x1x18x4xbf16, #tpu.memory_space<vmem>>, vector<1x1x18x4xbf16>
      %78 = vector.shape_cast %77 : vector<1x1x18x4xbf16> to vector<1x18x4xbf16>
      %c0_54 = arith.constant 0 : index
      %c0_55 = arith.constant 0 : index
      %c0_56 = arith.constant 0 : index
      %79 = vector.load %arg8[%c0_54, %c0_55, %c0_56] : memref<16x16x128xf32, #tpu.memory_space<vmem>>, vector<1x16x128xf32>
      %80 = vector.extract_strided_slice %78 {offsets = [0, 0, 0], sizes = [1, 16, 4], strides = [1, 1, 1]} : vector<1x18x4xbf16> to vector<1x16x4xbf16>
      %81 = vector.extract_strided_slice %2 {offsets = [0, 0, 0, 0], sizes = [1, 1, 4, 128], strides = [1, 1, 1, 1]} : vector<3x3x4x128xbf16> to vector<1x1x4x128xbf16>
      %82 = vector.shape_cast %81 : vector<1x1x4x128xbf16> to vector<4x128xbf16>
      %cst_57 = arith.constant dense<0.000000e+00> : vector<1x16x128xf32>
      %83 = tpu.matmul %80, %82, %cst_57 {dimension_numbers = #tpu.dot_dimension_numbers<[2], [0], [0, 1], [1], [0, 0, 0, 1, 1, 1], [], []>} : vector<1x16x4xbf16>, vector<4x128xbf16>, vector<1x16x128xf32> -> vector<1x16x128xf32>
      %84 = vector.extract_strided_slice %78 {offsets = [0, 1, 0], sizes = [1, 16, 4], strides = [1, 1, 1]} : vector<1x18x4xbf16> to vector<1x16x4xbf16>
      %85 = vector.extract_strided_slice %2 {offsets = [0, 1, 0, 0], sizes = [1, 1, 4, 128], strides = [1, 1, 1, 1]} : vector<3x3x4x128xbf16> to vector<1x1x4x128xbf16>
      %86 = vector.shape_cast %85 : vector<1x1x4x128xbf16> to vector<4x128xbf16>
      %cst_58 = arith.constant dense<0.000000e+00> : vector<1x16x128xf32>
      %87 = tpu.matmul %84, %86, %cst_58 {dimension_numbers = #tpu.dot_dimension_numbers<[2], [0], [0, 1], [1], [0, 0, 0, 1, 1, 1], [], []>} : vector<1x16x4xbf16>, vector<4x128xbf16>, vector<1x16x128xf32> -> vector<1x16x128xf32>
      %88 = arith.addf %83, %87 : vector<1x16x128xf32>
      %89 = vector.extract_strided_slice %78 {offsets = [0, 2, 0], sizes = [1, 16, 4], strides = [1, 1, 1]} : vector<1x18x4xbf16> to vector<1x16x4xbf16>
      %90 = vector.extract_strided_slice %2 {offsets = [0, 2, 0, 0], sizes = [1, 1, 4, 128], strides = [1, 1, 1, 1]} : vector<3x3x4x128xbf16> to vector<1x1x4x128xbf16>
      %91 = vector.shape_cast %90 : vector<1x1x4x128xbf16> to vector<4x128xbf16>
      %cst_59 = arith.constant dense<0.000000e+00> : vector<1x16x128xf32>
      %92 = tpu.matmul %89, %91, %cst_59 {dimension_numbers = #tpu.dot_dimension_numbers<[2], [0], [0, 1], [1], [0, 0, 0, 1, 1, 1], [], []>} : vector<1x16x4xbf16>, vector<4x128xbf16>, vector<1x16x128xf32> -> vector<1x16x128xf32>
      %93 = arith.addf %88, %92 : vector<1x16x128xf32>
      %94 = arith.addf %79, %93 : vector<1x16x128xf32>
      %c0_60 = arith.constant 0 : index
      %c0_61 = arith.constant 0 : index
      %c0_62 = arith.constant 0 : index
      %95 = vector.load %arg8[%c0_60, %c0_61, %c0_62] : memref<16x16x128xf32, #tpu.memory_space<vmem>>, vector<1x16x128xf32>
      tpu.vector_store %arg8[%c0_60, %c0_61, %c0_62], %94 {strides = array<i32>} : memref<16x16x128xf32, #tpu.memory_space<vmem>>, vector<1x16x128xf32>,
    } else {
    }
    %c0_i32_30 = arith.constant 0 : i32
    %55 = arith.cmpi slt, %arg1, %c0_i32_30 : i32
    %56 = arith.extui %55 : i1 to i32
    %c0_i32_31 = arith.constant 0 : i32
    %57 = arith.cmpi ne, %56, %c0_i32_31 : i32
    scf.if %57 {
      %c0_50 = arith.constant 0 : index
      %c0_51 = arith.constant 0 : index
      %c0_52 = arith.constant 0 : index
      %c0_53 = arith.constant 0 : index
      %77 = vector.load %arg4[%c0_50, %c0_51, %c0_52, %c0_53] : memref<1x1x18x4xbf16, #tpu.memory_space<vmem>>, vector<1x1x18x4xbf16>
      %78 = vector.shape_cast %77 : vector<1x1x18x4xbf16> to vector<1x18x4xbf16>
      %c15 = arith.constant 15 : index
      %c0_54 = arith.constant 0 : index
      %c0_55 = arith.constant 0 : index
      %79 = vector.load %arg8[%c15, %c0_54, %c0_55] : memref<16x16x128xf32, #tpu.memory_space<vmem>>, vector<1x16x128xf32>
      %80 = vector.extract_strided_slice %78 {offsets = [0, 0, 0], sizes = [1, 16, 4], strides = [1, 1, 1]} : vector<1x18x4xbf16> to vector<1x16x4xbf16>
      %81 = vector.extract_strided_slice %2 {offsets = [2, 0, 0, 0], sizes = [1, 1, 4, 128], strides = [1, 1, 1, 1]} : vector<3x3x4x128xbf16> to vector<1x1x4x128xbf16>
      %82 = vector.shape_cast %81 : vector<1x1x4x128xbf16> to vector<4x128xbf16>
      %cst_56 = arith.constant dense<0.000000e+00> : vector<1x16x128xf32>
      %83 = tpu.matmul %80, %82, %cst_56 {dimension_numbers = #tpu.dot_dimension_numbers<[2], [0], [0, 1], [1], [0, 0, 0, 1, 1, 1], [], []>} : vector<1x16x4xbf16>, vector<4x128xbf16>, vector<1x16x128xf32> -> vector<1x16x128xf32>
      %84 = vector.extract_strided_slice %78 {offsets = [0, 1, 0], sizes = [1, 16, 4], strides = [1, 1, 1]} : vector<1x18x4xbf16> to vector<1x16x4xbf16>
      %85 = vector.extract_strided_slice %2 {offsets = [2, 1, 0, 0], sizes = [1, 1, 4, 128], strides = [1, 1, 1, 1]} : vector<3x3x4x128xbf16> to vector<1x1x4x128xbf16>
      %86 = vector.shape_cast %85 : vector<1x1x4x128xbf16> to vector<4x128xbf16>
      %cst_57 = arith.constant dense<0.000000e+00> : vector<1x16x128xf32>
      %87 = tpu.matmul %84, %86, %cst_57 {dimension_numbers = #tpu.dot_dimension_numbers<[2], [0], [0, 1], [1], [0, 0, 0, 1, 1, 1], [], []>} : vector<1x16x4xbf16>, vector<4x128xbf16>, vector<1x16x128xf32> -> vector<1x16x128xf32>
      %88 = arith.addf %83, %87 : vector<1x16x128xf32>
      %89 = vector.extract_strided_slice %78 {offsets = [0, 2, 0], sizes = [1, 16, 4], strides = [1, 1, 1]} : vector<1x18x4xbf16> to vector<1x16x4xbf16>
      %90 = vector.extract_strided_slice %2 {offsets = [2, 2, 0, 0], sizes = [1, 1, 4, 128], strides = [1, 1, 1, 1]} : vector<3x3x4x128xbf16> to vector<1x1x4x128xbf16>
      %91 = vector.shape_cast %90 : vector<1x1x4x128xbf16> to vector<4x128xbf16>
      %cst_58 = arith.constant dense<0.000000e+00> : vector<1x16x128xf32>
      %92 = tpu.matmul %89, %91, %cst_58 {dimension_numbers = #tpu.dot_dimension_numbers<[2], [0], [0, 1], [1], [0, 0, 0, 1, 1, 1], [], []>} : vector<1x16x4xbf16>, vector<4x128xbf16>, vector<1x16x128xf32> -> vector<1x16x128xf32>
      %93 = arith.addf %88, %92 : vector<1x16x128xf32>
      %94 = arith.addf %79, %93 : vector<1x16x128xf32>
      %c15_59 = arith.constant 15 : index
      %c0_60 = arith.constant 0 : index
      %c0_61 = arith.constant 0 : index
      %95 = vector.load %arg8[%c15_59, %c0_60, %c0_61] : memref<16x16x128xf32, #tpu.memory_space<vmem>>, vector<1x16x128xf32>
      tpu.vector_store %arg8[%c15_59, %c0_60, %c0_61], %94 {strides = array<i32>} : memref<16x16x128xf32, #tpu.memory_space<vmem>>, vector<1x16x128xf32>,
    } else {
    }
    %c0_32 = arith.constant 0 : index
    %c0_33 = arith.constant 0 : index
    %c0_34 = arith.constant 0 : index
    %58 = vector.load %arg8[%c0_32, %c0_33, %c0_34] : memref<16x16x128xf32, #tpu.memory_space<vmem>>, vector<16x16x128xf32>
    %c0_35 = arith.constant 0 : index
    %c0_36 = arith.constant 0 : index
    %59 = vector.load %arg6[%c0_35, %c0_36] : memref<1x128xf32, #tpu.memory_space<vmem>>, vector<1x128xf32>
    %60 = vector.shape_cast %59 : vector<1x128xf32> to vector<128xf32>
    %61 = vector.shape_cast %60 : vector<128xf32> to vector<1x1x128xf32>
    %62 = vector.broadcast %61 : vector<1x1x128xf32> to vector<16x16x128xf32>
    %63 = arith.addf %58, %62 : vector<16x16x128xf32>
    %cst_37 = arith.constant 0.000000e+00 : f32
    %64 = vector.broadcast %cst_37 : f32 to vector<16x16x128xf32>
    %65 = arith.maximumf %63, %64 : vector<16x16x128xf32>
    %66 = arith.truncf %65 : vector<16x16x128xf32> to vector<16x16x128xbf16>
    %c0_38 = arith.constant 0 : index
    %c0_39 = arith.constant 0 : index
    %c1_40 = arith.constant 1 : index
    %c0_41 = arith.constant 0 : index
    %67 = vector.load %arg7[%c0_38, %c0_39, %c1_40, %c0_41] : memref<1x16x18x128xbf16, #tpu.memory_space<vmem>>, vector<1x16x16x128xbf16>
    %68 = vector.shape_cast %67 : vector<1x16x16x128xbf16> to vector<16x16x128xbf16>
    %69 = vector.shape_cast %66 : vector<16x16x128xbf16> to vector<1x16x16x128xbf16>
    tpu.vector_store %arg7[%c0_38, %c0_39, %c1_40, %c0_41], %69 {strides = array<i32>} : memref<1x16x18x128xbf16, #tpu.memory_space<vmem>>, vector<1x16x16x128xbf16>,
    %cst_42 = arith.constant 0.000000e+00 : bf16
    %70 = vector.broadcast %cst_42 : bf16 to vector<16x1x128xbf16>
    %c0_43 = arith.constant 0 : index
    %c0_44 = arith.constant 0 : index
    %c0_45 = arith.constant 0 : index
    %c0_46 = arith.constant 0 : index
    %71 = vector.load %arg7[%c0_43, %c0_44, %c0_45, %c0_46] : memref<1x16x18x128xbf16, #tpu.memory_space<vmem>>, vector<1x16x1x128xbf16>
    %72 = vector.shape_cast %71 : vector<1x16x1x128xbf16> to vector<16x1x128xbf16>
    %73 = vector.shape_cast %70 : vector<16x1x128xbf16> to vector<1x16x1x128xbf16>
    tpu.vector_store %arg7[%c0_43, %c0_44, %c0_45, %c0_46], %73 {strides = array<i32>} : memref<1x16x18x128xbf16, #tpu.memory_space<vmem>>, vector<1x16x1x128xbf16>,
    %c0_47 = arith.constant 0 : index
    %c0_48 = arith.constant 0 : index
    %c17 = arith.constant 17 : index
    %c0_49 = arith.constant 0 : index
    %74 = vector.load %arg7[%c0_47, %c0_48, %c17, %c0_49] : memref<1x16x18x128xbf16, #tpu.memory_space<vmem>>, vector<1x16x1x128xbf16>
    %75 = vector.shape_cast %74 : vector<1x16x1x128xbf16> to vector<16x1x128xbf16>
    %76 = vector.shape_cast %70 : vector<16x1x128xbf16> to vector<1x16x1x128xbf16>
    tpu.vector_store %arg7[%c0_47, %c0_48, %c17, %c0_49], %76 {strides = array<i32>} : memref<1x16x18x128xbf16, #tpu.memory_space<vmem>>, vector<1x16x1x128xbf16>,
    return
  }
  func.func @transform_0(%arg0: i32, %arg1: i32) -> (i32, i32, i32, i32) {
    %c0_i32 = arith.constant 0 : i32
    %c0_i32_0 = arith.constant 0 : i32
    %c0_i32_1 = arith.constant 0 : i32
    return %arg0, %arg1, %c0_i32, %c0_i32_0 : i32, i32, i32, i32
  }
  func.func @transform_1(%arg0: i32, %arg1: i32) -> (i32, i32, i32, i32) {
    %c16_i32 = arith.constant 16 : i32
    %0 = arith.muli %arg1, %c16_i32 : i32
    %c1_i32 = arith.constant 1 : i32
    %1 = arith.subi %0, %c1_i32 : i32
    %c0_i32 = arith.constant 0 : i32
    %2 = arith.maxsi %1, %c0_i32 : i32
    %c0_i32_0 = arith.constant 0 : i32
    %c0_i32_1 = arith.constant 0 : i32
    %c0_i32_2 = arith.constant 0 : i32
    return %arg0, %2, %c0_i32_0, %c0_i32_1 : i32, i32, i32, i32
  }
  func.func @transform_2(%arg0: i32, %arg1: i32) -> (i32, i32, i32, i32) {
    %c1_i32 = arith.constant 1 : i32
    %0 = arith.addi %arg1, %c1_i32 : i32
    %c16_i32 = arith.constant 16 : i32
    %1 = arith.muli %0, %c16_i32 : i32
    %c15_i32 = arith.constant 15 : i32
    %2 = arith.minsi %1, %c15_i32 : i32
    %c0_i32 = arith.constant 0 : i32
    %c0_i32_0 = arith.constant 0 : i32
    %c0_i32_1 = arith.constant 0 : i32
    return %arg0, %2, %c0_i32, %c0_i32_0 : i32, i32, i32, i32
  }
  func.func @transform_3(%arg0: i32, %arg1: i32) -> (i32, i32, i32, i32) {
    %c0_i32 = arith.constant 0 : i32
    %c0_i32_0 = arith.constant 0 : i32
    %c0_i32_1 = arith.constant 0 : i32
    %c0_i32_2 = arith.constant 0 : i32
    %c0_i32_3 = arith.constant 0 : i32
    return %c0_i32, %c0_i32_0, %c0_i32_1, %c0_i32_2 : i32, i32, i32, i32
  }
  func.func @transform_4(%arg0: i32, %arg1: i32) -> (i32, i32) {
    %c0_i32 = arith.constant 0 : i32
    %c0_i32_0 = arith.constant 0 : i32
    %c0_i32_1 = arith.constant 0 : i32
    return %c0_i32, %c0_i32_0 : i32, i32
  }
  func.func @transform_5(%arg0: i32, %arg1: i32) -> (i32, i32, i32, i32) {
    %c0_i32 = arith.constant 0 : i32
    %c0_i32_0 = arith.constant 0 : i32
    %c0_i32_1 = arith.constant 0 : i32
    return %arg0, %arg1, %c0_i32, %c0_i32_0 : i32, i32, i32, i32
  }
}

module attributes {stable_mosaic.version = 11 : i64} {
  func.func @_conv_bn_relu_kernel(%arg0: i32, %arg1: i32, %arg2: memref<1x16x18x128xbf16, #tpu.memory_space<vmem>>, %arg3: memref<1x1x18x128xbf16, #tpu.memory_space<vmem>>, %arg4: memref<1x1x18x128xbf16, #tpu.memory_space<vmem>>, %arg5: memref<3x3x128x8xbf16, #tpu.memory_space<vmem>>, %arg6: memref<1x8xf32, #tpu.memory_space<vmem>>, %arg7: memref<1x16x16x8xf32, #tpu.memory_space<vmem>>, %arg8: memref<1x8x8x8xf32, #tpu.memory_space<vmem>>, %arg9: memref<16x16x8xf32, #tpu.memory_space<vmem>>) attributes {dimension_semantics = [#tpu.dimension_semantics<parallel>, #tpu.dimension_semantics<parallel>], iteration_bounds = array<i64: 2, 1>, scalar_prefetch = 0 : i64, scratch_operands = 1 : i64, tpu.core_type = #tpu.core_type<tc>, window_params = [{transform_indices = @transform_0, window_bounds = array<i64: 1, 16, 18, 128>}, {transform_indices = @transform_1, window_bounds = array<i64: 1, 1, 18, 128>}, {transform_indices = @transform_2, window_bounds = array<i64: 1, 1, 18, 128>}, {pipeline_mode = #tpu.pipeline_mode<synchronous>, transform_indices = @transform_3, window_bounds = array<i64: 3, 3, 128, 8>}, {pipeline_mode = #tpu.pipeline_mode<synchronous>, transform_indices = @transform_4, window_bounds = array<i64: 1, 8>}, {transform_indices = @transform_5, window_bounds = array<i64: 1, 16, 16, 8>}, {transform_indices = @transform_6, window_bounds = array<i64: 1, 8, 8, 8>}]} {
    %c0 = arith.constant 0 : index
    %c0_0 = arith.constant 0 : index
    %c0_1 = arith.constant 0 : index
    %c0_2 = arith.constant 0 : index
    %0 = vector.load %arg2[%c0, %c0_0, %c0_1, %c0_2] : memref<1x16x18x128xbf16, #tpu.memory_space<vmem>>, vector<1x16x18x128xbf16>
    %1 = vector.shape_cast %0 : vector<1x16x18x128xbf16> to vector<16x18x128xbf16>
    %c0_3 = arith.constant 0 : index
    %c0_4 = arith.constant 0 : index
    %c0_5 = arith.constant 0 : index
    %c0_6 = arith.constant 0 : index
    %2 = vector.load %arg5[%c0_3, %c0_4, %c0_5, %c0_6] : memref<3x3x128x8xbf16, #tpu.memory_space<vmem>>, vector<3x3x128x8xbf16>
    %3 = vector.extract_strided_slice %1 {offsets = [0, 0, 0], sizes = [16, 16, 128], strides = [1, 1, 1]} : vector<16x18x128xbf16> to vector<16x16x128xbf16>
    %4 = vector.extract_strided_slice %1 {offsets = [0, 1, 0], sizes = [16, 16, 128], strides = [1, 1, 1]} : vector<16x18x128xbf16> to vector<16x16x128xbf16>
    %5 = vector.extract_strided_slice %1 {offsets = [0, 2, 0], sizes = [16, 16, 128], strides = [1, 1, 1]} : vector<16x18x128xbf16> to vector<16x16x128xbf16>
    %6 = vector.extract_strided_slice %2 {offsets = [1, 0, 0, 0], sizes = [1, 1, 128, 8], strides = [1, 1, 1, 1]} : vector<3x3x128x8xbf16> to vector<1x1x128x8xbf16>
    %7 = vector.shape_cast %6 : vector<1x1x128x8xbf16> to vector<128x8xbf16>
    %cst = arith.constant dense<0.000000e+00> : vector<16x16x8xf32>
    %8 = tpu.matmul %3, %7, %cst {dimension_numbers = #tpu.dot_dimension_numbers<[2], [0], [0, 1], [1], [0, 0, 0, 1, 1, 1], [], []>} : vector<16x16x128xbf16>, vector<128x8xbf16>, vector<16x16x8xf32> -> vector<16x16x8xf32>
    %9 = vector.extract_strided_slice %2 {offsets = [1, 1, 0, 0], sizes = [1, 1, 128, 8], strides = [1, 1, 1, 1]} : vector<3x3x128x8xbf16> to vector<1x1x128x8xbf16>
    %10 = vector.shape_cast %9 : vector<1x1x128x8xbf16> to vector<128x8xbf16>
    %cst_7 = arith.constant dense<0.000000e+00> : vector<16x16x8xf32>
    %11 = tpu.matmul %4, %10, %cst_7 {dimension_numbers = #tpu.dot_dimension_numbers<[2], [0], [0, 1], [1], [0, 0, 0, 1, 1, 1], [], []>} : vector<16x16x128xbf16>, vector<128x8xbf16>, vector<16x16x8xf32> -> vector<16x16x8xf32>
    %12 = arith.addf %8, %11 : vector<16x16x8xf32>
    %13 = vector.extract_strided_slice %2 {offsets = [1, 2, 0, 0], sizes = [1, 1, 128, 8], strides = [1, 1, 1, 1]} : vector<3x3x128x8xbf16> to vector<1x1x128x8xbf16>
    %14 = vector.shape_cast %13 : vector<1x1x128x8xbf16> to vector<128x8xbf16>
    %cst_8 = arith.constant dense<0.000000e+00> : vector<16x16x8xf32>
    %15 = tpu.matmul %5, %14, %cst_8 {dimension_numbers = #tpu.dot_dimension_numbers<[2], [0], [0, 1], [1], [0, 0, 0, 1, 1, 1], [], []>} : vector<16x16x128xbf16>, vector<128x8xbf16>, vector<16x16x8xf32> -> vector<16x16x8xf32>
    %16 = arith.addf %12, %15 : vector<16x16x8xf32>
    %c0_9 = arith.constant 0 : index
    %c0_10 = arith.constant 0 : index
    %c0_11 = arith.constant 0 : index
    %17 = vector.load %arg9[%c0_9, %c0_10, %c0_11] : memref<16x16x8xf32, #tpu.memory_space<vmem>>, vector<16x16x8xf32>
    tpu.vector_store %arg9[%c0_9, %c0_10, %c0_11], %16 {strides = array<i32>} : memref<16x16x8xf32, #tpu.memory_space<vmem>>, vector<16x16x8xf32>,
    %c1 = arith.constant 1 : index
    %c0_12 = arith.constant 0 : index
    %c0_13 = arith.constant 0 : index
    %18 = vector.load %arg9[%c1, %c0_12, %c0_13] : memref<16x16x8xf32, #tpu.memory_space<vmem>>, vector<15x16x8xf32>
    %19 = vector.extract_strided_slice %3 {offsets = [0, 0, 0], sizes = [15, 16, 128], strides = [1, 1, 1]} : vector<16x16x128xbf16> to vector<15x16x128xbf16>
    %20 = vector.extract_strided_slice %2 {offsets = [0, 0, 0, 0], sizes = [1, 1, 128, 8], strides = [1, 1, 1, 1]} : vector<3x3x128x8xbf16> to vector<1x1x128x8xbf16>
    %21 = vector.shape_cast %20 : vector<1x1x128x8xbf16> to vector<128x8xbf16>
    %cst_14 = arith.constant dense<0.000000e+00> : vector<15x16x8xf32>
    %22 = tpu.matmul %19, %21, %cst_14 {dimension_numbers = #tpu.dot_dimension_numbers<[2], [0], [0, 1], [1], [0, 0, 0, 1, 1, 1], [], []>} : vector<15x16x128xbf16>, vector<128x8xbf16>, vector<15x16x8xf32> -> vector<15x16x8xf32>
    %23 = vector.extract_strided_slice %4 {offsets = [0, 0, 0], sizes = [15, 16, 128], strides = [1, 1, 1]} : vector<16x16x128xbf16> to vector<15x16x128xbf16>
    %24 = vector.extract_strided_slice %2 {offsets = [0, 1, 0, 0], sizes = [1, 1, 128, 8], strides = [1, 1, 1, 1]} : vector<3x3x128x8xbf16> to vector<1x1x128x8xbf16>
    %25 = vector.shape_cast %24 : vector<1x1x128x8xbf16> to vector<128x8xbf16>
    %cst_15 = arith.constant dense<0.000000e+00> : vector<15x16x8xf32>
    %26 = tpu.matmul %23, %25, %cst_15 {dimension_numbers = #tpu.dot_dimension_numbers<[2], [0], [0, 1], [1], [0, 0, 0, 1, 1, 1], [], []>} : vector<15x16x128xbf16>, vector<128x8xbf16>, vector<15x16x8xf32> -> vector<15x16x8xf32>
    %27 = arith.addf %22, %26 : vector<15x16x8xf32>
    %28 = vector.extract_strided_slice %5 {offsets = [0, 0, 0], sizes = [15, 16, 128], strides = [1, 1, 1]} : vector<16x16x128xbf16> to vector<15x16x128xbf16>
    %29 = vector.extract_strided_slice %2 {offsets = [0, 2, 0, 0], sizes = [1, 1, 128, 8], strides = [1, 1, 1, 1]} : vector<3x3x128x8xbf16> to vector<1x1x128x8xbf16>
    %30 = vector.shape_cast %29 : vector<1x1x128x8xbf16> to vector<128x8xbf16>
    %cst_16 = arith.constant dense<0.000000e+00> : vector<15x16x8xf32>
    %31 = tpu.matmul %28, %30, %cst_16 {dimension_numbers = #tpu.dot_dimension_numbers<[2], [0], [0, 1], [1], [0, 0, 0, 1, 1, 1], [], []>} : vector<15x16x128xbf16>, vector<128x8xbf16>, vector<15x16x8xf32> -> vector<15x16x8xf32>
    %32 = arith.addf %27, %31 : vector<15x16x8xf32>
    %33 = arith.addf %18, %32 : vector<15x16x8xf32>
    %c1_17 = arith.constant 1 : index
    %c0_18 = arith.constant 0 : index
    %c0_19 = arith.constant 0 : index
    %34 = vector.load %arg9[%c1_17, %c0_18, %c0_19] : memref<16x16x8xf32, #tpu.memory_space<vmem>>, vector<15x16x8xf32>
    tpu.vector_store %arg9[%c1_17, %c0_18, %c0_19], %33 {strides = array<i32>} : memref<16x16x8xf32, #tpu.memory_space<vmem>>, vector<15x16x8xf32>,
    %c0_20 = arith.constant 0 : index
    %c0_21 = arith.constant 0 : index
    %c0_22 = arith.constant 0 : index
    %35 = vector.load %arg9[%c0_20, %c0_21, %c0_22] : memref<16x16x8xf32, #tpu.memory_space<vmem>>, vector<15x16x8xf32>
    %36 = vector.extract_strided_slice %3 {offsets = [1, 0, 0], sizes = [15, 16, 128], strides = [1, 1, 1]} : vector<16x16x128xbf16> to vector<15x16x128xbf16>
    %37 = vector.extract_strided_slice %2 {offsets = [2, 0, 0, 0], sizes = [1, 1, 128, 8], strides = [1, 1, 1, 1]} : vector<3x3x128x8xbf16> to vector<1x1x128x8xbf16>
    %38 = vector.shape_cast %37 : vector<1x1x128x8xbf16> to vector<128x8xbf16>
    %cst_23 = arith.constant dense<0.000000e+00> : vector<15x16x8xf32>
    %39 = tpu.matmul %36, %38, %cst_23 {dimension_numbers = #tpu.dot_dimension_numbers<[2], [0], [0, 1], [1], [0, 0, 0, 1, 1, 1], [], []>} : vector<15x16x128xbf16>, vector<128x8xbf16>, vector<15x16x8xf32> -> vector<15x16x8xf32>
    %40 = vector.extract_strided_slice %4 {offsets = [1, 0, 0], sizes = [15, 16, 128], strides = [1, 1, 1]} : vector<16x16x128xbf16> to vector<15x16x128xbf16>
    %41 = vector.extract_strided_slice %2 {offsets = [2, 1, 0, 0], sizes = [1, 1, 128, 8], strides = [1, 1, 1, 1]} : vector<3x3x128x8xbf16> to vector<1x1x128x8xbf16>
    %42 = vector.shape_cast %41 : vector<1x1x128x8xbf16> to vector<128x8xbf16>
    %cst_24 = arith.constant dense<0.000000e+00> : vector<15x16x8xf32>
    %43 = tpu.matmul %40, %42, %cst_24 {dimension_numbers = #tpu.dot_dimension_numbers<[2], [0], [0, 1], [1], [0, 0, 0, 1, 1, 1], [], []>} : vector<15x16x128xbf16>, vector<128x8xbf16>, vector<15x16x8xf32> -> vector<15x16x8xf32>
    %44 = arith.addf %39, %43 : vector<15x16x8xf32>
    %45 = vector.extract_strided_slice %5 {offsets = [1, 0, 0], sizes = [15, 16, 128], strides = [1, 1, 1]} : vector<16x16x128xbf16> to vector<15x16x128xbf16>
    %46 = vector.extract_strided_slice %2 {offsets = [2, 2, 0, 0], sizes = [1, 1, 128, 8], strides = [1, 1, 1, 1]} : vector<3x3x128x8xbf16> to vector<1x1x128x8xbf16>
    %47 = vector.shape_cast %46 : vector<1x1x128x8xbf16> to vector<128x8xbf16>
    %cst_25 = arith.constant dense<0.000000e+00> : vector<15x16x8xf32>
    %48 = tpu.matmul %45, %47, %cst_25 {dimension_numbers = #tpu.dot_dimension_numbers<[2], [0], [0, 1], [1], [0, 0, 0, 1, 1, 1], [], []>} : vector<15x16x128xbf16>, vector<128x8xbf16>, vector<15x16x8xf32> -> vector<15x16x8xf32>
    %49 = arith.addf %44, %48 : vector<15x16x8xf32>
    %50 = arith.addf %35, %49 : vector<15x16x8xf32>
    %c0_26 = arith.constant 0 : index
    %c0_27 = arith.constant 0 : index
    %c0_28 = arith.constant 0 : index
    %51 = vector.load %arg9[%c0_26, %c0_27, %c0_28] : memref<16x16x8xf32, #tpu.memory_space<vmem>>, vector<15x16x8xf32>
    tpu.vector_store %arg9[%c0_26, %c0_27, %c0_28], %50 {strides = array<i32>} : memref<16x16x8xf32, #tpu.memory_space<vmem>>, vector<15x16x8xf32>,
    %c0_i32 = arith.constant 0 : i32
    %52 = arith.cmpi sgt, %arg1, %c0_i32 : i32
    %53 = arith.extui %52 : i1 to i32
    %c0_i32_29 = arith.constant 0 : i32
    %54 = arith.cmpi ne, %53, %c0_i32_29 : i32
    scf.if %54 {
      %c0_46 = arith.constant 0 : index
      %c0_47 = arith.constant 0 : index
      %c0_48 = arith.constant 0 : index
      %c0_49 = arith.constant 0 : index
      %84 = vector.load %arg3[%c0_46, %c0_47, %c0_48, %c0_49] : memref<1x1x18x128xbf16, #tpu.memory_space<vmem>>, vector<1x1x18x128xbf16>
      %85 = vector.shape_cast %84 : vector<1x1x18x128xbf16> to vector<1x18x128xbf16>
      %c0_50 = arith.constant 0 : index
      %c0_51 = arith.constant 0 : index
      %c0_52 = arith.constant 0 : index
      %86 = vector.load %arg9[%c0_50, %c0_51, %c0_52] : memref<16x16x8xf32, #tpu.memory_space<vmem>>, vector<1x16x8xf32>
      %87 = vector.extract_strided_slice %85 {offsets = [0, 0, 0], sizes = [1, 16, 128], strides = [1, 1, 1]} : vector<1x18x128xbf16> to vector<1x16x128xbf16>
      %88 = vector.extract_strided_slice %2 {offsets = [0, 0, 0, 0], sizes = [1, 1, 128, 8], strides = [1, 1, 1, 1]} : vector<3x3x128x8xbf16> to vector<1x1x128x8xbf16>
      %89 = vector.shape_cast %88 : vector<1x1x128x8xbf16> to vector<128x8xbf16>
      %cst_53 = arith.constant dense<0.000000e+00> : vector<1x16x8xf32>
      %90 = tpu.matmul %87, %89, %cst_53 {dimension_numbers = #tpu.dot_dimension_numbers<[2], [0], [0, 1], [1], [0, 0, 0, 1, 1, 1], [], []>} : vector<1x16x128xbf16>, vector<128x8xbf16>, vector<1x16x8xf32> -> vector<1x16x8xf32>
      %91 = vector.extract_strided_slice %85 {offsets = [0, 1, 0], sizes = [1, 16, 128], strides = [1, 1, 1]} : vector<1x18x128xbf16> to vector<1x16x128xbf16>
      %92 = vector.extract_strided_slice %2 {offsets = [0, 1, 0, 0], sizes = [1, 1, 128, 8], strides = [1, 1, 1, 1]} : vector<3x3x128x8xbf16> to vector<1x1x128x8xbf16>
      %93 = vector.shape_cast %92 : vector<1x1x128x8xbf16> to vector<128x8xbf16>
      %cst_54 = arith.constant dense<0.000000e+00> : vector<1x16x8xf32>
      %94 = tpu.matmul %91, %93, %cst_54 {dimension_numbers = #tpu.dot_dimension_numbers<[2], [0], [0, 1], [1], [0, 0, 0, 1, 1, 1], [], []>} : vector<1x16x128xbf16>, vector<128x8xbf16>, vector<1x16x8xf32> -> vector<1x16x8xf32>
      %95 = arith.addf %90, %94 : vector<1x16x8xf32>
      %96 = vector.extract_strided_slice %85 {offsets = [0, 2, 0], sizes = [1, 16, 128], strides = [1, 1, 1]} : vector<1x18x128xbf16> to vector<1x16x128xbf16>
      %97 = vector.extract_strided_slice %2 {offsets = [0, 2, 0, 0], sizes = [1, 1, 128, 8], strides = [1, 1, 1, 1]} : vector<3x3x128x8xbf16> to vector<1x1x128x8xbf16>
      %98 = vector.shape_cast %97 : vector<1x1x128x8xbf16> to vector<128x8xbf16>
      %cst_55 = arith.constant dense<0.000000e+00> : vector<1x16x8xf32>
      %99 = tpu.matmul %96, %98, %cst_55 {dimension_numbers = #tpu.dot_dimension_numbers<[2], [0], [0, 1], [1], [0, 0, 0, 1, 1, 1], [], []>} : vector<1x16x128xbf16>, vector<128x8xbf16>, vector<1x16x8xf32> -> vector<1x16x8xf32>
      %100 = arith.addf %95, %99 : vector<1x16x8xf32>
      %101 = arith.addf %86, %100 : vector<1x16x8xf32>
      %c0_56 = arith.constant 0 : index
      %c0_57 = arith.constant 0 : index
      %c0_58 = arith.constant 0 : index
      %102 = vector.load %arg9[%c0_56, %c0_57, %c0_58] : memref<16x16x8xf32, #tpu.memory_space<vmem>>, vector<1x16x8xf32>
      tpu.vector_store %arg9[%c0_56, %c0_57, %c0_58], %101 {strides = array<i32>} : memref<16x16x8xf32, #tpu.memory_space<vmem>>, vector<1x16x8xf32>,
    } else {
    }
    %c0_i32_30 = arith.constant 0 : i32
    %55 = arith.cmpi slt, %arg1, %c0_i32_30 : i32
    %56 = arith.extui %55 : i1 to i32
    %c0_i32_31 = arith.constant 0 : i32
    %57 = arith.cmpi ne, %56, %c0_i32_31 : i32
    scf.if %57 {
      %c0_46 = arith.constant 0 : index
      %c0_47 = arith.constant 0 : index
      %c0_48 = arith.constant 0 : index
      %c0_49 = arith.constant 0 : index
      %84 = vector.load %arg4[%c0_46, %c0_47, %c0_48, %c0_49] : memref<1x1x18x128xbf16, #tpu.memory_space<vmem>>, vector<1x1x18x128xbf16>
      %85 = vector.shape_cast %84 : vector<1x1x18x128xbf16> to vector<1x18x128xbf16>
      %c15 = arith.constant 15 : index
      %c0_50 = arith.constant 0 : index
      %c0_51 = arith.constant 0 : index
      %86 = vector.load %arg9[%c15, %c0_50, %c0_51] : memref<16x16x8xf32, #tpu.memory_space<vmem>>, vector<1x16x8xf32>
      %87 = vector.extract_strided_slice %85 {offsets = [0, 0, 0], sizes = [1, 16, 128], strides = [1, 1, 1]} : vector<1x18x128xbf16> to vector<1x16x128xbf16>
      %88 = vector.extract_strided_slice %2 {offsets = [2, 0, 0, 0], sizes = [1, 1, 128, 8], strides = [1, 1, 1, 1]} : vector<3x3x128x8xbf16> to vector<1x1x128x8xbf16>
      %89 = vector.shape_cast %88 : vector<1x1x128x8xbf16> to vector<128x8xbf16>
      %cst_52 = arith.constant dense<0.000000e+00> : vector<1x16x8xf32>
      %90 = tpu.matmul %87, %89, %cst_52 {dimension_numbers = #tpu.dot_dimension_numbers<[2], [0], [0, 1], [1], [0, 0, 0, 1, 1, 1], [], []>} : vector<1x16x128xbf16>, vector<128x8xbf16>, vector<1x16x8xf32> -> vector<1x16x8xf32>
      %91 = vector.extract_strided_slice %85 {offsets = [0, 1, 0], sizes = [1, 16, 128], strides = [1, 1, 1]} : vector<1x18x128xbf16> to vector<1x16x128xbf16>
      %92 = vector.extract_strided_slice %2 {offsets = [2, 1, 0, 0], sizes = [1, 1, 128, 8], strides = [1, 1, 1, 1]} : vector<3x3x128x8xbf16> to vector<1x1x128x8xbf16>
      %93 = vector.shape_cast %92 : vector<1x1x128x8xbf16> to vector<128x8xbf16>
      %cst_53 = arith.constant dense<0.000000e+00> : vector<1x16x8xf32>
      %94 = tpu.matmul %91, %93, %cst_53 {dimension_numbers = #tpu.dot_dimension_numbers<[2], [0], [0, 1], [1], [0, 0, 0, 1, 1, 1], [], []>} : vector<1x16x128xbf16>, vector<128x8xbf16>, vector<1x16x8xf32> -> vector<1x16x8xf32>
      %95 = arith.addf %90, %94 : vector<1x16x8xf32>
      %96 = vector.extract_strided_slice %85 {offsets = [0, 2, 0], sizes = [1, 16, 128], strides = [1, 1, 1]} : vector<1x18x128xbf16> to vector<1x16x128xbf16>
      %97 = vector.extract_strided_slice %2 {offsets = [2, 2, 0, 0], sizes = [1, 1, 128, 8], strides = [1, 1, 1, 1]} : vector<3x3x128x8xbf16> to vector<1x1x128x8xbf16>
      %98 = vector.shape_cast %97 : vector<1x1x128x8xbf16> to vector<128x8xbf16>
      %cst_54 = arith.constant dense<0.000000e+00> : vector<1x16x8xf32>
      %99 = tpu.matmul %96, %98, %cst_54 {dimension_numbers = #tpu.dot_dimension_numbers<[2], [0], [0, 1], [1], [0, 0, 0, 1, 1, 1], [], []>} : vector<1x16x128xbf16>, vector<128x8xbf16>, vector<1x16x8xf32> -> vector<1x16x8xf32>
      %100 = arith.addf %95, %99 : vector<1x16x8xf32>
      %101 = arith.addf %86, %100 : vector<1x16x8xf32>
      %c15_55 = arith.constant 15 : index
      %c0_56 = arith.constant 0 : index
      %c0_57 = arith.constant 0 : index
      %102 = vector.load %arg9[%c15_55, %c0_56, %c0_57] : memref<16x16x8xf32, #tpu.memory_space<vmem>>, vector<1x16x8xf32>
      tpu.vector_store %arg9[%c15_55, %c0_56, %c0_57], %101 {strides = array<i32>} : memref<16x16x8xf32, #tpu.memory_space<vmem>>, vector<1x16x8xf32>,
    } else {
    }
    %c0_32 = arith.constant 0 : index
    %c0_33 = arith.constant 0 : index
    %c0_34 = arith.constant 0 : index
    %58 = vector.load %arg9[%c0_32, %c0_33, %c0_34] : memref<16x16x8xf32, #tpu.memory_space<vmem>>, vector<16x16x8xf32>
    %c0_35 = arith.constant 0 : index
    %c0_36 = arith.constant 0 : index
    %59 = vector.load %arg6[%c0_35, %c0_36] : memref<1x8xf32, #tpu.memory_space<vmem>>, vector<1x8xf32>
    %60 = vector.shape_cast %59 : vector<1x8xf32> to vector<8xf32>
    %61 = vector.shape_cast %60 : vector<8xf32> to vector<1x1x8xf32>
    %62 = vector.broadcast %61 : vector<1x1x8xf32> to vector<16x16x8xf32>
    %63 = arith.addf %58, %62 : vector<16x16x8xf32>
    %cst_37 = arith.constant 0.000000e+00 : f32
    %64 = vector.broadcast %cst_37 : f32 to vector<16x16x8xf32>
    %65 = arith.maximumf %63, %64 : vector<16x16x8xf32>
    %c0_38 = arith.constant 0 : index
    %c0_39 = arith.constant 0 : index
    %c0_40 = arith.constant 0 : index
    %c0_41 = arith.constant 0 : index
    %66 = vector.load %arg7[%c0_38, %c0_39, %c0_40, %c0_41] : memref<1x16x16x8xf32, #tpu.memory_space<vmem>>, vector<1x16x16x8xf32>
    %67 = vector.shape_cast %66 : vector<1x16x16x8xf32> to vector<16x16x8xf32>
    %68 = vector.shape_cast %65 : vector<16x16x8xf32> to vector<1x16x16x8xf32>
    tpu.vector_store %arg7[%c0_38, %c0_39, %c0_40, %c0_41], %68 {strides = array<i32>} : memref<1x16x16x8xf32, #tpu.memory_space<vmem>>, vector<1x16x16x8xf32>,
    %69 = vector.shape_cast %65 : vector<16x16x8xf32> to vector<8x2x16x8xf32>
    %70 = vector.extract_strided_slice %69 {offsets = [0, 0, 0, 0], sizes = [8, 1, 16, 8], strides = [1, 1, 1, 1]} : vector<8x2x16x8xf32> to vector<8x1x16x8xf32>
    %71 = vector.shape_cast %70 : vector<8x1x16x8xf32> to vector<8x16x8xf32>
    %72 = vector.extract_strided_slice %69 {offsets = [0, 1, 0, 0], sizes = [8, 1, 16, 8], strides = [1, 1, 1, 1]} : vector<8x2x16x8xf32> to vector<8x1x16x8xf32>
    %73 = vector.shape_cast %72 : vector<8x1x16x8xf32> to vector<8x16x8xf32>
    %74 = arith.maximumf %71, %73 : vector<8x16x8xf32>
    %75 = vector.shape_cast %74 : vector<8x16x8xf32> to vector<8x8x2x8xf32>
    %76 = vector.extract_strided_slice %75 {offsets = [0, 0, 0, 0], sizes = [8, 8, 1, 8], strides = [1, 1, 1, 1]} : vector<8x8x2x8xf32> to vector<8x8x1x8xf32>
    %77 = vector.shape_cast %76 : vector<8x8x1x8xf32> to vector<8x8x8xf32>
    %78 = vector.extract_strided_slice %75 {offsets = [0, 0, 1, 0], sizes = [8, 8, 1, 8], strides = [1, 1, 1, 1]} : vector<8x8x2x8xf32> to vector<8x8x1x8xf32>
    %79 = vector.shape_cast %78 : vector<8x8x1x8xf32> to vector<8x8x8xf32>
    %80 = arith.maximumf %77, %79 : vector<8x8x8xf32>
    %c0_42 = arith.constant 0 : index
    %c0_43 = arith.constant 0 : index
    %c0_44 = arith.constant 0 : index
    %c0_45 = arith.constant 0 : index
    %81 = vector.load %arg8[%c0_42, %c0_43, %c0_44, %c0_45] : memref<1x8x8x8xf32, #tpu.memory_space<vmem>>, vector<1x8x8x8xf32>
    %82 = vector.shape_cast %81 : vector<1x8x8x8xf32> to vector<8x8x8xf32>
    %83 = vector.shape_cast %80 : vector<8x8x8xf32> to vector<1x8x8x8xf32>
    tpu.vector_store %arg8[%c0_42, %c0_43, %c0_44, %c0_45], %83 {strides = array<i32>} : memref<1x8x8x8xf32, #tpu.memory_space<vmem>>, vector<1x8x8x8xf32>,
    return
  }
  func.func @transform_0(%arg0: i32, %arg1: i32) -> (i32, i32, i32, i32) {
    %c0_i32 = arith.constant 0 : i32
    %c0_i32_0 = arith.constant 0 : i32
    %c0_i32_1 = arith.constant 0 : i32
    return %arg0, %arg1, %c0_i32, %c0_i32_0 : i32, i32, i32, i32
  }
  func.func @transform_1(%arg0: i32, %arg1: i32) -> (i32, i32, i32, i32) {
    %c16_i32 = arith.constant 16 : i32
    %0 = arith.muli %arg1, %c16_i32 : i32
    %c1_i32 = arith.constant 1 : i32
    %1 = arith.subi %0, %c1_i32 : i32
    %c0_i32 = arith.constant 0 : i32
    %2 = arith.maxsi %1, %c0_i32 : i32
    %c0_i32_0 = arith.constant 0 : i32
    %c0_i32_1 = arith.constant 0 : i32
    %c0_i32_2 = arith.constant 0 : i32
    return %arg0, %2, %c0_i32_0, %c0_i32_1 : i32, i32, i32, i32
  }
  func.func @transform_2(%arg0: i32, %arg1: i32) -> (i32, i32, i32, i32) {
    %c1_i32 = arith.constant 1 : i32
    %0 = arith.addi %arg1, %c1_i32 : i32
    %c16_i32 = arith.constant 16 : i32
    %1 = arith.muli %0, %c16_i32 : i32
    %c15_i32 = arith.constant 15 : i32
    %2 = arith.minsi %1, %c15_i32 : i32
    %c0_i32 = arith.constant 0 : i32
    %c0_i32_0 = arith.constant 0 : i32
    %c0_i32_1 = arith.constant 0 : i32
    return %arg0, %2, %c0_i32, %c0_i32_0 : i32, i32, i32, i32
  }
  func.func @transform_3(%arg0: i32, %arg1: i32) -> (i32, i32, i32, i32) {
    %c0_i32 = arith.constant 0 : i32
    %c0_i32_0 = arith.constant 0 : i32
    %c0_i32_1 = arith.constant 0 : i32
    %c0_i32_2 = arith.constant 0 : i32
    %c0_i32_3 = arith.constant 0 : i32
    return %c0_i32, %c0_i32_0, %c0_i32_1, %c0_i32_2 : i32, i32, i32, i32
  }
  func.func @transform_4(%arg0: i32, %arg1: i32) -> (i32, i32) {
    %c0_i32 = arith.constant 0 : i32
    %c0_i32_0 = arith.constant 0 : i32
    %c0_i32_1 = arith.constant 0 : i32
    return %c0_i32, %c0_i32_0 : i32, i32
  }
  func.func @transform_5(%arg0: i32, %arg1: i32) -> (i32, i32, i32, i32) {
    %c0_i32 = arith.constant 0 : i32
    %c0_i32_0 = arith.constant 0 : i32
    %c0_i32_1 = arith.constant 0 : i32
    return %arg0, %arg1, %c0_i32, %c0_i32_0 : i32, i32, i32, i32
  }
  func.func @transform_6(%arg0: i32, %arg1: i32) -> (i32, i32, i32, i32) {
    %c0_i32 = arith.constant 0 : i32
    %c0_i32_0 = arith.constant 0 : i32
    %c0_i32_1 = arith.constant 0 : i32
    return %arg0, %arg1, %c0_i32, %c0_i32_0 : i32, i32, i32, i32
  }
}

</mosaic_0001>

<bundles_post_ra>
// kernel: stack_encoder_forward.2
= control target key start
LH: loop header
LB: loop body
LE: loop exit
PB: predicated region body
PF: predicated region fallthrough
CT: control target
= control target key end

     0   :  { %s5494_s18 = smov 0   ;;  %s5496_s19 = smov 0   ;;  %s7177_s0 = inlined_call_operand.vmem [shape: bf16[2,16,18,4], index: 0, kind: input, shape index: {}, may-alias: {0,1,2}]   ;;  %s7178_s1 = inlined_call_operand.vmem [shape: bf16[2,16,18,4], index: 1, kind: input, shape index: {}, may-alias: {0,1,2}]   ;;  %s7179_s2 = inlined_call_operand.vmem [shape: bf16[2,16,18,4], index: 2, kind: input, shape index: {}, may-alias: {0,1,2}]   ;;  %s7180_s3 = inlined_call_operand.vmem [shape: bf16[3,3,4,128], index: 3, kind: input, shape index: {}]   ;;  %s7181_s4 = inlined_call_operand.vmem [shape: f32[1,128], index: 4, kind: input, shape index: {}]   ;;  %s7182_s5 = inlined_call_operand.vmem [shape: bf16[2,16,18,128], index: 5, kind: output, shape index: {}]  }
   0x1   :  { %s5498_s20 = smov 0  }
   0x2 LB: > { %s27_s1 = sadd.s32 1, %s5456_s19  ;;  %p4245_p0 = scmp.ge.s32.totalorder %s5460_s20, 1  ;;  %s5460_s20 = sphi %s5498_s20, %s15_s20   ;;  %s5456_s19 = sphi %s5496_s19, %s7294_s19   ;;  %s5452_s18 = sphi %s5494_s18, %s7293_s18  }
   0x3   : > { %p29_p1 = scmp.ge.s32.totalorder %s27_s1, 2  ;;  %p273_p2 = scmp.lt.s32.totalorder %s5460_s20, 3 }
   0x5   : > { %s7296_s1 = smov (%p29_p1, %s27_s1), 0  ;;  %p274_p3 = pnand %p4245_p0, %p273_p2 }
   0x7   : > { %277 = sbr.rel (%p274_p3) target bundleno = 731 (0x2db), region = 40 }
   0xe   : > { %v443_v0 = vld [vmem:[%s7180_s3 + $0x2] sm:$0x3]  ;;  %vm935_vm0 = vcmask 1041408   ;;  %v446_v1 = vld [vmem:[%s7180_s3 + $0x8] sm:$0x3]  ;;  %v7183_v2 = vmov 0.0  }
   0xf   : > { %4780 = vmatprep.subr.bf16.mxu1 %v7183_v2  ;;  %v1879_v3 = vsel %vm935_vm0, %v443_v0, 0  ;;  %5390 = vmatprep.subr.msk.bf16.mxu0 %vm935_vm0, %v446_v1  ;;  %v937_v4 = vsel %vm935_vm0, %v446_v1, 0  ;;  %p338_p4 = scmp.lt.s32.totalorder %s5452_s18, 1  ;;  %vm5463_vm1 = vmmov 0   ;;  %v445_v5 = vld [vmem:[%s7180_s3 + $0x6] sm:$0x3] }
  0x10   : > { %4781 = vmatpush3.bf16.msra.mxu1 %v1879_v3  ;;  %4679 = vmatpush3.bf16.msra.mxu0 %v937_v4  ;;  %vm451_vm2 = vsmask.f32 3328  ;;  %vm452_vm3 = vsmask.f32 7440  ;;  %vm886_vm4 = vcmask 31744   ;;  %v1229_v40 = vsel %vm935_vm0, %v445_v5, 0 }
  0x11   : > { %4782 = vmatprep.mubr.msk.bf16.mxu1 %vm5463_vm1, %v7183_v2  ;;  %4842 = vmatprep.subr.bf16.mxu1 %v7183_v2  ;;  %s7298_s18 = smov (!%p338_p4, %s5452_s18), 1  ;;  %v442_v21 = vld [vmem:[%s7180_s3] sm:$0x3]  ;;  %vm5575_vm5 = vmor %vm451_vm2, %vm452_vm3  ;;  %vm1408_vm6 = vcmask 1042432   ;;  %vm1409_vm7 = vcmask 1046532   ;;  %vm3889_vm10 = vcmask 1043456  }
  0x12   : > { %5391 = vmatprep.subr.msk.bf16.mxu0 %vm935_vm0, %v445_v5  ;;  %s5393_s26 = smul.u32 192, %s7298_s18  ;;  %v2035_v32 = vsel %vm935_vm0, %v442_v21, 0  ;;  %vm5990_vm8 = vmor %vm1408_vm6, %vm1409_vm7  ;;  %vm3566_vm9 = vsmask.f32 256  ;;  %vm3890_vm11 = vsmask.f32 7938 }
  0x13   : > { %vm3896_vm12 = vcmask 1040384   ;;  %vm3567_vm13 = vsmask.f32 4368  ;;  %vm6763_vm14 = vmand %vm3889_vm10, %vm3890_vm11 }
  0x14   : > { %s5537_s29 = scalar_lea.vmem %s7177_s0, %s5393_s26  ;;  %s6756_s23 = scalar_lea.vmem %s7182_s5, %s5393_s26  ;;  %vm6773_vm15 = vmand %vm3896_vm12, %vm3566_vm9 }
  0x15   : > { %v5540_v6 = vld [vmem:[%s5537_s29] sm:$0xf]  ;;  %v5543_v7 = vld [vmem:[%s5537_s29 + $0x4] sm:$0xf]  ;;  %v5546_v8 = vld [vmem:[%s5537_s29 + $0x8] sm:$0x1] }
  0x16   : > { %7216 = vst [vmem:[#allocation3_spill] sm:$0xff] %v5546_v8  ;;  %v455_v9 = vshrl.u32 %v5540_v6, 16  ;;  %v458_v10 = vshll.u32 %v5540_v6, 16  ;;  %v464_v11 = vshll.u32 %v5543_v7, 16  ;;  %v468_v12 = vshrl.u32 %v5543_v7, 16 }
  0x17   : > { %v5553_v13 = vld [vmem:[%s5537_s29 + $0xc] sm:$0xf]  ;;  %v474_v14 = vshll.u32 %v5546_v8, 16  ;;  %v5557_v15 = vld [vmem:[%s5537_s29 + $0x10] sm:$0xf] }
  0x18   : > { %v5560_v16 = vld [vmem:[%s5537_s29 + $0x14] sm:$0x1]  ;;  %v457_v17 = vrot.slane %v455_v9, 4  ;;  %v460_v18 = vrot.slane %v458_v10, 5  ;;  %v466_v19 = vrot.slane %v464_v11, 5  ;;  %v470_v20 = vrot.slane %v468_v12, 4 }
  0x19   : > { %v476_v22 = vrot.slane %v474_v14, 5  ;;  %v479_v23 = vshrl.u32 %v5553_v13, 16  ;;  %v482_v24 = vshll.u32 %v5553_v13, 16  ;;  %v488_v25 = vshll.u32 %v5557_v15, 16  ;;  %v5571_v30 = vld [vmem:[%s5537_s29 + $0x18] sm:$0xf] }
  0x1a   : > { %v461_v26 = vor.u32 %v460_v18, %v457_v17  ;;  %v471_v27 = vor.u32 %v470_v20, %v466_v19  ;;  %v492_v28 = vshrl.u32 %v5557_v15, 16  ;;  %v498_v29 = vshll.u32 %v5560_v16, 16  ;;  %v5581_v36 = vld [vmem:[%s5537_s29 + $0x1c] sm:$0xf]  ;;  %v5585_v43 = vld [vmem:[%s5537_s29 + $0x20] sm:$0x1] }
  0x1b   : > { %v481_v33 = vrot.slane %v479_v23, 4  ;;  %v484_v34 = vrot.slane %v482_v24, 5  ;;  %v490_v35 = vrot.slane %v488_v25, 5  ;;  %7219 = vst [vmem:[#allocation4_spill] sm:$0xff] %v5585_v43  ;;  %v503_v44 = vshrl.u32 %v5571_v30, 16 }
  0x1c   : > { %v462_v37 = vrot.slane %v461_v26, 4  ;;  %v472_v38 = vrot.slane %v471_v27, 4  ;;  %v494_v39 = vrot.slane %v492_v28, 4  ;;  %v500_v42 = vrot.slane %v498_v29, 5  ;;  %v5595_v50 = vld [vmem:[%s5537_s29 + $0x24] sm:$0xf] }
  0x1d   : > { %v485_v41 = vor.u32 %v484_v34, %v481_v33  ;;  %v506_v45 = vshll.u32 %v5571_v30, 16  ;;  %v512_v49 = vshll.u32 %v5581_v36, 16  ;;  %v505_v53 = vrot.slane %v503_v44, 4  ;;  %v5598_v55 = vld [vmem:[%s5537_s29 + $0x28] sm:$0xf] }
  0x1e   : > { %v467_v46 = vsel %vm5575_vm5, %v462_v37, %v466_v19  ;;  %v477_v47 = vsel %vm5575_vm5, %v472_v38, %v476_v22  ;;  %v495_v48 = vor.u32 %v494_v39, %v490_v35  ;;  %v516_v58 = vshrl.u32 %v5581_v36, 16  ;;  %v5607_v62 = vld [vmem:[%s5537_s29 + $0x2c] sm:$0x1]  ;;  %v5617_v9 = vld [vmem:[%s5537_s29 + $0x30] sm:$0xf] }
  0x1f   : > { %v4250_v51 = vcombine.low %v467_v46, %v477_v47  ;;  %v486_v52 = vrot.slane %v485_v41, 4  ;;  %v508_v54 = vrot.slane %v506_v45, 5  ;;  %v514_v57 = vrot.slane %v512_v49, 5  ;;  %v5622_v17 = vld [vmem:[%s5537_s29 + $0x34] sm:$0xf] }
  0x20   : > { %v496_v56 = vrot.slane %v495_v48, 4  ;;  %v522_v59 = vshll.u32 %v5585_v43, 16  ;;  %v527_v63 = vshrl.u32 %v5595_v50, 16  ;;  %v530_v0 = vshll.u32 %v5595_v50, 16  ;;  %v5630_v22 = vld [vmem:[%s7180_s3 + $0xa] sm:$0x3] }
  0x21   : > { %4680 = vmatprep.mubr.msk.bf16.mxu0 %vm886_vm4, %v4250_v51  ;;  %4783 = vmatmul.mubr.msk.bf16.vlgmr.msra.gmra.mrb[0].mxu1 %vm886_vm4, %v4250_v51  ;;  %v491_v60 = vsel %vm5575_vm5, %v486_v52, %v490_v35  ;;  %v509_v61 = vor.u32 %v508_v54, %v505_v53  ;;  %v518_v3 = vrot.slane %v516_v58, 4  ;;  %v536_v5 = vshll.u32 %v5598_v55, 16  ;;  %v5637_v25 = vld [vmem:[%s5537_s29 + $0x38] sm:$0x1]  ;;  %v5644_v39 = vld [vmem:[%s5537_s29 + $0x3c] sm:$0xf] }
  0x22   : > { %4843 = vmatpush3.bf16.msra.mxu1 %v2035_v32  ;;  %v501_v1 = vsel %vm5575_vm5, %v496_v56, %v500_v42  ;;  %4786 = vmatprep.mubr.msk.bf16.mxu1 %vm5463_vm1, %v7183_v2  ;;  %v524_v4 = vrot.slane %v522_v59, 5  ;;  %v529_v12 = vrot.slane %v527_v63, 4  ;;  %v532_v14 = vrot.slane %v530_v0, 5  ;;  %v5652_v45 = vld [vmem:[%s5537_s29 + $0x40] sm:$0xf] }
  0x23   : > { %v5619_v10 = vcombine.low %v491_v60, %v501_v1  ;;  %v510_v11 = vrot.slane %v509_v61, 4  ;;  %4904 = vmatprep.subr.bf16.mxu1 %v7183_v2  ;;  %v519_v18 = vor.u32 %v518_v3, %v514_v57  ;;  %v538_v19 = vrot.slane %v536_v5, 5  ;;  %v5661_v51 = vld [vmem:[%s5537_s29 + $0x44] sm:$0x1]  ;;  %v5672_v61 = vld [vmem:[%s5537_s29 + $0x48] sm:$0xf] }
  0x24   : > { %v540_v20 = vshrl.u32 %v5598_v55, 16  ;;  %v546_v21 = vshll.u32 %v5607_v62, 16  ;;  %v533_v24 = vor.u32 %v532_v14, %v529_v12  ;;  %v551_v26 = vshrl.u32 %v5617_v9, 16  ;;  %7222 = vst [vmem:[#allocation7_spill] sm:$0xff] %v5661_v51  ;;  %v5845_v8 = vld [vmem:[%s5537_s29 + $0xa0] sm:$0xf] }
  0x25   : > { %7220 = vst [vmem:[#allocation5_spill] sm:$0xff] %v5619_v10  ;;  %4681 = vmatmul.mubr.msk.bf16.vlgmr.msra.gmra.mrb[0].mxu0 %vm886_vm4, %v5619_v10  ;;  %v515_v23 = vsel %vm5575_vm5, %v510_v11, %v514_v57  ;;  %v554_v27 = vshll.u32 %v5617_v9, 16  ;;  %v520_v28 = vrot.slane %v519_v18, 4  ;;  %v560_v33 = vshll.u32 %v5622_v17, 16 }
  0x26   : > { %4713 = vmatpush3.bf16.msra.mxu0 %v1229_v40  ;;  %v542_v29 = vrot.slane %v540_v20, 4  ;;  %v548_v32 = vrot.slane %v546_v21, 5  ;;  %v534_v34 = vrot.slane %v533_v24, 4  ;;  %v553_v35 = vrot.slane %v551_v26, 4  ;;  %v5685_v21 = vld [vmem:[%s5537_s29 + $0x50] sm:$0x1] }
  0x27   : > { %v556_v37 = vrot.slane %v554_v27, 5  ;;  %v564_v38 = vshrl.u32 %v5622_v17, 16  ;;  %5392 = vmatprep.subr.msk.bf16.mxu0 %vm935_vm0, %v5630_v22  ;;  %v525_v41 = vsel %vm5575_vm5, %v520_v28, %v524_v4  ;;  %v562_v42 = vrot.slane %v560_v33, 5  ;;  %v5678_v4 = vld [vmem:[%s5537_s29 + $0x4c] sm:$0xf]  ;;  %7224 = vst [vmem:[#allocation9_spill] sm:$0xff] %v5685_v21 }
  0x28   : > { %v543_v40 = vor.u32 %v542_v29, %v538_v19  ;;  %v570_v44 = vshll.u32 %v5637_v25, 16  ;;  %v5654_v46 = vcombine.low %v515_v23, %v525_v41  ;;  %v539_v47 = vsel %vm5575_vm5, %v534_v34, %v538_v19  ;;  %v5696_v29 = vld [vmem:[%s5537_s29 + $0x54] sm:$0xf] }
  0x29   : > { %4787 = vmatmul.mubr.msk.bf16.gmra.mrb[4].mxu1 %vm886_vm4, %v5619_v10  ;;  %v557_v48 = vor.u32 %v556_v37, %v553_v35  ;;  %v566_v49 = vrot.slane %v564_v38, 4  ;;  %v575_v54 = vshrl.u32 %v5644_v39, 16  ;;  %v578_v56 = vshll.u32 %v5644_v39, 16  ;;  %v5701_v37 = vld [vmem:[%s5537_s29 + $0x58] sm:$0xf] }
  0x2a   : > { %7221 = vst [vmem:[#allocation6_spill] sm:$0xff] %v5654_v46  ;;  %v544_v52 = vrot.slane %v543_v40, 4  ;;  %4790 = vmatprep.mubr.msk.bf16.mxu1 %vm5463_vm1, %v7183_v2  ;;  %v572_v53 = vrot.slane %v570_v44, 5  ;;  %4684 = vmatprep.mubr.msk.bf16.mxu0 %vm886_vm4, %v5654_v46  ;;  %v584_v59 = vshll.u32 %v5652_v45, 16  ;;  %v588_v60 = vshrl.u32 %v5652_v45, 16 }
  0x2b   : > { %v558_v57 = vrot.slane %v557_v48, 4  ;;  %v567_v58 = vor.u32 %v566_v49, %v562_v42  ;;  %v577_v0 = vrot.slane %v575_v54, 4  ;;  %v580_v1 = vrot.slane %v578_v56, 5  ;;  %v5715_v56 = vld [vmem:[%s5537_s29 + $0x5c] sm:$0x1] }
  0x2c   : > { %v549_v63 = vsel %vm5575_vm5, %v544_v52, %v548_v32  ;;  %v594_v3 = vshll.u32 %v5661_v51, 16  ;;  %v586_v14 = vrot.slane %v584_v59, 5  ;;  %v590_v19 = vrot.slane %v588_v60, 4  ;;  %7226 = vst [vmem:[#allocation11_spill] sm:$0xff] %v5715_v56  ;;  %v5837_v10 = vld [vmem:[%s5537_s29 + $0x9c] sm:$0xf] }
  0x2d   : > { %v5680_v5 = vcombine.low %v539_v47, %v549_v63  ;;  %v563_v11 = vsel %vm5575_vm5, %v558_v57, %v562_v42  ;;  %v568_v12 = vrot.slane %v567_v58, 4  ;;  %v581_v18 = vor.u32 %v580_v1, %v577_v0  ;;  %v5719_v58 = vld [vmem:[%s5537_s29 + $0x60] sm:$0xf]  ;;  %v5725_v1 = vld [vmem:[%s5537_s29 + $0x64] sm:$0xf] }
  0x2e   : > { %v596_v20 = vrot.slane %v594_v3, 5  ;;  %v599_v23 = vshrl.u32 %v5672_v61, 16  ;;  %v602_v26 = vshll.u32 %v5672_v61, 16  ;;  %v608_v27 = vshll.u32 %v5678_v4, 16 }
  0x2f   : > { %7223 = vst [vmem:[#allocation8_spill] sm:$0xff] %v5680_v5  ;;  %4685 = vmatmul.mubr.msk.bf16.gmra.mrb[4].mxu0 %vm886_vm4, %v5680_v5  ;;  %v573_v24 = vsel %vm5575_vm5, %v568_v12, %v572_v53  ;;  %v612_v28 = vshrl.u32 %v5678_v4, 16  ;;  %v582_v33 = vrot.slane %v581_v18, 4  ;;  %v591_v34 = vor.u32 %v590_v19, %v586_v14 }
  0x30   : > { %v5698_v32 = vcombine.low %v563_v11, %v573_v24  ;;  %v601_v35 = vrot.slane %v599_v23, 4  ;;  %v604_v38 = vrot.slane %v602_v26, 5  ;;  %v610_v41 = vrot.slane %v608_v27, 5  ;;  %v5738_v27 = vld [vmem:[%s5537_s29 + $0x68] sm:$0x1] }
  0x31   : > { %4791 = vmatmul.mubr.msk.bf16.gmra.mrb[8].mxu1 %vm886_vm4, %v5654_v46  ;;  %v614_v40 = vrot.slane %v612_v28, 4  ;;  %v618_v42 = vshll.u32 %v5685_v21, 16  ;;  %v587_v44 = vsel %vm5575_vm5, %v582_v33, %v586_v14  ;;  %v592_v47 = vrot.slane %v591_v34, 4  ;;  %7228 = vst [vmem:[#allocation13_spill] sm:$0xff] %v5738_v27  ;;  %v5743_v34 = vld [vmem:[%s5537_s29 + $0x6c] sm:$0xf] }
  0x32   : > { %7225 = vst [vmem:[#allocation10_spill] sm:$0xff] %v5698_v32  ;;  %4688 = vmatprep.mubr.msk.bf16.mxu0 %vm886_vm4, %v5698_v32  ;;  %4794 = vmatprep.mubr.msk.bf16.mxu1 %vm5463_vm1, %v7183_v2  ;;  %v623_v48 = vshrl.u32 %v5696_v29, 16  ;;  %v626_v49 = vshll.u32 %v5696_v29, 16  ;;  %v605_v52 = vor.u32 %v604_v38, %v601_v35  ;;  %v632_v57 = vshll.u32 %v5701_v37, 16  ;;  %v5907_v21 = vld [vmem:[%s5537_s29 + $0xbc] sm:$0x1] }
  0x33   : > { %v615_v53 = vor.u32 %v614_v40, %v610_v41  ;;  %v620_v54 = vrot.slane %v618_v42, 5  ;;  %v597_v59 = vsel %vm5575_vm5, %v592_v47, %v596_v20  ;;  %v636_v0 = vshrl.u32 %v5701_v37, 16 }
  0x34   : > { %v625_v60 = vrot.slane %v623_v48, 4  ;;  %v628_v63 = vrot.slane %v626_v49, 5  ;;  %v5727_v3 = vcombine.low %v587_v44, %v597_v59  ;;  %v606_v11 = vrot.slane %v605_v52, 4  ;;  %v5748_v44 = vld [vmem:[%s5537_s29 + $0x70] sm:$0xf] }
  0x35   : > { %v616_v12 = vrot.slane %v615_v53, 4  ;;  %v634_v14 = vrot.slane %v632_v57, 5  ;;  %v638_v19 = vrot.slane %v636_v0, 4  ;;  %v642_v23 = vshll.u32 %v5715_v56, 16  ;;  %v5761_v57 = vld [vmem:[%s5537_s29 + $0x74] sm:$0x1] }
  0x36   : > { %7227 = vst [vmem:[#allocation12_spill] sm:$0xff] %v5727_v3  ;;  %v629_v18 = vor.u32 %v628_v63, %v625_v60  ;;  %v647_v20 = vshrl.u32 %v5719_v58, 16  ;;  %v611_v24 = vsel %vm5575_vm5, %v606_v11, %v610_v41  ;;  %v650_v28 = vshll.u32 %v5719_v58, 16  ;;  %7230 = vst [vmem:[#allocation15_spill] sm:$0xff] %v5761_v57  ;;  %v5877_v56 = vld [vmem:[%s5537_s29 + $0xb0] sm:$0x1] }
  0x37   : > { %4689 = vmatmul.mubr.msk.bf16.gmra.mrb[8].mxu0 %vm886_vm4, %v5727_v3  ;;  %v621_v26 = vsel %vm5575_vm5, %v616_v12, %v620_v54  ;;  %v656_v33 = vshll.u32 %v5725_v1, 16  ;;  %v639_v40 = vor.u32 %v638_v19, %v634_v14  ;;  %v644_v42 = vrot.slane %v642_v23, 5  ;;  %v5767_v12 = vld [vmem:[%s5537_s29 + $0x78] sm:$0xf]  ;;  %7241 = vst [vmem:[#allocation25_spill] sm:$0xff] %v5877_v56 }
  0x38   : > { %v5745_v35 = vcombine.low %v611_v24, %v621_v26  ;;  %v630_v38 = vrot.slane %v629_v18, 4  ;;  %v649_v41 = vrot.slane %v647_v20, 4  ;;  %v652_v47 = vrot.slane %v650_v28, 5 }
  0x39   : > { %4795 = vmatmul.mubr.msk.bf16.gmra.mrb[12].mxu1 %vm886_vm4, %v5680_v5  ;;  %v658_v48 = vrot.slane %v656_v33, 5  ;;  %v660_v49 = vshrl.u32 %v5725_v1, 16  ;;  %v640_v53 = vrot.slane %v639_v40, 4  ;;  %v666_v54 = vshll.u32 %v5738_v27, 16  ;;  %v5775_v33 = vld [vmem:[%s5537_s29 + $0x7c] sm:$0xf] }
  0x3a   : > { %7229 = vst [vmem:[#allocation14_spill] sm:$0xff] %v5745_v35  ;;  %4692 = vmatprep.mubr.msk.bf16.mxu0 %vm886_vm4, %v5745_v35  ;;  %v635_v52 = vsel %vm5575_vm5, %v630_v38, %v634_v14  ;;  %4798 = vmatprep.mubr.msk.bf16.mxu1 %vm5463_vm1, %v7183_v2  ;;  %v671_v59 = vshrl.u32 %v5743_v34, 16  ;;  %v653_v60 = vor.u32 %v652_v47, %v649_v41  ;;  %v674_v0 = vshll.u32 %v5743_v34, 16 }
  0x3b   : > { %v662_v63 = vrot.slane %v660_v49, 4  ;;  %v680_v11 = vshll.u32 %v5748_v44, 16  ;;  %v645_v14 = vsel %vm5575_vm5, %v640_v53, %v644_v42  ;;  %v668_v18 = vrot.slane %v666_v54, 5  ;;  %v5784_v53 = vld [vmem:[%s5537_s29 + $0x80] sm:$0x1] }
  0x3c   : > { %v673_v19 = vrot.slane %v671_v59, 4  ;;  %v684_v23 = vshrl.u32 %v5748_v44, 16  ;;  %v5772_v20 = vcombine.low %v635_v52, %v645_v14  ;;  %v654_v24 = vrot.slane %v653_v60, 4  ;;  %7232 = vst [vmem:[#allocation17_spill] sm:$0xff] %v5784_v53 }
  0x3d   : > { %v663_v26 = vor.u32 %v662_v63, %v658_v48  ;;  %v676_v28 = vrot.slane %v674_v0, 5  ;;  %v682_v38 = vrot.slane %v680_v11, 5  ;;  %v690_v41 = vshll.u32 %v5761_v57, 16  ;;  %v5789_v11 = vld [vmem:[%s5537_s29 + $0x84] sm:$0xf] }
  0x3e   : > { %7231 = vst [vmem:[#allocation16_spill] sm:$0xff] %v5772_v20  ;;  %v686_v40 = vrot.slane %v684_v23, 4  ;;  %v695_v47 = vshrl.u32 %v5767_v12, 16  ;;  %v659_v42 = vsel %vm5575_vm5, %v654_v24, %v658_v48  ;;  %v698_v54 = vshll.u32 %v5767_v12, 16  ;;  %v5797_v24 = vld [vmem:[%s5537_s29 + $0x88] sm:$0xf] }
  0x3f   : > { %4693 = vmatmul.mubr.msk.bf16.gmra.mrb[12].mxu0 %vm886_vm4, %v5772_v20  ;;  %v664_v49 = vrot.slane %v663_v26, 4  ;;  %v677_v52 = vor.u32 %v676_v28, %v673_v19  ;;  %v692_v60 = vrot.slane %v690_v41, 5  ;;  %v704_v0 = vshll.u32 %v5775_v33, 16 }
  0x40   : > { %v687_v59 = vor.u32 %v686_v40, %v682_v38  ;;  %v697_v63 = vrot.slane %v695_v47, 4  ;;  %v700_v19 = vrot.slane %v698_v54, 5  ;;  %v708_v23 = vshrl.u32 %v5775_v33, 16 }
  0x41   : > { %v669_v14 = vsel %vm5575_vm5, %v664_v49, %v668_v18  ;;  %4799 = vmatmul.mubr.msk.bf16.gmra.mrb[16].mxu1 %vm886_vm4, %v5698_v32  ;;  %v678_v48 = vrot.slane %v677_v52, 4  ;;  %v706_v40 = vrot.slane %v704_v0, 5  ;;  %v714_v41 = vshll.u32 %v5784_v53, 16  ;;  %v5807_v52 = vld [vmem:[%s5537_s29 + $0x8c] sm:$0x1] }
  0x42   : > { %v5799_v26 = vcombine.low %v659_v42, %v669_v14  ;;  %v688_v28 = vrot.slane %v687_v59, 4  ;;  %4802 = vmatprep.mubr.msk.bf16.mxu1 %vm5463_vm1, %v7183_v2  ;;  %v701_v47 = vor.u32 %v700_v19, %v697_v63  ;;  %v710_v49 = vrot.slane %v708_v23, 4  ;;  %7234 = vst [vmem:[#allocation19_spill] sm:$0xff] %v5807_v52  ;;  %v5817_v2 = vld [vmem:[%s5537_s29 + $0x90] sm:$0xf] }
  0x43   : > { %v683_v18 = vsel %vm5575_vm5, %v678_v48, %v682_v38  ;;  %v719_v54 = vshrl.u32 %v5789_v11, 16  ;;  %v716_v59 = vrot.slane %v714_v41, 5  ;;  %v722_v0 = vshll.u32 %v5789_v11, 16  ;;  %v5822_v23 = vld [vmem:[%s5537_s29 + $0x94] sm:$0xf] }
  0x44   : > { %7233 = vst [vmem:[#allocation18_spill] sm:$0xff] %v5799_v26  ;;  %4696 = vmatprep.mubr.msk.bf16.mxu0 %vm886_vm4, %v5799_v26  ;;  %v693_v42 = vsel %vm5575_vm5, %v688_v28, %v692_v60  ;;  %v728_v14 = vshll.u32 %v5797_v24, 16  ;;  %v702_v63 = vrot.slane %v701_v47, 4  ;;  %v711_v48 = vor.u32 %v710_v49, %v706_v40  ;;  %v5831_v47 = vld [vmem:[%s5537_s29 + $0x98] sm:$0x1] }
  0x45   : > { %v5819_v38 = vcombine.low %v683_v18, %v693_v42  ;;  %v721_v19 = vrot.slane %v719_v54, 4  ;;  %v724_v32 = vrot.slane %v722_v0, 5  ;;  %v732_v60 = vshrl.u32 %v5797_v24, 16  ;;  %7236 = vst [vmem:[#allocation21_spill] sm:$0xff] %v5831_v47 }
  0x46   : > { %v730_v5 = vrot.slane %v728_v14, 5  ;;  %v738_v28 = vshll.u32 %v5807_v52, 16  ;;  %v707_v41 = vsel %vm5575_vm5, %v702_v63, %v706_v40  ;;  %v712_v18 = vrot.slane %v711_v48, 4 }
  0x47   : > { %7235 = vst [vmem:[#allocation20_spill] sm:$0xff] %v5819_v38  ;;  %4697 = vmatmul.mubr.msk.bf16.gmra.mrb[16].mxu0 %vm886_vm4, %v5819_v38  ;;  %v743_v49 = vshrl.u32 %v5817_v2, 16  ;;  %v746_v54 = vshll.u32 %v5817_v2, 16  ;;  %v725_v42 = vor.u32 %v724_v32, %v721_v19  ;;  %v734_v0 = vrot.slane %v732_v60, 4 }
  0x48   : > { %v740_v14 = vrot.slane %v738_v28, 5  ;;  %v752_v46 = vshll.u32 %v5822_v23, 16  ;;  %v717_v43 = vsel %vm5575_vm5, %v712_v18, %v716_v59  ;;  %v756_v48 = vshrl.u32 %v5822_v23, 16 }
  0x49   : > { %4803 = vmatmul.mubr.msk.bf16.gmra.mrb[20].mxu1 %vm886_vm4, %v5727_v3  ;;  %v745_v40 = vrot.slane %v743_v49, 4  ;;  %v748_v63 = vrot.slane %v746_v54, 5  ;;  %v5847_v32 = vcombine.low %v707_v41, %v717_v43  ;;  %v726_v19 = vrot.slane %v725_v42, 4  ;;  %v5858_v54 = vld [vmem:[%s5537_s29 + $0xa4] sm:$0x1] }
  0x4a   : > { %v735_v60 = vor.u32 %v734_v0, %v730_v5  ;;  %v7238_v28 = vmov 0.0   ;;  %v754_v52 = vrot.slane %v752_v46, 5  ;;  %v758_v18 = vrot.slane %v756_v48, 4  ;;  %7239 = vst [vmem:[#allocation23_spill] sm:$0xff] %v5858_v54 }
  0x4b   : > { %7237 = vst [vmem:[#allocation22_spill] sm:$0xff] %v5847_v32  ;;  %4806 = vmatprep.mubr.msk.bf16.mxu1 %vm5463_vm1, %v7238_v28  ;;  %v749_v59 = vor.u32 %v748_v63, %v745_v40  ;;  %v762_v3 = vshll.u32 %v5831_v47, 16  ;;  %v767_v49 = vshrl.u32 %v5837_v10, 16  ;;  %4700 = vmatprep.mubr.msk.bf16.mxu0 %vm886_vm4, %v5847_v32  ;;  %v731_v43 = vsel %vm5575_vm5, %v726_v19, %v730_v5  ;;  %v5863_v47 = vld [vmem:[%s5537_s29 + $0xa8] sm:$0xf] }
  0x4c   : > { %v736_v41 = vrot.slane %v735_v60, 4  ;;  %v770_v42 = vshll.u32 %v5837_v10, 16  ;;  %v776_v46 = vshll.u32 %v5845_v8, 16  ;;  %v759_v40 = vor.u32 %v758_v18, %v754_v52  ;;  %v5869_v19 = vld [vmem:[%s5537_s29 + $0xac] sm:$0xf] }
  0x4d   : > { %v750_v0 = vrot.slane %v749_v59, 4  ;;  %v764_v63 = vrot.slane %v762_v3, 5  ;;  %v769_v48 = vrot.slane %v767_v49, 4  ;;  %v780_v5 = vshrl.u32 %v5845_v8, 16 }
  0x4e   : > { %v741_v32 = vsel %vm5575_vm5, %v736_v41, %v740_v14  ;;  %v772_v53 = vrot.slane %v770_v42, 5  ;;  %v778_v57 = vrot.slane %v776_v46, 5  ;;  %v760_v18 = vrot.slane %v759_v40, 4  ;;  %v5890_v42 = vld [vmem:[%s5537_s29 + $0xb4] sm:$0xf] }
  0x4f   : > { %v5871_v60 = vcombine.low %v731_v43, %v741_v32  ;;  %v755_v59 = vsel %vm5575_vm5, %v750_v0, %v754_v52  ;;  %v786_v3 = vshll.u32 %v5858_v54, 16  ;;  %v782_v27 = vrot.slane %v780_v5, 4 }
  0x50   : > { %v773_v49 = vor.u32 %v772_v53, %v769_v48  ;;  %v791_v14 = vshrl.u32 %v5863_v47, 16  ;;  %v794_v41 = vshll.u32 %v5863_v47, 16  ;;  %v765_v32 = vsel %vm5575_vm5, %v760_v18, %v764_v63  ;;  %v5897_v63 = vld [vmem:[%s5537_s29 + $0xb8] sm:$0xf] }
  0x51   : > { %7240 = vst [vmem:[#allocation24_spill] sm:$0xff] %v5871_v60  ;;  %4701 = vmatmul.mubr.msk.bf16.gmra.mrb[20].mxu0 %vm886_vm4, %v5871_v60  ;;  %4807 = vmatmul.mubr.msk.bf16.gmra.mrb[24].mxu1 %vm886_vm4, %v5745_v35  ;;  %v788_v52 = vrot.slane %v786_v3, 5  ;;  %v800_v53 = vshll.u32 %v5869_v19, 16  ;;  %v804_v43 = vshrl.u32 %v5869_v19, 16  ;;  %v5892_v46 = vcombine.low %v755_v59, %v765_v32 }
  0x52   : > { %v774_v0 = vrot.slane %v773_v49, 4  ;;  %v783_v40 = vor.u32 %v782_v27, %v778_v57  ;;  %4810 = vmatprep.mubr.msk.bf16.mxu1 %vm5463_vm1, %v7238_v28  ;;  %v793_v48 = vrot.slane %v791_v14, 4  ;;  %v796_v5 = vrot.slane %v794_v41, 5 }
  0x53   : > { %7242 = vst [vmem:[#allocation26_spill] sm:$0xff] %v5892_v46  ;;  %v802_v18 = vrot.slane %v800_v53, 5  ;;  %v806_v3 = vrot.slane %v804_v43, 4  ;;  %v810_v35 = vshll.u32 %v5877_v56, 16  ;;  %4704 = vmatprep.mubr.msk.bf16.mxu0 %vm886_vm4, %v5892_v46  ;;  %v815_v27 = vshrl.u32 %v5890_v42, 16 }
  0x54   : > { %v779_v59 = vsel %vm5575_vm5, %v774_v0, %v778_v57  ;;  %v784_v49 = vrot.slane %v783_v40, 4  ;;  %v818_v32 = vshll.u32 %v5890_v42, 16  ;;  %v797_v60 = vor.u32 %v796_v5, %v793_v48 }
  0x55   : > { %v807_v14 = vor.u32 %v806_v3, %v802_v18  ;;  %v812_v54 = vrot.slane %v810_v35, 5  ;;  %v824_v41 = vshll.u32 %v5897_v63, 16  ;;  %v817_v43 = vrot.slane %v815_v27, 4 }
  0x56   : > { %v789_v53 = vsel %vm5575_vm5, %v784_v49, %v788_v52  ;;  %v820_v46 = vrot.slane %v818_v32, 5  ;;  %v828_v56 = vshrl.u32 %v5897_v63, 16  ;;  %v798_v0 = vrot.slane %v797_v60, 4 }
  0x57   : > { %v5913_v57 = vcombine.low %v779_v59, %v789_v53  ;;  %v808_v40 = vrot.slane %v807_v14, 4  ;;  %v826_v38 = vrot.slane %v824_v41, 5  ;;  %v834_v35 = vshll.u32 %v5907_v21, 16 }
  0x58   : > { %v821_v51 = vor.u32 %v820_v46, %v817_v43  ;;  %v830_v48 = vrot.slane %v828_v56, 4  ;;  %v1420_v5 = vrot.slane %v5557_v15, 5  ;;  %v803_v52 = vsel %vm5575_vm5, %v798_v0, %v802_v18 }
  0x59   : > { %4705 = vmatmul.mubr.msk.bf16.gmra.mrb[24].mxu0 %vm886_vm4, %v5913_v57  ;;  %v813_v3 = vsel %vm5575_vm5, %v808_v40, %v812_v54  ;;  %4811 = vmatmul.mubr.msk.bf16.gmra.mrb[28].mxu1 %vm886_vm4, %v5772_v20  ;;  %v5927_v60 = vcombine.low %v5540_v6, %v5543_v7  ;;  %v836_v49 = vrot.slane %v834_v35, 5  ;;  %v1423_v18 = vrot.slane %v5560_v16, 5 }
  0x5a   : > { %v5929_v56 = vcombine.low %v803_v52, %v813_v3  ;;  %v822_v46 = vrot.slane %v821_v51, 4  ;;  %v831_v59 = vor.u32 %v830_v48, %v826_v38  ;;  %4814 = vmatprep.mubr.msk.bf16.mxu1 %vm5463_vm1, %v7238_v28  ;;  %v5936_v54 = vcombine.low %v5617_v9, %v5622_v17  ;;  %v448_v3 = vld [vmem:[%s7180_s3 + $0xc] sm:$0x3] }
  0x5b   : > { %v5940_v27 = vcombine.low %v5644_v39, %v5652_v45  ;;  %v5944_v6 = vcombine.low %v5672_v61, %v5678_v4  ;;  %v5952_v16 = vcombine.low %v5696_v29, %v5701_v37  ;;  %v5956_v14 = vcombine.low %v5719_v58, %v5725_v1 }
  0x5c   : > { %4708 = vmatprep.mubr.msk.bf16.mxu0 %vm886_vm4, %v5929_v56  ;;  %v827_v51 = vsel %vm5575_vm5, %v822_v46, %v826_v38  ;;  %v832_v32 = vrot.slane %v831_v59, 4  ;;  %v5960_v41 = vcombine.low %v5743_v34, %v5748_v44  ;;  %v5964_v53 = vcombine.low %v5767_v12, %v5775_v33 }
  0x5d   : > { %v5968_v38 = vcombine.low %v5789_v11, %v5797_v24  ;;  %v5972_v43 = vcombine.low %v5817_v2, %v5822_v23  ;;  %v5978_v40 = vcombine.low %v5837_v10, %v5845_v8  ;;  %v5982_v48 = vcombine.low %v5863_v47, %v5869_v19 }
  0x5e   : > { %v837_v0 = vsel %vm5575_vm5, %v832_v32, %v836_v49  ;;  %v5986_v35 = vcombine.low %v5890_v42, %v5897_v63  ;;  %v4315_v31 = vrot.slane %v5553_v13, 9  ;;  %v1422_v46 = vrot.slane %v1420_v5, 4 }
  0x5f   : > { %7243 = vst [vmem:[#allocation27_spill] sm:$0xff] %v5982_v48  ;;  %v5988_v52 = vcombine.low %v827_v51, %v837_v0  ;;  %v4317_v59 = vrot.slane %v5595_v50, 9  ;;  %v1434_v0 = vrot.slane %v5598_v55, 5  ;;  %v4318_v20 = vrot.slane %v5617_v9, 9 }
  0x60   : > { %7244 = vst [vmem:[#allocation28_spill] sm:$0xff] %v5986_v35  ;;  %v1421_v49 = vsel %vm5990_vm8, %v4315_v31, %v1420_v5  ;;  %v1424_v51 = vsel %vm5990_vm8, %v1422_v46, %v1423_v18  ;;  %v1441_v35 = vrot.slane %v5622_v17, 5  ;;  %v6018_v48 = vcombine.low %v5553_v13, %v5557_v15 }
  0x61   : > { %7245 = vst [vmem:[#allocation29_spill] sm:$0xff] %v5988_v52  ;;  %4709 = vmatmul.mubr.msk.bf16.gmra.mrb[28].mxu0 %vm886_vm4, %v5988_v52  ;;  %4815 = vmatmul.mubr.msk.bf16.gmra.mrb[32].mxu1 %vm886_vm4, %v5799_v26  ;;  %v6008_v32 = vcombine.low %v1421_v49, %v1424_v51  ;;  %v1620_v52 = vsel %vm935_vm0, %v5630_v22, 0  ;;  %v1437_v26 = vrot.slane %v5607_v62, 5  ;;  %v6022_v5 = vcombine.low %v5571_v30, %v5581_v36  ;;  %v7248_v49 = vld [vmem:[#allocation7_spill] sm:$0xff] }
  0x62   : > { %4714 = vmatprep.mubr.msk.bf16.mxu0 %vm886_vm4, %v5927_v60  ;;  %4818 = vmatprep.mubr.msk.bf16.mxu1 %vm5463_vm1, %v7238_v28  ;;  %v1435_v18 = vsel %vm5990_vm8, %v4317_v59, %v1434_v0  ;;  %v1436_v31 = vrot.slane %v1434_v0, 4  ;;  %v6028_v22 = vcombine.low %v5595_v50, %v5598_v55  ;;  %v1442_v62 = vsel %vm5990_vm8, %v4318_v20, %v1441_v35 }
  0x63   : > { %v1443_v9 = vrot.slane %v1441_v35, 4  ;;  %v1444_v17 = vrot.slane %v5637_v25, 5  ;;  %v4319_v15 = vrot.slane %v5644_v39, 9  ;;  %v1448_v46 = vrot.slane %v5652_v45, 5  ;;  %v7249_v25 = vld [vmem:[#allocation20_spill] sm:$0xff]  ;;  %v7250_v35 = vld [vmem:[#allocation9_spill] sm:$0xff] }
  0x64   : > { %v1438_v13 = vsel %vm5990_vm8, %v1436_v31, %v1437_v26  ;;  %v1451_v59 = vrot.slane %v7248_v49, 5  ;;  %v4320_v55 = vrot.slane %v5672_v61, 9  ;;  %v1455_v20 = vrot.slane %v5678_v4, 5 }
  0x65   : > { %v6038_v51 = vcombine.low %v1435_v18, %v1438_v13  ;;  %v1445_v50 = vsel %vm5990_vm8, %v1443_v9, %v1444_v17  ;;  %v1449_v45 = vsel %vm5990_vm8, %v4319_v15, %v1448_v46  ;;  %v1450_v26 = vrot.slane %v1448_v46, 4 }
  0x66   : > { %v6048_v39 = vcombine.low %v1442_v62, %v1445_v50  ;;  %v1458_v0 = vrot.slane %v7250_v35, 5  ;;  %v1456_v61 = vsel %vm5990_vm8, %v4320_v55, %v1455_v20  ;;  %v1457_v4 = vrot.slane %v1455_v20, 4  ;;  %v7252_v55 = vld [vmem:[#allocation13_spill] sm:$0xff] }
  0x67   : > { %v4321_v18 = vrot.slane %v5696_v29, 9  ;;  %v1462_v31 = vrot.slane %v5701_v37, 5  ;;  %v1452_v62 = vsel %vm5990_vm8, %v1450_v26, %v1451_v59  ;;  %v4322_v17 = vrot.slane %v5719_v58, 9  ;;  %v7253_v26 = vld [vmem:[#allocation15_spill] sm:$0xff] }
  0x68   : > { %v1469_v13 = vrot.slane %v5725_v1, 5  ;;  %v6067_v15 = vcombine.low %v1449_v45, %v1452_v62  ;;  %v1459_v29 = vsel %vm5990_vm8, %v1457_v4, %v1458_v0  ;;  %v1472_v20 = vrot.slane %v7252_v55, 5 }
  0x69   : > { %4715 = vmatmul.mubr.msk.bf16.vlgmr.msra.gmra.mrb[0].mxu0 %vm886_vm4, %v6018_v48  ;;  %4819 = vmatmul.mubr.msk.bf16.gmra.mrb[36].mxu1 %vm886_vm4, %v7249_v25  ;;  %v1463_v37 = vsel %vm5990_vm8, %v4321_v18, %v1462_v31  ;;  %v1464_v46 = vrot.slane %v1462_v31, 4  ;;  %v6073_v49 = vcombine.low %v1456_v61, %v1459_v29  ;;  %v4323_v1 = vrot.slane %v5743_v34, 9  ;;  %v7254_v34 = vld [vmem:[#allocation17_spill] sm:$0xff] }
  0x6a   : > { %4747 = vmatpush3.bf16.msra.mxu0 %v1620_v52  ;;  %4718 = vmatprep.mubr.msk.bf16.mxu0 %vm886_vm4, %v6022_v5  ;;  %v7251_v52 = vld [vmem:[#allocation11_spill] sm:$0xff]  ;;  %v1470_v59 = vsel %vm5990_vm8, %v4322_v17, %v1469_v13  ;;  %v1471_v50 = vrot.slane %v1469_v13, 4  ;;  %v1476_v45 = vrot.slane %v5748_v44, 5  ;;  %v1479_v35 = vrot.slane %v7253_v26, 5  ;;  %v7255_v44 = vld [vmem:[#allocation22_spill] sm:$0xff]  ;;  %v7257_v26 = vld [vmem:[#allocation21_spill] sm:$0xff] }
  0x6b   : > { %4822 = vmatprep.mubr.msk.bf16.mxu1 %vm5463_vm1, %v7238_v28  ;;  %4966 = vmatprep.subr.bf16.mxu0 %v7238_v28  ;;  %v1465_v9 = vrot.slane %v7251_v52, 5  ;;  %v4324_v4 = vrot.slane %v5767_v12, 9  ;;  %v1483_v18 = vrot.slane %v5775_v33, 5  ;;  %v4325_v33 = vrot.slane %v5789_v11, 9 }
  0x6c   : > { %v1473_v61 = vsel %vm5990_vm8, %v1471_v50, %v1472_v20  ;;  %v1477_v62 = vsel %vm5990_vm8, %v4323_v1, %v1476_v45  ;;  %v1478_v52 = vrot.slane %v1476_v45, 4  ;;  %v1490_v13 = vrot.slane %v5797_v24, 5 }
  0x6d   : > { %v1466_v58 = vsel %vm5990_vm8, %v1464_v46, %v1465_v9  ;;  %v6089_v31 = vcombine.low %v1470_v59, %v1473_v61  ;;  %v1486_v9 = vrot.slane %v7254_v34, 5  ;;  %v1484_v17 = vsel %vm5990_vm8, %v4324_v4, %v1483_v18  ;;  %v7258_v4 = vld [vmem:[#allocation23_spill] sm:$0xff] }
  0x6e   : > { %v6083_v0 = vcombine.low %v1463_v37, %v1466_v58  ;;  %v1485_v12 = vrot.slane %v1483_v18, 4  ;;  %v1480_v29 = vsel %vm5990_vm8, %v1478_v52, %v1479_v35  ;;  %v7256_v37 = vld [vmem:[#allocation19_spill] sm:$0xff]  ;;  %v4326_v59 = vrot.slane %v5817_v2, 9 }
  0x6f   : > { %v1493_v46 = vrot.slane %v7256_v37, 5  ;;  %v1497_v50 = vrot.slane %v5822_v23, 5  ;;  %v6111_v55 = vcombine.low %v1477_v62, %v1480_v29  ;;  %v1491_v24 = vsel %vm5990_vm8, %v4325_v33, %v1490_v13 }
  0x70   : > { %v1487_v11 = vsel %vm5990_vm8, %v1485_v12, %v1486_v9  ;;  %v1492_v20 = vrot.slane %v1490_v13, 4  ;;  %v1500_v35 = vrot.slane %v7257_v26, 5  ;;  %v4327_v23 = vrot.slane %v5837_v10, 9  ;;  %v7259_v10 = vld [vmem:[#allocation25_spill] sm:$0xff]  ;;  %v444_v26 = vld [vmem:[%s7180_s3 + $0x4] sm:$0x3] }
  0x71   : > { %4719 = vmatmul.mubr.msk.bf16.gmra.mrb[4].mxu0 %vm886_vm4, %v6028_v22  ;;  %4823 = vmatmul.mubr.msk.bf16.gmra.mrb[40].mxu1 %vm886_vm4, %v7255_v44  ;;  %v6117_v58 = vcombine.low %v1484_v17, %v1487_v11  ;;  %v1498_v1 = vsel %vm5990_vm8, %v4326_v59, %v1497_v50  ;;  %v1499_v45 = vrot.slane %v1497_v50, 4  ;;  %v1504_v61 = vrot.slane %v5845_v8, 5 }
  0x72   : > { %4722 = vmatprep.mubr.msk.bf16.mxu0 %vm886_vm4, %v5936_v54  ;;  %4826 = vmatprep.mubr.msk.bf16.mxu1 %vm5463_vm1, %v7238_v28  ;;  %v1494_v2 = vsel %vm5990_vm8, %v1492_v20, %v1493_v46  ;;  %v1507_v18 = vrot.slane %v7258_v4, 5  ;;  %v4328_v34 = vrot.slane %v5863_v47, 9  ;;  %v1511_v9 = vrot.slane %v5869_v19, 5  ;;  %v7260_v47 = vld [vmem:[#allocation24_spill] sm:$0xff] }
  0x73   : > { %v6127_v62 = vcombine.low %v1491_v24, %v1494_v2  ;;  %v1501_v52 = vsel %vm5990_vm8, %v1499_v45, %v1500_v35  ;;  %v1505_v12 = vsel %vm5990_vm8, %v4327_v23, %v1504_v61  ;;  %v1506_v33 = vrot.slane %v1504_v61, 4  ;;  %v7262_v35 = vld [vmem:[#allocation3_spill] sm:$0xff] }
  0x74   : > { %v6133_v17 = vcombine.low %v1498_v1, %v1501_v52  ;;  %v1514_v13 = vrot.slane %v7259_v10, 5  ;;  %v1512_v8 = vsel %vm5990_vm8, %v4328_v34, %v1511_v9  ;;  %v1513_v29 = vrot.slane %v1511_v9, 4  ;;  %v7261_v1 = vld [vmem:[#allocation26_spill] sm:$0xff]  ;;  %v5436_v61 = vld [vmem:[%s5537_s29] sm:$0xf]  ;;  %v7264_v10 = vld [vmem:[#allocation4_spill] sm:$0xff] }
  0x75   : > { %v4329_v37 = vrot.slane %v5890_v42, 9  ;;  %v1518_v46 = vrot.slane %v5897_v63, 5  ;;  %v1508_v19 = vsel %vm5990_vm8, %v1506_v33, %v1507_v18  ;;  %v1521_v59 = vrot.slane %v5907_v21, 5  ;;  %v7263_v52 = vld [vmem:[#allocation27_spill] sm:$0xff] }
  0x76   : > { %v6153_v42 = vcombine.low %v1505_v12, %v1508_v19  ;;  %v1515_v63 = vsel %vm5990_vm8, %v1513_v29, %v1514_v13  ;;  %v1413_v45 = vrot.slane %v5543_v7, 5  ;;  %v1416_v2 = vrot.slane %v7262_v35, 5  ;;  %v449_v29 = vld [vmem:[%s7180_s3 + $0xe] sm:$0x3] }
  0x77   : > { %v1519_v50 = vsel %vm5990_vm8, %v4329_v37, %v1518_v46  ;;  %v1520_v11 = vrot.slane %v1518_v46, 4  ;;  %v6159_v24 = vcombine.low %v1512_v8, %v1515_v63  ;;  %v2191_v23 = vsel %vm935_vm0, %v444_v26, 0  ;;  %v7265_v8 = vld [vmem:[#allocation28_spill] sm:$0xff]  ;;  %v7267_v63 = vld [vmem:[#allocation6_spill] sm:$0xff] }
  0x78   : > { %v4314_v4 = vrot.slane %v5436_v61, 9  ;;  %v1415_v18 = vrot.slane %v1413_v45, 4  ;;  %v1427_v9 = vrot.slane %v5581_v36, 5  ;;  %v1430_v13 = vrot.slane %v7264_v10, 5 }
  0x79   : > { %4723 = vmatmul.mubr.msk.bf16.gmra.mrb[8].mxu0 %vm886_vm4, %v5940_v27  ;;  %4827 = vmatmul.mubr.msk.bf16.gmra.mrb[44].mxu1 %vm886_vm4, %v7260_v47  ;;  %v1522_v21 = vsel %vm5990_vm8, %v1520_v11, %v1521_v59  ;;  %v6232_v46 = vsel %vm935_vm0, %v449_v29, 0  ;;  %v2623_v19 = vsel %vm935_vm0, %v448_v3, 0  ;;  %v7266_v59 = vld [vmem:[#allocation5_spill] sm:$0xff] }
  0x7a   : > { %4726 = vmatprep.mubr.msk.bf16.mxu0 %vm886_vm4, %v5944_v6  ;;  %4830 = vmatprep.mubr.msk.bf16.mxu1 %vm5463_vm1, %v7238_v28  ;;  %v6163_v20 = vcombine.low %v1519_v50, %v1522_v21  ;;  %v1414_v7 = vsel %vm5990_vm8, %v4314_v4, %v1413_v45  ;;  %v1417_v34 = vsel %vm5990_vm8, %v1415_v18, %v1416_v2  ;;  %v1429_v33 = vrot.slane %v1427_v9, 4  ;;  %v7268_v50 = vld [vmem:[#allocation8_spill] sm:$0xff]  ;;  %v450_v11 = vld [vmem:[%s7180_s3 + $0x10] sm:$0x3] }
  0x7b   : > { %v6210_v12 = vcombine.low %v1414_v7, %v1417_v34  ;;  %v2779_v21 = vsel %vm935_vm0, %v450_v11, 0  ;;  %vm6779_vm0 = vmor %vm3566_vm9, %vm3567_vm13 }
  0x81   : > { %4727 = vmatmul.mubr.msk.bf16.gmra.mrb[12].mxu0 %vm886_vm4, %v5952_v16  ;;  %4831 = vmatmul.mubr.msk.bf16.gmra.mrb[48].mxu1 %vm886_vm4, %v7261_v1 }
  0x82   : > { %4730 = vmatprep.mubr.msk.bf16.mxu0 %vm886_vm4, %v5956_v14  ;;  %4834 = vmatprep.mubr.msk.bf16.mxu1 %vm5463_vm1, %v7238_v28 }
  0x89   : > { %4731 = vmatmul.mubr.msk.bf16.gmra.mrb[16].mxu0 %vm886_vm4, %v5960_v41  ;;  %4835 = vmatmul.mubr.msk.bf16.gmra.mrb[52].mxu1 %vm886_vm4, %v5913_v57 }
  0x8a   : > { %4734 = vmatprep.mubr.msk.bf16.mxu0 %vm886_vm4, %v5964_v53  ;;  %4838 = vmatprep.mubr.msk.bf16.mxu1 %vm5463_vm1, %v7238_v28 }
  0x91   : > { %4735 = vmatmul.mubr.msk.bf16.gmra.mrb[20].mxu0 %vm886_vm4, %v5968_v38  ;;  %4839 = vmatmul.mubr.msk.bf16.gmra.mrb[56].mxu1 %vm886_vm4, %v5929_v56 }
  0x92   : > { %4738 = vmatprep.mubr.msk.bf16.mxu0 %vm886_vm4, %v5972_v43  ;;  %4844 = vmatprep.mubr.msk.bf16.mxu1 %vm5463_vm1, %v7238_v28 }
  0x99   : > { %4739 = vmatmul.mubr.msk.bf16.gmra.mrb[24].mxu0 %vm886_vm4, %v5978_v40  ;;  %4845 = vmatmul.mubr.msk.bf16.vlgmr.msra.gmra.mrb[0].mxu1 %vm886_vm4, %v5927_v60  ;;  %v4316_v60 = vrot.slane %v5571_v30, 9  ;;  %v1431_v30 = vsel %vm5990_vm8, %v1429_v33, %v1430_v13 }
  0x9a   : > { %4742 = vmatprep.mubr.msk.bf16.mxu0 %vm886_vm4, %v7263_v52  ;;  %4905 = vmatpush3.bf16.msra.mxu1 %v2191_v23 }
  0x9b   : > { %4848 = vmatprep.mubr.msk.bf16.mxu1 %vm5463_vm1, %v7238_v28  ;;  %5152 = vmatprep.subr.bf16.mxu1 %v7238_v28  ;;  %v1428_v36 = vsel %vm5990_vm8, %v4316_v60, %v1427_v9 }
  0x9c   : > { %v6229_v37 = vcombine.low %v1428_v36, %v1431_v30 }
  0xa1   : > { %4743 = vmatmul.mubr.msk.bf16.gmra.mrb[28].mxu0 %vm886_vm4, %v7265_v8  ;;  %4849 = vmatmul.mubr.msk.bf16.gmra.mrb[4].mxu1 %vm886_vm4, %v6018_v48 }
  0xa2   : > { %4748 = vmatprep.mubr.msk.bf16.mxu0 %vm886_vm4, %v6210_v12  ;;  %4852 = vmatprep.mubr.msk.bf16.mxu1 %vm5463_vm1, %v7238_v28 }
  0xa9   : > { %4749 = vmatmul.mubr.msk.bf16.vlgmr.msra.gmra.mrb[0].mxu0 %vm886_vm4, %v6008_v32  ;;  %4853 = vmatmul.mubr.msk.bf16.gmra.mrb[8].mxu1 %vm886_vm4, %v6022_v5 }
  0xaa   : > { %4967 = vmatpush3.bf16.msra.mxu0 %v6232_v46  ;;  %4752 = vmatprep.mubr.msk.bf16.mxu0 %vm886_vm4, %v6229_v37 }
  0xab   : > { %4856 = vmatprep.mubr.msk.bf16.mxu1 %vm5463_vm1, %v7238_v28  ;;  %5028 = vmatprep.subr.bf16.mxu0 %v7238_v28 }
  0xb1   : > { %4753 = vmatmul.mubr.msk.bf16.gmra.mrb[4].mxu0 %vm886_vm4, %v6038_v51  ;;  %4857 = vmatmul.mubr.msk.bf16.gmra.mrb[12].mxu1 %vm886_vm4, %v6028_v22 }
  0xb2   : > { %4756 = vmatprep.mubr.msk.bf16.mxu0 %vm886_vm4, %v6048_v39  ;;  %4860 = vmatprep.mubr.msk.bf16.mxu1 %vm5463_vm1, %v7238_v28 }
  0xb9   : > { %4757 = vmatmul.mubr.msk.bf16.gmra.mrb[8].mxu0 %vm886_vm4, %v6067_v15  ;;  %4861 = vmatmul.mubr.msk.bf16.gmra.mrb[16].mxu1 %vm886_vm4, %v5936_v54 }
  0xba   : > { %4760 = vmatprep.mubr.msk.bf16.mxu0 %vm886_vm4, %v6073_v49  ;;  %4864 = vmatprep.mubr.msk.bf16.mxu1 %vm5463_vm1, %v7238_v28 }
  0xc1   : > { %4761 = vmatmul.mubr.msk.bf16.gmra.mrb[12].mxu0 %vm886_vm4, %v6083_v0  ;;  %4865 = vmatmul.mubr.msk.bf16.gmra.mrb[20].mxu1 %vm886_vm4, %v5940_v27 }
  0xc2   : > { %4764 = vmatprep.mubr.msk.bf16.mxu0 %vm886_vm4, %v6089_v31  ;;  %4868 = vmatprep.mubr.msk.bf16.mxu1 %vm5463_vm1, %v7238_v28 }
  0xc9   : > { %4765 = vmatmul.mubr.msk.bf16.gmra.mrb[16].mxu0 %vm886_vm4, %v6111_v55  ;;  %4869 = vmatmul.mubr.msk.bf16.gmra.mrb[24].mxu1 %vm886_vm4, %v5944_v6 }
  0xca   : > { %4768 = vmatprep.mubr.msk.bf16.mxu0 %vm886_vm4, %v6117_v58  ;;  %4872 = vmatprep.mubr.msk.bf16.mxu1 %vm5463_vm1, %v7238_v28 }
  0xd1   : > { %4769 = vmatmul.mubr.msk.bf16.gmra.mrb[20].mxu0 %vm886_vm4, %v6127_v62  ;;  %4873 = vmatmul.mubr.msk.bf16.gmra.mrb[28].mxu1 %vm886_vm4, %v5952_v16 }
  0xd2   : > { %4772 = vmatprep.mubr.msk.bf16.mxu0 %vm886_vm4, %v6133_v17  ;;  %4876 = vmatprep.mubr.msk.bf16.mxu1 %vm5463_vm1, %v7238_v28 }
  0xd9   : > { %4773 = vmatmul.mubr.msk.bf16.gmra.mrb[24].mxu0 %vm886_vm4, %v6153_v42  ;;  %4877 = vmatmul.mubr.msk.bf16.gmra.mrb[32].mxu1 %vm886_vm4, %v5956_v14 }
  0xda   : > { %4776 = vmatprep.mubr.msk.bf16.mxu0 %vm886_vm4, %v6159_v24  ;;  %4880 = vmatprep.mubr.msk.bf16.mxu1 %vm5463_vm1, %v7238_v28 }
  0xe1   : > { %4777 = vmatmul.mubr.msk.bf16.gmra.mrb[28].mxu0 %vm886_vm4, %v6163_v20  ;;  %4881 = vmatmul.mubr.msk.bf16.gmra.mrb[36].mxu1 %vm886_vm4, %v5960_v41 }
  0xe2   : > { %4968 = vmatprep.mubr.msk.bf16.mxu0 %vm5463_vm1, %v7238_v28  ;;  %4884 = vmatprep.mubr.msk.bf16.mxu1 %vm5463_vm1, %v7238_v28 }
  0xe9   : > { %4969 = vmatmul.mubr.msk.bf16.vlgmr.msra.gmra.mrb[32].mxu0 %vm886_vm4, %v7266_v59  ;;  %4885 = vmatmul.mubr.msk.bf16.gmra.mrb[40].mxu1 %vm886_vm4, %v5964_v53 }
  0xea   : > { %5029 = vmatpush3.bf16.msra.mxu0 %v2623_v19  ;;  %4972 = vmatprep.mubr.msk.bf16.mxu0 %vm5463_vm1, %v7238_v28 }
  0xeb   : > { %4888 = vmatprep.mubr.msk.bf16.mxu1 %vm5463_vm1, %v7238_v28  ;;  %5090 = vmatprep.subr.bf16.mxu0 %v7238_v28 }
  0xf1   : > { %4973 = vmatmul.mubr.msk.bf16.gmra.mrb[36].mxu0 %vm886_vm4, %v7267_v63  ;;  %4889 = vmatmul.mubr.msk.bf16.gmra.mrb[44].mxu1 %vm886_vm4, %v5968_v38 }
  0xf2   : > { %4976 = vmatprep.mubr.msk.bf16.mxu0 %vm5463_vm1, %v7238_v28  ;;  %4892 = vmatprep.mubr.msk.bf16.mxu1 %vm5463_vm1, %v7238_v28 }
  0xf9   : > { %4977 = vmatmul.mubr.msk.bf16.gmra.mrb[40].mxu0 %vm886_vm4, %v7268_v50  ;;  %4893 = vmatmul.mubr.msk.bf16.gmra.mrb[48].mxu1 %vm886_vm4, %v5972_v43 }
  0xfa   : > { %5030 = vmatprep.mubr.msk.bf16.mxu0 %vm5463_vm1, %v7238_v28  ;;  %4896 = vmatprep.mubr.msk.bf16.mxu1 %vm5463_vm1, %v7238_v28 }
 0x101   : > { %5031 = vmatmul.mubr.msk.bf16.vlgmr.msra.gmra.mrb[32].mxu0 %vm886_vm4, %v6018_v48  ;;  %4897 = vmatmul.mubr.msk.bf16.gmra.mrb[52].mxu1 %vm886_vm4, %v5978_v40 }
 0x102   : > { %5091 = vmatpush3.bf16.msra.mxu0 %v2779_v21  ;;  %5034 = vmatprep.mubr.msk.bf16.mxu0 %vm5463_vm1, %v7238_v28 }
 0x103   : > { %4900 = vmatprep.mubr.msk.bf16.mxu1 %vm5463_vm1, %v7238_v28 }
 0x109   : > { %5035 = vmatmul.mubr.msk.bf16.gmra.mrb[36].mxu0 %vm886_vm4, %v6022_v5  ;;  %4901 = vmatmul.mubr.msk.bf16.gmra.mrb[56].mxu1 %vm886_vm4, %v7263_v52 }
 0x10a   : > { %5038 = vmatprep.mubr.msk.bf16.mxu0 %vm5463_vm1, %v7238_v28  ;;  %4906 = vmatprep.mubr.msk.bf16.mxu1 %vm5463_vm1, %v7238_v28 }
 0x111   : > { %5039 = vmatmul.mubr.msk.bf16.gmra.mrb[44].mxu0 %vm886_vm4, %v6028_v22  ;;  %4907 = vmatmul.mubr.msk.bf16.vlgmr.msra.gmra.mrb[0].mxu1 %vm886_vm4, %v6210_v12  ;;  %v7270_v22 = vld [vmem:[#allocation12_spill] sm:$0xff] }
 0x112   : > { %5153 = vmatpush3.bf16.msra.mxu1 %v6232_v46  ;;  %5042 = vmatprep.mubr.msk.bf16.mxu0 %vm5463_vm1, %v7238_v28 }
 0x113   : > { %4910 = vmatprep.mubr.msk.bf16.mxu1 %vm5463_vm1, %v7238_v28 }
 0x119   : > { %5043 = vmatmul.mubr.msk.bf16.gmra.mrb[48].mxu0 %vm886_vm4, %v5936_v54  ;;  %4911 = vmatmul.mubr.msk.bf16.gmra.mrb[4].mxu1 %vm886_vm4, %v6008_v32 }
 0x11a   : > { %5046 = vmatprep.mubr.msk.bf16.mxu0 %vm5463_vm1, %v7238_v28  ;;  %4914 = vmatprep.mubr.msk.bf16.mxu1 %vm5463_vm1, %v7238_v28 }
 0x121   : > { %5047 = vmatmul.mubr.msk.bf16.gmra.mrb[52].mxu0 %vm886_vm4, %v5940_v27  ;;  %4915 = vmatmul.mubr.msk.bf16.gmra.mrb[8].mxu1 %vm886_vm4, %v6229_v37 }
 0x122   : > { %5050 = vmatprep.mubr.msk.bf16.mxu0 %vm5463_vm1, %v7238_v28  ;;  %4918 = vmatprep.mubr.msk.bf16.mxu1 %vm5463_vm1, %v7238_v28 }
 0x129   : > { %5051 = vmatmul.mubr.msk.bf16.gmra.mrb[56].mxu0 %vm886_vm4, %v5944_v6  ;;  %4919 = vmatmul.mubr.msk.bf16.gmra.mrb[12].mxu1 %vm886_vm4, %v6038_v51 }
 0x12a   : > { %5054 = vmatprep.mubr.msk.bf16.mxu0 %vm5463_vm1, %v7238_v28  ;;  %4922 = vmatprep.mubr.msk.bf16.mxu1 %vm5463_vm1, %v7238_v28 }
 0x131   : > { %5055 = vmatmul.mubr.msk.bf16.gmra.mrb[60].mxu0 %vm886_vm4, %v5952_v16  ;;  %4923 = vmatmul.mubr.msk.bf16.gmra.mrb[16].mxu1 %vm886_vm4, %v6048_v39 }
 0x132   : > { %5058 = vmatprep.mubr.msk.bf16.mxu0 %vm5463_vm1, %v7238_v28  ;;  %4926 = vmatprep.mubr.msk.bf16.mxu1 %vm5463_vm1, %v7238_v28 }
 0x139   : > { %5059 = vmatmul.mubr.msk.bf16.gmra.mrb[64].mxu0 %vm886_vm4, %v5956_v14  ;;  %4927 = vmatmul.mubr.msk.bf16.gmra.mrb[20].mxu1 %vm886_vm4, %v6067_v15 }
 0x13a   : > { %5062 = vmatprep.mubr.msk.bf16.mxu0 %vm5463_vm1, %v7238_v28  ;;  %4930 = vmatprep.mubr.msk.bf16.mxu1 %vm5463_vm1, %v7238_v28 }
 0x141   : > { %5063 = vmatmul.mubr.msk.bf16.gmra.mrb[68].mxu0 %vm886_vm4, %v5960_v41  ;;  %4931 = vmatmul.mubr.msk.bf16.gmra.mrb[24].mxu1 %vm886_vm4, %v6073_v49 }
 0x142   : > { %5066 = vmatprep.mubr.msk.bf16.mxu0 %vm5463_vm1, %v7238_v28  ;;  %4934 = vmatprep.mubr.msk.bf16.mxu1 %vm5463_vm1, %v7238_v28 }
 0x149   : > { %5067 = vmatmul.mubr.msk.bf16.gmra.mrb[72].mxu0 %vm886_vm4, %v5964_v53  ;;  %4935 = vmatmul.mubr.msk.bf16.gmra.mrb[28].mxu1 %vm886_vm4, %v6083_v0 }
 0x14a   : > { %5070 = vmatprep.mubr.msk.bf16.mxu0 %vm5463_vm1, %v7238_v28  ;;  %4938 = vmatprep.mubr.msk.bf16.mxu1 %vm5463_vm1, %v7238_v28 }
 0x151   : > { %5071 = vmatmul.mubr.msk.bf16.gmra.mrb[76].mxu0 %vm886_vm4, %v5968_v38  ;;  %4939 = vmatmul.mubr.msk.bf16.gmra.mrb[32].mxu1 %vm886_vm4, %v6089_v31 }
 0x152   : > { %5074 = vmatprep.mubr.msk.bf16.mxu0 %vm5463_vm1, %v7238_v28  ;;  %4942 = vmatprep.mubr.msk.bf16.mxu1 %vm5463_vm1, %v7238_v28 }
 0x159   : > { %5075 = vmatmul.mubr.msk.bf16.gmra.mrb[80].mxu0 %vm886_vm4, %v5972_v43  ;;  %4943 = vmatmul.mubr.msk.bf16.gmra.mrb[36].mxu1 %vm886_vm4, %v6111_v55  ;;  %v7269_v43 = vld [vmem:[#allocation10_spill] sm:$0xff] }
 0x15a   : > { %5078 = vmatprep.mubr.msk.bf16.mxu0 %vm5463_vm1, %v7238_v28  ;;  %4946 = vmatprep.mubr.msk.bf16.mxu1 %vm5463_vm1, %v7238_v28 }
 0x161   : > { %5079 = vmatmul.mubr.msk.bf16.gmra.mrb[84].mxu0 %vm886_vm4, %v5978_v40  ;;  %4947 = vmatmul.mubr.msk.bf16.gmra.mrb[40].mxu1 %vm886_vm4, %v6117_v58 }
 0x162   : > { %5082 = vmatprep.mubr.msk.bf16.mxu0 %vm5463_vm1, %v7238_v28  ;;  %4950 = vmatprep.mubr.msk.bf16.mxu1 %vm5463_vm1, %v7238_v28 }
 0x169   : > { %5083 = vmatmul.mubr.msk.bf16.gmra.mrb[88].mxu0 %vm886_vm4, %v7263_v52  ;;  %4951 = vmatmul.mubr.msk.bf16.gmra.mrb[44].mxu1 %vm886_vm4, %v6127_v62 }
 0x16a   : > { %5086 = vmatprep.mubr.msk.bf16.mxu0 %vm5463_vm1, %v7238_v28  ;;  %4954 = vmatprep.mubr.msk.bf16.mxu1 %vm5463_vm1, %v7238_v28 }
 0x171   : > { %5087 = vmatmul.mubr.msk.bf16.gmra.mrb[92].mxu0 %vm886_vm4, %v7265_v8  ;;  %4955 = vmatmul.mubr.msk.bf16.gmra.mrb[48].mxu1 %vm886_vm4, %v6133_v17 }
 0x172   : > { %5092 = vmatprep.mubr.msk.bf16.mxu0 %vm5463_vm1, %v7238_v28  ;;  %4958 = vmatprep.mubr.msk.bf16.mxu1 %vm5463_vm1, %v7238_v28 }
 0x179   : > { %5093 = vmatmul.mubr.msk.bf16.vlgmr.msra.gmra.mrb[32].mxu0 %vm886_vm4, %v6008_v32  ;;  %4959 = vmatmul.mubr.msk.bf16.gmra.mrb[52].mxu1 %vm886_vm4, %v6153_v42 }
 0x17a   : > { %5096 = vmatprep.mubr.msk.bf16.mxu0 %vm5463_vm1, %v7238_v28  ;;  %4962 = vmatprep.mubr.msk.bf16.mxu1 %vm5463_vm1, %v7238_v28 }
 0x17c   : > { %v6462_v54 = vpop.f32.mrb[0].mxu0 }
 0x17d   : > { %v6464_v27 = vpop.f32.mrb[1].mxu0 }
 0x17e   : > { %v6466_v6 = vpop.f32.mrb[2].mxu0 }
 0x17f   : > { %v6468_v16 = vpop.f32.mrb[3].mxu0 }
 0x181   : > { %5097 = vmatmul.mubr.msk.bf16.gmra.mrb[36].mxu0 %vm886_vm4, %v6229_v37  ;;  %4963 = vmatmul.mubr.msk.bf16.gmra.mrb[56].mxu1 %vm886_vm4, %v6159_v24 }
 0x182   : > { %5100 = vmatprep.mubr.msk.bf16.mxu0 %vm5463_vm1, %v7238_v28  ;;  %4980 = vmatprep.mubr.msk.bf16.mxu1 %vm5463_vm1, %v7238_v28 }
 0x184   : > { %v6478_v14 = vpop.f32.mrb[4].mxu0 }
 0x185   : > { %v6480_v41 = vpop.f32.mrb[5].mxu0 }
 0x186   : > { %v6482_v53 = vpop.f32.mrb[6].mxu0 }
 0x187   : > { %v6484_v38 = vpop.f32.mrb[7].mxu0 }
 0x189   : > { %5101 = vmatmul.mubr.msk.bf16.gmra.mrb[96].mxu0 %vm886_vm4, %v6038_v51  ;;  %4981 = vmatmul.mubr.msk.bf16.vlgmr.msra.gmra.mrb[60].mxu1 %vm886_vm4, %v7269_v43 }
 0x18a   : > { %5104 = vmatprep.mubr.msk.bf16.mxu0 %vm5463_vm1, %v7238_v28  ;;  %4984 = vmatprep.mubr.msk.bf16.mxu1 %vm5463_vm1, %v7238_v28 }
 0x18c   : > { %v6494_v40 = vpop.f32.mrb[8].mxu0 }
 0x18d   : > { %v6496_v48 = vpop.f32.mrb[9].mxu0 }
 0x18e   : > { %v6498_v32 = vpop.f32.mrb[10].mxu0 }
 0x18f   : > { %v6500_v5 = vpop.f32.mrb[11].mxu0 }
 0x191   : > { %5105 = vmatmul.mubr.msk.bf16.gmra.mrb[48].mxu0 %vm886_vm4, %v6048_v39  ;;  %4985 = vmatmul.mubr.msk.bf16.gmra.mrb[64].mxu1 %vm886_vm4, %v7270_v22  ;;  %v7271_v39 = vld [vmem:[#allocation14_spill] sm:$0xff] }
 0x192   : > { %5108 = vmatprep.mubr.msk.bf16.mxu0 %vm5463_vm1, %v7238_v28  ;;  %4988 = vmatprep.mubr.msk.bf16.mxu1 %vm5463_vm1, %v7238_v28 }
 0x194   : > { %v6510_v51 = vpop.f32.mrb[12].mxu0 }
 0x195   : > { %v6512_v45 = vpop.f32.mrb[13].mxu0 }
 0x196   : > { %v6514_v26 = vpop.f32.mrb[14].mxu0 }
 0x197   : > { %v6516_v35 = vpop.f32.mrb[15].mxu0 }
 0x199   : > { %5109 = vmatmul.mubr.msk.bf16.gmra.mrb[100].mxu0 %vm886_vm4, %v6067_v15  ;;  %4989 = vmatmul.mubr.msk.bf16.gmra.mrb[68].mxu1 %vm886_vm4, %v7271_v39  ;;  %v7272_v15 = vld [vmem:[#allocation16_spill] sm:$0xff] }
 0x19a   : > { %5112 = vmatprep.mubr.msk.bf16.mxu0 %vm5463_vm1, %v7238_v28  ;;  %4992 = vmatprep.mubr.msk.bf16.mxu1 %vm5463_vm1, %v7238_v28 }
 0x19c   : > { %v6526_v2 = vpop.f32.mrb[16].mxu0 }
 0x19d   : > { %v6528_v23 = vpop.f32.mrb[17].mxu0 }
 0x19e   : > { %v6530_v61 = vpop.f32.mrb[18].mxu0 }
 0x19f   : > { %v6532_v4 = vpop.f32.mrb[19].mxu0 }
 0x1a1   : > { %5113 = vmatmul.mubr.msk.bf16.gmra.mrb[56].mxu0 %vm886_vm4, %v6073_v49  ;;  %4993 = vmatmul.mubr.msk.bf16.gmra.mrb[72].mxu1 %vm886_vm4, %v7272_v15  ;;  %v7273_v49 = vld [vmem:[#allocation18_spill] sm:$0xff] }
 0x1a2   : > { %5116 = vmatprep.mubr.msk.bf16.mxu0 %vm5463_vm1, %v7238_v28  ;;  %4996 = vmatprep.mubr.msk.bf16.mxu1 %vm5463_vm1, %v7238_v28 }
 0x1a4   : > { %v6542_v18 = vpop.f32.mrb[20].mxu0 }
 0x1a5   : > { %v6544_v52 = vpop.f32.mrb[21].mxu0 }
 0x1a6   : > { %v6546_v7 = vpop.f32.mrb[22].mxu0 }
 0x1a7   : > { %v6548_v34 = vpop.f32.mrb[23].mxu0 }
 0x1a9   : > { %5117 = vmatmul.mubr.msk.bf16.gmra.mrb[104].mxu0 %vm886_vm4, %v6083_v0  ;;  %4997 = vmatmul.mubr.msk.bf16.gmra.mrb[76].mxu1 %vm886_vm4, %v7273_v49 }
 0x1aa   : > { %5120 = vmatprep.mubr.msk.bf16.mxu0 %vm5463_vm1, %v7238_v28  ;;  %5000 = vmatprep.mubr.msk.bf16.mxu1 %vm5463_vm1, %v7238_v28 }
 0x1ac   : > { %v6558_v9 = vpop.f32.mrb[24].mxu0 }
 0x1ad   : > { %v6560_v12 = vpop.f32.mrb[25].mxu0 }
 0x1ae   : > { %v6562_v60 = vpop.f32.mrb[26].mxu0 }
 0x1af   : > { %v6564_v33 = vpop.f32.mrb[27].mxu0 }
 0x1b1   : > { %5121 = vmatmul.mubr.msk.bf16.gmra.mrb[64].mxu0 %vm886_vm4, %v6089_v31  ;;  %5001 = vmatmul.mubr.msk.bf16.gmra.mrb[80].mxu1 %vm886_vm4, %v7249_v25 }
 0x1b2   : > { %5124 = vmatprep.mubr.msk.bf16.mxu0 %vm5463_vm1, %v7238_v28  ;;  %5004 = vmatprep.mubr.msk.bf16.mxu1 %vm5463_vm1, %v7238_v28 }
 0x1b4   : > { %v6574_v0 = vpop.f32.mrb[28].mxu0 }
 0x1b5   : > { %v6576_v10 = vpop.f32.mrb[29].mxu0 }
 0x1b6   : > { %v6578_v13 = vpop.f32.mrb[30].mxu0 }
 0x1b7   : > { %v6580_v8 = vpop.f32.mrb[31].mxu0 }
 0x1b9   : > { %5125 = vmatmul.mubr.msk.bf16.gmra.mrb[108].mxu0 %vm886_vm4, %v6111_v55  ;;  %5005 = vmatmul.mubr.msk.bf16.gmra.mrb[84].mxu1 %vm886_vm4, %v7255_v44 }
 0x1ba   : > { %5128 = vmatprep.mubr.msk.bf16.mxu0 %vm5463_vm1, %v7238_v28  ;;  %5008 = vmatprep.mubr.msk.bf16.mxu1 %vm5463_vm1, %v7238_v28 }
 0x1c1   : > { %5129 = vmatmul.mubr.msk.bf16.gmra.mrb[72].mxu0 %vm886_vm4, %v6117_v58  ;;  %5009 = vmatmul.mubr.msk.bf16.gmra.mrb[88].mxu1 %vm886_vm4, %v7260_v47 }
 0x1c2   : > { %5132 = vmatprep.mubr.msk.bf16.mxu0 %vm5463_vm1, %v7238_v28  ;;  %5012 = vmatprep.mubr.msk.bf16.mxu1 %vm5463_vm1, %v7238_v28 }
 0x1c9   : > { %5133 = vmatmul.mubr.msk.bf16.gmra.mrb[112].mxu0 %vm886_vm4, %v6127_v62  ;;  %5013 = vmatmul.mubr.msk.bf16.gmra.mrb[92].mxu1 %vm886_vm4, %v7261_v1 }
 0x1ca   : > { %5136 = vmatprep.mubr.msk.bf16.mxu0 %vm5463_vm1, %v7238_v28  ;;  %5016 = vmatprep.mubr.msk.bf16.mxu1 %vm5463_vm1, %v7238_v28 }
 0x1cc   : > { %v2519_v25 = vpop.f32.mrb[40].mxu0 }
 0x1cd   : > { %v4978_v31 = vpop.f32.mrb[41].mxu0 }
 0x1ce   : > { %v2522_v44 = vpop.f32.mrb[42].mxu0 }
 0x1cf   : > { %v4979_v55 = vpop.f32.mrb[43].mxu0 }
 0x1d1   : > { %5137 = vmatmul.mubr.msk.bf16.gmra.mrb[80].mxu0 %vm886_vm4, %v6133_v17  ;;  %5017 = vmatmul.mubr.msk.bf16.gmra.mrb[96].mxu1 %vm886_vm4, %v5913_v57  ;;  %v7274_v57 = vld [vmem:[#allocation29_spill] sm:$0xff] }
 0x1d2   : > { %5140 = vmatprep.mubr.msk.bf16.mxu0 %vm5463_vm1, %v7238_v28  ;;  %5020 = vmatprep.mubr.msk.bf16.mxu1 %vm5463_vm1, %v7238_v28 }
 0x1d9   : > { %5141 = vmatmul.mubr.msk.bf16.gmra.mrb[116].mxu0 %vm886_vm4, %v6153_v42  ;;  %5021 = vmatmul.mubr.msk.bf16.gmra.mrb[100].mxu1 %vm886_vm4, %v5929_v56 }
 0x1da   : > { %5144 = vmatprep.mubr.msk.bf16.mxu0 %vm5463_vm1, %v7238_v28  ;;  %5024 = vmatprep.mubr.msk.bf16.mxu1 %vm5463_vm1, %v7238_v28 }
 0x1e1   : > { %5145 = vmatmul.mubr.msk.bf16.gmra.mrb[88].mxu0 %vm886_vm4, %v6159_v24  ;;  %5025 = vmatmul.mubr.msk.bf16.gmra.mrb[104].mxu1 %vm886_vm4, %v7274_v57 }
 0x1e2   : > { %5148 = vmatprep.mubr.msk.bf16.mxu0 %vm5463_vm1, %v7238_v28  ;;  %vm6806_vm1 = vmand %vm3896_vm12, %vm3890_vm11 }
 0x1e4   : > { %v2675_v58 = vpop.f32.mrb[44].mxu0  ;;  %v2227_v62 = vpop.f32.mrb[0].mxu1 }
 0x1e5   : > { %v6628_v17 = vadd.f32 %v2675_v58, %v2519_v25  ;;  %v5040_v56 = vpop.f32.mrb[45].mxu0  ;;  %v6631_v47 = vadd.f32 %v6462_v54, %v2227_v62  ;;  %v4908_v42 = vpop.f32.mrb[1].mxu1 }
 0x1e6   : > { %v2678_v1 = vpop.f32.mrb[46].mxu0  ;;  %v2230_v36 = vpop.f32.mrb[2].mxu1 }
 0x1e7   : > { %v6633_v30 = vadd.f32 %v2678_v1, %v2522_v44  ;;  %v5041_v24 = vpop.f32.mrb[47].mxu0  ;;  %v6636_v29 = vadd.f32 %v6466_v6, %v2230_v36  ;;  %v4909_v37 = vpop.f32.mrb[3].mxu1 }
 0x1e9   : > { %5149 = vmatmul.mubr.msk.bf16.gmra.mrb[120].mxu0 %vm886_vm4, %v6163_v20 }
 0x1ec   : > { %v2235_v28 = vpop.f32.mrb[4].mxu1 }
 0x1ed   : > { %v6641_v46 = vadd.f32 %v2235_v28, %v6480_v41  ;;  %v4912_v3 = vpop.f32.mrb[5].mxu1 }
 0x1ee   : > { %v2238_v19 = vpop.f32.mrb[6].mxu1 }
 0x1ef   : > { %v6644_v59 = vadd.f32 %v2238_v19, %v6484_v38  ;;  %v4913_v63 = vpop.f32.mrb[7].mxu1 }
 0x1f4   : > { %v6646_v50 = vpop.f32.mrb[52].mxu0  ;;  %v2243_v11 = vpop.f32.mrb[8].mxu1 }
 0x1f5   : > { %v5048_v21 = vpop.f32.mrb[53].mxu0  ;;  %v6649_v54 = vadd.f32 %v6478_v14, %v2243_v11  ;;  %v4916_v6 = vpop.f32.mrb[9].mxu1 }
 0x1f6   : > { %v6651_v43 = vpop.f32.mrb[54].mxu0  ;;  %v2246_v20 = vpop.f32.mrb[10].mxu1 }
 0x1f7   : > { %v5049_v22 = vpop.f32.mrb[55].mxu0  ;;  %v6654_v41 = vadd.f32 %v6482_v53, %v2246_v20  ;;  %v4917_v39 = vpop.f32.mrb[11].mxu1 }
 0x1fc   : > { %v2251_v15 = vpop.f32.mrb[12].mxu1 }
 0x1fd   : > { %v6657_v38 = vadd.f32 %v2251_v15, %v6496_v48  ;;  %v4920_v49 = vpop.f32.mrb[13].mxu1 }
 0x1fe   : > { %v2254_v25 = vpop.f32.mrb[14].mxu1 }
 0x1ff   : > { %v6660_v31 = vadd.f32 %v2254_v25, %v6500_v5  ;;  %v4921_v14 = vpop.f32.mrb[15].mxu1 }
 0x204   : > { %v6662_v44 = vpop.f32.mrb[60].mxu0  ;;  %v2259_v55 = vpop.f32.mrb[16].mxu1 }
 0x205   : > { %v5056_v57 = vpop.f32.mrb[61].mxu0  ;;  %v6665_v58 = vadd.f32 %v6494_v40, %v2259_v55  ;;  %v4924_v53 = vpop.f32.mrb[17].mxu1 }
 0x206   : > { %v6667_v62 = vpop.f32.mrb[62].mxu0  ;;  %v2262_v56 = vpop.f32.mrb[18].mxu1 }
 0x207   : > { %v5057_v42 = vpop.f32.mrb[63].mxu0  ;;  %v6670_v48 = vadd.f32 %v6498_v32, %v2262_v56  ;;  %v4925_v1 = vpop.f32.mrb[19].mxu1 }
 0x20c   : > { %v2267_v36 = vpop.f32.mrb[20].mxu1 }
 0x20d   : > { %v6673_v5 = vadd.f32 %v2267_v36, %v6512_v45  ;;  %v4928_v24 = vpop.f32.mrb[21].mxu1 }
 0x20e   : > { %v2270_v37 = vpop.f32.mrb[22].mxu1 }
 0x20f   : > { %v6676_v28 = vadd.f32 %v2270_v37, %v6516_v35  ;;  %v4929_v40 = vpop.f32.mrb[23].mxu1 }
 0x214   : > { %v6678_v3 = vpop.f32.mrb[68].mxu0  ;;  %v2275_v19 = vpop.f32.mrb[24].mxu1 }
 0x215   : > { %v5064_v63 = vpop.f32.mrb[69].mxu0  ;;  %v6681_v11 = vadd.f32 %v6510_v51, %v2275_v19  ;;  %v4932_v32 = vpop.f32.mrb[25].mxu1 }
 0x216   : > { %v6683_v21 = vpop.f32.mrb[70].mxu0  ;;  %v2278_v6 = vpop.f32.mrb[26].mxu1 }
 0x217   : > { %v5065_v20 = vpop.f32.mrb[71].mxu0  ;;  %v6686_v45 = vadd.f32 %v6514_v26, %v2278_v6  ;;  %v4933_v22 = vpop.f32.mrb[27].mxu1 }
 0x21c   : > { %v2283_v39 = vpop.f32.mrb[28].mxu1 }
 0x21d   : > { %v6689_v35 = vadd.f32 %v2283_v39, %v6528_v23  ;;  %v4936_v15 = vpop.f32.mrb[29].mxu1 }
 0x21e   : > { %v2286_v49 = vpop.f32.mrb[30].mxu1 }
 0x21f   : > { %v6692_v25 = vadd.f32 %v2286_v49, %v6532_v4  ;;  %v4937_v51 = vpop.f32.mrb[31].mxu1 }
 0x224   : > { %v6694_v14 = vpop.f32.mrb[76].mxu0  ;;  %v2291_v55 = vpop.f32.mrb[32].mxu1 }
 0x225   : > { %v5072_v57 = vpop.f32.mrb[77].mxu0  ;;  %v6697_v53 = vadd.f32 %v6526_v2, %v2291_v55  ;;  %v4940_v26 = vpop.f32.mrb[33].mxu1 }
 0x226   : > { %v6699_v56 = vpop.f32.mrb[78].mxu0  ;;  %v2294_v42 = vpop.f32.mrb[34].mxu1 }
 0x227   : > { %v5073_v1 = vpop.f32.mrb[79].mxu0  ;;  %v6702_v23 = vadd.f32 %v6530_v61, %v2294_v42  ;;  %v4941_v36 = vpop.f32.mrb[35].mxu1 }
 0x22c   : > { %v2299_v24 = vpop.f32.mrb[36].mxu1 }
 0x22d   : > { %v6705_v4 = vadd.f32 %v2299_v24, %v6544_v52  ;;  %v4944_v37 = vpop.f32.mrb[37].mxu1 }
 0x22e   : > { %v2302_v40 = vpop.f32.mrb[38].mxu1 }
 0x22f   : > { %v6708_v19 = vadd.f32 %v2302_v40, %v6548_v34  ;;  %v4945_v2 = vpop.f32.mrb[39].mxu1 }
 0x234   : > { %v6710_v63 = vpop.f32.mrb[84].mxu0  ;;  %v2307_v32 = vpop.f32.mrb[40].mxu1 }
 0x235   : > { %v5080_v6 = vpop.f32.mrb[85].mxu0  ;;  %v6713_v20 = vadd.f32 %v6542_v18, %v2307_v32  ;;  %v4948_v61 = vpop.f32.mrb[41].mxu1 }
 0x236   : > { %v6715_v22 = vpop.f32.mrb[86].mxu0  ;;  %v2310_v39 = vpop.f32.mrb[42].mxu1 }
 0x237   : > { %v5081_v15 = vpop.f32.mrb[87].mxu0  ;;  %v6718_v52 = vadd.f32 %v6546_v7, %v2310_v39  ;;  %v4949_v49 = vpop.f32.mrb[43].mxu1 }
 0x23c   : > { %v2315_v51 = vpop.f32.mrb[44].mxu1 }
 0x23d   : > { %v6721_v34 = vadd.f32 %v2315_v51, %v6560_v12  ;;  %v4952_v55 = vpop.f32.mrb[45].mxu1 }
 0x23e   : > { %v2318_v57 = vpop.f32.mrb[46].mxu1 }
 0x23f   : > { %v6724_v26 = vadd.f32 %v2318_v57, %v6564_v33  ;;  %v4953_v18 = vpop.f32.mrb[47].mxu1  ;;  %v6739_v33 = vld [vmem:[%s7181_s4] ss:$0 sm:$0xff] }
 0x244   : > { %v6726_v42 = vpop.f32.mrb[92].mxu0  ;;  %v2323_v1 = vpop.f32.mrb[48].mxu1 }
 0x245   : > { %v5088_v36 = vpop.f32.mrb[93].mxu0  ;;  %v6729_v24 = vadd.f32 %v6558_v9, %v2323_v1  ;;  %v4956_v7 = vpop.f32.mrb[49].mxu1 }
 0x246   : > { %v6731_v37 = vpop.f32.mrb[94].mxu0  ;;  %v2326_v40 = vpop.f32.mrb[50].mxu1 }
 0x247   : > { %7275 = vst [vmem:[#allocation7_spill] sm:$0xff] %v6729_v24  ;;  %7276 = vst [vmem:[#allocation20_spill] sm:$0xff] %v6731_v37  ;;  %v5089_v2 = vpop.f32.mrb[95].mxu0  ;;  %v6734_v12 = vadd.f32 %v6562_v60, %v2326_v40  ;;  %v4957_v32 = vpop.f32.mrb[51].mxu1  ;;  %v3999_v37 = vld [vmem:[%s6756_s23 + $0xb4] sm:$0xf] }
 0x249   : > { %7277 = vst [vmem:[#allocation9_spill] sm:$0xff] %v6734_v12 }
 0x24c   : > { %v2815_v6 = vpop.f32.mrb[32].mxu0  ;;  %v2331_v61 = vpop.f32.mrb[52].mxu1 }
 0x24d   : > { %v2964_v39 = vadd.f32 %v2815_v6, %v6464_v27  ;;  %v5094_v9 = vpop.f32.mrb[33].mxu0  ;;  %v6743_v15 = vadd.f32 %v2331_v61, %v6576_v10  ;;  %v4960_v49 = vpop.f32.mrb[53].mxu1 }
 0x24e   : > { %v2818_v51 = vpop.f32.mrb[34].mxu0  ;;  %v2334_v55 = vpop.f32.mrb[54].mxu1 }
 0x24f   : > { %7278 = vst [vmem:[#allocation11_spill] sm:$0xff] %v6743_v15  ;;  %v3406_v60 = vadd.f32 %v6739_v33, %v2964_v39  ;;  %v2965_v57 = vadd.f32 %v2818_v51, %v6468_v16  ;;  %v5095_v18 = vpop.f32.mrb[35].mxu0  ;;  %v6748_v1 = vadd.f32 %v2334_v55, %v6580_v8  ;;  %v4961_v36 = vpop.f32.mrb[55].mxu1 }
 0x251   : > { %7279 = vst [vmem:[#allocation13_spill] sm:$0xff] %v6748_v1  ;;  %v3438_v7 = vmax.f32 %v3406_v60, 0.0  ;;  %v3407_v27 = vadd.f32 %v6739_v33, %v2965_v57 }
 0x253   : > { %v4499_v40 = vpack.c.bf16 %v3438_v7, %v3438_v7  ;;  %v3439_v2 = vmax.f32 %v3407_v27, 0.0  ;;  %v3892_v27 = vld [vmem:[%s6756_s23] sm:$0xf] }
 0x254   : > { %v2823_v10 = vpop.f32.mrb[36].mxu0  ;;  %v2339_v32 = vpop.f32.mrb[56].mxu1 }
 0x255   : > { %v3570_v16 = vshrl.u32 %v4499_v40, 16  ;;  %v4500_v8 = vpack.c.bf16 %v3439_v2, %v3439_v2  ;;  %v2966_v6 = vadd.f32 %v2823_v10, %v6631_v47  ;;  %v5098_v61 = vpop.f32.mrb[37].mxu0  ;;  %v4964_v39 = vpop.f32.mrb[57].mxu1  ;;  %v2404_v49 = vadd.f32 %v6574_v0, %v2339_v32 }
 0x256   : > { %v2826_v9 = vpop.f32.mrb[38].mxu0  ;;  %v2342_v51 = vpop.f32.mrb[58].mxu1  ;;  %v3573_v60 = vshll.u32 %v4499_v40, 16 }
 0x257   : > { %v3572_v55 = vrot.slane %v3570_v16, 7  ;;  %v3578_v57 = vshrl.u32 %v4500_v8, 16  ;;  %v3408_v18 = vadd.f32 %v6739_v33, %v2966_v6  ;;  %v5099_v36 = vpop.f32.mrb[39].mxu0  ;;  %v4965_v7 = vpop.f32.mrb[59].mxu1  ;;  %v2967_v2 = vadd.f32 %v2826_v9, %v6636_v29  ;;  %v3898_v9 = vld [vmem:[%s6756_s23 + $0x8] sm:$0x1] }
 0x258   : > { %v3436_v0 = vadd.f32 %v6739_v33, %v2404_v49  ;;  %v2405_v10 = vadd.f32 %v6578_v13, %v2342_v51  ;;  %v3581_v6 = vshll.u32 %v4500_v8, 16 }
 0x259   : > { %v3575_v40 = vor.u32 %v3573_v60, %v3572_v55  ;;  %v3580_v16 = vrot.slane %v3578_v57, 7  ;;  %v3440_v61 = vmax.f32 %v3408_v18, 0.0  ;;  %v3576_v39 = vrot.slane %v3572_v55, 4 }
 0x25a   : > { %v3409_v13 = vadd.f32 %v6739_v33, %v2967_v2  ;;  %v3468_v49 = vmax.f32 %v3436_v0, 0.0  ;;  %v3437_v51 = vadd.f32 %v6739_v33, %v2405_v10 }
 0x25b   : > { %v3893_v60 = vsel %vm6763_vm14, %v3575_v40, %v3892_v27  ;;  %v3583_v8 = vor.u32 %v3581_v6, %v3580_v16  ;;  %v3585_v57 = vrot.slane %v3580_v16, 4  ;;  %v4501_v55 = vpack.c.bf16 %v3440_v61, %v3440_v61 }
 0x25c   : > { %3894 = vst [vmem:[%s6756_s23] sm:$0xf] %v3893_v60  ;;  %v3441_v18 = vmax.f32 %v3409_v13, 0.0  ;;  %v4529_v36 = vpack.c.bf16 %v3468_v49, %v3468_v49  ;;  %v2831_v7 = vpop.f32.mrb[96].mxu0  ;;  %v3469_v1 = vmax.f32 %v3437_v51, 0.0  ;;  %v2527_v15 = vpop.f32.mrb[60].mxu1 }
 0x25d   : > { %v3584_v2 = vsel %vm6779_vm0, %v3576_v39, %v3583_v8  ;;  %v3899_v0 = vsel %vm6773_vm15, %v3585_v57, %v3898_v9  ;;  %v3587_v10 = vshrl.u32 %v4501_v55, 16  ;;  %v5102_v12 = vpop.f32.mrb[97].mxu0  ;;  %v4982_v27 = vpop.f32.mrb[61].mxu1  ;;  %v2938_v6 = vadd.f32 %v2831_v7, %v6628_v17 }
 0x25e   : > { %3895 = vst [vmem:[%s6756_s23 + $0x4] sm:$0xf] %v3584_v2  ;;  %3900 = vst [vmem:[%s6756_s23 + $0x8] sm:$0x1] %v3899_v0  ;;  %v4502_v40 = vpack.c.bf16 %v3441_v18, %v3441_v18  ;;  %v3825_v16 = vshrl.u32 %v4529_v36, 16  ;;  %v2834_v61 = vpop.f32.mrb[98].mxu0  ;;  %v4530_v39 = vpack.c.bf16 %v3469_v1, %v3469_v1 }
 0x25f   : > { %v6796_v13 = vpop.f32.mrb[62].mxu1  ;;  %v3589_v49 = vrot.slane %v3587_v10, 7  ;;  %v3590_v51 = vshll.u32 %v4501_v55, 16  ;;  %v2939_v60 = vadd.f32 %v2834_v61, %v6633_v30  ;;  %v5103_v9 = vpop.f32.mrb[99].mxu0  ;;  %v3901_v12 = vld [vmem:[%s6756_s23 + $0xc] sm:$0xf]  ;;  %v2968_v0 = vadd.f32 %v2938_v6, %v6641_v46 }
 0x260   : > { %v4983_v8 = vpop.f32.mrb[63].mxu1  ;;  %v3595_v57 = vshrl.u32 %v4502_v40, 16  ;;  %v3827_v2 = vrot.slane %v3825_v16, 7  ;;  %v3828_v18 = vshll.u32 %v4529_v36, 16  ;;  %v3598_v27 = vshll.u32 %v4502_v40, 16 }
 0x261   : > { %v3592_v17 = vor.u32 %v3590_v51, %v3589_v49  ;;  %v3593_v7 = vrot.slane %v3589_v49, 4  ;;  %v3833_v10 = vshrl.u32 %v4530_v39, 16  ;;  %v3410_v30 = vadd.f32 %v6739_v33, %v2968_v0  ;;  %v3905_v40 = vld [vmem:[%s6756_s23 + $0x14] sm:$0x1] }
 0x262   : > { %v3597_v55 = vrot.slane %v3595_v57, 7  ;;  %v3830_v1 = vor.u32 %v3828_v18, %v3827_v2  ;;  %v3836_v61 = vshll.u32 %v4530_v39, 16  ;;  %v3831_v16 = vrot.slane %v3827_v2, 4  ;;  %v4003_v18 = vld [vmem:[%s6756_s23 + $0xbc] sm:$0x1] }
 0x263   : > { %v4006_v9 = vld [vmem:[%s6756_s23] sm:$0x1]  ;;  %v3902_v46 = vsel %vm6763_vm14, %v3592_v17, %v3901_v12  ;;  %v3835_v6 = vrot.slane %v3833_v10, 7  ;;  %v2969_v49 = vadd.f32 %v2939_v60, %v6644_v59  ;;  %v3442_v2 = vmax.f32 %v3410_v30, 0.0 }
 0x264   : > { %v4007_v51 = vsel %vm6773_vm15, 0, %v4006_v9  ;;  %3903 = vst [vmem:[%s6756_s23 + $0xc] sm:$0xf] %v3902_v46  ;;  %v3600_v39 = vor.u32 %v3598_v27, %v3597_v55  ;;  %v3602_v8 = vrot.slane %v3597_v55, 4  ;;  %v4000_v57 = vsel %vm6763_vm14, %v3830_v1, %v3999_v37  ;;  %v2839_v0 = vpop.f32.mrb[48].mxu0  ;;  %v2535_v24 = vpop.f32.mrb[64].mxu1 }
 0x265   : > { %4008 = vst [vmem:[%s6756_s23] sm:$0x1] %v4007_v51  ;;  %v4055_v12 = vld [vmem:[%s6756_s23 + $0x8] sm:$0x1]  ;;  %4001 = vst [vmem:[%s6756_s23 + $0xb4] sm:$0xf] %v4000_v57  ;;  %v3838_v59 = vor.u32 %v3836_v61, %v3835_v6  ;;  %v3840_v60 = vrot.slane %v3835_v6, 4  ;;  %v3411_v17 = vadd.f32 %v6739_v33, %v2969_v49  ;;  %v5154_v9 = vadd.f32 %v2839_v0, %v2527_v15 }
 0x266   : > { %v5106_v10 = vpop.f32.mrb[49].mxu0  ;;  %v4986_v27 = vpop.f32.mrb[65].mxu1  ;;  %v4056_v37 = vsel %vm6806_vm1, 0, %v4055_v12  ;;  %v3601_v55 = vsel %vm6779_vm0, %v3593_v7, %v3600_v39  ;;  %v3906_v1 = vsel %vm6773_vm15, %v3602_v8, %v3905_v40  ;;  %v4503_v61 = vpack.c.bf16 %v3442_v2, %v3442_v2  ;;  %v3908_v12 = vld [vmem:[%s6756_s23 + $0x18] sm:$0xf] }
 0x267   : > { %v2842_v46 = vpop.f32.mrb[50].mxu0  ;;  %v2538_v30 = vpop.f32.mrb[66].mxu1  ;;  %4057 = vst [vmem:[%s6756_s23 + $0x8] sm:$0x1] %v4056_v37  ;;  %3904 = vst [vmem:[%s6756_s23 + $0x10] sm:$0xf] %v3601_v55  ;;  %v3839_v6 = vsel %vm6779_vm0, %v3831_v16, %v3838_v59  ;;  %v4004_v49 = vsel %vm6773_vm15, %v3840_v60, %v4003_v18  ;;  %v2970_v15 = vadd.f32 %v5154_v9, %v6649_v54 }
 0x268   : > { %3907 = vst [vmem:[%s6756_s23 + $0x14] sm:$0x1] %v3906_v1  ;;  %v3443_v51 = vmax.f32 %v3411_v17, 0.0  ;;  %v5107_v7 = vpop.f32.mrb[51].mxu0  ;;  %v4987_v39 = vpop.f32.mrb[67].mxu1  ;;  %v5155_v40 = vadd.f32 %v2842_v46, %v6796_v13  ;;  %v2692_v8 = vadd.f32 %v6646_v50, %v2535_v24  ;;  %v2695_v57 = vadd.f32 %v6651_v43, %v2538_v30 }
 0x269   : > { %4002 = vst [vmem:[%s6756_s23 + $0xb8] sm:$0xf] %v3839_v6  ;;  %4005 = vst [vmem:[%s6756_s23 + $0xbc] sm:$0x1] %v4004_v49  ;;  %v3604_v16 = vshrl.u32 %v4503_v61, 16  ;;  %v3412_v18 = vadd.f32 %v6739_v33, %v2970_v15  ;;  %v3607_v17 = vshll.u32 %v4503_v61, 16 }
 0x26a   : > { %v4504_v0 = vpack.c.bf16 %v3443_v51, %v3443_v51  ;;  %v2971_v2 = vadd.f32 %v5155_v40, %v6654_v41  ;;  %v3912_v24 = vld [vmem:[%s6756_s23 + $0x20] sm:$0x1] }
 0x26b   : > { %v4009_v59 = vld [vmem:[%s6756_s23 + $0xc] sm:$0x1]  ;;  %v3606_v60 = vrot.slane %v3604_v16, 7  ;;  %v3444_v43 = vmax.f32 %v3412_v18, 0.0 }
 0x26c   : > { %v3612_v10 = vshrl.u32 %v4504_v0, 16  ;;  %v4010_v54 = vsel %vm6773_vm15, 0, %v4009_v59  ;;  %v4051_v50 = vld [vmem:[%s6756_s23 + $0xb4] sm:$0x1]  ;;  %v3413_v13 = vadd.f32 %v6739_v33, %v2971_v2  ;;  %v2847_v27 = vpop.f32.mrb[100].mxu0  ;;  %v2543_v37 = vpop.f32.mrb[68].mxu1 }
 0x26d   : > { %4011 = vst [vmem:[%s6756_s23 + $0xc] sm:$0x1] %v4010_v54  ;;  %v4052_v41 = vsel %vm6773_vm15, 0, %v4051_v50  ;;  %v3609_v55 = vor.u32 %v3607_v17, %v3606_v60  ;;  %v3615_v9 = vshll.u32 %v4504_v0, 16  ;;  %v5110_v46 = vpop.f32.mrb[101].mxu0  ;;  %v4990_v30 = vpop.f32.mrb[69].mxu1  ;;  %v4505_v49 = vpack.c.bf16 %v3444_v43, %v3444_v43 }
 0x26e   : > { %v3614_v1 = vrot.slane %v3612_v10, 7  ;;  %4053 = vst [vmem:[%s6756_s23 + $0xb4] sm:$0x1] %v4052_v41  ;;  %v3610_v6 = vrot.slane %v3606_v60, 4  ;;  %v3445_v51 = vmax.f32 %v3413_v13, 0.0  ;;  %v2942_v7 = vadd.f32 %v2847_v27, %v2692_v8  ;;  %v2850_v39 = vpop.f32.mrb[102].mxu0 }
 0x26f   : > { %v4058_v61 = vld [vmem:[%s6756_s23 + $0x14] sm:$0x1]  ;;  %v2546_v15 = vpop.f32.mrb[70].mxu1  ;;  %v3909_v16 = vsel %vm6763_vm14, %v3609_v55, %v3908_v12  ;;  %v5111_v59 = vpop.f32.mrb[103].mxu0  ;;  %v3621_v60 = vshrl.u32 %v4505_v49, 16  ;;  %v2943_v43 = vadd.f32 %v2850_v39, %v2695_v57  ;;  %v3624_v27 = vshll.u32 %v4505_v49, 16 }
 0x270   : > { %v4059_v40 = vsel %vm6806_vm1, 0, %v4058_v61  ;;  %v4100_v0 = vld [vmem:[%s6756_s23 + $0xbc] sm:$0x1]  ;;  %v3617_v18 = vor.u32 %v3615_v9, %v3614_v1  ;;  %v3619_v2 = vrot.slane %v3614_v1, 4  ;;  %v4991_v17 = vpop.f32.mrb[71].mxu1  ;;  %v4506_v10 = vpack.c.bf16 %v3445_v51, %v3445_v51 }
 0x271   : > { %4060 = vst [vmem:[%s6756_s23 + $0x14] sm:$0x1] %v4059_v40  ;;  %3910 = vst [vmem:[%s6756_s23 + $0x18] sm:$0xf] %v3909_v16  ;;  %v4101_v8 = vsel %vm6806_vm1, 0, %v4100_v0  ;;  %v2972_v50 = vadd.f32 %v2942_v7, %v6657_v38  ;;  %v3623_v13 = vrot.slane %v3621_v60, 7  ;;  %v2973_v9 = vadd.f32 %v2943_v43, %v6660_v31 }
 0x272   : > { %4102 = vst [vmem:[%s6756_s23 + $0xbc] sm:$0x1] %v4101_v8  ;;  %v3618_v54 = vsel %vm6779_vm0, %v3610_v6, %v3617_v18  ;;  %v3913_v12 = vsel %vm6773_vm15, %v3619_v2, %v3912_v24  ;;  %v3629_v41 = vshrl.u32 %v4506_v10, 16  ;;  %v3915_v55 = vld [vmem:[%s6756_s23 + $0x24] sm:$0xf]  ;;  %v3632_v61 = vshll.u32 %v4506_v10, 16 }
 0x273   : > { %3911 = vst [vmem:[%s6756_s23 + $0x1c] sm:$0xf] %v3618_v54  ;;  %3914 = vst [vmem:[%s6756_s23 + $0x20] sm:$0x1] %v3913_v12  ;;  %v3414_v1 = vadd.f32 %v6739_v33, %v2972_v50  ;;  %v3626_v46 = vor.u32 %v3624_v27, %v3623_v13  ;;  %v3919_v51 = vld [vmem:[%s6756_s23 + $0x2c] sm:$0x1]  ;;  %v3415_v57 = vadd.f32 %v6739_v33, %v2973_v9 }
 0x274   : > { %v3631_v30 = vrot.slane %v3629_v41, 7  ;;  %v2855_v6 = vpop.f32.mrb[56].mxu0  ;;  %v2551_v24 = vpop.f32.mrb[72].mxu1  ;;  %v3627_v16 = vrot.slane %v3623_v13, 4 }
 0x275   : > { %v3446_v38 = vmax.f32 %v3414_v1, 0.0  ;;  %v5156_v7 = vadd.f32 %v2855_v6, %v2543_v37  ;;  %v5114_v39 = vpop.f32.mrb[57].mxu0  ;;  %v2708_v49 = vadd.f32 %v6662_v44, %v2551_v24  ;;  %v4994_v40 = vpop.f32.mrb[73].mxu1  ;;  %v3916_v31 = vsel %vm6763_vm14, %v3626_v46, %v3915_v55 }
 0x276   : > { %v3634_v0 = vor.u32 %v3632_v61, %v3631_v30  ;;  %v3636_v18 = vrot.slane %v3631_v30, 4  ;;  %v2858_v2 = vpop.f32.mrb[58].mxu0  ;;  %v2554_v59 = vpop.f32.mrb[74].mxu1  ;;  %3917 = vst [vmem:[%s6756_s23 + $0x24] sm:$0xf] %v3916_v31  ;;  %v3447_v37 = vmax.f32 %v3415_v57, 0.0 }
 0x277   : > { %v4507_v8 = vpack.c.bf16 %v3446_v38, %v3446_v38  ;;  %v2974_v60 = vadd.f32 %v5156_v7, %v6665_v58  ;;  %v5157_v44 = vadd.f32 %v2858_v2, %v2546_v15  ;;  %v5115_v10 = vpop.f32.mrb[59].mxu0  ;;  %v4995_v54 = vpop.f32.mrb[75].mxu1  ;;  %v2711_v13 = vadd.f32 %v6667_v62, %v2554_v59  ;;  %v3922_v61 = vld [vmem:[%s6756_s23 + $0x30] sm:$0xf]  ;;  %v3926_v39 = vld [vmem:[%s6756_s23 + $0x38] sm:$0x1] }
 0x278   : > { %v4012_v17 = vld [vmem:[%s6756_s23 + $0x18] sm:$0x1]  ;;  %v3635_v50 = vsel %vm6779_vm0, %v3627_v16, %v3634_v0  ;;  %v3920_v43 = vsel %vm6773_vm15, %v3636_v18, %v3919_v51  ;;  %v4508_v15 = vpack.c.bf16 %v3447_v37, %v3447_v37 }
 0x279   : > { %v4013_v12 = vsel %vm6773_vm15, 0, %v4012_v17  ;;  %3918 = vst [vmem:[%s6756_s23 + $0x28] sm:$0xf] %v3635_v50  ;;  %3921 = vst [vmem:[%s6756_s23 + $0x2c] sm:$0x1] %v3920_v43  ;;  %v3638_v58 = vshrl.u32 %v4507_v8, 16  ;;  %v3416_v41 = vadd.f32 %v6739_v33, %v2974_v60  ;;  %v2975_v1 = vadd.f32 %v5157_v44, %v6670_v48 }
 0x27a   : > { %4014 = vst [vmem:[%s6756_s23 + $0x18] sm:$0x1] %v4013_v12  ;;  %v4061_v27 = vld [vmem:[%s6756_s23 + $0x20] sm:$0x1]  ;;  %v3641_v46 = vshll.u32 %v4507_v8, 16  ;;  %v3646_v30 = vshrl.u32 %v4508_v15, 16 }
 0x27b   : > { %v4062_v55 = vsel %vm6806_vm1, 0, %v4061_v27  ;;  %v3640_v9 = vrot.slane %v3638_v58, 7  ;;  %v3448_v62 = vmax.f32 %v3416_v41, 0.0  ;;  %v3417_v6 = vadd.f32 %v6739_v33, %v2975_v1 }
 0x27c   : > { %4063 = vst [vmem:[%s6756_s23 + $0x20] sm:$0x1] %v4062_v55  ;;  %v2863_v24 = vpop.f32.mrb[104].mxu0  ;;  %v2559_v51 = vpop.f32.mrb[76].mxu1  ;;  %v3648_v57 = vrot.slane %v3646_v30, 7  ;;  %v3649_v7 = vshll.u32 %v4508_v15, 16 }
 0x27d   : > { %v3643_v38 = vor.u32 %v3641_v46, %v3640_v9  ;;  %v4509_v40 = vpack.c.bf16 %v3448_v62, %v3448_v62  ;;  %v5118_v16 = vpop.f32.mrb[105].mxu0  ;;  %v4998_v48 = vpop.f32.mrb[77].mxu1  ;;  %v4015_v31 = vld [vmem:[%s6756_s23 + $0x24] sm:$0x1]  ;;  %v3644_v0 = vrot.slane %v3640_v9, 4  ;;  %v3449_v18 = vmax.f32 %v3417_v6, 0.0 }
 0x27e   : > { %v2946_v2 = vadd.f32 %v2863_v24, %v2708_v49  ;;  %v2866_v59 = vpop.f32.mrb[106].mxu0  ;;  %v2562_v17 = vpop.f32.mrb[78].mxu1  ;;  %v4016_v8 = vsel %vm6773_vm15, 0, %v4015_v31  ;;  %v3651_v60 = vor.u32 %v3649_v7, %v3648_v57  ;;  %v3653_v44 = vrot.slane %v3648_v57, 4  ;;  %v3933_v7 = vld [vmem:[%s6756_s23 + $0x44] sm:$0x1] }
 0x27f   : > { %v3923_v37 = vsel %vm6763_vm14, %v3643_v38, %v3922_v61  ;;  %v5119_v10 = vpop.f32.mrb[107].mxu0  ;;  %v4999_v54 = vpop.f32.mrb[79].mxu1  ;;  %4017 = vst [vmem:[%s6756_s23 + $0x24] sm:$0x1] %v4016_v8  ;;  %v3655_v49 = vshrl.u32 %v4509_v40, 16  ;;  %v4510_v50 = vpack.c.bf16 %v3449_v18, %v3449_v18  ;;  %v2947_v41 = vadd.f32 %v2866_v59, %v2711_v13 }
 0x280   : > { %v4064_v12 = vld [vmem:[%s6756_s23 + $0x2c] sm:$0x1]  ;;  %3924 = vst [vmem:[%s6756_s23 + $0x30] sm:$0xf] %v3923_v37  ;;  %v2976_v43 = vadd.f32 %v2946_v2, %v6673_v5  ;;  %v3652_v58 = vsel %vm6779_vm0, %v3644_v0, %v3651_v60  ;;  %v3927_v15 = vsel %vm6773_vm15, %v3653_v44, %v3926_v39  ;;  %v3658_v1 = vshll.u32 %v4509_v40, 16 }
 0x281   : > { %v4065_v27 = vsel %vm6806_vm1, 0, %v4064_v12  ;;  %3925 = vst [vmem:[%s6756_s23 + $0x34] sm:$0xf] %v3652_v58  ;;  %3928 = vst [vmem:[%s6756_s23 + $0x38] sm:$0x1] %v3927_v15  ;;  %v3657_v55 = vrot.slane %v3655_v49, 7  ;;  %v2977_v30 = vadd.f32 %v2947_v41, %v6676_v28 }
 0x282   : > { %4066 = vst [vmem:[%s6756_s23 + $0x2c] sm:$0x1] %v4065_v27  ;;  %v3663_v9 = vshrl.u32 %v4510_v50, 16  ;;  %v3418_v46 = vadd.f32 %v6739_v33, %v2976_v43  ;;  %v3929_v5 = vld [vmem:[%s6756_s23 + $0x3c] sm:$0xf]  ;;  %v3666_v6 = vshll.u32 %v4510_v50, 16 }
 0x283   : > { %v3660_v62 = vor.u32 %v3658_v1, %v3657_v55  ;;  %v3661_v57 = vrot.slane %v3657_v55, 4  ;;  %v3419_v39 = vadd.f32 %v6739_v33, %v2977_v30  ;;  %v3936_v55 = vld [vmem:[%s6756_s23 + $0x48] sm:$0xf] }
 0x284   : > { %v3665_v61 = vrot.slane %v3663_v9, 7  ;;  %v3450_v24 = vmax.f32 %v3418_v46, 0.0  ;;  %v2871_v38 = vpop.f32.mrb[64].mxu0  ;;  %v2567_v13 = vpop.f32.mrb[80].mxu1 }
 0x285   : > { %v5158_v16 = vadd.f32 %v2871_v38, %v2559_v51  ;;  %v5122_v40 = vpop.f32.mrb[65].mxu0  ;;  %v2724_v48 = vadd.f32 %v6678_v3, %v2567_v13  ;;  %v5002_v31 = vpop.f32.mrb[81].mxu1  ;;  %v3930_v28 = vsel %vm6763_vm14, %v3660_v62, %v3929_v5  ;;  %v3451_v60 = vmax.f32 %v3419_v39, 0.0 }
 0x286   : > { %v3668_v0 = vor.u32 %v3666_v6, %v3665_v61  ;;  %v3670_v18 = vrot.slane %v3665_v61, 4  ;;  %v4511_v2 = vpack.c.bf16 %v3450_v24, %v3450_v24  ;;  %v2874_v59 = vpop.f32.mrb[66].mxu0  ;;  %v2570_v8 = vpop.f32.mrb[82].mxu1  ;;  %3931 = vst [vmem:[%s6756_s23 + $0x3c] sm:$0xf] %v3930_v28 }
 0x287   : > { %v4018_v37 = vld [vmem:[%s6756_s23 + $0x30] sm:$0x1]  ;;  %v2978_v51 = vadd.f32 %v5158_v16, %v6681_v11  ;;  %v5159_v44 = vadd.f32 %v2874_v59, %v2562_v17  ;;  %v5123_v3 = vpop.f32.mrb[67].mxu0  ;;  %v2727_v10 = vadd.f32 %v6683_v21, %v2570_v8  ;;  %v5003_v54 = vpop.f32.mrb[83].mxu1  ;;  %v4512_v11 = vpack.c.bf16 %v3451_v60, %v3451_v60 }
 0x288   : > { %v4019_v12 = vsel %vm6773_vm15, 0, %v4018_v37  ;;  %v3669_v49 = vsel %vm6779_vm0, %v3661_v57, %v3668_v0  ;;  %v3934_v50 = vsel %vm6773_vm15, %v3670_v18, %v3933_v7  ;;  %v3672_v43 = vshrl.u32 %v4511_v2, 16  ;;  %v4067_v27 = vld [vmem:[%s6756_s23 + $0x38] sm:$0x1]  ;;  %v3940_v24 = vld [vmem:[%s6756_s23 + $0x50] sm:$0x1] }
 0x289   : > { %4020 = vst [vmem:[%s6756_s23 + $0x30] sm:$0x1] %v4019_v12  ;;  %3932 = vst [vmem:[%s6756_s23 + $0x40] sm:$0xf] %v3669_v49  ;;  %v3420_v21 = vadd.f32 %v6739_v33, %v2978_v51  ;;  %v2979_v17 = vadd.f32 %v5159_v44, %v6686_v45  ;;  %v4068_v58 = vsel %vm6806_vm1, 0, %v4067_v27  ;;  %v3675_v41 = vshll.u32 %v4511_v2, 16 }
 0x28a   : > { %3935 = vst [vmem:[%s6756_s23 + $0x44] sm:$0x1] %v3934_v50  ;;  %v3674_v15 = vrot.slane %v3672_v43, 7  ;;  %4069 = vst [vmem:[%s6756_s23 + $0x38] sm:$0x1] %v4068_v58  ;;  %v3680_v1 = vshrl.u32 %v4512_v11, 16 }
 0x28b   : > { %v3452_v9 = vmax.f32 %v3420_v21, 0.0  ;;  %v3421_v46 = vadd.f32 %v6739_v33, %v2979_v17  ;;  %v3683_v30 = vshll.u32 %v4512_v11, 16  ;;  %v3943_v43 = vld [vmem:[%s6756_s23 + $0x54] sm:$0xf] }
 0x28c   : > { %v3677_v5 = vor.u32 %v3675_v41, %v3674_v15  ;;  %v2879_v62 = vpop.f32.mrb[108].mxu0  ;;  %v2575_v61 = vpop.f32.mrb[84].mxu1  ;;  %v3682_v6 = vrot.slane %v3680_v1, 7  ;;  %v3678_v16 = vrot.slane %v3674_v15, 4 }
 0x28d   : > { %v4513_v45 = vpack.c.bf16 %v3452_v9, %v3452_v9  ;;  %v3453_v38 = vmax.f32 %v3421_v46, 0.0  ;;  %v2950_v13 = vadd.f32 %v2879_v62, %v2724_v48  ;;  %v5126_v57 = vpop.f32.mrb[109].mxu0  ;;  %v5006_v7 = vpop.f32.mrb[85].mxu1  ;;  %v4021_v39 = vld [vmem:[%s6756_s23 + $0x3c] sm:$0x1] }
 0x28e   : > { %v3937_v40 = vsel %vm6763_vm14, %v3677_v5, %v3936_v55  ;;  %v2882_v31 = vpop.f32.mrb[110].mxu0  ;;  %v2578_v28 = vpop.f32.mrb[86].mxu1  ;;  %v4022_v0 = vsel %vm6773_vm15, 0, %v4021_v39  ;;  %v3685_v18 = vor.u32 %v3683_v30, %v3682_v6  ;;  %v3687_v2 = vrot.slane %v3682_v6, 4  ;;  %v3947_v46 = vld [vmem:[%s6756_s23 + $0x5c] sm:$0x1] }
 0x28f   : > { %3938 = vst [vmem:[%s6756_s23 + $0x48] sm:$0xf] %v3937_v40  ;;  %v3689_v48 = vshrl.u32 %v4513_v45, 16  ;;  %v5127_v59 = vpop.f32.mrb[111].mxu0  ;;  %v5007_v8 = vpop.f32.mrb[87].mxu1  ;;  %v3692_v60 = vshll.u32 %v4513_v45, 16  ;;  %v4514_v51 = vpack.c.bf16 %v3453_v38, %v3453_v38  ;;  %v2980_v44 = vadd.f32 %v2950_v13, %v6689_v35 }
 0x290   : > { %4023 = vst [vmem:[%s6756_s23 + $0x3c] sm:$0x1] %v4022_v0  ;;  %v2951_v3 = vadd.f32 %v2882_v31, %v2727_v10  ;;  %v3686_v12 = vsel %vm6779_vm0, %v3678_v16, %v3685_v18  ;;  %v3941_v49 = vsel %vm6773_vm15, %v3687_v2, %v3940_v24 }
 0x291   : > { %v4070_v37 = vld [vmem:[%s6756_s23 + $0x44] sm:$0x1]  ;;  %v3691_v50 = vrot.slane %v3689_v48, 7  ;;  %3939 = vst [vmem:[%s6756_s23 + $0x4c] sm:$0xf] %v3686_v12  ;;  %v3697_v27 = vshrl.u32 %v4514_v51, 16  ;;  %v3422_v11 = vadd.f32 %v6739_v33, %v2980_v44 }
 0x292   : > { %v4071_v54 = vsel %vm6806_vm1, 0, %v4070_v37  ;;  %3942 = vst [vmem:[%s6756_s23 + $0x50] sm:$0x1] %v3941_v49  ;;  %v2981_v35 = vadd.f32 %v2951_v3, %v6692_v25  ;;  %v3700_v17 = vshll.u32 %v4514_v51, 16 }
 0x293   : > { %4072 = vst [vmem:[%s6756_s23 + $0x44] sm:$0x1] %v4071_v54  ;;  %v3694_v10 = vor.u32 %v3692_v60, %v3691_v50  ;;  %v3699_v21 = vrot.slane %v3697_v27, 7  ;;  %v3454_v58 = vmax.f32 %v3422_v11, 0.0  ;;  %v3695_v1 = vrot.slane %v3691_v50, 4 }
 0x294   : > { %v3423_v15 = vadd.f32 %v6739_v33, %v2981_v35  ;;  %v2887_v41 = vpop.f32.mrb[72].mxu0  ;;  %v2583_v55 = vpop.f32.mrb[88].mxu1  ;;  %v3950_v60 = vld [vmem:[%s6756_s23 + $0x60] sm:$0xf] }
 0x295   : > { %v3944_v9 = vsel %vm6763_vm14, %v3694_v10, %v3943_v43  ;;  %v5160_v5 = vadd.f32 %v2887_v41, %v2575_v61  ;;  %v5130_v30 = vpop.f32.mrb[73].mxu0  ;;  %v2740_v62 = vadd.f32 %v6694_v14, %v2583_v55  ;;  %v5010_v25 = vpop.f32.mrb[89].mxu1  ;;  %v3702_v24 = vor.u32 %v3700_v17, %v3699_v21 }
 0x296   : > { %v4024_v6 = vld [vmem:[%s6756_s23 + $0x48] sm:$0x1]  ;;  %3945 = vst [vmem:[%s6756_s23 + $0x54] sm:$0xf] %v3944_v9  ;;  %v3704_v45 = vrot.slane %v3699_v21, 4  ;;  %v4515_v38 = vpack.c.bf16 %v3454_v58, %v3454_v58  ;;  %v3455_v13 = vmax.f32 %v3423_v15, 0.0 }
 0x297   : > { %v2890_v57 = vpop.f32.mrb[74].mxu0  ;;  %v2586_v7 = vpop.f32.mrb[90].mxu1  ;;  %v4025_v39 = vsel %vm6773_vm15, 0, %v4024_v6  ;;  %v2982_v61 = vadd.f32 %v5160_v5, %v6697_v53  ;;  %v3703_v0 = vsel %vm6779_vm0, %v3695_v1, %v3702_v24  ;;  %v3954_v15 = vld [vmem:[%s6756_s23 + $0x68] sm:$0x1] }
 0x298   : > { %v5161_v16 = vadd.f32 %v2890_v57, %v2578_v28  ;;  %v5131_v14 = vpop.f32.mrb[75].mxu0  ;;  %v2743_v40 = vadd.f32 %v6699_v56, %v2586_v7  ;;  %v5011_v31 = vpop.f32.mrb[91].mxu1  ;;  %4026 = vst [vmem:[%s6756_s23 + $0x48] sm:$0x1] %v4025_v39  ;;  %v3948_v18 = vsel %vm6773_vm15, %v3704_v45, %v3947_v46  ;;  %v3706_v2 = vshrl.u32 %v4515_v38, 16 }
 0x299   : > { %v4073_v48 = vld [vmem:[%s6756_s23 + $0x50] sm:$0x1]  ;;  %3946 = vst [vmem:[%s6756_s23 + $0x58] sm:$0xf] %v3703_v0  ;;  %3949 = vst [vmem:[%s6756_s23 + $0x5c] sm:$0x1] %v3948_v18  ;;  %v4516_v53 = vpack.c.bf16 %v3455_v13, %v3455_v13  ;;  %v3424_v28 = vadd.f32 %v6739_v33, %v2982_v61 }
 0x29a   : > { %v2983_v59 = vadd.f32 %v5161_v16, %v6702_v23  ;;  %v4074_v56 = vsel %vm6806_vm1, 0, %v4073_v48  ;;  %v3708_v8 = vrot.slane %v3706_v2, 7  ;;  %v3709_v37 = vshll.u32 %v4515_v38, 16  ;;  %v3957_v61 = vld [vmem:[%s6756_s23 + $0x6c] sm:$0xf] }
 0x29b   : > { %4075 = vst [vmem:[%s6756_s23 + $0x50] sm:$0x1] %v4074_v56  ;;  %v3714_v51 = vshrl.u32 %v4516_v53, 16  ;;  %v3456_v44 = vmax.f32 %v3424_v28, 0.0  ;;  %v3717_v12 = vshll.u32 %v4516_v53, 16 }
 0x29c   : > { %v3425_v3 = vadd.f32 %v6739_v33, %v2983_v59  ;;  %v3711_v54 = vor.u32 %v3709_v37, %v3708_v8  ;;  %v2895_v49 = vpop.f32.mrb[112].mxu0  ;;  %v2591_v50 = vpop.f32.mrb[92].mxu1  ;;  %v3712_v1 = vrot.slane %v3708_v8, 4  ;;  %v3961_v56 = vld [vmem:[%s6756_s23 + $0x74] sm:$0x1] }
 0x29d   : > { %v4027_v43 = vld [vmem:[%s6756_s23 + $0x54] sm:$0x1]  ;;  %v3716_v23 = vrot.slane %v3714_v51, 7  ;;  %v4517_v27 = vpack.c.bf16 %v3456_v44, %v3456_v44  ;;  %v2954_v35 = vadd.f32 %v2895_v49, %v2740_v62  ;;  %v5134_v10 = vpop.f32.mrb[113].mxu0  ;;  %v5014_v21 = vpop.f32.mrb[93].mxu1 }
 0x29e   : > { %v3457_v11 = vmax.f32 %v3425_v3, 0.0  ;;  %v4028_v17 = vsel %vm6773_vm15, 0, %v4027_v43  ;;  %v3951_v58 = vsel %vm6763_vm14, %v3711_v54, %v3950_v60  ;;  %v2898_v41 = vpop.f32.mrb[114].mxu0  ;;  %v2594_v55 = vpop.f32.mrb[94].mxu1 }
 0x29f   : > { %4029 = vst [vmem:[%s6756_s23 + $0x54] sm:$0x1] %v4028_v17  ;;  %3952 = vst [vmem:[%s6756_s23 + $0x60] sm:$0xf] %v3951_v58  ;;  %v3719_v9 = vor.u32 %v3717_v12, %v3716_v23  ;;  %v3721_v46 = vrot.slane %v3716_v23, 4  ;;  %v3723_v5 = vshrl.u32 %v4517_v27, 16  ;;  %v2984_v45 = vadd.f32 %v2954_v35, %v6705_v4 }
 0x2a0   : > { %v5135_v30 = vpop.f32.mrb[115].mxu0  ;;  %v5015_v62 = vpop.f32.mrb[95].mxu1  ;;  %v4076_v25 = vld [vmem:[%s6756_s23 + $0x5c] sm:$0x1]  ;;  %v3726_v6 = vshll.u32 %v4517_v27, 16  ;;  %v4518_v24 = vpack.c.bf16 %v3457_v11, %v3457_v11  ;;  %v2955_v38 = vadd.f32 %v2898_v41, %v2743_v40 }
 0x2a1   : > { %v4077_v13 = vsel %vm6806_vm1, 0, %v4076_v25  ;;  %v3720_v57 = vsel %vm6779_vm0, %v3712_v1, %v3719_v9  ;;  %v3955_v7 = vsel %vm6773_vm15, %v3721_v46, %v3954_v15  ;;  %v3725_v39 = vrot.slane %v3723_v5, 7  ;;  %v3964_v9 = vld [vmem:[%s6756_s23 + $0x78] sm:$0xf] }
 0x2a2   : > { %4078 = vst [vmem:[%s6756_s23 + $0x5c] sm:$0x1] %v4077_v13  ;;  %3953 = vst [vmem:[%s6756_s23 + $0x64] sm:$0xf] %v3720_v57  ;;  %v3731_v16 = vshrl.u32 %v4518_v24, 16  ;;  %v3426_v14 = vadd.f32 %v6739_v33, %v2984_v45  ;;  %v2985_v4 = vadd.f32 %v2955_v38, %v6708_v19  ;;  %v3734_v0 = vshll.u32 %v4518_v24, 16 }
 0x2a3   : > { %3956 = vst [vmem:[%s6756_s23 + $0x68] sm:$0x1] %v3955_v7  ;;  %v3728_v40 = vor.u32 %v3726_v6, %v3725_v39  ;;  %v3729_v28 = vrot.slane %v3725_v39, 4 }
 0x2a4   : > { %v3733_v31 = vrot.slane %v3731_v16, 7  ;;  %v3458_v18 = vmax.f32 %v3426_v14, 0.0  ;;  %v3427_v2 = vadd.f32 %v6739_v33, %v2985_v4  ;;  %v2903_v48 = vpop.f32.mrb[80].mxu0  ;;  %v2599_v53 = vpop.f32.mrb[96].mxu1  ;;  %v3968_v16 = vld [vmem:[%s6756_s23 + $0x80] sm:$0x1] }
 0x2a5   : > { %v3958_v59 = vsel %vm6763_vm14, %v3728_v40, %v3957_v61  ;;  %v5162_v8 = vadd.f32 %v2903_v48, %v2591_v50  ;;  %v5138_v37 = vpop.f32.mrb[81].mxu0  ;;  %v2756_v60 = vadd.f32 %v6710_v63, %v2599_v53  ;;  %v5018_v19 = vpop.f32.mrb[97].mxu1 }
 0x2a6   : > { %v4030_v51 = vld [vmem:[%s6756_s23 + $0x60] sm:$0x1]  ;;  %3959 = vst [vmem:[%s6756_s23 + $0x6c] sm:$0xf] %v3958_v59  ;;  %v3736_v44 = vor.u32 %v3734_v0, %v3733_v31  ;;  %v3738_v3 = vrot.slane %v3733_v31, 4  ;;  %v4519_v54 = vpack.c.bf16 %v3458_v18, %v3458_v18  ;;  %v3459_v12 = vmax.f32 %v3427_v2, 0.0 }
 0x2a7   : > { %v2906_v49 = vpop.f32.mrb[82].mxu0  ;;  %v2602_v43 = vpop.f32.mrb[98].mxu1  ;;  %v4031_v23 = vsel %vm6773_vm15, 0, %v4030_v51  ;;  %v2986_v50 = vadd.f32 %v5162_v8, %v6713_v20 }
 0x2a8   : > { %v5163_v27 = vadd.f32 %v2906_v49, %v2594_v55  ;;  %v5139_v63 = vpop.f32.mrb[83].mxu0  ;;  %v2759_v11 = vadd.f32 %v6715_v22, %v2602_v43  ;;  %v5019_v35 = vpop.f32.mrb[99].mxu1  ;;  %4032 = vst [vmem:[%s6756_s23 + $0x60] sm:$0x1] %v4031_v23  ;;  %v3737_v10 = vsel %vm6779_vm0, %v3729_v28, %v3736_v44  ;;  %v3962_v21 = vsel %vm6773_vm15, %v3738_v3, %v3961_v56  ;;  %v3971_v44 = vld [vmem:[%s6756_s23 + $0x84] sm:$0xf] }
 0x2a9   : > { %v3740_v17 = vshrl.u32 %v4519_v54, 16  ;;  %3960 = vst [vmem:[%s6756_s23 + $0x70] sm:$0xf] %v3737_v10  ;;  %3963 = vst [vmem:[%s6756_s23 + $0x74] sm:$0x1] %v3962_v21  ;;  %v4520_v20 = vpack.c.bf16 %v3459_v12, %v3459_v12  ;;  %v3428_v15 = vadd.f32 %v6739_v33, %v2986_v50  ;;  %v3743_v1 = vshll.u32 %v4519_v54, 16 }
 0x2aa   : > { %v4079_v58 = vld [vmem:[%s6756_s23 + $0x68] sm:$0x1]  ;;  %v2987_v41 = vadd.f32 %v5163_v27, %v6718_v52  ;;  %v3975_v21 = vld [vmem:[%s6756_s23 + $0x8c] sm:$0x1] }
 0x2ab   : > { %v4080_v22 = vsel %vm6806_vm1, 0, %v4079_v58  ;;  %v3742_v55 = vrot.slane %v3740_v17, 7  ;;  %v3748_v46 = vshrl.u32 %v4520_v20, 16  ;;  %v3460_v5 = vmax.f32 %v3428_v15, 0.0 }
 0x2ac   : > { %4081 = vst [vmem:[%s6756_s23 + $0x68] sm:$0x1] %v4080_v22  ;;  %v3429_v30 = vadd.f32 %v6739_v33, %v2987_v41  ;;  %v3751_v25 = vshll.u32 %v4520_v20, 16  ;;  %v2911_v6 = vpop.f32.mrb[116].mxu0  ;;  %v2607_v24 = vpop.f32.mrb[100].mxu1 }
 0x2ad   : > { %v3745_v62 = vor.u32 %v3743_v1, %v3742_v55  ;;  %v4033_v45 = vld [vmem:[%s6756_s23 + $0x6c] sm:$0x1]  ;;  %v3750_v52 = vrot.slane %v3748_v46, 7  ;;  %v4521_v38 = vpack.c.bf16 %v3460_v5, %v3460_v5  ;;  %v2958_v57 = vadd.f32 %v2911_v6, %v2756_v60  ;;  %v5142_v7 = vpop.f32.mrb[117].mxu0  ;;  %v5022_v39 = vpop.f32.mrb[101].mxu1 }
 0x2ae   : > { %v3461_v13 = vmax.f32 %v3429_v30, 0.0  ;;  %v4034_v61 = vsel %vm6773_vm15, 0, %v4033_v45  ;;  %v2914_v14 = vpop.f32.mrb[118].mxu0  ;;  %v2610_v4 = vpop.f32.mrb[102].mxu1  ;;  %v3746_v40 = vrot.slane %v3742_v55, 4  ;;  %v7288_v30 = vld [vmem:[#allocation7_spill] sm:$0xff] }
 0x2af   : > { %v3965_v33 = vsel %vm6763_vm14, %v3745_v62, %v3964_v9  ;;  %4035 = vst [vmem:[%s6756_s23 + $0x6c] sm:$0x1] %v4034_v61  ;;  %v3753_v31 = vor.u32 %v3751_v25, %v3750_v52  ;;  %v3755_v0 = vrot.slane %v3750_v52, 4  ;;  %v3757_v18 = vshrl.u32 %v4521_v38, 16  ;;  %v5143_v2 = vpop.f32.mrb[119].mxu0  ;;  %v5023_v48 = vpop.f32.mrb[103].mxu1 }
 0x2b0   : > { %3966 = vst [vmem:[%s6756_s23 + $0x78] sm:$0xf] %v3965_v33  ;;  %v4082_v53 = vld [vmem:[%s6756_s23 + $0x74] sm:$0x1]  ;;  %v3760_v28 = vshll.u32 %v4521_v38, 16  ;;  %v4522_v59 = vpack.c.bf16 %v3461_v13, %v3461_v13  ;;  %v2988_v56 = vadd.f32 %v2958_v57, %v6721_v34  ;;  %v2959_v8 = vadd.f32 %v2914_v14, %v2759_v11  ;;  %v7289_v6 = vld [vmem:[#allocation20_spill] sm:$0xff] }
 0x2b1   : > { %v4083_v37 = vsel %vm6806_vm1, 0, %v4082_v53  ;;  %v3754_v60 = vsel %vm6779_vm0, %v3746_v40, %v3753_v31  ;;  %v3969_v19 = vsel %vm6773_vm15, %v3755_v0, %v3968_v16  ;;  %v3759_v51 = vrot.slane %v3757_v18, 7  ;;  %v7070_v34 = vld [vmem:[%s7181_s4] ss:$0 sm:$0xff]  ;;  %v7290_v61 = vld [vmem:[#allocation9_spill] sm:$0xff] }
 0x2b2   : > { %4084 = vst [vmem:[%s6756_s23 + $0x74] sm:$0x1] %v4083_v37  ;;  %3967 = vst [vmem:[%s6756_s23 + $0x7c] sm:$0xf] %v3754_v60  ;;  %v3765_v3 = vshrl.u32 %v4522_v59, 16  ;;  %v3430_v54 = vadd.f32 %v7070_v34, %v2988_v56  ;;  %v2989_v12 = vadd.f32 %v2959_v8, %v6724_v26  ;;  %v3768_v23 = vshll.u32 %v4522_v59, 16 }
 0x2b3   : > { %3970 = vst [vmem:[%s6756_s23 + $0x80] sm:$0x1] %v3969_v19  ;;  %v3762_v49 = vor.u32 %v3760_v28, %v3759_v51  ;;  %v3763_v35 = vrot.slane %v3759_v51, 4  ;;  %v3978_v40 = vld [vmem:[%s6756_s23 + $0x90] sm:$0xf] }
 0x2b4   : > { %v3767_v43 = vrot.slane %v3765_v3, 7  ;;  %v3462_v50 = vmax.f32 %v3430_v54, 0.0  ;;  %v3431_v27 = vadd.f32 %v7070_v34, %v2989_v12  ;;  %v2919_v63 = vpop.f32.mrb[88].mxu0  ;;  %v2615_v11 = vpop.f32.mrb[104].mxu1 }
 0x2b5   : > { %v3972_v10 = vsel %vm6763_vm14, %v3762_v49, %v3971_v44  ;;  %v5164_v17 = vadd.f32 %v2919_v63, %v2607_v24  ;;  %v5146_v58 = vpop.f32.mrb[89].mxu0  ;;  %v2772_v20 = vadd.f32 %v6726_v42, %v2615_v11  ;;  %v5026_v26 = vpop.f32.mrb[105].mxu1  ;;  %v3982_v44 = vld [vmem:[%s6756_s23 + $0x98] sm:$0x1]  ;;  %v7291_v11 = vld [vmem:[#allocation11_spill] sm:$0xff] }
 0x2b6   : > { %3973 = vst [vmem:[%s6756_s23 + $0x84] sm:$0xf] %v3972_v10  ;;  %v3770_v41 = vor.u32 %v3768_v23, %v3767_v43  ;;  %v3772_v22 = vrot.slane %v3767_v43, 4  ;;  %v4523_v55 = vpack.c.bf16 %v3462_v50, %v3462_v50  ;;  %v3463_v1 = vmax.f32 %v3431_v27, 0.0  ;;  %v2922_v9 = vpop.f32.mrb[90].mxu0  ;;  %v2618_v46 = vpop.f32.mrb[106].mxu1 }
 0x2b7   : > { %v4036_v15 = vld [vmem:[%s6756_s23 + $0x78] sm:$0x1]  ;;  %v2990_v62 = vadd.f32 %v5164_v17, %v7288_v30  ;;  %v5165_v25 = vadd.f32 %v2922_v9, %v2610_v4  ;;  %v5147_v42 = vpop.f32.mrb[91].mxu0  ;;  %v2775_v24 = vadd.f32 %v7289_v6, %v2618_v46  ;;  %v5027_v45 = vpop.f32.mrb[107].mxu1  ;;  %v3985_v26 = vld [vmem:[%s6756_s23 + $0x9c] sm:$0xf] }
 0x2b8   : > { %v4037_v5 = vsel %vm6773_vm15, 0, %v4036_v15  ;;  %v3771_v52 = vsel %vm6779_vm0, %v3763_v35, %v3770_v41  ;;  %v3976_v38 = vsel %vm6773_vm15, %v3772_v22, %v3975_v21  ;;  %v3774_v13 = vshrl.u32 %v4523_v55, 16  ;;  %v7292_v22 = vld [vmem:[#allocation13_spill] sm:$0xff]  ;;  %v3989_v42 = vld [vmem:[%s6756_s23 + $0xa4] sm:$0x1] }
 0x2b9   : > { %4038 = vst [vmem:[%s6756_s23 + $0x78] sm:$0x1] %v4037_v5  ;;  %3974 = vst [vmem:[%s6756_s23 + $0x88] sm:$0xf] %v3771_v52  ;;  %v4524_v7 = vpack.c.bf16 %v3463_v1, %v3463_v1  ;;  %v3432_v39 = vadd.f32 %v7070_v34, %v2990_v62  ;;  %v2991_v33 = vadd.f32 %v5165_v25, %v7290_v61  ;;  %v3777_v4 = vshll.u32 %v4523_v55, 16 }
 0x2ba   : > { %v4085_v57 = vld [vmem:[%s6756_s23 + $0x80] sm:$0x1]  ;;  %3977 = vst [vmem:[%s6756_s23 + $0x8c] sm:$0x1] %v3976_v38  ;;  %v3776_v14 = vrot.slane %v3774_v13, 7 }
 0x2bb   : > { %v4086_v16 = vsel %vm6806_vm1, 0, %v4085_v57  ;;  %v3782_v31 = vshrl.u32 %v4524_v7, 16  ;;  %v3464_v0 = vmax.f32 %v3432_v39, 0.0  ;;  %v3433_v18 = vadd.f32 %v7070_v34, %v2991_v33 }
 0x2bc   : > { %4087 = vst [vmem:[%s6756_s23 + $0x80] sm:$0x1] %v4086_v16  ;;  %v3779_v2 = vor.u32 %v3777_v4, %v3776_v14  ;;  %v3785_v48 = vshll.u32 %v4524_v7, 16  ;;  %v2927_v53 = vpop.f32.mrb[120].mxu0  ;;  %v3780_v54 = vrot.slane %v3776_v14, 4 }
 0x2bd   : > { %v4039_v28 = vld [vmem:[%s6756_s23 + $0x84] sm:$0x1]  ;;  %v3784_v59 = vrot.slane %v3782_v31, 7  ;;  %v4525_v56 = vpack.c.bf16 %v3464_v0, %v3464_v0  ;;  %v3465_v8 = vmax.f32 %v3433_v18, 0.0  ;;  %v2962_v37 = vadd.f32 %v2927_v53, %v2772_v20  ;;  %v5150_v60 = vpop.f32.mrb[121].mxu0 }
 0x2be   : > { %v4040_v19 = vsel %vm6773_vm15, 0, %v4039_v28  ;;  %v3979_v51 = vsel %vm6763_vm14, %v3779_v2, %v3978_v40  ;;  %v2930_v3 = vpop.f32.mrb[122].mxu0  ;;  %v3992_v4 = vld [vmem:[%s6756_s23 + $0xa8] sm:$0xf]  ;;  %v3996_v28 = vld [vmem:[%s6756_s23 + $0xb0] sm:$0x1] }
 0x2bf   : > { %4041 = vst [vmem:[%s6756_s23 + $0x84] sm:$0x1] %v4040_v19  ;;  %3980 = vst [vmem:[%s6756_s23 + $0x90] sm:$0xf] %v3979_v51  ;;  %v3787_v12 = vor.u32 %v3785_v48, %v3784_v59  ;;  %v3789_v49 = vrot.slane %v3784_v59, 4  ;;  %v3791_v43 = vshrl.u32 %v4525_v56, 16  ;;  %v4526_v63 = vpack.c.bf16 %v3465_v8, %v3465_v8 }
 0x2c0   : > { %v5151_v23 = vpop.f32.mrb[123].mxu0  ;;  %v3794_v27 = vshll.u32 %v4525_v56, 16  ;;  %v2992_v35 = vadd.f32 %v2962_v37, %v7291_v11  ;;  %v2963_v10 = vadd.f32 %v2930_v3, %v2775_v24 }
 0x2c1   : > { %v4088_v50 = vld [vmem:[%s6756_s23 + $0x8c] sm:$0x1]  ;;  %v3788_v17 = vsel %vm6779_vm0, %v3780_v54, %v3787_v12  ;;  %v3983_v58 = vsel %vm6773_vm15, %v3789_v49, %v3982_v44  ;;  %v3793_v20 = vrot.slane %v3791_v43, 7  ;;  %v3799_v15 = vshrl.u32 %v4526_v63, 16 }
 0x2c2   : > { %v4089_v21 = vsel %vm6806_vm1, 0, %v4088_v50  ;;  %3981 = vst [vmem:[%s6756_s23 + $0x94] sm:$0xf] %v3788_v17  ;;  %3984 = vst [vmem:[%s6756_s23 + $0x98] sm:$0x1] %v3983_v58  ;;  %v3434_v41 = vadd.f32 %v7070_v34, %v2992_v35  ;;  %v2993_v55 = vadd.f32 %v2963_v10, %v7292_v22  ;;  %v3802_v46 = vshll.u32 %v4526_v63, 16 }
 0x2c3   : > { %4090 = vst [vmem:[%s6756_s23 + $0x8c] sm:$0x1] %v4089_v21  ;;  %v3796_v1 = vor.u32 %v3794_v27, %v3793_v20  ;;  %v3801_v9 = vrot.slane %v3799_v15, 7  ;;  %v3797_v62 = vrot.slane %v3793_v20, 4 }
 0x2c4   : > { %v3466_v5 = vmax.f32 %v3434_v41, 0.0  ;;  %v3435_v30 = vadd.f32 %v7070_v34, %v2993_v55 }
 0x2c5   : > { %v3986_v25 = vsel %vm6763_vm14, %v3796_v1, %v3985_v26  ;;  %v3804_v24 = vor.u32 %v3802_v46, %v3801_v9  ;;  %v3806_v45 = vrot.slane %v3801_v9, 4 }
 0x2c6   : > { %v4042_v6 = vld [vmem:[%s6756_s23 + $0x90] sm:$0x1]  ;;  %3987 = vst [vmem:[%s6756_s23 + $0x9c] sm:$0xf] %v3986_v25  ;;  %v4527_v52 = vpack.c.bf16 %v3466_v5, %v3466_v5  ;;  %v3467_v38 = vmax.f32 %v3435_v30, 0.0 }
 0x2c7   : > { %v4043_v13 = vsel %vm6773_vm15, 0, %v4042_v6  ;;  %v3805_v34 = vsel %vm6779_vm0, %v3797_v62, %v3804_v24  ;;  %v3990_v57 = vsel %vm6773_vm15, %v3806_v45, %v3989_v42 }
 0x2c8   : > { %4044 = vst [vmem:[%s6756_s23 + $0x90] sm:$0x1] %v4043_v13  ;;  %v3808_v7 = vshrl.u32 %v4527_v52, 16  ;;  %3988 = vst [vmem:[%s6756_s23 + $0xa0] sm:$0xf] %v3805_v34  ;;  %v4528_v61 = vpack.c.bf16 %v3467_v38, %v3467_v38  ;;  %v3811_v14 = vshll.u32 %v4527_v52, 16 }
 0x2c9   : > { %v4091_v39 = vld [vmem:[%s6756_s23 + $0x98] sm:$0x1]  ;;  %3991 = vst [vmem:[%s6756_s23 + $0xa4] sm:$0x1] %v3990_v57 }
 0x2ca   : > { %v4092_v33 = vsel %vm6806_vm1, 0, %v4091_v39  ;;  %v3810_v16 = vrot.slane %v3808_v7, 7  ;;  %v3816_v40 = vshrl.u32 %v4528_v61, 16  ;;  %v3819_v2 = vshll.u32 %v4528_v61, 16 }
 0x2cb   : > { %4093 = vst [vmem:[%s6756_s23 + $0x98] sm:$0x1] %v4092_v33 }
 0x2cc   : > { %v3813_v31 = vor.u32 %v3811_v14, %v3810_v16  ;;  %v3818_v18 = vrot.slane %v3816_v40, 7  ;;  %v3814_v59 = vrot.slane %v3810_v16, 4 }
 0x2cd   : > { %v4045_v0 = vld [vmem:[%s6756_s23 + $0x9c] sm:$0x1] }
 0x2ce   : > { %v4046_v48 = vsel %vm6773_vm15, 0, %v4045_v0  ;;  %v3993_v53 = vsel %vm6763_vm14, %v3813_v31, %v3992_v4  ;;  %v3821_v56 = vor.u32 %v3819_v2, %v3818_v18  ;;  %v3823_v8 = vrot.slane %v3818_v18, 4 }
 0x2cf   : > { %4047 = vst [vmem:[%s6756_s23 + $0x9c] sm:$0x1] %v4046_v48  ;;  %3994 = vst [vmem:[%s6756_s23 + $0xa8] sm:$0xf] %v3993_v53 }
 0x2d0   : > { %v4094_v37 = vld [vmem:[%s6756_s23 + $0xa4] sm:$0x1]  ;;  %v3822_v19 = vsel %vm6779_vm0, %v3814_v59, %v3821_v56  ;;  %v3997_v47 = vsel %vm6773_vm15, %v3823_v8, %v3996_v28 }
 0x2d1   : > { %v4095_v60 = vsel %vm6806_vm1, 0, %v4094_v37  ;;  %3995 = vst [vmem:[%s6756_s23 + $0xac] sm:$0xf] %v3822_v19  ;;  %3998 = vst [vmem:[%s6756_s23 + $0xb0] sm:$0x1] %v3997_v47 }
 0x2d2   : > { %4096 = vst [vmem:[%s6756_s23 + $0xa4] sm:$0x1] %v4095_v60 }
 0x2d6   : > { %v4048_v51 = vld [vmem:[%s6756_s23 + $0xa8] sm:$0x1] }
 0x2d7   : > { %v4049_v44 = vsel %vm6773_vm15, 0, %v4048_v51 }
 0x2d8   : > { %4050 = vst [vmem:[%s6756_s23 + $0xa8] sm:$0x1] %v4049_v44  ;;  %v4097_v3 = vld [vmem:[%s6756_s23 + $0xb0] sm:$0x1] }
 0x2d9   : > { %v4098_v54 = vsel %vm6806_vm1, 0, %v4097_v3 }
 0x2da   : > { %4099 = vst [vmem:[%s6756_s23 + $0xb0] sm:$0x1] %v4098_v54 }
 0x2db PF: > { %s15_s20 = sadd.s32 1, %s5460_s20   ;;  %s7293_s18 = smov %s5456_s19 }
 0x2dc   : > { %p12_p5 = scmp.ge.s32.totalorder %s15_s20, 4   ;;  %s7294_s19 = smov %s7296_s1 }
 0x2de   :  { %14 = sbr.rel (!%p12_p5) target bundleno = 2 (0x2), region = 86 }

// kernel: stack_encoder_forward.3
= control target key start
LH: loop header
LB: loop body
LE: loop exit
PB: predicated region body
PF: predicated region fallthrough
CT: control target
= control target key end

     0   :  { %s6498_s21 = smov 0   ;;  %s6500_s22 = smov 0   ;;  %s8472_s0 = inlined_call_operand.vmem [shape: bf16[2,16,18,128], index: 0, kind: input, shape index: {}, may-alias: {0,1,2}]   ;;  %s8473_s1 = inlined_call_operand.vmem [shape: bf16[2,16,18,128], index: 1, kind: input, shape index: {}, may-alias: {0,1,2}]   ;;  %s8474_s2 = inlined_call_operand.vmem [shape: bf16[2,16,18,128], index: 2, kind: input, shape index: {}, may-alias: {0,1,2}]   ;;  %s8475_s3 = inlined_call_operand.vmem [shape: bf16[3,3,128,8], index: 3, kind: input, shape index: {}]   ;;  %s8476_s4 = inlined_call_operand.vmem [shape: f32[1,8], index: 4, kind: input, shape index: {}]   ;;  %s8477_s5 = inlined_call_operand.vmem [shape: f32[2,16,16,8], index: 5, kind: output, shape index: {0}]   ;;  %s8478_s6 = inlined_call_operand.vmem [shape: f32[2,8,8,8], index: 6, kind: output, shape index: {1}]  }
   0x1   :  { %s6502_s1 = smov 0  }
   0x2 LB: > { %s29_s2 = sadd.s32 1, %s6454_s22  ;;  %p5201_p0 = scmp.ge.s32.totalorder %s6458_s1, 1  ;;  %s6458_s1 = sphi %s6502_s1, %s17_s1   ;;  %s6454_s22 = sphi %s6500_s22, %s8581_s22   ;;  %s6450_s21 = sphi %s6498_s21, %s8580_s21  }
   0x3   : > { %p31_p1 = scmp.ge.s32.totalorder %s29_s2, 2  ;;  %p303_p2 = scmp.lt.s32.totalorder %s6458_s1, 3 }
   0x5   : > { %s8583_s2 = smov (%p31_p1, %s29_s2), 0  ;;  %p304_p3 = pnand %p5201_p0, %p303_p2 }
   0x7   : > { %307 = sbr.rel (%p304_p3) target bundleno = 777 (0x309), region = 40 }
   0xe   : > { %v6338_v0 = vld [vmem:[%s8475_s3 + $0x100] sm:$0xff]   ;;  %v8479_v1 = vmov 0.0   ;;  %v6340_v3 = vld [vmem:[%s8475_s3 + $0x108] sm:$0xff]   ;;  %vm6461_vm0 = vmmov 0   ;;  %p379_p4 = scmp.lt.s32.totalorder %s6450_s21, 1  ;;  %v6342_v5 = vld [vmem:[%s8475_s3 + $0x110] sm:$0xff]  }
   0xf   : > { %5774 = vmatprep.subr.bf16.mxu1 %v8479_v1  ;;  %v6339_v2 = vld [vmem:[%s8475_s3 + $0x40] sm:$0xff]   ;;  %5630 = vmatprep.subr.bf16.mxu0 %v6338_v0  ;;  %v6341_v4 = vld [vmem:[%s8475_s3 + $0x48] sm:$0xff]   ;;  %v6343_v6 = vld [vmem:[%s8475_s3 + $0x50] sm:$0xff]   ;;  %vm637_vm1 = vsmask.f32 3328  ;;  %vm1618_vm4 = vcmask 1042432  }
  0x10   : > { %5790 = vmatprep.mubr.msk.bf16.mxu1 %vm6461_vm0, %v8479_v1  ;;  %5775 = vmatpush3.bf16.msra.mxu1 %v6339_v2  ;;  %s8585_s21 = smov (!%p379_p4, %s6450_s21), 1  ;;  %v6344_v7 = vld [vmem:[%s8475_s3 + $0x118] sm:$0xff]   ;;  %v6346_v9 = vld [vmem:[%s8475_s3 + $0x120] sm:$0xff]   ;;  %v6348_v11 = vld [vmem:[%s8475_s3 + $0x128] sm:$0xff]   ;;  %vm638_vm2 = vsmask.f32 7440 }
  0x11   : > { %5631 = vmatpush3.bf16.msra.mxu0 %v6338_v0  ;;  %5776 = vmatprep.subr.bf16.mxu1 %v8479_v1  ;;  %s6310_s13 = smul.u32 192, %s8585_s21  ;;  %v6345_v8 = vld [vmem:[%s8475_s3 + $0x58] sm:$0xff]   ;;  %v6347_v10 = vld [vmem:[%s8475_s3 + $0x60] sm:$0xff]   ;;  %v6349_v17 = vld [vmem:[%s8475_s3 + $0x68] sm:$0xff]   ;;  %vm1619_vm5 = vcmask 1046532   ;;  %vm2038_vm7 = vcmask 64512  }
  0x12   : > { %5632 = vmatprep.subr.bf16.mxu0 %v6340_v3  ;;  %v6350_v26 = vld [vmem:[%s8475_s3 + $0x130] sm:$0xff]   ;;  %v6352_v35 = vld [vmem:[%s8475_s3 + $0x138] sm:$0xff]   ;;  %vm6601_vm3 = vmor %vm637_vm1, %vm638_vm2  ;;  %s5418_s19 = sshll.u32 %s8585_s21, 8  ;;  %vm4930_vm8 = vcmask 1041409   ;;  %vm4932_vm9 = vcmask 1042434   ;;  %vm4934_vm10 = vcmask 1043459  }
  0x13   : > { %s6555_s20 = scalar_lea.vmem %s8472_s0, %s6310_s13  ;;  %v6351_v30 = vld [vmem:[%s8475_s3 + $0x70] sm:$0xff]   ;;  %v6353_v55 = vld [vmem:[%s8475_s3 + $0x78] sm:$0xff]   ;;  %v6354_v0 = vld [vmem:[%s8475_s3 + $0xc0] sm:$0xff]   ;;  %s7981_s25 = scalar_lea.vmem %s8477_s5, %s5418_s19  ;;  %vm4936_vm11 = vcmask 1044484   ;;  %vm4938_vm12 = vcmask 1045509   ;;  %vm4940_vm13 = vcmask 1046534  }
  0x14   : > { %5777 = vmatpush3.bf16.msra.mxu1 %v6341_v4  ;;  %v6565_v12 = vld [vmem:[%s6555_s20] sm:$0xf]  ;;  %v6568_v13 = vld [vmem:[%s6555_s20 + $0x4] sm:$0xf]  ;;  %v447_v14 = vld [vmem:[%s6555_s20 + $0x8] sm:$0x1] }
  0x15   : > { %5633 = vmatpush3.bf16.msra.mxu0 %v6340_v3  ;;  %5778 = vmatprep.subr.bf16.mxu1 %v8479_v1  ;;  %v641_v15 = vshrl.u32 %v6565_v12, 16  ;;  %v644_v16 = vshll.u32 %v6565_v12, 16  ;;  %v650_v18 = vshll.u32 %v6568_v13, 16  ;;  %v654_v19 = vshrl.u32 %v6568_v13, 16  ;;  %v6579_v21 = vld [vmem:[%s6555_s20 + $0xc] sm:$0xf]  ;;  %vm7061_vm6 = vmor %vm1618_vm4, %vm1619_vm5 }
  0x16   : > { %5634 = vmatprep.subr.bf16.mxu0 %v6342_v5  ;;  %v660_v20 = vshll.u32 %v447_v14, 16  ;;  %v6582_v24 = vld [vmem:[%s6555_s20 + $0x10] sm:$0xf]  ;;  %v450_v25 = vld [vmem:[%s6555_s20 + $0x14] sm:$0x1]  ;;  %v665_v29 = vshrl.u32 %v6579_v21, 16 }
  0x17   : > { %v643_v22 = vrot.slane %v641_v15, 4  ;;  %v646_v23 = vrot.slane %v644_v16, 5  ;;  %v652_v27 = vrot.slane %v650_v18, 5  ;;  %v656_v28 = vrot.slane %v654_v19, 4  ;;  %v6607_v47 = vld [vmem:[%s6555_s20 + $0x18] sm:$0xf] }
  0x18   : > { %5779 = vmatpush3.bf16.msra.mxu1 %v6343_v6  ;;  %v668_v32 = vshll.u32 %v6579_v21, 16  ;;  %v674_v33 = vshll.u32 %v6582_v24, 16  ;;  %v678_v34 = vshrl.u32 %v6582_v24, 16  ;;  %v662_v38 = vrot.slane %v660_v20, 5  ;;  %v6610_v48 = vld [vmem:[%s6555_s20 + $0x1c] sm:$0xf] }
  0x19   : > { %5635 = vmatpush3.bf16.msra.mxu0 %v6342_v5  ;;  %5780 = vmatprep.subr.bf16.mxu1 %v8479_v1  ;;  %v647_v31 = vor.u32 %v646_v23, %v643_v22  ;;  %v657_v37 = vor.u32 %v656_v28, %v652_v27  ;;  %v667_v39 = vrot.slane %v665_v29, 4  ;;  %v684_v40 = vshll.u32 %v450_v25, 16  ;;  %v453_v52 = vld [vmem:[%s6555_s20 + $0x20] sm:$0x1]  ;;  %v6617_v54 = vld [vmem:[%s6555_s20 + $0x24] sm:$0xf] }
  0x1a   : > { %5636 = vmatprep.subr.bf16.mxu0 %v6344_v7  ;;  %v670_v42 = vrot.slane %v668_v32, 5  ;;  %v676_v43 = vrot.slane %v674_v33, 5  ;;  %v680_v44 = vrot.slane %v678_v34, 4  ;;  %v689_v53 = vshrl.u32 %v6607_v47, 16  ;;  %v6628_v60 = vld [vmem:[%s6555_s20 + $0x28] sm:$0xf] }
  0x1b   : > { %v648_v41 = vrot.slane %v647_v31, 4  ;;  %v658_v45 = vrot.slane %v657_v37, 4  ;;  %v686_v46 = vrot.slane %v684_v40, 5  ;;  %v692_v57 = vshll.u32 %v6607_v47, 16  ;;  %v6634_v3 = vld [vmem:[%s6555_s20 + $0x2c] sm:$0x1] }
  0x1c   : > { %5781 = vmatpush3.bf16.msra.mxu1 %v6345_v8  ;;  %v671_v50 = vor.u32 %v670_v42, %v667_v39  ;;  %v681_v51 = vor.u32 %v680_v44, %v676_v43  ;;  %v698_v58 = vshll.u32 %v6610_v48, 16  ;;  %v702_v59 = vshrl.u32 %v6610_v48, 16  ;;  %v6644_v14 = vld [vmem:[%s6555_s20 + $0x30] sm:$0xf]  ;;  %v6355_v16 = vld [vmem:[%s8475_s3] sm:$0xff]   ;;  %v6356_v20 = vld [vmem:[%s8475_s3 + $0xc8] sm:$0xff]  }
  0x1d   : > { %5637 = vmatpush3.bf16.msra.mxu0 %v6344_v7  ;;  %5782 = vmatprep.subr.bf16.mxu1 %v8479_v1  ;;  %v653_v49 = vsel %vm6601_vm3, %v648_v41, %v652_v27  ;;  %v663_v56 = vsel %vm6601_vm3, %v658_v45, %v662_v38  ;;  %v691_v2 = vrot.slane %v689_v53, 4  ;;  %v694_v4 = vrot.slane %v692_v57, 5  ;;  %v6657_v27 = vld [vmem:[%s6555_s20 + $0x34] sm:$0xf]  ;;  %v6662_v31 = vld [vmem:[%s6555_s20 + $0x38] sm:$0x1] }
  0x1e   : > { %5638 = vmatprep.subr.bf16.mxu0 %v6346_v9  ;;  %v5209_v61 = vcombine.low %v653_v49, %v663_v56  ;;  %v672_v62 = vrot.slane %v671_v50, 4  ;;  %v682_v63 = vrot.slane %v681_v51, 4  ;;  %v700_v5 = vrot.slane %v698_v58, 5  ;;  %v6667_v38 = vld [vmem:[%s6555_s20 + $0x3c] sm:$0xf]  ;;  %v6358_v39 = vld [vmem:[%s8475_s3 + $0x8] sm:$0xff]  }
  0x1f   : > { %v704_v6 = vrot.slane %v702_v59, 4  ;;  %v708_v7 = vshll.u32 %v453_v52, 16  ;;  %v722_v25 = vshll.u32 %v6628_v60, 16  ;;  %v737_v32 = vshrl.u32 %v6644_v14, 16  ;;  %v6357_v44 = vld [vmem:[%s8475_s3 + $0xd0] sm:$0xff]   ;;  %v6402_v36 = vld [vmem:[%s8475_s3 + $0x1d8] sm:$0xff]  }
  0x20   : > { %5783 = vmatpush3.bf16.msra.mxu1 %v6347_v10  ;;  %5646 = vmatprep.mubr.bf16.mxu0 %v5209_v61  ;;  %v677_v8 = vsel %vm6601_vm3, %v672_v62, %v676_v43  ;;  %v713_v10 = vshrl.u32 %v6617_v54, 16  ;;  %v740_v37 = vshll.u32 %v6644_v14, 16  ;;  %v746_v51 = vshll.u32 %v6657_v27, 16 }
  0x21   : > { %5639 = vmatpush3.bf16.msra.mxu0 %v6346_v9  ;;  %5784 = vmatprep.subr.bf16.mxu1 %v8479_v1  ;;  %v687_v9 = vsel %vm6601_vm3, %v682_v63, %v686_v46  ;;  %v705_v18 = vor.u32 %v704_v6, %v700_v5  ;;  %v710_v19 = vrot.slane %v708_v7, 5  ;;  %v724_v34 = vrot.slane %v722_v25, 5 }
  0x22   : > { %5640 = vmatprep.subr.bf16.mxu0 %v6348_v11  ;;  %v6646_v15 = vcombine.low %v677_v8, %v687_v9  ;;  %v715_v22 = vrot.slane %v713_v10, 4  ;;  %v739_v43 = vrot.slane %v737_v32, 4  ;;  %v742_v50 = vrot.slane %v740_v37, 5  ;;  %v6359_v10 = vld [vmem:[%s8475_s3 + $0xd8] sm:$0xff]  }
  0x23   : > { %v706_v29 = vrot.slane %v705_v18, 4  ;;  %v750_v52 = vshrl.u32 %v6657_v27, 16  ;;  %v756_v53 = vshll.u32 %v6662_v31, 16  ;;  %v761_v56 = vshrl.u32 %v6667_v38, 16 }
  0x24   : > { %5785 = vmatpush3.bf16.msra.mxu1 %v6349_v17  ;;  %8517 = vst [vmem:[#allocation3_spill] sm:$0xff] %v6646_v15  ;;  %v695_v17 = vor.u32 %v694_v4, %v691_v2  ;;  %v743_v59 = vor.u32 %v742_v50, %v739_v43  ;;  %v764_v62 = vshll.u32 %v6667_v38, 16  ;;  %v748_v63 = vrot.slane %v746_v51, 5 }
  0x25   : > { %5641 = vmatpush3.bf16.msra.mxu0 %v6348_v11  ;;  %5786 = vmatprep.subr.bf16.mxu1 %v8479_v1  ;;  %v716_v11 = vshll.u32 %v6617_v54, 16  ;;  %v711_v41 = vsel %vm6601_vm3, %v706_v29, %v710_v19  ;;  %v758_v2 = vrot.slane %v756_v53, 5  ;;  %v763_v4 = vrot.slane %v761_v56, 4  ;;  %v6751_v56 = vld [vmem:[%s6555_s20 + $0x5c] sm:$0x1] }
  0x26   : > { %5642 = vmatprep.subr.bf16.mxu0 %v6350_v26  ;;  %v696_v28 = vrot.slane %v695_v17, 4  ;;  %v744_v7 = vrot.slane %v743_v59, 4  ;;  %v766_v8 = vrot.slane %v764_v62, 5  ;;  %8522 = vst [vmem:[#allocation8_spill] sm:$0xff] %v6751_v56  ;;  %vm4942_vm14 = vcmask 1047559  }
  0x27   : > { %v718_v23 = vrot.slane %v716_v11, 5  ;;  %v6360_v11 = vld [vmem:[%s8475_s3 + $0x10] sm:$0xff]  }
  0x28   : > { %5787 = vmatpush3.bf16.msra.mxu1 %v6351_v30  ;;  %v732_v30 = vshll.u32 %v6634_v3, 16  ;;  %v701_v40 = vsel %vm6601_vm3, %v696_v28, %v700_v5  ;;  %v6700_v5 = vld [vmem:[%s6555_s20 + $0x48] sm:$0xf] }
  0x29   : > { %5643 = vmatpush3.bf16.msra.mxu0 %v6350_v26  ;;  %5788 = vmatprep.subr.bf16.mxu1 %v8479_v1  ;;  %v726_v26 = vshrl.u32 %v6628_v60, 16  ;;  %v719_v33 = vor.u32 %v718_v23, %v715_v22  ;;  %v6680_v45 = vcombine.low %v701_v40, %v711_v41  ;;  %v749_v22 = vsel %vm6601_vm3, %v744_v7, %v748_v63 }
  0x2a   : > { %5644 = vmatprep.subr.bf16.mxu0 %v6352_v35  ;;  %v734_v42 = vrot.slane %v732_v30, 5  ;;  %v767_v23 = vor.u32 %v766_v8, %v763_v4  ;;  %v785_v28 = vshrl.u32 %v6700_v5, 16 }
  0x2b   : > { %8518 = vst [vmem:[#allocation4_spill] sm:$0xff] %v6680_v45  ;;  %v720_v46 = vrot.slane %v719_v33, 4  ;;  %v788_v33 = vshll.u32 %v6700_v5, 16 }
  0x2c   : > { %5789 = vmatpush3.bf16.msra.mxu1 %v6353_v55  ;;  %v6688_v55 = vld [vmem:[%s6555_s20 + $0x40] sm:$0xf]  ;;  %v768_v37 = vrot.slane %v767_v23, 4 }
  0x2d   : > { %5645 = vmatpush3.bf16.msra.mxu0 %v6352_v35  ;;  %5850 = vmatprep.subr.bf16.mxu1 %v8479_v1  ;;  %v728_v35 = vrot.slane %v726_v26, 4  ;;  %v725_v57 = vsel %vm6601_vm3, %v720_v46, %v724_v34  ;;  %v770_v9 = vshll.u32 %v6688_v55, 16  ;;  %v774_v18 = vshrl.u32 %v6688_v55, 16  ;;  %v6722_v26 = vld [vmem:[%s6555_s20 + $0x50] sm:$0x1] }
  0x2e   : > { %5678 = vmatprep.subr.bf16.mxu0 %v6354_v0  ;;  %8520 = vst [vmem:[#allocation6_spill] sm:$0xff] %v6722_v26  ;;  %v804_v50 = vshll.u32 %v6722_v26, 16 }
  0x2f   : > { %5791 = vmatmul.mubr.bf16.vlgmr.msra.gmra.mrb[0].mxu1 %v5209_v61  ;;  %v729_v49 = vor.u32 %v728_v35, %v724_v34  ;;  %v6696_v61 = vld [vmem:[%s6555_s20 + $0x44] sm:$0x1]  ;;  %v772_v25 = vrot.slane %v770_v9, 5  ;;  %v776_v30 = vrot.slane %v774_v18, 4  ;;  %v6729_v34 = vld [vmem:[%s6555_s20 + $0x54] sm:$0xf] }
  0x30   : > { %5647 = vmatmul.mubr.bf16.vlgmr.msra.gmra.mrb[0].mxu0 %v6646_v15  ;;  %5851 = vmatpush3.bf16.msra.mxu1 %v6355_v16  ;;  %v780_v19 = vshll.u32 %v6696_v61, 16  ;;  %v6734_v35 = vld [vmem:[%s8475_s3 + $0xe0] sm:$0xff]   ;;  %v806_v62 = vrot.slane %v804_v50, 5  ;;  %v828_v18 = vshll.u32 %v6751_v56, 16 }
  0x31   : > { %5679 = vmatpush3.bf16.msra.mxu0 %v6354_v0  ;;  %5794 = vmatprep.mubr.msk.bf16.mxu1 %vm6461_vm0, %v8479_v1  ;;  %v730_v58 = vrot.slane %v729_v49, 4  ;;  %v752_v0 = vrot.slane %v750_v52, 4  ;;  %v777_v46 = vor.u32 %v776_v30, %v772_v25  ;;  %v790_v49 = vrot.slane %v788_v33, 5  ;;  %v6785_v33 = vld [vmem:[%s6555_s20 + $0x68] sm:$0x1] }
  0x32   : > { %5680 = vmatprep.subr.bf16.mxu0 %v6356_v20  ;;  %5650 = vmatprep.mubr.bf16.mxu0 %v6680_v45  ;;  %v782_v32 = vrot.slane %v780_v19, 5  ;;  %8524 = vst [vmem:[#allocation10_spill] sm:$0xff] %v6785_v33 }
  0x33   : > { %5852 = vmatprep.subr.bf16.mxu1 %v8479_v1  ;;  %v735_v6 = vsel %vm6601_vm3, %v730_v58, %v734_v42  ;;  %v753_v17 = vor.u32 %v752_v0, %v748_v63  ;;  %v6741_v42 = vld [vmem:[%s6555_s20 + $0x58] sm:$0xf]  ;;  %v778_v58 = vrot.slane %v777_v46, 4  ;;  %v809_v63 = vshrl.u32 %v6729_v34, 16  ;;  %v6759_v0 = vld [vmem:[%s6555_s20 + $0x64] sm:$0xf] }
  0x34   : > { %5853 = vmatpush3.bf16.msra.mxu1 %v6358_v39  ;;  %v6711_v16 = vcombine.low %v725_v57, %v735_v6  ;;  %v787_v39 = vrot.slane %v785_v28, 4  ;;  %v6754_v57 = vld [vmem:[%s6555_s20 + $0x60] sm:$0xf]  ;;  %v812_v6 = vshll.u32 %v6729_v34, 16  ;;  %v818_v7 = vshll.u32 %v6741_v42, 16 }
  0x35   : > { %5681 = vmatpush3.bf16.msra.mxu0 %v6356_v20  ;;  %v6716_v20 = vld [vmem:[%s6555_s20 + $0x4c] sm:$0xf]  ;;  %5854 = vmatprep.subr.bf16.mxu1 %v8479_v1  ;;  %v754_v29 = vrot.slane %v753_v17, 4  ;;  %v822_v8 = vshrl.u32 %v6741_v42, 16  ;;  %v783_v9 = vsel %vm6601_vm3, %v778_v58, %v782_v32  ;;  %v811_v17 = vrot.slane %v809_v63, 4  ;;  %v6366_v28 = vld [vmem:[%s8475_s3 + $0x20] sm:$0xff]  }
  0x36   : > { %8519 = vst [vmem:[#allocation5_spill] sm:$0xff] %v6711_v16  ;;  %5682 = vmatprep.subr.bf16.mxu0 %v6357_v44  ;;  %v794_v40 = vshll.u32 %v6716_v20, 16  ;;  %v798_v41 = vshrl.u32 %v6716_v20, 16  ;;  %v791_v59 = vor.u32 %v790_v49, %v787_v39  ;;  %v814_v23 = vrot.slane %v812_v6, 5  ;;  %v6796_v46 = vld [vmem:[%s6555_s20 + $0x6c] sm:$0xf] }
  0x37   : > { %5795 = vmatmul.mubr.bf16.gmra.mrb[4].mxu1 %v6646_v15  ;;  %v759_v43 = vsel %vm6601_vm3, %v754_v29, %v758_v2  ;;  %v6363_v2 = vld [vmem:[%s8475_s3 + $0x18] sm:$0xff]   ;;  %v824_v30 = vrot.slane %v822_v8, 4  ;;  %v830_v32 = vrot.slane %v828_v18, 5  ;;  %v6364_v58 = vld [vmem:[%s8475_s3 + $0xf0] sm:$0xff]   ;;  %v857_v8 = vshrl.u32 %v6796_v46, 16 }
  0x38   : > { %5651 = vmatmul.mubr.bf16.gmra.mrb[4].mxu0 %v6711_v16  ;;  %5798 = vmatprep.mubr.msk.bf16.mxu1 %vm6461_vm0, %v8479_v1  ;;  %v6746_v51 = vcombine.low %v749_v22, %v759_v43  ;;  %v796_v52 = vrot.slane %v794_v40, 5  ;;  %v800_v53 = vrot.slane %v798_v41, 4  ;;  %v815_v40 = vor.u32 %v814_v23, %v811_v17  ;;  %v6813_v6 = vld [vmem:[%s6555_s20 + $0x78] sm:$0xf] }
  0x39   : > { %5683 = vmatpush3.bf16.msra.mxu0 %v6357_v44  ;;  %5855 = vmatpush3.bf16.msra.mxu1 %v6360_v11  ;;  %v773_v44 = vsel %vm6601_vm3, %v768_v37, %v772_v25  ;;  %v792_v11 = vrot.slane %v791_v59, 4  ;;  %v820_v25 = vrot.slane %v818_v7, 5  ;;  %v833_v37 = vshrl.u32 %v6754_v57, 16 }
  0x3a   : > { %5684 = vmatprep.subr.bf16.mxu0 %v6359_v10  ;;  %8521 = vst [vmem:[#allocation7_spill] sm:$0xff] %v6746_v51  ;;  %5856 = vmatprep.subr.bf16.mxu1 %v8479_v1  ;;  %v801_v4 = vor.u32 %v800_v53, %v796_v52  ;;  %v6772_v19 = vcombine.low %v773_v44, %v783_v9  ;;  %v836_v41 = vshll.u32 %v6754_v57, 16  ;;  %v842_v43 = vshll.u32 %v6759_v0, 16  ;;  %v6802_v53 = vld [vmem:[%s6555_s20 + $0x70] sm:$0xf] }
  0x3b   : > { %5654 = vmatprep.mubr.bf16.mxu0 %v6746_v51  ;;  %v797_v29 = vsel %vm6601_vm3, %v792_v11, %v796_v52  ;;  %v825_v50 = vor.u32 %v824_v30, %v820_v25  ;;  %v835_v44 = vrot.slane %v833_v37, 4  ;;  %v846_v52 = vshrl.u32 %v6759_v0, 16  ;;  %v6825_v37 = vld [vmem:[%s6555_s20 + $0x7c] sm:$0xf] }
  0x3c   : > { %8523 = vst [vmem:[#allocation9_spill] sm:$0xff] %v6772_v19  ;;  %v802_v22 = vrot.slane %v801_v4, 4  ;;  %v816_v59 = vrot.slane %v815_v40, 4  ;;  %v844_v63 = vrot.slane %v842_v43, 5  ;;  %v6810_v4 = vld [vmem:[%s6555_s20 + $0x74] sm:$0x1] }
  0x3d   : > { %5685 = vmatpush3.bf16.msra.mxu0 %v6359_v10  ;;  %5857 = vmatpush3.bf16.msra.mxu1 %v6363_v2  ;;  %v6362_v10 = vld [vmem:[%s8475_s3 + $0xe8] sm:$0xff]   ;;  %v852_v2 = vshll.u32 %v6785_v33, 16  ;;  %8525 = vst [vmem:[#allocation11_spill] sm:$0xff] %v6810_v4  ;;  %v848_v7 = vrot.slane %v846_v52, 4  ;;  %v860_v9 = vshll.u32 %v6796_v46, 16  ;;  %v6365_v43 = vld [vmem:[%s8475_s3 + $0xf8] sm:$0xff]  }
  0x3e   : > { %5686 = vmatprep.subr.bf16.mxu0 %v6734_v35  ;;  %5858 = vmatprep.subr.bf16.mxu1 %v8479_v1  ;;  %v807_v39 = vsel %vm6601_vm3, %v802_v22, %v806_v62  ;;  %v838_v62 = vrot.slane %v836_v41, 5  ;;  %v821_v11 = vsel %vm6601_vm3, %v816_v59, %v820_v25  ;;  %v866_v22 = vshll.u32 %v6802_v53, 16  ;;  %v6373_v59 = vld [vmem:[%s8475_s3 + $0x28] sm:$0xff]  }
  0x3f   : > { %5799 = vmatmul.mubr.bf16.gmra.mrb[8].mxu1 %v6680_v45  ;;  %v6798_v49 = vcombine.low %v797_v29, %v807_v39  ;;  %v854_v18 = vrot.slane %v852_v2, 5  ;;  %v859_v29 = vrot.slane %v857_v8, 4  ;;  %v862_v30 = vrot.slane %v860_v9, 5  ;;  %v6850_v8 = vld [vmem:[%s6555_s20 + $0x84] sm:$0xf] }
  0x40   : > { %5655 = vmatmul.mubr.bf16.gmra.mrb[8].mxu0 %v6772_v19  ;;  %5802 = vmatprep.mubr.msk.bf16.mxu1 %vm6461_vm0, %v8479_v1  ;;  %v839_v17 = vor.u32 %v838_v62, %v835_v44  ;;  %v868_v41 = vrot.slane %v866_v22, 5  ;;  %v870_v25 = vshrl.u32 %v6802_v53, 16  ;;  %v876_v44 = vshll.u32 %v6810_v4, 16  ;;  %v6909_v45 = vld [vmem:[%s6555_s20 + $0xa0] sm:$0xf] }
  0x41   : > { %5687 = vmatpush3.bf16.msra.mxu0 %v6734_v35  ;;  %5859 = vmatpush3.bf16.msra.mxu1 %v6366_v28  ;;  %v826_v35 = vrot.slane %v825_v50, 4  ;;  %v849_v28 = vor.u32 %v848_v7, %v844_v63  ;;  %v863_v50 = vor.u32 %v862_v30, %v859_v29  ;;  %v881_v52 = vshrl.u32 %v6813_v6, 16 }
  0x42   : > { %5688 = vmatprep.subr.bf16.mxu0 %v6362_v10  ;;  %5860 = vmatprep.subr.bf16.mxu1 %v8479_v1  ;;  %v840_v40 = vrot.slane %v839_v17, 4  ;;  %v872_v2 = vrot.slane %v870_v25, 4  ;;  %v890_v7 = vshll.u32 %v6825_v37, 16  ;;  %v878_v17 = vrot.slane %v876_v44, 5 }
  0x43   : > { %5658 = vmatprep.mubr.bf16.mxu0 %v6798_v49  ;;  %v831_v23 = vsel %vm6601_vm3, %v826_v35, %v830_v32  ;;  %v850_v32 = vrot.slane %v849_v28, 4  ;;  %v884_v35 = vshll.u32 %v6813_v6, 16  ;;  %v883_v22 = vrot.slane %v881_v52, 4 }
  0x44   : > { %v6827_v39 = vcombine.low %v821_v11, %v831_v23  ;;  %v845_v62 = vsel %vm6601_vm3, %v840_v40, %v844_v63  ;;  %v864_v11 = vrot.slane %v863_v50, 4  ;;  %v6855_v23 = vld [vmem:[%s6555_s20 + $0x88] sm:$0xf]  ;;  %v6860_v63 = vld [vmem:[%s8475_s3 + $0x140] sm:$0xff]   ;;  %v873_v29 = vor.u32 %v872_v2, %v868_v41  ;;  %v6380_v50 = vld [vmem:[%s8475_s3 + $0x30] sm:$0xff]  }
  0x45   : > { %5689 = vmatpush3.bf16.msra.mxu0 %v6362_v10  ;;  %v6836_v10 = vld [vmem:[%s6555_s20 + $0x80] sm:$0x1]  ;;  %v855_v9 = vsel %vm6601_vm3, %v850_v32, %v854_v18  ;;  %8527 = vst [vmem:[#allocation13_spill] sm:$0xff] %v6860_v63  ;;  %5861 = vmatpush3.bf16.msra.mxu1 %v6373_v59  ;;  %v886_v30 = vrot.slane %v884_v35, 5  ;;  %v892_v40 = vrot.slane %v890_v7, 5  ;;  %v905_v32 = vshrl.u32 %v6850_v8, 16 }
  0x46   : > { %5690 = vmatprep.subr.bf16.mxu0 %v6364_v58  ;;  %8526 = vst [vmem:[#allocation12_spill] sm:$0xff] %v6836_v10  ;;  %v6862_v28 = vcombine.low %v845_v62, %v855_v9  ;;  %5862 = vmatprep.subr.bf16.mxu1 %v8479_v1  ;;  %v869_v18 = vsel %vm6601_vm3, %v864_v11, %v868_v41  ;;  %v900_v25 = vshll.u32 %v6836_v10, 16  ;;  %v874_v44 = vrot.slane %v873_v29, 4  ;;  %v6875_v59 = vld [vmem:[%s6555_s20 + $0x8c] sm:$0x1] }
  0x47   : > { %5803 = vmatmul.mubr.bf16.gmra.mrb[12].mxu1 %v6711_v16  ;;  %v887_v52 = vor.u32 %v886_v30, %v883_v22  ;;  %8528 = vst [vmem:[#allocation14_spill] sm:$0xff] %v6875_v59  ;;  %v908_v62 = vshll.u32 %v6850_v8, 16  ;;  %v914_v41 = vshll.u32 %v6855_v23, 16  ;;  %v907_v7 = vrot.slane %v905_v32, 4  ;;  %v6881_v11 = vld [vmem:[%s6555_s20 + $0x90] sm:$0xf] }
  0x48   : > { %5659 = vmatmul.mubr.bf16.gmra.mrb[12].mxu0 %v6827_v39  ;;  %5806 = vmatprep.mubr.msk.bf16.mxu1 %vm6461_vm0, %v8479_v1  ;;  %v902_v35 = vrot.slane %v900_v25, 5  ;;  %v918_v9 = vshrl.u32 %v6855_v23, 16  ;;  %v879_v29 = vsel %vm6601_vm3, %v874_v44, %v878_v17  ;;  %v6886_v16 = vld [vmem:[%s6555_s20 + $0x94] sm:$0xf]  ;;  %v6895_v17 = vld [vmem:[%s6555_s20 + $0x98] sm:$0x1] }
  0x49   : > { %5691 = vmatpush3.bf16.msra.mxu0 %v6364_v58  ;;  %v894_v58 = vshrl.u32 %v6825_v37, 16  ;;  %5662 = vmatprep.mubr.bf16.mxu0 %v6862_v28  ;;  %v888_v22 = vrot.slane %v887_v52, 4  ;;  %v910_v30 = vrot.slane %v908_v62, 5  ;;  %v916_v1 = vrot.slane %v914_v41, 5  ;;  %8531 = vst [vmem:[#allocation16_spill] sm:$0xff] %v6895_v17 }
  0x4a   : > { %5692 = vmatprep.subr.bf16.mxu0 %v6365_v43  ;;  %5863 = vmatpush3.bf16.msra.mxu1 %v6380_v50  ;;  %v6891_v25 = vcombine.low %v869_v18, %v879_v29  ;;  %v920_v32 = vrot.slane %v918_v9, 4  ;;  %v924_v50 = vshll.u32 %v6875_v59, 16  ;;  %v929_v62 = vshrl.u32 %v6881_v11, 16  ;;  %v6904_v41 = vld [vmem:[%s6555_s20 + $0x9c] sm:$0xf] }
  0x4b   : > { %v896_v2 = vrot.slane %v894_v58, 4  ;;  %v8529_v58 = vmov 0.0   ;;  %v893_v44 = vsel %vm6601_vm3, %v888_v22, %v892_v40  ;;  %v911_v52 = vor.u32 %v910_v30, %v907_v7  ;;  %v6916_v59 = vld [vmem:[%s6555_s20 + $0xa4] sm:$0x1] }
  0x4c   : > { %5864 = vmatprep.subr.bf16.mxu1 %v8529_v58  ;;  %8530 = vst [vmem:[#allocation15_spill] sm:$0xff] %v6891_v25  ;;  %v932_v18 = vshll.u32 %v6881_v11, 16  ;;  %v921_v9 = vor.u32 %v920_v32, %v916_v1  ;;  %v926_v29 = vrot.slane %v924_v50, 5  ;;  %v931_v22 = vrot.slane %v929_v62, 4  ;;  %8532 = vst [vmem:[#allocation17_spill] sm:$0xff] %v6916_v59 }
  0x4d   : > { %5693 = vmatpush3.bf16.msra.mxu0 %v6365_v43  ;;  %v897_v43 = vor.u32 %v896_v2, %v892_v40  ;;  %v6387_v40 = vld [vmem:[%s8475_s3 + $0x38] sm:$0xff]   ;;  %v912_v7 = vrot.slane %v911_v52, 4  ;;  %v942_v15 = vshrl.u32 %v6886_v16, 16  ;;  %v948_v10 = vshll.u32 %v6895_v17, 16 }
  0x4e   : > { %5726 = vmatprep.subr.bf16.mxu0 %v6860_v63  ;;  %v934_v30 = vrot.slane %v932_v18, 5  ;;  %v922_v32 = vrot.slane %v921_v9, 4  ;;  %5865 = vmatpush3.bf16.msra.mxu1 %v6387_v40  ;;  %v956_v9 = vshll.u32 %v6904_v41, 16  ;;  %v6934_v40 = vld [vmem:[%s6555_s20 + $0xac] sm:$0xf] }
  0x4f   : > { %5807 = vmatmul.mubr.bf16.gmra.mrb[16].mxu1 %v6746_v51  ;;  %v898_v2 = vrot.slane %v897_v43, 4  ;;  %v938_v51 = vshll.u32 %v6886_v16, 16  ;;  %v917_v52 = vsel %vm6601_vm3, %v912_v7, %v916_v1  ;;  %v944_v18 = vrot.slane %v942_v15, 4  ;;  %6002 = vmatprep.subr.bf16.mxu1 %v8529_v58 }
  0x50   : > { %5810 = vmatprep.mubr.msk.bf16.mxu1 %vm6461_vm0, %v8529_v58  ;;  %5663 = vmatmul.mubr.bf16.gmra.mrb[16].mxu0 %v6891_v25  ;;  %v6922_v25 = vld [vmem:[%s6555_s20 + $0xa8] sm:$0xf]  ;;  %v935_v62 = vor.u32 %v934_v30, %v931_v22  ;;  %v962_v7 = vshll.u32 %v6909_v45, 16  ;;  %v972_v30 = vshll.u32 %v6916_v59, 16  ;;  %v6957_v59 = vld [vmem:[%s6555_s20 + $0xb8] sm:$0xf] }
  0x51   : > { %v903_v43 = vsel %vm6601_vm3, %v898_v2, %v902_v35  ;;  %v940_v50 = vrot.slane %v938_v51, 5  ;;  %v927_v35 = vsel %vm6601_vm3, %v922_v32, %v926_v29  ;;  %v950_v51 = vrot.slane %v948_v10, 5  ;;  %v6947_v32 = vld [vmem:[%s6555_s20 + $0xb4] sm:$0xf] }
  0x52   : > { %v6924_v4 = vcombine.low %v893_v44, %v903_v43  ;;  %v953_v2 = vshrl.u32 %v6904_v41, 16  ;;  %v6937_v44 = vcombine.low %v917_v52, %v927_v35  ;;  %v936_v1 = vrot.slane %v935_v62, 4  ;;  %v6944_v43 = vld [vmem:[%s6555_s20 + $0xb0] sm:$0x1] }
  0x53   : > { %v945_v15 = vor.u32 %v944_v18, %v940_v50  ;;  %v958_v29 = vrot.slane %v956_v9, 5  ;;  %v966_v10 = vshrl.u32 %v6909_v45, 16  ;;  %8535 = vst [vmem:[#allocation20_spill] sm:$0xff] %v6944_v43  ;;  %v964_v18 = vrot.slane %v962_v7, 5 }
  0x54   : > { %8533 = vst [vmem:[#allocation18_spill] sm:$0xff] %v6924_v4  ;;  %5666 = vmatprep.mubr.bf16.mxu0 %v6924_v4  ;;  %8534 = vst [vmem:[#allocation19_spill] sm:$0xff] %v6937_v44  ;;  %v955_v22 = vrot.slane %v953_v2, 4  ;;  %v941_v52 = vsel %vm6601_vm3, %v936_v1, %v940_v50  ;;  %v977_v35 = vshrl.u32 %v6922_v25, 16  ;;  %v980_v4 = vshll.u32 %v6922_v25, 16 }
  0x55   : > { %v946_v62 = vrot.slane %v945_v15, 4  ;;  %v968_v9 = vrot.slane %v966_v10, 4  ;;  %v986_v50 = vshll.u32 %v6934_v40, 16  ;;  %v990_v1 = vshrl.u32 %v6934_v40, 16 }
  0x56   : > { %v959_v2 = vor.u32 %v958_v29, %v955_v22  ;;  %v979_v33 = vrot.slane %v977_v35, 4  ;;  %v6966_v22 = vld [vmem:[%s6555_s20 + $0xbc] sm:$0x1]  ;;  %v1001_v56 = vshrl.u32 %v6947_v32, 16 }
  0x57   : > { %5811 = vmatmul.mubr.bf16.gmra.mrb[20].mxu1 %v6772_v19  ;;  %v974_v19 = vrot.slane %v972_v30, 5  ;;  %v951_v17 = vsel %vm6601_vm3, %v946_v62, %v950_v51  ;;  %v969_v63 = vor.u32 %v968_v9, %v964_v18  ;;  %v988_v29 = vrot.slane %v986_v50, 5 }
  0x58   : > { %5814 = vmatprep.mubr.msk.bf16.mxu1 %vm6461_vm0, %v8529_v58  ;;  %5667 = vmatmul.mubr.bf16.gmra.mrb[20].mxu0 %v6937_v44  ;;  %v6963_v15 = vcombine.low %v941_v52, %v951_v17  ;;  %v960_v7 = vrot.slane %v959_v2, 4  ;;  %v982_v44 = vrot.slane %v980_v4, 5  ;;  %v992_v10 = vrot.slane %v990_v1, 4 }
  0x59   : > { %v996_v30 = vshll.u32 %v6944_v43, 16  ;;  %v970_v62 = vrot.slane %v969_v63, 4  ;;  %v1004_v17 = vshll.u32 %v6947_v32, 16  ;;  %v1003_v4 = vrot.slane %v1001_v56, 4 }
  0x5a   : > { %8536 = vst [vmem:[#allocation21_spill] sm:$0xff] %v6963_v15  ;;  %5670 = vmatprep.mubr.bf16.mxu0 %v6963_v15  ;;  %v965_v51 = vsel %vm6601_vm3, %v960_v7, %v964_v18  ;;  %v983_v35 = vor.u32 %v982_v44, %v979_v33  ;;  %v993_v52 = vor.u32 %v992_v10, %v988_v29  ;;  %v1010_v9 = vshll.u32 %v6957_v59, 16 }
  0x5b   : > { %v998_v2 = vrot.slane %v996_v30, 5  ;;  %v975_v50 = vsel %vm6601_vm3, %v970_v62, %v974_v19  ;;  %v1006_v43 = vrot.slane %v1004_v17, 5  ;;  %v1014_v15 = vshrl.u32 %v6957_v59, 16 }
  0x5c   : > { %v984_v1 = vrot.slane %v983_v35, 4  ;;  %v6979_v26 = vcombine.low %v965_v51, %v975_v50  ;;  %v994_v33 = vrot.slane %v993_v52, 4  ;;  %v1012_v63 = vrot.slane %v1010_v9, 5 }
  0x5d   : > { %v1020_v56 = vshll.u32 %v6966_v22, 16  ;;  %v1007_v18 = vor.u32 %v1006_v43, %v1003_v4  ;;  %v1016_v7 = vrot.slane %v1014_v15, 4  ;;  %v6991_v30 = vcombine.low %v6617_v54, %v6628_v60 }
  0x5e   : > { %v989_v44 = vsel %vm6601_vm3, %v984_v1, %v988_v29  ;;  %v999_v19 = vsel %vm6601_vm3, %v994_v33, %v998_v2  ;;  %v6995_v51 = vcombine.low %v6644_v14, %v6657_v27  ;;  %v7001_v43 = vcombine.low %v6667_v38, %v6688_v55 }
  0x5f   : > { %5815 = vmatmul.mubr.bf16.gmra.mrb[24].mxu1 %v6798_v49  ;;  %v1022_v10 = vrot.slane %v1020_v56, 5  ;;  %v6997_v62 = vcombine.low %v989_v44, %v999_v19  ;;  %v1008_v35 = vrot.slane %v1007_v18, 4  ;;  %v1017_v29 = vor.u32 %v1016_v7, %v1012_v63 }
  0x60   : > { %5818 = vmatprep.mubr.msk.bf16.mxu1 %vm6461_vm0, %v8529_v58  ;;  %5671 = vmatmul.mubr.bf16.gmra.mrb[24].mxu0 %v6979_v26  ;;  %v7005_v15 = vcombine.low %v6700_v5, %v6716_v20  ;;  %v7009_v17 = vcombine.low %v6729_v34, %v6741_v42  ;;  %v7013_v52 = vcombine.low %v6754_v57, %v6759_v0 }
  0x61   : > { %v7017_v2 = vcombine.low %v6796_v46, %v6802_v53  ;;  %5674 = vmatprep.mubr.bf16.mxu0 %v6997_v62  ;;  %v1013_v4 = vsel %vm6601_vm3, %v1008_v35, %v1012_v63  ;;  %v1018_v9 = vrot.slane %v1017_v29, 4  ;;  %v7024_v50 = vcombine.low %v6813_v6, %v6825_v37 }
  0x62   : > { %v7028_v1 = vcombine.low %v6850_v8, %v6855_v23  ;;  %v7032_v33 = vcombine.low %v6881_v11, %v6886_v16  ;;  %v7036_v56 = vcombine.low %v6904_v41, %v6909_v45  ;;  %v7040_v63 = vcombine.low %v6922_v25, %v6934_v40 }
  0x63   : > { %v7044_v44 = vcombine.low %v6947_v32, %v6957_v59  ;;  %v1023_v18 = vsel %vm6601_vm3, %v1018_v9, %v1022_v10  ;;  %v7051_v7 = vcombine.low %v6565_v12, %v6568_v13  ;;  %v5260_v35 = vrot.slane %v6617_v54, 9 }
  0x64   : > { %8537 = vst [vmem:[#allocation22_spill] sm:$0xff] %v7036_v56  ;;  %8538 = vst [vmem:[#allocation23_spill] sm:$0xff] %v7040_v63  ;;  %v7053_v19 = vcombine.low %v1013_v4, %v1023_v18  ;;  %v1644_v29 = vrot.slane %v6628_v60, 5  ;;  %v1647_v10 = vrot.slane %v6634_v3, 5  ;;  %v5261_v4 = vrot.slane %v6644_v14, 9 }
  0x65   : > { %8539 = vst [vmem:[#allocation24_spill] sm:$0xff] %v7044_v44  ;;  %v7071_v9 = vcombine.low %v6579_v21, %v6582_v24  ;;  %v7075_v54 = vcombine.low %v6607_v47, %v6610_v48  ;;  %v1651_v18 = vrot.slane %v6657_v27, 5  ;;  %v1654_v3 = vrot.slane %v6662_v31, 5  ;;  %v6372_v24 = vld [vmem:[%s8475_s3 + $0x148] sm:$0xff]  }
  0x66   : > { %v1645_v12 = vsel %vm7061_vm6, %v5260_v35, %v1644_v29  ;;  %v1646_v13 = vrot.slane %v1644_v29, 4  ;;  %v5262_v14 = vrot.slane %v6667_v38, 9  ;;  %v1658_v21 = vrot.slane %v6688_v55, 5 }
  0x67   : > { %5819 = vmatmul.mubr.bf16.gmra.mrb[28].mxu1 %v6827_v39  ;;  %v1652_v47 = vsel %vm7061_vm6, %v5261_v4, %v1651_v18  ;;  %v1653_v48 = vrot.slane %v1651_v18, 4  ;;  %v1661_v27 = vrot.slane %v6696_v61, 5  ;;  %v5263_v29 = vrot.slane %v6700_v5, 9  ;;  %v8544_v61 = vld [vmem:[#allocation8_spill] sm:$0xff]  ;;  %v8545_v5 = vld [vmem:[#allocation13_spill] sm:$0xff] }
  0x68   : > { %5822 = vmatprep.mubr.msk.bf16.mxu1 %vm6461_vm0, %v8529_v58  ;;  %5675 = vmatmul.mubr.bf16.gmra.mrb[28].mxu0 %v7053_v19  ;;  %v1648_v60 = vsel %vm7061_vm6, %v1646_v13, %v1647_v10  ;;  %v1659_v31 = vsel %vm7061_vm6, %v5262_v14, %v1658_v21  ;;  %v1660_v38 = vrot.slane %v1658_v21, 4  ;;  %v1665_v55 = vrot.slane %v6716_v20, 5  ;;  %v6376_v20 = vld [vmem:[%s8475_s3 + $0x150] sm:$0xff]  }
  0x69   : > { %5694 = vmatprep.mubr.bf16.mxu0 %v7051_v7  ;;  %v7081_v35 = vcombine.low %v1645_v12, %v1648_v60  ;;  %v8543_v12 = vld [vmem:[#allocation6_spill] sm:$0xff]  ;;  %v1655_v10 = vsel %vm7061_vm6, %v1653_v48, %v1654_v3  ;;  %v5264_v4 = vrot.slane %v6729_v34, 9  ;;  %v1672_v60 = vrot.slane %v6741_v42, 5 }
  0x6a   : > { %v1668_v13 = vrot.slane %v8543_v12, 5  ;;  %v1675_v18 = vrot.slane %v8544_v61, 5  ;;  %v7110_v14 = vcombine.low %v1652_v47, %v1655_v10  ;;  %v1662_v21 = vsel %vm7061_vm6, %v1660_v38, %v1661_v27 }
  0x6b   : > { %8542 = vst [vmem:[#allocation25_spill] sm:$0xff] %v7081_v35  ;;  %v1666_v34 = vsel %vm7061_vm6, %v5263_v29, %v1665_v55  ;;  %v1667_v3 = vrot.slane %v1665_v55, 4  ;;  %v7116_v42 = vcombine.low %v1659_v31, %v1662_v21  ;;  %v1673_v48 = vsel %vm7061_vm6, %v5264_v4, %v1672_v60  ;;  %v8547_v4 = vld [vmem:[#allocation11_spill] sm:$0xff] }
  0x6c   : > { %v1674_v12 = vrot.slane %v1672_v60, 4  ;;  %v5265_v61 = vrot.slane %v6754_v57, 9  ;;  %v1679_v10 = vrot.slane %v6759_v0, 5  ;;  %v5266_v38 = vrot.slane %v6796_v46, 9  ;;  %v8548_v21 = vld [vmem:[#allocation15_spill] sm:$0xff] }
  0x6d   : > { %v1669_v47 = vsel %vm7061_vm6, %v1667_v3, %v1668_v13  ;;  %v1686_v55 = vrot.slane %v6802_v53, 5  ;;  %v1689_v60 = vrot.slane %v8547_v4, 5  ;;  %v5267_v46 = vrot.slane %v6813_v6, 9  ;;  %v6379_v53 = vld [vmem:[%s8475_s3 + $0x158] sm:$0xff]   ;;  %v8549_v3 = vld [vmem:[#allocation12_spill] sm:$0xff]  ;;  %v6383_v4 = vld [vmem:[%s8475_s3 + $0x160] sm:$0xff]  }
  0x6e   : > { %v7126_v29 = vcombine.low %v1666_v34, %v1669_v47  ;;  %v1676_v31 = vsel %vm7061_vm6, %v1674_v12, %v1675_v18  ;;  %v1680_v0 = vsel %vm7061_vm6, %v5265_v61, %v1679_v10  ;;  %v1681_v13 = vrot.slane %v1679_v10, 4  ;;  %v8550_v47 = vld [vmem:[#allocation14_spill] sm:$0xff] }
  0x6f   : > { %5823 = vmatmul.mubr.bf16.gmra.mrb[32].mxu1 %v6862_v28  ;;  %v7133_v57 = vcombine.low %v1673_v48, %v1676_v31  ;;  %v1687_v18 = vsel %vm7061_vm6, %v5266_v38, %v1686_v55  ;;  %v1693_v34 = vrot.slane %v6825_v37, 5  ;;  %v1696_v48 = vrot.slane %v8549_v3, 5 }
  0x70   : > { %5826 = vmatprep.mubr.msk.bf16.mxu1 %vm6461_vm0, %v8529_v58  ;;  %5695 = vmatmul.mubr.bf16.vlgmr.msra.gmra.mrb[0].mxu0 %v7071_v9  ;;  %v5268_v6 = vrot.slane %v6850_v8, 9  ;;  %v1700_v61 = vrot.slane %v6855_v23, 5  ;;  %v1703_v10 = vrot.slane %v8550_v47, 5 }
  0x71   : > { %5727 = vmatpush3.bf16.msra.mxu0 %v8545_v5  ;;  %5698 = vmatprep.mubr.bf16.mxu0 %v7075_v54  ;;  %v8546_v5 = vld [vmem:[#allocation10_spill] sm:$0xff]  ;;  %v1694_v37 = vsel %vm7061_vm6, %v5267_v46, %v1693_v34  ;;  %v1695_v31 = vrot.slane %v1693_v34, 4  ;;  %v5270_v46 = vrot.slane %v6904_v41, 9  ;;  %v8553_v34 = vld [vmem:[#allocation17_spill] sm:$0xff] }
  0x72   : > { %5728 = vmatprep.subr.bf16.mxu0 %v6372_v24  ;;  %v1682_v27 = vrot.slane %v8546_v5, 5  ;;  %v1701_v8 = vsel %vm7061_vm6, %v5268_v6, %v1700_v61  ;;  %v1702_v23 = vrot.slane %v1700_v61, 4  ;;  %v1717_v3 = vrot.slane %v8553_v34, 5  ;;  %v8555_v61 = vld [vmem:[#allocation18_spill] sm:$0xff]  ;;  %v8561_v34 = vld [vmem:[#allocation21_spill] sm:$0xff] }
  0x74   : > { %v1683_v12 = vsel %vm7061_vm6, %v1681_v13, %v1682_v27  ;;  %v8551_v13 = vld [vmem:[#allocation16_spill] sm:$0xff] }
  0x75   : > { %5729 = vmatpush3.bf16.msra.mxu0 %v6372_v24  ;;  %v1688_v24 = vrot.slane %v1686_v55, 4  ;;  %v7153_v5 = vcombine.low %v1680_v0, %v1683_v12  ;;  %v5269_v55 = vrot.slane %v6881_v11, 9  ;;  %v1707_v0 = vrot.slane %v6886_v16, 5 }
  0x76   : > { %5730 = vmatprep.subr.bf16.mxu0 %v6376_v20  ;;  %v1714_v11 = vrot.slane %v6909_v45, 5  ;;  %v5271_v16 = vrot.slane %v6922_v25, 9  ;;  %v8556_v45 = vld [vmem:[#allocation20_spill] sm:$0xff] }
  0x77   : > { %5827 = vmatmul.mubr.bf16.gmra.mrb[36].mxu1 %v8548_v21  ;;  %v1690_v38 = vsel %vm7061_vm6, %v1688_v24, %v1689_v60  ;;  %v1697_v60 = vsel %vm7061_vm6, %v1695_v31, %v1696_v48  ;;  %v1704_v24 = vsel %vm7061_vm6, %v1702_v23, %v1703_v10  ;;  %v1708_v48 = vsel %vm7061_vm6, %v5269_v55, %v1707_v0 }
  0x78   : > { %5830 = vmatprep.mubr.msk.bf16.mxu1 %vm6461_vm0, %v8529_v58  ;;  %5699 = vmatmul.mubr.bf16.gmra.mrb[4].mxu0 %v6991_v30  ;;  %v7160_v27 = vcombine.low %v1687_v18, %v1690_v38  ;;  %v7173_v18 = vcombine.low %v1694_v37, %v1697_v60  ;;  %v7179_v12 = vcombine.low %v1701_v8, %v1704_v24  ;;  %v1709_v6 = vrot.slane %v1707_v0, 4  ;;  %v6386_v37 = vld [vmem:[%s8475_s3 + $0x168] sm:$0xff]  }
  0x79   : > { %5702 = vmatprep.mubr.bf16.mxu0 %v6995_v51  ;;  %5731 = vmatpush3.bf16.msra.mxu0 %v6376_v20  ;;  %v1710_v20 = vrot.slane %v8551_v13, 5  ;;  %v1715_v41 = vsel %vm7061_vm6, %v5270_v46, %v1714_v11  ;;  %v1716_v47 = vrot.slane %v1714_v11, 4  ;;  %v1721_v10 = vrot.slane %v6934_v40, 5  ;;  %v8560_v11 = vld [vmem:[#allocation19_spill] sm:$0xff] }
  0x7a   : > { %5732 = vmatprep.subr.bf16.mxu0 %v6379_v53  ;;  %8552 = vst [vmem:[#allocation6_spill] sm:$0xff] %v7173_v18  ;;  %8554 = vst [vmem:[#allocation8_spill] sm:$0xff] %v7179_v12  ;;  %v1724_v38 = vrot.slane %v8556_v45, 5  ;;  %v1728_v31 = vrot.slane %v6957_v59, 5  ;;  %v1731_v8 = vrot.slane %v6966_v22, 5  ;;  %v6390_v59 = vld [vmem:[%s8475_s3 + $0x170] sm:$0xff]  }
  0x7b   : > { %v1711_v25 = vsel %vm7061_vm6, %v1709_v6, %v1710_v20  ;;  %v1718_v23 = vsel %vm7061_vm6, %v1716_v47, %v1717_v3  ;;  %v1722_v55 = vsel %vm7061_vm6, %v5271_v16, %v1721_v10  ;;  %v1723_v60 = vrot.slane %v1721_v10, 4  ;;  %v6426_v3 = vld [vmem:[%s6555_s20 + $0x4] sm:$0xf]  ;;  %v6427_v6 = vld [vmem:[%s6555_s20] sm:$0xf] }
  0x7c   : > { %v7199_v40 = vcombine.low %v1708_v48, %v1711_v25  ;;  %v7206_v0 = vcombine.low %v1715_v41, %v1718_v23  ;;  %v1730_v13 = vrot.slane %v1728_v31, 4  ;;  %v1623_v48 = vrot.slane %v6426_v3, 5  ;;  %v6428_v47 = vld [vmem:[%s6555_s20 + $0x8] sm:$0x1]  ;;  %v6429_v45 = vld [vmem:[%s6555_s20 + $0x10] sm:$0xf] }
  0x7d   : > { %5733 = vmatpush3.bf16.msra.mxu0 %v6379_v53  ;;  %v5272_v53 = vrot.slane %v6947_v32, 9  ;;  %v1725_v22 = vsel %vm7061_vm6, %v1723_v60, %v1724_v38  ;;  %v5257_v16 = vrot.slane %v6427_v6, 9  ;;  %v1626_v10 = vrot.slane %v6428_v47, 5  ;;  %v6431_v23 = vld [vmem:[%s6555_s20 + $0x14] sm:$0x1]  ;;  %v6396_v6 = vld [vmem:[%s8475_s3 + $0x1c8] sm:$0xff]  }
  0x7e   : > { %5734 = vmatprep.subr.bf16.mxu0 %v6383_v4  ;;  %8557 = vst [vmem:[#allocation13_spill] sm:$0xff] %v7199_v40  ;;  %8558 = vst [vmem:[#allocation10_spill] sm:$0xff] %v7206_v0  ;;  %v7216_v20 = vcombine.low %v1722_v55, %v1725_v22  ;;  %v1732_v46 = vsel %vm7061_vm6, %v1730_v13, %v1731_v8  ;;  %v1625_v41 = vrot.slane %v1623_v48, 4  ;;  %v1630_v38 = vrot.slane %v6429_v45, 5  ;;  %v6433_v22 = vld [vmem:[%s6555_s20 + $0x18] sm:$0xf] }
  0x7f   : > { %5831 = vmatmul.mubr.bf16.gmra.mrb[40].mxu1 %v8555_v61  ;;  %v1729_v32 = vsel %vm7061_vm6, %v5272_v53, %v1728_v31  ;;  %v1624_v25 = vsel %vm7061_vm6, %v5257_v16, %v1623_v48  ;;  %v6430_v31 = vld [vmem:[%s6555_s20 + $0x1c] sm:$0xf]  ;;  %v1633_v55 = vrot.slane %v6431_v23, 5  ;;  %v6434_v3 = vld [vmem:[%s6555_s20 + $0x20] sm:$0x1] }
  0x80   : > { %5834 = vmatprep.mubr.msk.bf16.mxu1 %vm6461_vm0, %v8529_v58  ;;  %5703 = vmatmul.mubr.bf16.gmra.mrb[8].mxu0 %v7001_v43  ;;  %v7220_v24 = vcombine.low %v1729_v32, %v1732_v46  ;;  %v1627_v53 = vsel %vm7061_vm6, %v1625_v41, %v1626_v10  ;;  %v1637_v8 = vrot.slane %v6430_v31, 5  ;;  %v6432_v32 = vld [vmem:[%s6555_s20 + $0xc] sm:$0xf]  ;;  %v5259_v46 = vrot.slane %v6433_v22, 9  ;;  %v6399_v10 = vld [vmem:[%s8475_s3 + $0x1d0] sm:$0xff]   ;;  %v6400_v23 = vld [vmem:[%s8475_s3 + $0x98] sm:$0xff]  }
  0x81   : > { %5706 = vmatprep.mubr.bf16.mxu0 %v7005_v15  ;;  %5735 = vmatpush3.bf16.msra.mxu0 %v6383_v4  ;;  %v6393_v4 = vld [vmem:[%s8475_s3 + $0x178] sm:$0xff]   ;;  %v7260_v60 = vcombine.low %v1624_v25, %v1627_v53  ;;  %v5258_v13 = vrot.slane %v6432_v32, 9  ;;  %v1640_v48 = vrot.slane %v6434_v3, 5  ;;  %v6397_v25 = vld [vmem:[%s8475_s3 + $0x88] sm:$0xff]   ;;  %v6405_v53 = vld [vmem:[%s8475_s3 + $0x1e0] sm:$0xff]   ;;  %s5419_s20 = sshll.u32 %s8585_s21, 6 }
  0x82   : > { %5736 = vmatprep.subr.bf16.mxu0 %v6386_v37  ;;  %8559 = vst [vmem:[#allocation11_spill] sm:$0xff] %v7220_v24  ;;  %v1638_v41 = vsel %vm7061_vm6, %v5259_v46, %v1637_v8  ;;  %v6398_v31 = vld [vmem:[%s8475_s3 + $0x90] sm:$0xff]   ;;  %v6401_v32 = vld [vmem:[%s8475_s3 + $0xa0] sm:$0xff]   ;;  %v6406_v46 = vld [vmem:[%s8475_s3 + $0xb8] sm:$0xff]   ;;  %s8144_s27 = scalar_lea.vmem %s8478_s6, %s5419_s20 }
  0x83   : > { %v6404_v22 = vld [vmem:[%s8475_s3 + $0xb0] sm:$0xff]   ;;  %v6409_v3 = vld [vmem:[%s8475_s3 + $0x188] sm:$0xff]  }
  0x85   : > { %5737 = vmatpush3.bf16.msra.mxu0 %v6386_v37  ;;  %v6394_v37 = vld [vmem:[%s8475_s3 + $0x1c0] sm:$0xff]  }
  0x86   : > { %5738 = vmatprep.subr.bf16.mxu0 %v6390_v59 }
  0x87   : > { %5835 = vmatmul.mubr.bf16.gmra.mrb[44].mxu1 %v8560_v11 }
  0x88   : > { %5838 = vmatprep.mubr.msk.bf16.mxu1 %vm6461_vm0, %v8529_v58  ;;  %5707 = vmatmul.mubr.bf16.gmra.mrb[12].mxu0 %v7009_v17 }
  0x89   : > { %5710 = vmatprep.mubr.bf16.mxu0 %v7013_v52  ;;  %5739 = vmatpush3.bf16.msra.mxu0 %v6390_v59  ;;  %v1632_v59 = vrot.slane %v1630_v38, 4 }
  0x8a   : > { %5740 = vmatprep.subr.bf16.mxu0 %v6393_v4 }
  0x8b   : > { %v1634_v16 = vsel %vm7061_vm6, %v1632_v59, %v1633_v55  ;;  %v6410_v55 = vld [vmem:[%s8475_s3 + $0x1f0] sm:$0xff]   ;;  %v6403_v59 = vld [vmem:[%s8475_s3 + $0xa8] sm:$0xff]  }
  0x8d   : > { %5741 = vmatpush3.bf16.msra.mxu0 %v6393_v4  ;;  %v1639_v4 = vrot.slane %v1637_v8, 4  ;;  %v6408_v8 = vld [vmem:[%s8475_s3 + $0x1e8] sm:$0xff]  }
  0x8e   : > { %5926 = vmatprep.subr.bf16.mxu0 %v8529_v58 }
  0x8f   : > { %5839 = vmatmul.mubr.bf16.gmra.mrb[48].mxu1 %v8561_v34  ;;  %v1641_v47 = vsel %vm7061_vm6, %v1639_v4, %v1640_v48  ;;  %v6407_v4 = vld [vmem:[%s8475_s3 + $0x180] sm:$0xff]   ;;  %v6411_v48 = vld [vmem:[%s8475_s3 + $0x190] sm:$0xff]  }
  0x90   : > { %5842 = vmatprep.mubr.msk.bf16.mxu1 %vm6461_vm0, %v8529_v58  ;;  %5711 = vmatmul.mubr.bf16.gmra.mrb[16].mxu0 %v7017_v2 }
  0x91   : > { %5714 = vmatprep.mubr.bf16.mxu0 %v7024_v50 }
  0x97   : > { %5843 = vmatmul.mubr.bf16.gmra.mrb[52].mxu1 %v6979_v26 }
  0x98   : > { %5846 = vmatprep.mubr.msk.bf16.mxu1 %vm6461_vm0, %v8529_v58  ;;  %5715 = vmatmul.mubr.bf16.gmra.mrb[20].mxu0 %v7028_v1 }
  0x99   : > { %5718 = vmatprep.mubr.bf16.mxu0 %v7032_v33 }
  0x9f   : > { %5847 = vmatmul.mubr.bf16.gmra.mrb[56].mxu1 %v6997_v62 }
  0xa0   : > { %5866 = vmatprep.mubr.msk.bf16.mxu1 %vm6461_vm0, %v8529_v58  ;;  %5719 = vmatmul.mubr.bf16.gmra.mrb[24].mxu0 %v7036_v56 }
  0xa1   : > { %5722 = vmatprep.mubr.bf16.mxu0 %v7040_v63 }
  0xa7   : > { %5867 = vmatmul.mubr.bf16.vlgmr.msra.gmra.mrb[60].mxu1 %v7051_v7  ;;  %v1631_v7 = vsel %vm7061_vm6, %v5258_v13, %v1630_v38  ;;  %v6395_v38 = vld [vmem:[%s8475_s3 + $0x80] sm:$0xff]   ;;  %v6412_v13 = vld [vmem:[%s8475_s3 + $0x1f8] sm:$0xff]  }
  0xa8   : > { %6003 = vmatpush3.bf16.msra.mxu1 %v6394_v37  ;;  %5870 = vmatprep.mubr.msk.bf16.mxu1 %vm6461_vm0, %v8529_v58  ;;  %v7285_v45 = vcombine.low %v1631_v7, %v1634_v16  ;;  %v7291_v37 = vcombine.low %v1638_v41, %v1641_v47  ;;  %v6417_v41 = vld [vmem:[%s8475_s3 + $0x1a8] sm:$0xff]  }
  0xa9   : > { %6004 = vmatprep.subr.bf16.mxu1 %v8529_v58  ;;  %5723 = vmatmul.mubr.bf16.gmra.mrb[28].mxu0 %v7044_v44 }
  0xaa   : > { %5742 = vmatprep.mubr.bf16.mxu0 %v7260_v60  ;;  %8562 = vst [vmem:[#allocation15_spill] sm:$0xff] %v7285_v45  ;;  %8563 = vst [vmem:[#allocation12_spill] sm:$0xff] %v7291_v37 }
  0xac   : > { %6005 = vmatpush3.bf16.msra.mxu1 %v6396_v6  ;;  %v6415_v6 = vld [vmem:[%s8475_s3 + $0x1a0] sm:$0xff]  }
  0xad   : > { %6006 = vmatprep.subr.bf16.mxu1 %v8529_v58 }
  0xaf   : > { %5871 = vmatmul.mubr.bf16.gmra.mrb[64].mxu1 %v7071_v9 }
  0xb0   : > { %5874 = vmatprep.mubr.msk.bf16.mxu1 %vm6461_vm0, %v8529_v58  ;;  %6007 = vmatpush3.bf16.msra.mxu1 %v6399_v10 }
  0xb1   : > { %6008 = vmatprep.subr.bf16.mxu1 %v8529_v58  ;;  %5743 = vmatmul.mubr.bf16.vlgmr.msra.gmra.mrb[0].mxu0 %v7285_v45 }
  0xb2   : > { %5927 = vmatpush3.bf16.msra.mxu0 %v6395_v38  ;;  %5746 = vmatprep.mubr.bf16.mxu0 %v7291_v37  ;;  %v6419_v38 = vld [vmem:[%s8475_s3 + $0x1b0] sm:$0xff]  }
  0xb3   : > { %5928 = vmatprep.subr.bf16.mxu0 %v8529_v58 }
  0xb4   : > { %6009 = vmatpush3.bf16.msra.mxu1 %v6402_v36 }
  0xb5   : > { %6010 = vmatprep.subr.bf16.mxu1 %v8529_v58 }
  0xb6   : > { %5929 = vmatpush3.bf16.msra.mxu0 %v6397_v25 }
  0xb7   : > { %5875 = vmatmul.mubr.bf16.gmra.mrb[68].mxu1 %v7075_v54  ;;  %5930 = vmatprep.subr.bf16.mxu0 %v8529_v58 }
  0xb8   : > { %5878 = vmatprep.mubr.msk.bf16.mxu1 %vm6461_vm0, %v8529_v58  ;;  %6011 = vmatpush3.bf16.msra.mxu1 %v6405_v53  ;;  %v6421_v53 = vld [vmem:[%s8475_s3 + $0x1b8] sm:$0xff]  }
  0xb9   : > { %5747 = vmatmul.mubr.bf16.gmra.mrb[4].mxu0 %v7081_v35  ;;  %6012 = vmatprep.subr.bf16.mxu1 %v8529_v58 }
  0xba   : > { %5750 = vmatprep.mubr.bf16.mxu0 %v7110_v14  ;;  %5931 = vmatpush3.bf16.msra.mxu0 %v6398_v31 }
  0xbb   : > { %5932 = vmatprep.subr.bf16.mxu0 %v8529_v58 }
  0xbc   : > { %6013 = vmatpush3.bf16.msra.mxu1 %v6408_v8 }
  0xbd   : > { %6014 = vmatprep.subr.bf16.mxu1 %v8529_v58 }
  0xbe   : > { %5933 = vmatpush3.bf16.msra.mxu0 %v6400_v23 }
  0xbf   : > { %5879 = vmatmul.mubr.bf16.gmra.mrb[72].mxu1 %v6991_v30  ;;  %5934 = vmatprep.subr.bf16.mxu0 %v8529_v58 }
  0xc0   : > { %5882 = vmatprep.mubr.msk.bf16.mxu1 %vm6461_vm0, %v8529_v58  ;;  %6015 = vmatpush3.bf16.msra.mxu1 %v6410_v55 }
  0xc1   : > { %5751 = vmatmul.mubr.bf16.gmra.mrb[8].mxu0 %v7116_v42  ;;  %6016 = vmatprep.subr.bf16.mxu1 %v8529_v58 }
  0xc2   : > { %5754 = vmatprep.mubr.bf16.mxu0 %v7126_v29  ;;  %5935 = vmatpush3.bf16.msra.mxu0 %v6401_v32 }
  0xc3   : > { %5936 = vmatprep.subr.bf16.mxu0 %v8529_v58 }
  0xc4   : > { %6017 = vmatpush3.bf16.msra.mxu1 %v6412_v13 }
  0xc5   : > { %6230 = vmatprep.subr.bf16.mxu1 %v8529_v58 }
  0xc6   : > { %5937 = vmatpush3.bf16.msra.mxu0 %v6403_v59 }
  0xc7   : > { %5883 = vmatmul.mubr.bf16.gmra.mrb[76].mxu1 %v6995_v51  ;;  %5938 = vmatprep.subr.bf16.mxu0 %v8529_v58 }
  0xc8   : > { %5886 = vmatprep.mubr.msk.bf16.mxu1 %vm6461_vm0, %v8529_v58 }
  0xc9   : > { %5755 = vmatmul.mubr.bf16.gmra.mrb[12].mxu0 %v7133_v57 }
  0xca   : > { %5758 = vmatprep.mubr.bf16.mxu0 %v7153_v5  ;;  %5939 = vmatpush3.bf16.msra.mxu0 %v6404_v22 }
  0xcb   : > { %5940 = vmatprep.subr.bf16.mxu0 %v8529_v58 }
  0xce   : > { %5941 = vmatpush3.bf16.msra.mxu0 %v6406_v46 }
  0xcf   : > { %5887 = vmatmul.mubr.bf16.gmra.mrb[80].mxu1 %v7001_v43  ;;  %6078 = vmatprep.subr.bf16.mxu0 %v8529_v58 }
  0xd0   : > { %5890 = vmatprep.mubr.msk.bf16.mxu1 %vm6461_vm0, %v8529_v58 }
  0xd1   : > { %5759 = vmatmul.mubr.bf16.gmra.mrb[16].mxu0 %v7160_v27 }
  0xd2   : > { %5762 = vmatprep.mubr.bf16.mxu0 %v7173_v18 }
  0xd7   : > { %5891 = vmatmul.mubr.bf16.gmra.mrb[84].mxu1 %v7005_v15 }
  0xd8   : > { %5894 = vmatprep.mubr.msk.bf16.mxu1 %vm6461_vm0, %v8529_v58 }
  0xd9   : > { %5763 = vmatmul.mubr.bf16.gmra.mrb[20].mxu0 %v7179_v12 }
  0xda   : > { %5766 = vmatprep.mubr.bf16.mxu0 %v7199_v40 }
  0xdf   : > { %5895 = vmatmul.mubr.bf16.gmra.mrb[88].mxu1 %v7009_v17 }
  0xe0   : > { %5898 = vmatprep.mubr.msk.bf16.mxu1 %vm6461_vm0, %v8529_v58 }
  0xe1   : > { %5767 = vmatmul.mubr.bf16.gmra.mrb[24].mxu0 %v7206_v0 }
  0xe2   : > { %5770 = vmatprep.mubr.bf16.mxu0 %v7216_v20 }
  0xe7   : > { %5899 = vmatmul.mubr.bf16.gmra.mrb[92].mxu1 %v7013_v52 }
  0xe8   : > { %5902 = vmatprep.mubr.msk.bf16.mxu1 %vm6461_vm0, %v8529_v58 }
  0xe9   : > { %5771 = vmatmul.mubr.bf16.gmra.mrb[28].mxu0 %v7220_v24 }
  0xea   : > { %5942 = vmatprep.mubr.msk.bf16.mxu0 %vm6461_vm0, %v8529_v58 }
  0xef   : > { %5903 = vmatmul.mubr.bf16.gmra.mrb[96].mxu1 %v7017_v2 }
  0xf0   : > { %5906 = vmatprep.mubr.msk.bf16.mxu1 %vm6461_vm0, %v8529_v58 }
  0xf1   : > { %5943 = vmatmul.mubr.bf16.vlgmr.msra.gmra.mrb[32].mxu0 %v7260_v60  ;;  %v6413_v60 = vld [vmem:[%s8475_s3 + $0x198] sm:$0xff]  }
  0xf2   : > { %6079 = vmatpush3.bf16.msra.mxu0 %v6407_v4  ;;  %5946 = vmatprep.mubr.msk.bf16.mxu0 %vm6461_vm0, %v8529_v58  ;;  %v7470_v4 = vld [vmem:[%s8475_s3 + $0x200] sm:$0xff]  }
  0xf3   : > { %6080 = vmatprep.subr.bf16.mxu0 %v8529_v58 }
  0xf6   : > { %6081 = vmatpush3.bf16.msra.mxu0 %v6409_v3 }
  0xf7   : > { %5907 = vmatmul.mubr.bf16.gmra.mrb[100].mxu1 %v7024_v50  ;;  %6082 = vmatprep.subr.bf16.mxu0 %v8529_v58 }
  0xf8   : > { %5910 = vmatprep.mubr.msk.bf16.mxu1 %vm6461_vm0, %v8529_v58 }
  0xf9   : > { %5947 = vmatmul.mubr.bf16.gmra.mrb[36].mxu0 %v7285_v45  ;;  %v8568_v45 = vld [vmem:[#allocation9_spill] sm:$0xff] }
  0xfa   : > { %5950 = vmatprep.mubr.msk.bf16.mxu0 %vm6461_vm0, %v8529_v58  ;;  %6083 = vmatpush3.bf16.msra.mxu0 %v6411_v48  ;;  %v8564_v48 = vld [vmem:[#allocation3_spill] sm:$0xff] }
  0xfb   : > { %6084 = vmatprep.subr.bf16.mxu0 %v8529_v58 }
  0xfe   : > { %6085 = vmatpush3.bf16.msra.mxu0 %v6413_v60  ;;  %v7479_v60 = vld [vmem:[%s8475_s3 + $0x208] sm:$0xff]  }
  0xff   : > { %5911 = vmatmul.mubr.bf16.gmra.mrb[104].mxu1 %v7028_v1  ;;  %6086 = vmatprep.subr.bf16.mxu0 %v8529_v58 }
 0x100   : > { %5914 = vmatprep.mubr.msk.bf16.mxu1 %vm6461_vm0, %v8529_v58 }
 0x101   : > { %5951 = vmatmul.mubr.bf16.gmra.mrb[40].mxu0 %v7291_v37 }
 0x102   : > { %v7418_v7 = vpop.f32.mrb[0].mxu1  ;;  %5954 = vmatprep.mubr.msk.bf16.mxu0 %vm6461_vm0, %v8529_v58  ;;  %6087 = vmatpush3.bf16.msra.mxu0 %v6415_v6 }
 0x103   : > { %v5792_v16 = vpop.f32.mrb[1].mxu1  ;;  %6088 = vmatprep.subr.bf16.mxu0 %v8529_v58 }
 0x104   : > { %v7425_v47 = vpop.f32.mrb[2].mxu1 }
 0x105   : > { %v5793_v10 = vpop.f32.mrb[3].mxu1 }
 0x106   : > { %6089 = vmatpush3.bf16.msra.mxu0 %v6417_v41  ;;  %v7493_v10 = vld [vmem:[%s8475_s3 + $0x210] sm:$0xff]  }
 0x107   : > { %5915 = vmatmul.mubr.bf16.gmra.mrb[108].mxu1 %v7032_v33  ;;  %6090 = vmatprep.subr.bf16.mxu0 %v8529_v58 }
 0x108   : > { %5918 = vmatprep.mubr.msk.bf16.mxu1 %vm6461_vm0, %v8529_v58 }
 0x109   : > { %5955 = vmatmul.mubr.bf16.gmra.mrb[44].mxu0 %v7081_v35  ;;  %v8567_v35 = vld [vmem:[#allocation7_spill] sm:$0xff] }
 0x10a   : > { %v7436_v36 = vpop.f32.mrb[4].mxu1  ;;  %5958 = vmatprep.mubr.msk.bf16.mxu0 %vm6461_vm0, %v8529_v58  ;;  %6091 = vmatpush3.bf16.msra.mxu0 %v6419_v38 }
 0x10b   : > { %v5796_v25 = vpop.f32.mrb[5].mxu1  ;;  %6092 = vmatprep.subr.bf16.mxu0 %v8529_v58 }
 0x10c   : > { %v7443_v31 = vpop.f32.mrb[6].mxu1  ;;  %v8565_v25 = vld [vmem:[#allocation4_spill] sm:$0xff] }
 0x10d   : > { %v5797_v8 = vpop.f32.mrb[7].mxu1 }
 0x10e   : > { %6093 = vmatpush3.bf16.msra.mxu0 %v6421_v53  ;;  %v7503_v53 = vld [vmem:[%s8475_s3 + $0x218] sm:$0xff]  }
 0x10f   : > { %5919 = vmatmul.mubr.bf16.gmra.mrb[112].mxu1 %v7036_v56  ;;  %6154 = vmatprep.subr.bf16.mxu0 %v8529_v58 }
 0x110   : > { %5922 = vmatprep.mubr.msk.bf16.mxu1 %vm6461_vm0, %v8529_v58 }
 0x111   : > { %5959 = vmatmul.mubr.bf16.gmra.mrb[48].mxu0 %v7110_v14 }
 0x112   : > { %v7451_v23 = vpop.f32.mrb[8].mxu1  ;;  %5962 = vmatprep.mubr.msk.bf16.mxu0 %vm6461_vm0, %v8529_v58 }
 0x113   : > { %v5800_v55 = vpop.f32.mrb[9].mxu1 }
 0x114   : > { %v7455_v32 = vpop.f32.mrb[10].mxu1 }
 0x115   : > { %v5801_v13 = vpop.f32.mrb[11].mxu1 }
 0x117   : > { %5923 = vmatmul.mubr.bf16.gmra.mrb[116].mxu1 %v7040_v63 }
 0x118   : > { %6018 = vmatprep.mubr.msk.bf16.mxu1 %vm6461_vm0, %v8529_v58 }
 0x119   : > { %5963 = vmatmul.mubr.bf16.gmra.mrb[52].mxu0 %v7116_v42 }
 0x11a   : > { %v7461_v59 = vpop.f32.mrb[12].mxu1  ;;  %5966 = vmatprep.mubr.msk.bf16.mxu0 %vm6461_vm0, %v8529_v58 }
 0x11b   : > { %v5804_v22 = vpop.f32.mrb[13].mxu1 }
 0x11c   : > { %v7465_v46 = vpop.f32.mrb[14].mxu1  ;;  %v7517_v22 = vld [vmem:[%s8475_s3 + $0x220] sm:$0xff]  }
 0x11d   : > { %v5805_v3 = vpop.f32.mrb[15].mxu1 }
 0x11f   : > { %6019 = vmatmul.mubr.bf16.vlgmr.msra.gmra.mrb[120].mxu1 %v8564_v48  ;;  %v8566_v48 = vld [vmem:[#allocation5_spill] sm:$0xff] }
 0x120   : > { %6238 = vmatpush3.bf16.msra.mxu1 %v7470_v4  ;;  %6022 = vmatprep.mubr.msk.bf16.mxu1 %vm6461_vm0, %v8529_v58 }
 0x121   : > { %6231 = vmatprep.subr.bf16.mxu1 %v8529_v58  ;;  %5967 = vmatmul.mubr.bf16.gmra.mrb[56].mxu0 %v7126_v29 }
 0x122   : > { %v7483_v6 = vpop.f32.mrb[16].mxu1  ;;  %5970 = vmatprep.mubr.msk.bf16.mxu0 %vm6461_vm0, %v8529_v58 }
 0x123   : > { %v5808_v16 = vpop.f32.mrb[17].mxu1 }
 0x124   : > { %v7487_v41 = vpop.f32.mrb[18].mxu1  ;;  %6239 = vmatpush3.bf16.msra.mxu1 %v7479_v60  ;;  %v7527_v16 = vld [vmem:[%s8475_s3 + $0x228] sm:$0xff]  }
 0x125   : > { %v5809_v38 = vpop.f32.mrb[19].mxu1  ;;  %6232 = vmatprep.subr.bf16.mxu1 %v8529_v58 }
 0x127   : > { %6023 = vmatmul.mubr.bf16.gmra.mrb[124].mxu1 %v8565_v25 }
 0x128   : > { %6026 = vmatprep.mubr.msk.bf16.mxu1 %vm6461_vm0, %v8529_v58  ;;  %6240 = vmatpush3.bf16.msra.mxu1 %v7493_v10 }
 0x129   : > { %6233 = vmatprep.subr.bf16.mxu1 %v8529_v58  ;;  %5971 = vmatmul.mubr.bf16.gmra.mrb[60].mxu0 %v7133_v57 }
 0x12a   : > { %v7507_v8 = vpop.f32.mrb[20].mxu1  ;;  %5974 = vmatprep.mubr.msk.bf16.mxu0 %vm6461_vm0, %v8529_v58 }
 0x12b   : > { %v5812_v55 = vpop.f32.mrb[21].mxu1 }
 0x12c   : > { %v7511_v13 = vpop.f32.mrb[22].mxu1  ;;  %6241 = vmatpush3.bf16.msra.mxu1 %v7503_v53 }
 0x12d   : > { %v5813_v3 = vpop.f32.mrb[23].mxu1  ;;  %6234 = vmatprep.subr.bf16.mxu1 %v8529_v58 }
 0x12e   : > { %v7541_v3 = vld [vmem:[%s8475_s3 + $0x230] sm:$0xff]  }
 0x12f   : > { %6027 = vmatmul.mubr.bf16.gmra.mrb[128].mxu1 %v8566_v48 }
 0x130   : > { %6030 = vmatprep.mubr.msk.bf16.mxu1 %vm6461_vm0, %v8529_v58  ;;  %6242 = vmatpush3.bf16.msra.mxu1 %v7517_v22 }
 0x131   : > { %6235 = vmatprep.subr.bf16.mxu1 %v8529_v58  ;;  %5975 = vmatmul.mubr.bf16.gmra.mrb[64].mxu0 %v7153_v5 }
 0x132   : > { %v7531_v38 = vpop.f32.mrb[24].mxu1  ;;  %5978 = vmatprep.mubr.msk.bf16.mxu0 %vm6461_vm0, %v8529_v58 }
 0x133   : > { %v5816_v25 = vpop.f32.mrb[25].mxu1 }
 0x134   : > { %v7535_v55 = vpop.f32.mrb[26].mxu1  ;;  %6243 = vmatpush3.bf16.msra.mxu1 %v7527_v16  ;;  %v7551_v25 = vld [vmem:[%s8475_s3 + $0x238] sm:$0xff]  }
 0x135   : > { %v5817_v48 = vpop.f32.mrb[27].mxu1  ;;  %6236 = vmatprep.subr.bf16.mxu1 %v8529_v58 }
 0x137   : > { %6031 = vmatmul.mubr.bf16.gmra.mrb[132].mxu1 %v8567_v35 }
 0x138   : > { %6034 = vmatprep.mubr.msk.bf16.mxu1 %vm6461_vm0, %v8529_v58  ;;  %6244 = vmatpush3.bf16.msra.mxu1 %v7541_v3 }
 0x139   : > { %6237 = vmatprep.subr.bf16.mxu1 %v8529_v58  ;;  %5979 = vmatmul.mubr.bf16.gmra.mrb[68].mxu0 %v7160_v27 }
 0x13a   : > { %v7555_v24 = vpop.f32.mrb[28].mxu1  ;;  %5982 = vmatprep.mubr.msk.bf16.mxu0 %vm6461_vm0, %v8529_v58 }
 0x13b   : > { %v5820_v48 = vpop.f32.mrb[29].mxu1 }
 0x13c   : > { %v7559_v35 = vpop.f32.mrb[30].mxu1  ;;  %6245 = vmatpush3.bf16.msra.mxu1 %v7551_v25 }
 0x13d   : > { %v5821_v37 = vpop.f32.mrb[31].mxu1 }
 0x13f   : > { %6035 = vmatmul.mubr.bf16.gmra.mrb[136].mxu1 %v8568_v45 }
 0x140   : > { %6038 = vmatprep.mubr.msk.bf16.mxu1 %vm6461_vm0, %v8529_v58 }
 0x141   : > { %5983 = vmatmul.mubr.bf16.gmra.mrb[72].mxu0 %v7173_v18 }
 0x142   : > { %v7566_v44 = vpop.f32.mrb[32].mxu1  ;;  %5986 = vmatprep.mubr.msk.bf16.mxu0 %vm6461_vm0, %v8529_v58 }
 0x143   : > { %v5824_v63 = vpop.f32.mrb[33].mxu1 }
 0x144   : > { %v7570_v48 = vpop.f32.mrb[34].mxu1 }
 0x145   : > { %v5825_v56 = vpop.f32.mrb[35].mxu1 }
 0x147   : > { %6039 = vmatmul.mubr.bf16.gmra.mrb[140].mxu1 %v6798_v49 }
 0x148   : > { %6042 = vmatprep.mubr.msk.bf16.mxu1 %vm6461_vm0, %v8529_v58 }
 0x149   : > { %5987 = vmatmul.mubr.bf16.gmra.mrb[76].mxu0 %v7179_v12 }
 0x14a   : > { %v7576_v45 = vpop.f32.mrb[36].mxu1  ;;  %5990 = vmatprep.mubr.msk.bf16.mxu0 %vm6461_vm0, %v8529_v58 }
 0x14b   : > { %v5828_v37 = vpop.f32.mrb[37].mxu1 }
 0x14c   : > { %v7580_v63 = vpop.f32.mrb[38].mxu1 }
 0x14d   : > { %v5829_v18 = vpop.f32.mrb[39].mxu1 }
 0x14f   : > { %6043 = vmatmul.mubr.bf16.gmra.mrb[144].mxu1 %v6827_v39 }
 0x150   : > { %6046 = vmatprep.mubr.msk.bf16.mxu1 %vm6461_vm0, %v8529_v58 }
 0x151   : > { %5991 = vmatmul.mubr.bf16.gmra.mrb[80].mxu0 %v7199_v40 }
 0x152   : > { %v7586_v49 = vpop.f32.mrb[40].mxu1  ;;  %5994 = vmatprep.mubr.msk.bf16.mxu0 %vm6461_vm0, %v8529_v58 }
 0x153   : > { %v5832_v56 = vpop.f32.mrb[41].mxu1 }
 0x154   : > { %v7590_v37 = vpop.f32.mrb[42].mxu1 }
 0x155   : > { %v5833_v12 = vpop.f32.mrb[43].mxu1 }
 0x157   : > { %6047 = vmatmul.mubr.bf16.gmra.mrb[148].mxu1 %v6862_v28 }
 0x158   : > { %6050 = vmatprep.mubr.msk.bf16.mxu1 %vm6461_vm0, %v8529_v58 }
 0x159   : > { %5995 = vmatmul.mubr.bf16.gmra.mrb[84].mxu0 %v7206_v0 }
 0x15a   : > { %v7596_v39 = vpop.f32.mrb[44].mxu1  ;;  %5998 = vmatprep.mubr.msk.bf16.mxu0 %vm6461_vm0, %v8529_v58 }
 0x15b   : > { %v5836_v18 = vpop.f32.mrb[45].mxu1 }
 0x15c   : > { %v7600_v56 = vpop.f32.mrb[46].mxu1 }
 0x15d   : > { %v5837_v40 = vpop.f32.mrb[47].mxu1 }
 0x15f   : > { %6051 = vmatmul.mubr.bf16.gmra.mrb[152].mxu1 %v8548_v21 }
 0x160   : > { %6054 = vmatprep.mubr.msk.bf16.mxu1 %vm6461_vm0, %v8529_v58 }
 0x161   : > { %5999 = vmatmul.mubr.bf16.gmra.mrb[88].mxu0 %v7216_v20 }
 0x162   : > { %v7606_v28 = vpop.f32.mrb[48].mxu1  ;;  %6094 = vmatprep.mubr.msk.bf16.mxu0 %vm6461_vm0, %v8529_v58 }
 0x163   : > { %v5840_v12 = vpop.f32.mrb[49].mxu1 }
 0x164   : > { %v7610_v18 = vpop.f32.mrb[50].mxu1 }
 0x165   : > { %v5841_v0 = vpop.f32.mrb[51].mxu1 }
 0x167   : > { %6055 = vmatmul.mubr.bf16.gmra.mrb[156].mxu1 %v8555_v61 }
 0x168   : > { %6058 = vmatprep.mubr.msk.bf16.mxu1 %vm6461_vm0, %v8529_v58 }
 0x169   : > { %6095 = vmatmul.mubr.bf16.vlgmr.msra.gmra.mrb[92].mxu0 %v7071_v9 }
 0x16a   : > { %v7616_v21 = vpop.f32.mrb[52].mxu1  ;;  %6155 = vmatpush3.bf16.msra.mxu0 %v7470_v4  ;;  %6098 = vmatprep.mubr.msk.bf16.mxu0 %vm6461_vm0, %v8529_v58 }
 0x16b   : > { %v5844_v40 = vpop.f32.mrb[53].mxu1  ;;  %6156 = vmatprep.subr.bf16.mxu0 %v8529_v58 }
 0x16c   : > { %v7621_v12 = vpop.f32.mrb[54].mxu1 }
 0x16d   : > { %v5845_v0 = vpop.f32.mrb[55].mxu1 }
 0x16e   : > { %6157 = vmatpush3.bf16.msra.mxu0 %v7479_v60 }
 0x16f   : > { %6059 = vmatmul.mubr.bf16.gmra.mrb[160].mxu1 %v8560_v11  ;;  %6158 = vmatprep.subr.bf16.mxu0 %v8529_v58 }
 0x170   : > { %6062 = vmatprep.mubr.msk.bf16.mxu1 %vm6461_vm0, %v8529_v58 }
 0x171   : > { %6099 = vmatmul.mubr.bf16.gmra.mrb[96].mxu0 %v7075_v54 }
 0x172   : > { %v7630_v9 = vpop.f32.mrb[56].mxu1  ;;  %6102 = vmatprep.mubr.msk.bf16.mxu0 %vm6461_vm0, %v8529_v58  ;;  %6159 = vmatpush3.bf16.msra.mxu0 %v7493_v10 }
 0x173   : > { %v5848_v61 = vpop.f32.mrb[57].mxu1  ;;  %6160 = vmatprep.subr.bf16.mxu0 %v8529_v58 }
 0x174   : > { %v7635_v4 = vpop.f32.mrb[58].mxu1 }
 0x175   : > { %v5849_v11 = vpop.f32.mrb[59].mxu1 }
 0x176   : > { %6161 = vmatpush3.bf16.msra.mxu0 %v7503_v53 }
 0x177   : > { %6063 = vmatmul.mubr.bf16.gmra.mrb[164].mxu1 %v8561_v34  ;;  %6162 = vmatprep.subr.bf16.mxu0 %v8529_v58 }
 0x178   : > { %6066 = vmatprep.mubr.msk.bf16.mxu1 %vm6461_vm0, %v8529_v58 }
 0x179   : > { %6103 = vmatmul.mubr.bf16.gmra.mrb[100].mxu0 %v6991_v30 }
 0x17a   : > { %v2385_v54 = vpop.f32.mrb[60].mxu1  ;;  %6106 = vmatprep.mubr.msk.bf16.mxu0 %vm6461_vm0, %v8529_v58  ;;  %6163 = vmatpush3.bf16.msra.mxu0 %v7517_v22 }
 0x17b   : > { %v7645_v60 = vadd.f32 %v2385_v54, %v7418_v7  ;;  %v5868_v10 = vpop.f32.mrb[61].mxu1  ;;  %6164 = vmatprep.subr.bf16.mxu0 %v8529_v58 }
 0x17c   : > { %v2388_v34 = vpop.f32.mrb[62].mxu1 }
 0x17d   : > { %v7652_v53 = vadd.f32 %v2388_v34, %v7425_v47  ;;  %v5869_v40 = vpop.f32.mrb[63].mxu1 }
 0x17e   : > { %6165 = vmatpush3.bf16.msra.mxu0 %v7527_v16 }
 0x17f   : > { %6067 = vmatmul.mubr.bf16.gmra.mrb[168].mxu1 %v6979_v26  ;;  %6166 = vmatprep.subr.bf16.mxu0 %v8529_v58 }
 0x180   : > { %6070 = vmatprep.mubr.msk.bf16.mxu1 %vm6461_vm0, %v8529_v58 }
 0x181   : > { %6107 = vmatmul.mubr.bf16.gmra.mrb[104].mxu0 %v6995_v51 }
 0x182   : > { %v2393_v30 = vpop.f32.mrb[64].mxu1  ;;  %6110 = vmatprep.mubr.msk.bf16.mxu0 %vm6461_vm0, %v8529_v58  ;;  %6167 = vmatpush3.bf16.msra.mxu0 %v7541_v3 }
 0x183   : > { %v7661_v7 = vadd.f32 %v2393_v30, %v7436_v36  ;;  %v5872_v22 = vpop.f32.mrb[65].mxu1  ;;  %6168 = vmatprep.subr.bf16.mxu0 %v8529_v58 }
 0x184   : > { %v2396_v26 = vpop.f32.mrb[66].mxu1  ;;  %v5744_v47 = vpop.f32.mrb[0].mxu0 }
 0x185   : > { %v7668_v16 = vadd.f32 %v2396_v26, %v7443_v31  ;;  %v5873_v0 = vpop.f32.mrb[67].mxu1  ;;  %2041 = vst.msk [vmem:[#allocation2 + $0x10] sm:$0xff] %vm2038_vm7, %v5744_v47  ;;  %v1879_v51 = vpop.f32.mrb[1].mxu0 }
 0x186   : > { %2039 = vst.msk [vmem:[#allocation2] sm:$0xff] %vm2038_vm7, %v1879_v51  ;;  %v5745_v36 = vpop.f32.mrb[2].mxu0  ;;  %6169 = vmatpush3.bf16.msra.mxu0 %v7551_v25 }
 0x187   : > { %6071 = vmatmul.mubr.bf16.gmra.mrb[172].mxu1 %v6997_v62  ;;  %2042 = vst.msk [vmem:[#allocation2 + $0x18] sm:$0xff] %vm2038_vm7, %v5745_v36  ;;  %v1882_v3 = vpop.f32.mrb[3].mxu0 }
 0x188   : > { %6074 = vmatprep.mubr.msk.bf16.mxu1 %vm6461_vm0, %v8529_v58  ;;  %2040 = vst.msk [vmem:[#allocation2 + $0x8] sm:$0xff] %vm2038_vm7, %v1882_v3 }
 0x189   : > { %6111 = vmatmul.mubr.bf16.gmra.mrb[108].mxu0 %v7001_v43 }
 0x18a   : > { %v2401_v31 = vpop.f32.mrb[68].mxu1  ;;  %6114 = vmatprep.mubr.msk.bf16.mxu0 %vm6461_vm0, %v8529_v58 }
 0x18b   : > { %v7680_v61 = vadd.f32 %v2401_v31, %v7451_v23  ;;  %v5876_v11 = vpop.f32.mrb[69].mxu1 }
 0x18c   : > { %v2404_v62 = vpop.f32.mrb[70].mxu1  ;;  %v5748_v25 = vpop.f32.mrb[4].mxu0 }
 0x18d   : > { %v7685_v54 = vadd.f32 %v2404_v62, %v7455_v32  ;;  %v5877_v10 = vpop.f32.mrb[71].mxu1  ;;  %2045 = vst.msk [vmem:[#allocation2 + $0x30] sm:$0xff] %vm2038_vm7, %v5748_v25  ;;  %v1895_v34 = vpop.f32.mrb[5].mxu0 }
 0x18e   : > { %2043 = vst.msk [vmem:[#allocation2 + $0x20] sm:$0xff] %vm2038_vm7, %v1895_v34  ;;  %v5749_v43 = vpop.f32.mrb[6].mxu0 }
 0x18f   : > { %6075 = vmatmul.mubr.bf16.gmra.mrb[176].mxu1 %v7053_v19  ;;  %2046 = vst.msk [vmem:[#allocation2 + $0x38] sm:$0xff] %vm2038_vm7, %v5749_v43  ;;  %v1898_v23 = vpop.f32.mrb[7].mxu0 }
 0x190   : > { %6182 = vmatprep.mubr.msk.bf16.mxu1 %vm6461_vm0, %v8529_v58  ;;  %2044 = vst.msk [vmem:[#allocation2 + $0x28] sm:$0xff] %vm2038_vm7, %v1898_v23 }
 0x191   : > { %6115 = vmatmul.mubr.bf16.gmra.mrb[112].mxu0 %v7005_v15 }
 0x192   : > { %v2409_v32 = vpop.f32.mrb[72].mxu1  ;;  %6118 = vmatprep.mubr.msk.bf16.mxu0 %vm6461_vm0, %v8529_v58 }
 0x193   : > { %v7696_v40 = vadd.f32 %v2409_v32, %v7461_v59  ;;  %v5880_v30 = vpop.f32.mrb[73].mxu1 }
 0x194   : > { %v2412_v22 = vpop.f32.mrb[74].mxu1  ;;  %v5752_v19 = vpop.f32.mrb[8].mxu0 }
 0x195   : > { %v7701_v26 = vadd.f32 %v2412_v22, %v7465_v46  ;;  %v5881_v47 = vpop.f32.mrb[75].mxu1  ;;  %2049 = vst.msk [vmem:[#allocation2 + $0x50] sm:$0xff] %vm2038_vm7, %v5752_v19  ;;  %v1911_v0 = vpop.f32.mrb[9].mxu0 }
 0x196   : > { %2047 = vst.msk [vmem:[#allocation2 + $0x40] sm:$0xff] %vm2038_vm7, %v1911_v0  ;;  %v5753_v15 = vpop.f32.mrb[10].mxu0 }
 0x197   : > { %6183 = vmatmul.mubr.bf16.vlgmr.msra.gmra.mrb[180].mxu1 %v7110_v14  ;;  %2050 = vst.msk [vmem:[#allocation2 + $0x58] sm:$0xff] %vm2038_vm7, %v5753_v15  ;;  %v1914_v59 = vpop.f32.mrb[11].mxu0 }
 0x198   : > { %6186 = vmatprep.mubr.msk.bf16.mxu1 %vm6461_vm0, %v8529_v58  ;;  %2048 = vst.msk [vmem:[#allocation2 + $0x48] sm:$0xff] %vm2038_vm7, %v1914_v59 }
 0x199   : > { %6119 = vmatmul.mubr.bf16.gmra.mrb[116].mxu0 %v7009_v17 }
 0x19a   : > { %v2417_v46 = vpop.f32.mrb[76].mxu1  ;;  %6122 = vmatprep.mubr.msk.bf16.mxu0 %vm6461_vm0, %v8529_v58 }
 0x19b   : > { %v7712_v51 = vadd.f32 %v2417_v46, %v7483_v6  ;;  %v5884_v36 = vpop.f32.mrb[77].mxu1 }
 0x19c   : > { %v2420_v3 = vpop.f32.mrb[78].mxu1  ;;  %v5756_v14 = vpop.f32.mrb[12].mxu0 }
 0x19d   : > { %v7717_v31 = vadd.f32 %v2420_v3, %v7487_v41  ;;  %v5885_v11 = vpop.f32.mrb[79].mxu1  ;;  %2053 = vst.msk [vmem:[#allocation2 + $0x70] sm:$0xff] %vm2038_vm7, %v5756_v14  ;;  %v1927_v62 = vpop.f32.mrb[13].mxu0 }
 0x19e   : > { %2051 = vst.msk [vmem:[#allocation2 + $0x60] sm:$0xff] %vm2038_vm7, %v1927_v62  ;;  %v5757_v17 = vpop.f32.mrb[14].mxu0 }
 0x19f   : > { %6187 = vmatmul.mubr.bf16.gmra.mrb[184].mxu1 %v7116_v42  ;;  %2054 = vst.msk [vmem:[#allocation2 + $0x78] sm:$0xff] %vm2038_vm7, %v5757_v17  ;;  %v1930_v6 = vpop.f32.mrb[15].mxu0 }
 0x1a0   : > { %6190 = vmatprep.mubr.msk.bf16.mxu1 %vm6461_vm0, %v8529_v58  ;;  %2052 = vst.msk [vmem:[#allocation2 + $0x68] sm:$0xff] %vm2038_vm7, %v1930_v6 }
 0x1a1   : > { %6123 = vmatmul.mubr.bf16.gmra.mrb[120].mxu0 %v7013_v52 }
 0x1a2   : > { %v2425_v41 = vpop.f32.mrb[80].mxu1  ;;  %6126 = vmatprep.mubr.msk.bf16.mxu0 %vm6461_vm0, %v8529_v58 }
 0x1a3   : > { %v7728_v25 = vadd.f32 %v2425_v41, %v7507_v8  ;;  %v5888_v10 = vpop.f32.mrb[81].mxu1 }
 0x1a4   : > { %v2428_v34 = vpop.f32.mrb[82].mxu1  ;;  %v5760_v42 = vpop.f32.mrb[16].mxu0 }
 0x1a5   : > { %v7733_v43 = vadd.f32 %v2428_v34, %v7511_v13  ;;  %v5889_v23 = vpop.f32.mrb[83].mxu1  ;;  %2057 = vst.msk [vmem:[#allocation2 + $0x90] sm:$0xff] %vm2038_vm7, %v5760_v42  ;;  %v1943_v32 = vpop.f32.mrb[17].mxu0 }
 0x1a6   : > { %2055 = vst.msk [vmem:[#allocation2 + $0x80] sm:$0xff] %vm2038_vm7, %v1943_v32  ;;  %v5761_v52 = vpop.f32.mrb[18].mxu0 }
 0x1a7   : > { %6191 = vmatmul.mubr.bf16.gmra.mrb[188].mxu1 %v7126_v29  ;;  %2058 = vst.msk [vmem:[#allocation2 + $0x98] sm:$0xff] %vm2038_vm7, %v5761_v52  ;;  %v1946_v8 = vpop.f32.mrb[19].mxu0 }
 0x1a8   : > { %6194 = vmatprep.mubr.msk.bf16.mxu1 %vm6461_vm0, %v8529_v58  ;;  %2056 = vst.msk [vmem:[#allocation2 + $0x88] sm:$0xff] %vm2038_vm7, %v1946_v8 }
 0x1a9   : > { %6127 = vmatmul.mubr.bf16.gmra.mrb[124].mxu0 %v7017_v2 }
 0x1aa   : > { %v2433_v13 = vpop.f32.mrb[84].mxu1  ;;  %6130 = vmatprep.mubr.msk.bf16.mxu0 %vm6461_vm0, %v8529_v58 }
 0x1ab   : > { %v7744_v30 = vadd.f32 %v2433_v13, %v7531_v38  ;;  %v5892_v22 = vpop.f32.mrb[85].mxu1 }
 0x1ac   : > { %v2436_v19 = vpop.f32.mrb[86].mxu1  ;;  %v5764_v29 = vpop.f32.mrb[20].mxu0 }
 0x1ad   : > { %v7749_v47 = vadd.f32 %v2436_v19, %v7535_v55  ;;  %v5893_v0 = vpop.f32.mrb[87].mxu1  ;;  %2061 = vst.msk [vmem:[#allocation2 + $0xb0] sm:$0xff] %vm2038_vm7, %v5764_v29  ;;  %v1959_v15 = vpop.f32.mrb[21].mxu0  ;;  %v2072_v19 = vld [vmem:[#allocation2 + $0x10] sm:$0xff] }
 0x1ae   : > { %2059 = vst.msk [vmem:[#allocation2 + $0xa0] sm:$0xff] %vm2038_vm7, %v1959_v15  ;;  %v5765_v2 = vpop.f32.mrb[22].mxu0 }
 0x1af   : > { %6195 = vmatmul.mubr.bf16.gmra.mrb[192].mxu1 %v7133_v57  ;;  %2062 = vst.msk [vmem:[#allocation2 + $0xb8] sm:$0xff] %vm2038_vm7, %v5765_v2  ;;  %v1962_v38 = vpop.f32.mrb[23].mxu0  ;;  %v2073_v2 = vld [vmem:[#allocation2 + $0x18] sm:$0xff] }
 0x1b0   : > { %6198 = vmatprep.mubr.msk.bf16.mxu1 %vm6461_vm0, %v8529_v58  ;;  %2060 = vst.msk [vmem:[#allocation2 + $0xa8] sm:$0xff] %vm2038_vm7, %v1962_v38  ;;  %v8570_v38 = vld [vmem:[#allocation22_spill] sm:$0xff] }
 0x1b1   : > { %6131 = vmatmul.mubr.bf16.gmra.mrb[128].mxu0 %v7024_v50 }
 0x1b2   : > { %v2441_v55 = vpop.f32.mrb[88].mxu1  ;;  %6134 = vmatprep.mubr.msk.bf16.mxu0 %vm6461_vm0, %v8529_v58 }
 0x1b3   : > { %v7760_v59 = vadd.f32 %v2441_v55, %v7555_v24  ;;  %v5896_v46 = vpop.f32.mrb[89].mxu1 }
 0x1b4   : > { %v2444_v36 = vpop.f32.mrb[90].mxu1  ;;  %v5768_v57 = vpop.f32.mrb[24].mxu0 }
 0x1b5   : > { %v7765_v3 = vadd.f32 %v2444_v36, %v7559_v35  ;;  %v5897_v14 = vpop.f32.mrb[91].mxu1  ;;  %2065 = vst.msk [vmem:[#allocation2 + $0xd0] sm:$0xff] %vm2038_vm7, %v5768_v57  ;;  %v1975_v11 = vpop.f32.mrb[25].mxu0 }
 0x1b6   : > { %2063 = vst.msk [vmem:[#allocation2 + $0xc0] sm:$0xff] %vm2038_vm7, %v1975_v11  ;;  %v5769_v50 = vpop.f32.mrb[26].mxu0 }
 0x1b7   : > { %6199 = vmatmul.mubr.bf16.gmra.mrb[196].mxu1 %v7153_v5  ;;  %2066 = vst.msk [vmem:[#allocation2 + $0xd8] sm:$0xff] %vm2038_vm7, %v5769_v50  ;;  %v1978_v24 = vpop.f32.mrb[27].mxu0 }
 0x1b8   : > { %6202 = vmatprep.mubr.msk.bf16.mxu1 %vm6461_vm0, %v8529_v58  ;;  %2064 = vst.msk [vmem:[#allocation2 + $0xc8] sm:$0xff] %vm2038_vm7, %v1978_v24  ;;  %v2074_v24 = vld [vmem:[#allocation2 + $0x20] sm:$0xff] }
 0x1b9   : > { %6135 = vmatmul.mubr.bf16.gmra.mrb[132].mxu0 %v7028_v1 }
 0x1ba   : > { %v2449_v35 = vpop.f32.mrb[92].mxu1  ;;  %6138 = vmatprep.mubr.msk.bf16.mxu0 %vm6461_vm0, %v8529_v58 }
 0x1bb   : > { %v7776_v62 = vadd.f32 %v2449_v35, %v7566_v44  ;;  %v5900_v17 = vpop.f32.mrb[93].mxu1 }
 0x1bc   : > { %v2452_v6 = vpop.f32.mrb[94].mxu1  ;;  %v5772_v5 = vpop.f32.mrb[28].mxu0  ;;  %v8571_v17 = vld [vmem:[#allocation8_spill] sm:$0xff] }
 0x1bd   : > { %v7781_v41 = vadd.f32 %v2452_v6, %v7570_v48  ;;  %v5901_v10 = vpop.f32.mrb[95].mxu1  ;;  %2069 = vst.msk [vmem:[#allocation2 + $0xf0] sm:$0xff] %vm2038_vm7, %v5772_v5  ;;  %v1991_v34 = vpop.f32.mrb[29].mxu0 }
 0x1be   : > { %2067 = vst.msk [vmem:[#allocation2 + $0xe0] sm:$0xff] %vm2038_vm7, %v1991_v34  ;;  %v5773_v1 = vpop.f32.mrb[30].mxu0  ;;  %v2075_v10 = vld [vmem:[#allocation2 + $0x28] sm:$0xff]  ;;  %v8572_v34 = vld [vmem:[#allocation23_spill] sm:$0xff] }
 0x1bf   : > { %6203 = vmatmul.mubr.bf16.gmra.mrb[200].mxu1 %v7160_v27  ;;  %2070 = vst.msk [vmem:[#allocation2 + $0xf8] sm:$0xff] %vm2038_vm7, %v5773_v1  ;;  %v1994_v44 = vpop.f32.mrb[31].mxu0 }
 0x1c0   : > { %6206 = vmatprep.mubr.msk.bf16.mxu1 %vm6461_vm0, %v8529_v58  ;;  %2068 = vst.msk [vmem:[#allocation2 + $0xe8] sm:$0xff] %vm2038_vm7, %v1994_v44 }
 0x1c1   : > { %6139 = vmatmul.mubr.bf16.gmra.mrb[136].mxu0 %v7032_v33  ;;  %v8569_v33 = vld [vmem:[#allocation6_spill] sm:$0xff] }
 0x1c2   : > { %v2457_v48 = vpop.f32.mrb[96].mxu1  ;;  %6142 = vmatprep.mubr.msk.bf16.mxu0 %vm6461_vm0, %v8529_v58 }
 0x1c3   : > { %v7792_v42 = vadd.f32 %v2457_v48, %v7576_v45  ;;  %v5904_v23 = vpop.f32.mrb[97].mxu1 }
 0x1c4   : > { %v2460_v32 = vpop.f32.mrb[98].mxu1  ;;  %v2586_v27 = vpop.f32.mrb[32].mxu0 }
 0x1c5   : > { %v7797_v52 = vadd.f32 %v2460_v32, %v7580_v63  ;;  %v5905_v8 = vpop.f32.mrb[99].mxu1  ;;  %v2705_v13 = vadd.f32 %v2586_v27, %v7645_v60  ;;  %v5944_v22 = vpop.f32.mrb[33].mxu0 }
 0x1c6   : > { %v2589_v29 = vpop.f32.mrb[34].mxu0 }
 0x1c7   : > { %6207 = vmatmul.mubr.bf16.gmra.mrb[204].mxu1 %v8569_v33  ;;  %v2735_v0 = vadd.f32 %v2705_v13, %v2072_v19  ;;  %v2706_v45 = vadd.f32 %v2589_v29, %v7652_v53  ;;  %v5945_v15 = vpop.f32.mrb[35].mxu0  ;;  %v2076_v13 = vld [vmem:[#allocation2 + $0x30] sm:$0xff] }
 0x1c8   : > { %6210 = vmatprep.mubr.msk.bf16.mxu1 %vm6461_vm0, %v8529_v58  ;;  %v8573_v19 = vld [vmem:[#allocation13_spill] sm:$0xff] }
 0x1c9   : > { %2765 = vst.msk [vmem:[#allocation2 + $0x10] sm:$0xff] %vm2038_vm7, %v2735_v0  ;;  %v2736_v63 = vadd.f32 %v2706_v45, %v2073_v2  ;;  %6143 = vmatmul.mubr.bf16.gmra.mrb[140].mxu0 %v8570_v38  ;;  %v2077_v0 = vld [vmem:[#allocation2 + $0x38] sm:$0xff]  ;;  %v8574_v45 = vld [vmem:[#allocation24_spill] sm:$0xff] }
 0x1ca   : > { %v2465_v55 = vpop.f32.mrb[100].mxu1  ;;  %6146 = vmatprep.mubr.msk.bf16.mxu0 %vm6461_vm0, %v8529_v58 }
 0x1cb   : > { %v7807_v60 = vadd.f32 %v2465_v55, %v7586_v49  ;;  %v5908_v46 = vpop.f32.mrb[101].mxu1  ;;  %2766 = vst.msk [vmem:[#allocation2 + $0x18] sm:$0xff] %vm2038_vm7, %v2736_v63 }
 0x1cc   : > { %v2468_v53 = vpop.f32.mrb[102].mxu1  ;;  %v2594_v36 = vpop.f32.mrb[36].mxu0 }
 0x1cd   : > { %v7813_v57 = vadd.f32 %v2468_v53, %v7590_v37  ;;  %v5909_v14 = vpop.f32.mrb[103].mxu1  ;;  %v2707_v11 = vadd.f32 %v2594_v36, %v7661_v7  ;;  %v5948_v50 = vpop.f32.mrb[37].mxu0  ;;  %v2078_v36 = vld [vmem:[#allocation2 + $0x40] sm:$0xff] }
 0x1ce   : > { %v2597_v35 = vpop.f32.mrb[38].mxu0 }
 0x1cf   : > { %6211 = vmatmul.mubr.bf16.gmra.mrb[208].mxu1 %v8571_v17  ;;  %v2737_v49 = vadd.f32 %v2707_v11, %v2074_v24  ;;  %v2708_v6 = vadd.f32 %v2597_v35, %v7668_v16  ;;  %v5949_v5 = vpop.f32.mrb[39].mxu0  ;;  %v8575_v11 = vld [vmem:[#allocation10_spill] sm:$0xff]  ;;  %v2079_v35 = vld [vmem:[#allocation2 + $0x48] sm:$0xff]  ;;  %v8576_v17 = vld [vmem:[#allocation15_spill] sm:$0xff] }
 0x1d0   : > { %6214 = vmatprep.mubr.msk.bf16.mxu1 %vm6461_vm0, %v8529_v58 }
 0x1d1   : > { %2767 = vst.msk [vmem:[#allocation2 + $0x20] sm:$0xff] %vm2038_vm7, %v2737_v49  ;;  %v2738_v37 = vadd.f32 %v2708_v6, %v2075_v10  ;;  %6147 = vmatmul.mubr.bf16.gmra.mrb[144].mxu0 %v8572_v34 }
 0x1d2   : > { %v2473_v1 = vpop.f32.mrb[104].mxu1  ;;  %6150 = vmatprep.mubr.msk.bf16.mxu0 %vm6461_vm0, %v8529_v58 }
 0x1d3   : > { %v7823_v7 = vadd.f32 %v2473_v1, %v7596_v39  ;;  %v5912_v44 = vpop.f32.mrb[105].mxu1  ;;  %2768 = vst.msk [vmem:[#allocation2 + $0x28] sm:$0xff] %vm2038_vm7, %v2738_v37 }
 0x1d4   : > { %v2476_v16 = vpop.f32.mrb[106].mxu1  ;;  %v2602_v48 = vpop.f32.mrb[40].mxu0  ;;  %v2080_v44 = vld [vmem:[#allocation2 + $0x50] sm:$0xff] }
 0x1d5   : > { %v7829_v23 = vadd.f32 %v2476_v16, %v7600_v56  ;;  %v5913_v32 = vpop.f32.mrb[107].mxu1  ;;  %v2709_v27 = vadd.f32 %v2602_v48, %v7680_v61  ;;  %v5952_v8 = vpop.f32.mrb[41].mxu0 }
 0x1d6   : > { %v2605_v22 = vpop.f32.mrb[42].mxu0  ;;  %v8577_v8 = vld [vmem:[#allocation12_spill] sm:$0xff] }
 0x1d7   : > { %6215 = vmatmul.mubr.bf16.gmra.mrb[212].mxu1 %v8573_v19  ;;  %v2739_v39 = vadd.f32 %v2709_v27, %v2076_v13  ;;  %v2710_v29 = vadd.f32 %v2605_v22, %v7685_v54  ;;  %v5953_v33 = vpop.f32.mrb[43].mxu0  ;;  %v2081_v27 = vld [vmem:[#allocation2 + $0x58] sm:$0xff] }
 0x1d8   : > { %6218 = vmatprep.mubr.msk.bf16.mxu1 %vm6461_vm0, %v8529_v58 }
 0x1d9   : > { %2769 = vst.msk [vmem:[#allocation2 + $0x30] sm:$0xff] %vm2038_vm7, %v2739_v39  ;;  %v2740_v56 = vadd.f32 %v2710_v29, %v2077_v0  ;;  %6151 = vmatmul.mubr.bf16.gmra.mrb[148].mxu0 %v8574_v45  ;;  %v2082_v0 = vld [vmem:[#allocation2 + $0x60] sm:$0xff] }
 0x1da   : > { %v2481_v15 = vpop.f32.mrb[108].mxu1  ;;  %6170 = vmatprep.mubr.msk.bf16.mxu0 %vm6461_vm0, %v8529_v58  ;;  %v8578_v45 = vld [vmem:[#allocation11_spill] sm:$0xff] }
 0x1db   : > { %v7839_v61 = vadd.f32 %v2481_v15, %v7606_v28  ;;  %v5916_v2 = vpop.f32.mrb[109].mxu1  ;;  %2770 = vst.msk [vmem:[#allocation2 + $0x38] sm:$0xff] %vm2038_vm7, %v2740_v56 }
 0x1dc   : > { %v2484_v54 = vpop.f32.mrb[110].mxu1  ;;  %v2610_v63 = vpop.f32.mrb[44].mxu0 }
 0x1dd   : > { %v7845_v38 = vadd.f32 %v2484_v54, %v7610_v18  ;;  %v5917_v55 = vpop.f32.mrb[111].mxu1  ;;  %v2711_v46 = vadd.f32 %v2610_v63, %v7696_v40  ;;  %v5956_v53 = vpop.f32.mrb[45].mxu0  ;;  %v8579_v63 = vld [vmem:[#allocation25_spill] sm:$0xff] }
 0x1de   : > { %v2613_v14 = vpop.f32.mrb[46].mxu0 }
 0x1df   : > { %6219 = vmatmul.mubr.bf16.gmra.mrb[216].mxu1 %v8575_v11  ;;  %v2741_v28 = vadd.f32 %v2711_v46, %v2078_v36  ;;  %v2712_v50 = vadd.f32 %v2613_v14, %v7701_v26  ;;  %v5957_v24 = vpop.f32.mrb[47].mxu0 }
 0x1e0   : > { %6222 = vmatprep.mubr.msk.bf16.mxu1 %vm6461_vm0, %v8529_v58 }
 0x1e1   : > { %2771 = vst.msk [vmem:[#allocation2 + $0x40] sm:$0xff] %vm2038_vm7, %v2741_v28  ;;  %v2742_v18 = vadd.f32 %v2712_v50, %v2079_v35  ;;  %6171 = vmatmul.mubr.bf16.vlgmr.msra.gmra.mrb[152].mxu0 %v8576_v17  ;;  %v2085_v35 = vld [vmem:[#allocation2 + $0x78] sm:$0xff] }
 0x1e2   : > { %v2489_v49 = vpop.f32.mrb[112].mxu1  ;;  %6174 = vmatprep.mubr.msk.bf16.mxu0 %vm6461_vm0, %v8529_v58 }
 0x1e3   : > { %v7855_v40 = vadd.f32 %v2489_v49, %v7616_v21  ;;  %v5920_v6 = vpop.f32.mrb[113].mxu1  ;;  %2772 = vst.msk [vmem:[#allocation2 + $0x48] sm:$0xff] %vm2038_vm7, %v2742_v18 }
 0x1e4   : > { %v2492_v26 = vpop.f32.mrb[114].mxu1  ;;  %v2618_v5 = vpop.f32.mrb[48].mxu0 }
 0x1e5   : > { %v7861_v10 = vadd.f32 %v2492_v26, %v7621_v12  ;;  %v5921_v37 = vpop.f32.mrb[115].mxu1  ;;  %v2713_v34 = vadd.f32 %v2618_v5, %v7712_v51  ;;  %v5960_v1 = vpop.f32.mrb[49].mxu0 }
 0x1e6   : > { %v2621_v16 = vpop.f32.mrb[50].mxu0 }
 0x1e7   : > { %6223 = vmatmul.mubr.bf16.gmra.mrb[220].mxu1 %v7216_v20  ;;  %v2743_v21 = vadd.f32 %v2713_v34, %v2080_v44  ;;  %v2714_v48 = vadd.f32 %v2621_v16, %v7717_v31  ;;  %v5961_v32 = vpop.f32.mrb[51].mxu0  ;;  %v2086_v34 = vld [vmem:[#allocation2 + $0x80] sm:$0xff] }
 0x1e8   : > { %6226 = vmatprep.mubr.msk.bf16.mxu1 %vm6461_vm0, %v8529_v58 }
 0x1e9   : > { %2773 = vst.msk [vmem:[#allocation2 + $0x50] sm:$0xff] %vm2038_vm7, %v2743_v21  ;;  %v2744_v12 = vadd.f32 %v2714_v48, %v2081_v27  ;;  %6175 = vmatmul.mubr.bf16.gmra.mrb[156].mxu0 %v8577_v8  ;;  %v2087_v21 = vld [vmem:[#allocation2 + $0x88] sm:$0xff] }
 0x1ea   : > { %v2497_v13 = vpop.f32.mrb[116].mxu1  ;;  %6178 = vmatprep.mubr.msk.bf16.mxu0 %vm6461_vm0, %v8529_v58  ;;  %v2083_v58 = vld [vmem:[#allocation2 + $0x68] sm:$0xff] }
 0x1eb   : > { %v7871_v51 = vadd.f32 %v2497_v13, %v7630_v9  ;;  %v5924_v22 = vpop.f32.mrb[117].mxu1  ;;  %2774 = vst.msk [vmem:[#allocation2 + $0x58] sm:$0xff] %vm2038_vm7, %v2744_v12 }
 0x1ec   : > { %v2500_v20 = vpop.f32.mrb[118].mxu1  ;;  %v2626_v31 = vpop.f32.mrb[52].mxu0 }
 0x1ed   : > { %v7877_v19 = vadd.f32 %v2500_v20, %v7635_v4  ;;  %v5925_v39 = vpop.f32.mrb[119].mxu1  ;;  %v2715_v29 = vadd.f32 %v2626_v31, %v7728_v25  ;;  %v5964_v33 = vpop.f32.mrb[53].mxu0  ;;  %v2088_v20 = vld [vmem:[#allocation2 + $0x90] sm:$0xff] }
 0x1ee   : > { %v2629_v56 = vpop.f32.mrb[54].mxu0  ;;  %v2089_v33 = vld [vmem:[#allocation2 + $0x98] sm:$0xff] }
 0x1ef   : > { %6227 = vmatmul.mubr.bf16.gmra.mrb[224].mxu1 %v8578_v45  ;;  %v2745_v9 = vadd.f32 %v2715_v29, %v2082_v0  ;;  %v2716_v15 = vadd.f32 %v2629_v56, %v7733_v43  ;;  %v5965_v2 = vpop.f32.mrb[55].mxu0  ;;  %v2084_v43 = vld [vmem:[#allocation2 + $0x70] sm:$0xff] }
 0x1f1   : > { %2775 = vst.msk [vmem:[#allocation2 + $0x60] sm:$0xff] %vm2038_vm7, %v2745_v9  ;;  %v2746_v54 = vadd.f32 %v2716_v15, %v2083_v58  ;;  %6179 = vmatmul.mubr.bf16.gmra.mrb[160].mxu0 %v8579_v63 }
 0x1f2   : > { %v7884_v4 = vpop.f32.mrb[120].mxu1 }
 0x1f3   : > { %v6020_v55 = vpop.f32.mrb[121].mxu1  ;;  %2776 = vst.msk [vmem:[#allocation2 + $0x68] sm:$0xff] %vm2038_vm7, %v2746_v54  ;;  %v2090_v54 = vld [vmem:[#allocation2 + $0xa0] sm:$0xff] }
 0x1f4   : > { %v7887_v25 = vpop.f32.mrb[122].mxu1  ;;  %v2634_v46 = vpop.f32.mrb[56].mxu0 }
 0x1f5   : > { %v6021_v53 = vpop.f32.mrb[123].mxu1  ;;  %v2717_v36 = vadd.f32 %v2634_v46, %v7744_v30  ;;  %v5968_v14 = vpop.f32.mrb[57].mxu0 }
 0x1f6   : > { %v2637_v11 = vpop.f32.mrb[58].mxu0  ;;  %v2091_v53 = vld [vmem:[#allocation2 + $0xa8] sm:$0xff] }
 0x1f7   : > { %v2747_v28 = vadd.f32 %v2717_v36, %v2084_v43  ;;  %v2718_v50 = vadd.f32 %v2637_v11, %v7749_v47  ;;  %v5969_v24 = vpop.f32.mrb[59].mxu0 }
 0x1f9   : > { %2777 = vst.msk [vmem:[#allocation2 + $0x70] sm:$0xff] %vm2038_vm7, %v2747_v28  ;;  %v2748_v18 = vadd.f32 %v2718_v50, %v2085_v35  ;;  %v2092_v35 = vld [vmem:[#allocation2 + $0xb0] sm:$0xff] }
 0x1fa   : > { %v7892_v17 = vpop.f32.mrb[124].mxu1 }
 0x1fb   : > { %v6024_v49 = vpop.f32.mrb[125].mxu1  ;;  %2778 = vst.msk [vmem:[#allocation2 + $0x78] sm:$0xff] %vm2038_vm7, %v2748_v18 }
 0x1fc   : > { %v7895_v6 = vpop.f32.mrb[126].mxu1  ;;  %v2642_v26 = vpop.f32.mrb[60].mxu0 }
 0x1fd   : > { %v6025_v30 = vpop.f32.mrb[127].mxu1  ;;  %v2719_v5 = vadd.f32 %v2642_v26, %v7760_v59  ;;  %v5972_v37 = vpop.f32.mrb[61].mxu0 }
 0x1fe   : > { %v2645_v1 = vpop.f32.mrb[62].mxu0  ;;  %v2093_v30 = vld [vmem:[#allocation2 + $0xb8] sm:$0xff] }
 0x1ff   : > { %v2749_v47 = vadd.f32 %v2719_v5, %v2086_v34  ;;  %v2720_v44 = vadd.f32 %v2645_v1, %v7765_v3  ;;  %v5973_v16 = vpop.f32.mrb[63].mxu0 }
 0x201   : > { %2779 = vst.msk [vmem:[#allocation2 + $0x80] sm:$0xff] %vm2038_vm7, %v2749_v47  ;;  %v2750_v48 = vadd.f32 %v2720_v44, %v2087_v21  ;;  %v2094_v21 = vld [vmem:[#allocation2 + $0xc0] sm:$0xff] }
 0x202   : > { %v7900_v32 = vpop.f32.mrb[128].mxu1 }
 0x203   : > { %v6028_v27 = vpop.f32.mrb[129].mxu1  ;;  %2780 = vst.msk [vmem:[#allocation2 + $0x88] sm:$0xff] %vm2038_vm7, %v2750_v48 }
 0x204   : > { %v7903_v12 = vpop.f32.mrb[130].mxu1  ;;  %v2650_v8 = vpop.f32.mrb[64].mxu0 }
 0x205   : > { %v6029_v59 = vpop.f32.mrb[131].mxu1  ;;  %v2721_v13 = vadd.f32 %v2650_v8, %v7776_v62  ;;  %v5976_v22 = vpop.f32.mrb[65].mxu0 }
 0x206   : > { %v2653_v31 = vpop.f32.mrb[66].mxu0  ;;  %v2095_v59 = vld [vmem:[#allocation2 + $0xc8] sm:$0xff] }
 0x207   : > { %v2751_v3 = vadd.f32 %v2721_v13, %v2088_v20  ;;  %v2722_v39 = vadd.f32 %v2653_v31, %v7781_v41  ;;  %v5977_v29 = vpop.f32.mrb[67].mxu0 }
 0x209   : > { %2781 = vst.msk [vmem:[#allocation2 + $0x90] sm:$0xff] %vm2038_vm7, %v2751_v3  ;;  %v2752_v0 = vadd.f32 %v2722_v39, %v2089_v33  ;;  %v2096_v33 = vld [vmem:[#allocation2 + $0xd0] sm:$0xff] }
 0x20a   : > { %v7908_v56 = vpop.f32.mrb[132].mxu1 }
 0x20b   : > { %v6032_v45 = vpop.f32.mrb[133].mxu1  ;;  %2782 = vst.msk [vmem:[#allocation2 + $0x98] sm:$0xff] %vm2038_vm7, %v2752_v0 }
 0x20c   : > { %v7911_v9 = vpop.f32.mrb[134].mxu1  ;;  %v2658_v15 = vpop.f32.mrb[68].mxu0 }
 0x20d   : > { %v6033_v62 = vpop.f32.mrb[135].mxu1  ;;  %v2723_v2 = vadd.f32 %v2658_v15, %v7792_v42  ;;  %v5980_v58 = vpop.f32.mrb[69].mxu0 }
 0x20e   : > { %v2661_v63 = vpop.f32.mrb[70].mxu0  ;;  %v2097_v62 = vld [vmem:[#allocation2 + $0xd8] sm:$0xff] }
 0x20f   : > { %v2753_v41 = vadd.f32 %v2723_v2, %v2090_v54  ;;  %v2724_v55 = vadd.f32 %v2661_v63, %v7797_v52  ;;  %v5981_v46 = vpop.f32.mrb[71].mxu0 }
 0x211   : > { %2783 = vst.msk [vmem:[#allocation2 + $0xa0] sm:$0xff] %vm2038_vm7, %v2753_v41  ;;  %v2754_v36 = vadd.f32 %v2724_v55, %v2091_v53  ;;  %v2098_v53 = vld [vmem:[#allocation2 + $0xe0] sm:$0xff] }
 0x212   : > { %v7916_v14 = vpop.f32.mrb[136].mxu1 }
 0x213   : > { %v6036_v43 = vpop.f32.mrb[137].mxu1  ;;  %2784 = vst.msk [vmem:[#allocation2 + $0xa8] sm:$0xff] %vm2038_vm7, %v2754_v36 }
 0x214   : > { %v7919_v11 = vpop.f32.mrb[138].mxu1  ;;  %v2666_v28 = vpop.f32.mrb[72].mxu0 }
 0x215   : > { %v6037_v42 = vpop.f32.mrb[139].mxu1  ;;  %v2725_v50 = vadd.f32 %v2666_v28, %v7807_v60  ;;  %v5984_v24 = vpop.f32.mrb[73].mxu0 }
 0x216   : > { %v2669_v18 = vpop.f32.mrb[74].mxu0  ;;  %v2099_v42 = vld [vmem:[#allocation2 + $0xe8] sm:$0xff] }
 0x217   : > { %v2755_v52 = vadd.f32 %v2725_v50, %v2092_v35  ;;  %v2726_v49 = vadd.f32 %v2669_v18, %v7813_v57  ;;  %v5985_v26 = vpop.f32.mrb[75].mxu0 }
 0x219   : > { %2785 = vst.msk [vmem:[#allocation2 + $0xb0] sm:$0xff] %vm2038_vm7, %v2755_v52  ;;  %v2756_v5 = vadd.f32 %v2726_v49, %v2093_v30  ;;  %v2100_v30 = vld [vmem:[#allocation2 + $0xf0] sm:$0xff] }
 0x21a   : > { %v7924_v37 = vpop.f32.mrb[140].mxu1 }
 0x21b   : > { %v6040_v34 = vpop.f32.mrb[141].mxu1  ;;  %2786 = vst.msk [vmem:[#allocation2 + $0xb8] sm:$0xff] %vm2038_vm7, %v2756_v5 }
 0x21c   : > { %v7927_v1 = vpop.f32.mrb[142].mxu1  ;;  %v2674_v47 = vpop.f32.mrb[76].mxu0 }
 0x21d   : > { %v6041_v60 = vpop.f32.mrb[143].mxu1  ;;  %v2727_v44 = vadd.f32 %v2674_v47, %v7823_v7  ;;  %v5988_v16 = vpop.f32.mrb[77].mxu0 }
 0x21e   : > { %v2677_v48 = vpop.f32.mrb[78].mxu0  ;;  %v2101_v60 = vld [vmem:[#allocation2 + $0xf8] sm:$0xff] }
 0x21f   : > { %v2757_v57 = vadd.f32 %v2727_v44, %v2094_v21  ;;  %v2728_v27 = vadd.f32 %v2677_v48, %v7829_v23  ;;  %v5989_v8 = vpop.f32.mrb[79].mxu0 }
 0x221   : > { %2787 = vst.msk [vmem:[#allocation2 + $0xc0] sm:$0xff] %vm2038_vm7, %v2757_v57  ;;  %v2758_v13 = vadd.f32 %v2728_v27, %v2095_v59 }
 0x222   : > { %v7932_v22 = vpop.f32.mrb[144].mxu1 }
 0x223   : > { %v6044_v20 = vpop.f32.mrb[145].mxu1  ;;  %2788 = vst.msk [vmem:[#allocation2 + $0xc8] sm:$0xff] %vm2038_vm7, %v2758_v13 }
 0x224   : > { %v7935_v31 = vpop.f32.mrb[146].mxu1  ;;  %v2682_v3 = vpop.f32.mrb[80].mxu0 }
 0x225   : > { %v6045_v7 = vpop.f32.mrb[147].mxu1  ;;  %v2729_v39 = vadd.f32 %v2682_v3, %v7839_v61  ;;  %v5992_v29 = vpop.f32.mrb[81].mxu0 }
 0x226   : > { %v2685_v0 = vpop.f32.mrb[82].mxu0 }
 0x227   : > { %v2759_v23 = vadd.f32 %v2729_v39, %v2096_v33  ;;  %v2730_v45 = vadd.f32 %v2685_v0, %v7845_v38  ;;  %v5993_v15 = vpop.f32.mrb[83].mxu0 }
 0x229   : > { %2789 = vst.msk [vmem:[#allocation2 + $0xd0] sm:$0xff] %vm2038_vm7, %v2759_v23  ;;  %v2760_v2 = vadd.f32 %v2730_v45, %v2097_v62 }
 0x22a   : > { %v7940_v58 = vpop.f32.mrb[148].mxu1 }
 0x22b   : > { %v6048_v54 = vpop.f32.mrb[149].mxu1  ;;  %2790 = vst.msk [vmem:[#allocation2 + $0xd8] sm:$0xff] %vm2038_vm7, %v2760_v2 }
 0x22c   : > { %v7943_v63 = vpop.f32.mrb[150].mxu1  ;;  %v2690_v41 = vpop.f32.mrb[84].mxu0 }
 0x22d   : > { %v6049_v61 = vpop.f32.mrb[151].mxu1  ;;  %v2731_v55 = vadd.f32 %v2690_v41, %v7855_v40  ;;  %v5996_v46 = vpop.f32.mrb[85].mxu0 }
 0x22e   : > { %v2693_v36 = vpop.f32.mrb[86].mxu0 }
 0x22f   : > { %v2761_v38 = vadd.f32 %v2731_v55, %v2098_v53  ;;  %v2732_v43 = vadd.f32 %v2693_v36, %v7861_v10  ;;  %v5997_v28 = vpop.f32.mrb[87].mxu0 }
 0x231   : > { %2791 = vst.msk [vmem:[#allocation2 + $0xe0] sm:$0xff] %vm2038_vm7, %v2761_v38  ;;  %v2762_v50 = vadd.f32 %v2732_v43, %v2099_v42 }
 0x232   : > { %v7948_v24 = vpop.f32.mrb[152].mxu1 }
 0x233   : > { %v6052_v35 = vpop.f32.mrb[153].mxu1  ;;  %2792 = vst.msk [vmem:[#allocation2 + $0xe8] sm:$0xff] %vm2038_vm7, %v2762_v50 }
 0x234   : > { %v7951_v18 = vpop.f32.mrb[154].mxu1  ;;  %v2698_v52 = vpop.f32.mrb[88].mxu0 }
 0x235   : > { %v6053_v40 = vpop.f32.mrb[155].mxu1  ;;  %v2733_v49 = vadd.f32 %v2698_v52, %v7871_v51  ;;  %v6000_v26 = vpop.f32.mrb[89].mxu0 }
 0x236   : > { %v2701_v5 = vpop.f32.mrb[90].mxu0 }
 0x237   : > { %v2763_v10 = vadd.f32 %v2733_v49, %v2100_v30  ;;  %v2734_v34 = vadd.f32 %v2701_v5, %v7877_v19  ;;  %v6001_v47 = vpop.f32.mrb[91].mxu0  ;;  %v7967_v19 = vld [vmem:[%s8476_s4] ss:$0 sm:$0xff] }
 0x239   : > { %2793 = vst.msk [vmem:[#allocation2 + $0xf0] sm:$0xff] %vm2038_vm7, %v2763_v10  ;;  %v2764_v44 = vadd.f32 %v2734_v34, %v2101_v60 }
 0x23a   : > { %v7956_v16 = vpop.f32.mrb[156].mxu1 }
 0x23b   : > { %v6056_v21 = vpop.f32.mrb[157].mxu1  ;;  %2794 = vst.msk [vmem:[#allocation2 + $0xf8] sm:$0xff] %vm2038_vm7, %v2764_v44 }
 0x23c   : > { %v7959_v48 = vpop.f32.mrb[158].mxu1  ;;  %v3108_v51 = vpop.f32.mrb[92].mxu0 }
 0x23d   : > { %v6057_v57 = vpop.f32.mrb[159].mxu1  ;;  %v7962_v27 = vadd.f32 %v3108_v51, %v7884_v4  ;;  %v6096_v8 = vpop.f32.mrb[93].mxu0 }
 0x23e   : > { %v3111_v59 = vpop.f32.mrb[94].mxu0 }
 0x23f   : > { %v7971_v13 = vadd.f32 %v3111_v59, %v7887_v25  ;;  %v6097_v20 = vpop.f32.mrb[95].mxu0 }
 0x240   : > { %v3881_v3 = vld [vmem:[#allocation2 + $0xf0] sm:$0xff] }
 0x241   : > { %v7974_v7 = vadd.f32 %v7967_v19, %v3881_v3 }
 0x242   : > { %v7976_v39 = vpop.f32.mrb[160].mxu1  ;;  %v3882_v4 = vld [vmem:[#allocation2 + $0xf8] sm:$0xff] }
 0x243   : > { %v6060_v29 = vpop.f32.mrb[161].mxu1  ;;  %v3952_v33 = vmax.f32 %v7974_v7, 0.0  ;;  %v7985_v25 = vadd.f32 %v7967_v19, %v3882_v4 }
 0x244   : > { %v7987_v0 = vpop.f32.mrb[162].mxu1  ;;  %v3116_v23 = vpop.f32.mrb[96].mxu0 }
 0x245   : > { %v6061_v45 = vpop.f32.mrb[163].mxu1  ;;  %3984 = vst.msk [vmem:[%s7981_s25 + $0xf0] sm:$0xff] %vm2038_vm7, %v3952_v33  ;;  %v3953_v15 = vmax.f32 %v7985_v25, 0.0  ;;  %v7995_v62 = vadd.f32 %v3116_v23, %v7892_v17  ;;  %v6100_v2 = vpop.f32.mrb[97].mxu0 }
 0x246   : > { %v3119_v54 = vpop.f32.mrb[98].mxu0 }
 0x247   : > { %3985 = vst.msk [vmem:[%s7981_s25 + $0xf8] sm:$0xff] %vm2038_vm7, %v3953_v15  ;;  %v8002_v41 = vadd.f32 %v3119_v54, %v7895_v6  ;;  %v6101_v61 = vpop.f32.mrb[99].mxu0 }
 0x24a   : > { %v8004_v55 = vpop.f32.mrb[164].mxu1 }
 0x24b   : > { %v6064_v46 = vpop.f32.mrb[165].mxu1 }
 0x24c   : > { %v8006_v53 = vpop.f32.mrb[166].mxu1  ;;  %v3124_v36 = vpop.f32.mrb[100].mxu0 }
 0x24d   : > { %v6065_v38 = vpop.f32.mrb[167].mxu1  ;;  %v8009_v17 = vadd.f32 %v3124_v36, %v7900_v32  ;;  %v6104_v43 = vpop.f32.mrb[101].mxu0  ;;  %v2801_v36 = vld [vmem:[#allocation2 + $0x30] sm:$0xff] }
 0x24e   : > { %v3127_v28 = vpop.f32.mrb[102].mxu0 }
 0x24f   : > { %v8012_v42 = vadd.f32 %v3127_v28, %v7903_v12  ;;  %v6105_v50 = vpop.f32.mrb[103].mxu0 }
 0x252   : > { %v8014_v35 = vpop.f32.mrb[168].mxu1 }
 0x253   : > { %v6068_v6 = vpop.f32.mrb[169].mxu1 }
 0x254   : > { %v8016_v52 = vpop.f32.mrb[170].mxu1  ;;  %v3132_v40 = vpop.f32.mrb[104].mxu0 }
 0x255   : > { %v6069_v49 = vpop.f32.mrb[171].mxu1  ;;  %v3133_v26 = vadd.f32 %v3132_v40, %v7908_v56  ;;  %v6108_v30 = vpop.f32.mrb[105].mxu0 }
 0x256   : > { %v3135_v5 = vpop.f32.mrb[106].mxu0  ;;  %v2802_v49 = vld [vmem:[#allocation2 + $0x38] sm:$0xff] }
 0x257   : > { %v3136_v32 = vadd.f32 %v3135_v5, %v7911_v9  ;;  %v6109_v10 = vpop.f32.mrb[107].mxu0 }
 0x25a   : > { %v8020_v34 = vpop.f32.mrb[172].mxu1 }
 0x25b   : > { %v6072_v47 = vpop.f32.mrb[173].mxu1 }
 0x25c   : > { %v8022_v12 = vpop.f32.mrb[174].mxu1  ;;  %v3140_v60 = vpop.f32.mrb[108].mxu0 }
 0x25d   : > { %v6073_v44 = vpop.f32.mrb[175].mxu1  ;;  %v3141_v21 = vadd.f32 %v3140_v60, %v7916_v14  ;;  %v6112_v51 = vpop.f32.mrb[109].mxu0 }
 0x25e   : > { %v3143_v57 = vpop.f32.mrb[110].mxu0 }
 0x25f   : > { %v3144_v8 = vadd.f32 %v3143_v57, %v7919_v11  ;;  %v6113_v59 = vpop.f32.mrb[111].mxu0 }
 0x262   : > { %v8026_v56 = vpop.f32.mrb[176].mxu1 }
 0x263   : > { %v6076_v20 = vpop.f32.mrb[177].mxu1 }
 0x264   : > { %v8028_v3 = vpop.f32.mrb[178].mxu1  ;;  %v3148_v9 = vpop.f32.mrb[112].mxu0 }
 0x265   : > { %v6077_v4 = vpop.f32.mrb[179].mxu1  ;;  %v3149_v29 = vadd.f32 %v3148_v9, %v7924_v37  ;;  %v6116_v23 = vpop.f32.mrb[113].mxu0 }
 0x266   : > { %v3151_v45 = vpop.f32.mrb[114].mxu0 }
 0x267   : > { %v3152_v2 = vadd.f32 %v3151_v45, %v7927_v1  ;;  %v6117_v54 = vpop.f32.mrb[115].mxu0 }
 0x26a   : > { %v3333_v14 = vpop.f32.mrb[180].mxu1 }
 0x26b   : > { %v3434_v61 = vadd.f32 %v3333_v14, %v3133_v26  ;;  %v6184_v46 = vpop.f32.mrb[181].mxu1 }
 0x26c   : > { %v3336_v11 = vpop.f32.mrb[182].mxu1  ;;  %v3156_v43 = vpop.f32.mrb[116].mxu0 }
 0x26d   : > { %v3464_v38 = vadd.f32 %v3434_v61, %v2801_v36  ;;  %v3435_v28 = vadd.f32 %v3336_v11, %v3136_v32  ;;  %v6185_v50 = vpop.f32.mrb[183].mxu1  ;;  %v8033_v6 = vadd.f32 %v3156_v43, %v7932_v22  ;;  %v6120_v40 = vpop.f32.mrb[117].mxu0  ;;  %v2803_v32 = vld [vmem:[#allocation2 + $0x40] sm:$0xff] }
 0x26e   : > { %v3159_v30 = vpop.f32.mrb[118].mxu0 }
 0x26f   : > { %3494 = vst.msk [vmem:[#allocation2 + $0x30] sm:$0xff] %vm2038_vm7, %v3464_v38  ;;  %v3465_v37 = vadd.f32 %v3435_v28, %v2802_v49  ;;  %v8037_v1 = vadd.f32 %v3159_v30, %v7935_v31  ;;  %v6121_v26 = vpop.f32.mrb[119].mxu0  ;;  %v2804_v31 = vld [vmem:[#allocation2 + $0x48] sm:$0xff]  ;;  %v2805_v38 = vld [vmem:[#allocation2 + $0x50] sm:$0xff] }
 0x270   : > { %v2806_v26 = vld [vmem:[#allocation2 + $0x58] sm:$0xff] }
 0x271   : > { %3495 = vst.msk [vmem:[#allocation2 + $0x38] sm:$0xff] %vm2038_vm7, %v3465_v37 }
 0x272   : > { %v3341_v5 = vpop.f32.mrb[184].mxu1 }
 0x273   : > { %v3436_v10 = vadd.f32 %v3341_v5, %v3141_v21  ;;  %v6188_v47 = vpop.f32.mrb[185].mxu1 }
 0x274   : > { %v3344_v60 = vpop.f32.mrb[186].mxu1  ;;  %v3164_v22 = vpop.f32.mrb[120].mxu0 }
 0x275   : > { %v3466_v44 = vadd.f32 %v3436_v10, %v2803_v32  ;;  %v3437_v51 = vadd.f32 %v3344_v60, %v3144_v8  ;;  %v6189_v57 = vpop.f32.mrb[187].mxu1  ;;  %v8041_v20 = vadd.f32 %v3164_v22, %v7940_v58  ;;  %v6124_v9 = vpop.f32.mrb[121].mxu0 }
 0x276   : > { %v3857_v59 = vld [vmem:[#allocation2 + $0x30] sm:$0xff]  ;;  %v3167_v23 = vpop.f32.mrb[122].mxu0 }
 0x277   : > { %v8044_v4 = vadd.f32 %v7967_v19, %v3857_v59  ;;  %3496 = vst.msk [vmem:[#allocation2 + $0x40] sm:$0xff] %vm2038_vm7, %v3466_v44  ;;  %v3467_v21 = vadd.f32 %v3437_v51, %v2804_v31  ;;  %v8048_v54 = vadd.f32 %v3167_v23, %v7943_v63  ;;  %v6125_v8 = vpop.f32.mrb[123].mxu0  ;;  %v4022_v51 = vlaneseq }
 0x278   : > { %v3858_v45 = vld [vmem:[#allocation2 + $0x38] sm:$0xff] }
 0x279   : > { %v3928_v14 = vmax.f32 %v8044_v4, 0.0  ;;  %v8052_v58 = vadd.f32 %v7967_v19, %v3858_v45  ;;  %3497 = vst.msk [vmem:[#allocation2 + $0x48] sm:$0xff] %vm2038_vm7, %v3467_v21  ;;  %v2807_v21 = vld [vmem:[#allocation2 + $0x60] sm:$0xff]  ;;  %v4023_v45 = vshrl.u32 %v4022_v51, 7 }
 0x27a   : > { %v3349_v61 = vpop.f32.mrb[188].mxu1 }
 0x27b   : > { %3960 = vst.msk [vmem:[%s7981_s25 + $0x30] sm:$0xff] %vm2038_vm7, %v3928_v14  ;;  %v3929_v46 = vmax.f32 %v8052_v58, 0.0  ;;  %v3438_v36 = vadd.f32 %v3349_v61, %v3149_v29  ;;  %v6192_v11 = vpop.f32.mrb[189].mxu1 }
 0x27c   : > { %v3352_v63 = vpop.f32.mrb[190].mxu1  ;;  %v3172_v28 = vpop.f32.mrb[124].mxu0 }
 0x27d   : > { %3961 = vst.msk [vmem:[%s7981_s25 + $0x38] sm:$0xff] %vm2038_vm7, %v3929_v46  ;;  %v3468_v43 = vadd.f32 %v3438_v36, %v2805_v38  ;;  %v3439_v50 = vadd.f32 %v3352_v63, %v3152_v2  ;;  %v6193_v40 = vpop.f32.mrb[191].mxu1  ;;  %v8065_v37 = vadd.f32 %v3172_v28, %v7948_v24  ;;  %v6128_v30 = vpop.f32.mrb[125].mxu0  ;;  %v6462_v24 = vmov 1983009808   ;;  %v2808_v28 = vld [vmem:[#allocation2 + $0x68] sm:$0xff] }
 0x27e   : > { %v3859_v49 = vld [vmem:[#allocation2 + $0x40] sm:$0xff]  ;;  %v3175_v10 = vpop.f32.mrb[126].mxu0  ;;  %v4020_v22 = vunpack.c.l.s4 %v6462_v24  ;;  %v8095_v24 = vsub.s32 0, %v4023_v45 }
 0x27f   : > { %v3898_v29 = vadd.f32 %v7967_v19, %v3859_v49  ;;  %3498 = vst.msk [vmem:[#allocation2 + $0x50] sm:$0xff] %vm2038_vm7, %v3468_v43  ;;  %v3469_v5 = vadd.f32 %v3439_v50, %v2806_v26  ;;  %v8070_v32 = vadd.f32 %v3175_v10, %v7951_v18  ;;  %v6129_v2 = vpop.f32.mrb[127].mxu0 }
 0x280   : > { %v3860_v47 = vld [vmem:[#allocation2 + $0x48] sm:$0xff]  ;;  %v4021_v18 = vunpack.c.0.s8 %v4020_v22 }
 0x281   : > { %v3930_v60 = vmax.f32 %v3898_v29, 0.0  ;;  %v3899_v44 = vadd.f32 %v7967_v19, %v3860_v47  ;;  %3499 = vst.msk [vmem:[#allocation2 + $0x58] sm:$0xff] %vm2038_vm7, %v3469_v5 }
 0x282   : > { %v3357_v57 = vpop.f32.mrb[192].mxu1  ;;  %v8088_v29 = vsub.s32 %v4021_v18, %v4023_v45 }
 0x283   : > { %3962 = vst.msk [vmem:[%s7981_s25 + $0x40] sm:$0xff] %vm2038_vm7, %v3930_v60  ;;  %v3931_v59 = vmax.f32 %v3899_v44, 0.0  ;;  %v3440_v9 = vadd.f32 %v3357_v57, %v8033_v6  ;;  %v6196_v31 = vpop.f32.mrb[193].mxu1 }
 0x284   : > { %v3360_v23 = vpop.f32.mrb[194].mxu1  ;;  %v3180_v61 = vpop.f32.mrb[128].mxu0 }
 0x285   : > { %3963 = vst.msk [vmem:[%s7981_s25 + $0x48] sm:$0xff] %vm2038_vm7, %v3931_v59  ;;  %v3470_v8 = vadd.f32 %v3440_v9, %v2807_v21  ;;  %v3441_v36 = vadd.f32 %v3360_v23, %v8037_v1  ;;  %v6197_v11 = vpop.f32.mrb[195].mxu1  ;;  %v8081_v63 = vadd.f32 %v3180_v61, %v7956_v16  ;;  %v6132_v43 = vpop.f32.mrb[129].mxu0 }
 0x286   : > { %v3861_v38 = vld [vmem:[#allocation2 + $0x50] sm:$0xff]  ;;  %v3183_v40 = vpop.f32.mrb[130].mxu0 }
 0x287   : > { %v3900_v6 = vadd.f32 %v7967_v19, %v3861_v38  ;;  %3500 = vst.msk [vmem:[#allocation2 + $0x60] sm:$0xff] %vm2038_vm7, %v3470_v8  ;;  %v3471_v50 = vadd.f32 %v3441_v36, %v2808_v28  ;;  %v8086_v30 = vadd.f32 %v3183_v40, %v7959_v48  ;;  %v6133_v26 = vpop.f32.mrb[131].mxu0  ;;  %v2809_v48 = vld [vmem:[#allocation2 + $0x70] sm:$0xff] }
 0x288   : > { %v3862_v49 = vld [vmem:[#allocation2 + $0x58] sm:$0xff] }
 0x289   : > { %v3932_v1 = vmax.f32 %v3900_v6, 0.0  ;;  %v3901_v16 = vadd.f32 %v7967_v19, %v3862_v49  ;;  %3501 = vst.msk [vmem:[#allocation2 + $0x68] sm:$0xff] %vm2038_vm7, %v3471_v50 }
 0x28a   : > { %v3365_v5 = vpop.f32.mrb[196].mxu1 }
 0x28b   : > { %3964 = vst.msk [vmem:[%s7981_s25 + $0x50] sm:$0xff] %vm2038_vm7, %v3932_v1  ;;  %v3990_v10 = vmax.f32 %v3930_v60, %v3932_v1  ;;  %v3933_v47 = vmax.f32 %v3901_v16, 0.0  ;;  %v3442_v2 = vadd.f32 %v3365_v5, %v8041_v20  ;;  %v6200_v44 = vpop.f32.mrb[197].mxu1 }
 0x28c   : > { %v3368_v22 = vpop.f32.mrb[198].mxu1  ;;  %v3188_v21 = vpop.f32.mrb[132].mxu0 }
 0x28d   : > { %v4086_v51 = vcombine.high %v3990_v10, %v3990_v10  ;;  %v4093_v57 = vrot.slane %v3990_v10, %v8088_v29  ;;  %3965 = vst.msk [vmem:[%s7981_s25 + $0x58] sm:$0xff] %vm2038_vm7, %v3933_v47  ;;  %v3991_v9 = vmax.f32 %v3931_v59, %v3933_v47  ;;  %v3472_v31 = vadd.f32 %v3442_v2, %v2809_v48  ;;  %v6201_v23 = vpop.f32.mrb[199].mxu1  ;;  %v6136_v18 = vpop.f32.mrb[133].mxu0  ;;  %v2810_v59 = vld [vmem:[#allocation2 + $0x78] sm:$0xff] }
 0x28e   : > { %v3863_v60 = vld [vmem:[#allocation2 + $0x60] sm:$0xff]  ;;  %v8101_v20 = vadd.f32 %v3188_v21, %v7976_v39  ;;  %v3443_v45 = vadd.f32 %v3368_v22, %v8048_v54  ;;  %v3191_v38 = vpop.f32.mrb[134].mxu0 }
 0x28f   : > { %v4100_v8 = vrot.slane %v4086_v51, %v8088_v29  ;;  %v4101_v61 = vcombine.high %v4093_v57, %v4093_v57  ;;  %v5366_v36 = vrot.slane %v4093_v57, 9  ;;  %v4103_v11 = vcombine.high %v3991_v9, %v3991_v9  ;;  %3502 = vst.msk [vmem:[#allocation2 + $0x70] sm:$0xff] %vm2038_vm7, %v3472_v31  ;;  %v6137_v54 = vpop.f32.mrb[135].mxu0 }
 0x290   : > { %v4110_v43 = vrot.slane %v3991_v9, %v8088_v29  ;;  %v8108_v28 = vadd.f32 %v7967_v19, %v3863_v60  ;;  %v3473_v39 = vadd.f32 %v3443_v45, %v2810_v59  ;;  %v8111_v6 = vadd.f32 %v3191_v38, %v7987_v0  ;;  %v3864_v47 = vld [vmem:[#allocation2 + $0x68] sm:$0xff] }
 0x291   : > { %v4102_v50 = vcombine.high %v4100_v8, %v4100_v8  ;;  %v5367_v40 = vrot.slane %v4101_v61, 9  ;;  %v5368_v49 = vrot.slane %v4100_v8, 9  ;;  %v4562_v26 = vmax.f32 %v4093_v57, %v5366_v36 }
 0x292   : > { %v4117_v1 = vrot.slane %v4103_v11, %v8088_v29  ;;  %v4118_v16 = vcombine.high %v4110_v43, %v4110_v43  ;;  %v5370_v5 = vrot.slane %v4110_v43, 9  ;;  %v3934_v10 = vmax.f32 %v8108_v28, 0.0  ;;  %3503 = vst.msk [vmem:[#allocation2 + $0x78] sm:$0xff] %vm2038_vm7, %v3473_v39  ;;  %v3373_v2 = vpop.f32.mrb[200].mxu1 }
 0x293   : > { %v5369_v0 = vrot.slane %v4102_v50, 9  ;;  %v4563_v44 = vmax.f32 %v4101_v61, %v5367_v40  ;;  %v4564_v48 = vmax.f32 %v4100_v8, %v5368_v49  ;;  %v4741_v22 = vrot.slane %v4562_v26, %v8095_v24  ;;  %v6204_v51 = vpop.f32.mrb[201].mxu1 }
 0x294   : > { %v4119_v57 = vcombine.high %v4117_v1, %v4117_v1  ;;  %v5371_v9 = vrot.slane %v4118_v16, 9  ;;  %v5372_v31 = vrot.slane %v4117_v1, 9  ;;  %v4566_v21 = vmax.f32 %v4110_v43, %v5370_v5  ;;  %3966 = vst.msk [vmem:[%s7981_s25 + $0x60] sm:$0xff] %vm2038_vm7, %v3934_v10  ;;  %v3376_v23 = vpop.f32.mrb[202].mxu1  ;;  %v3196_v61 = vpop.f32.mrb[136].mxu0 }
 0x295   : > { %v4565_v60 = vmax.f32 %v4102_v50, %v5369_v0  ;;  %v4745_v18 = vrot.slane %v4563_v44, %v8095_v24  ;;  %v4749_v45 = vrot.slane %v4564_v48, %v8095_v24  ;;  %v3903_v36 = vadd.f32 %v7967_v19, %v3864_v47  ;;  %v6205_v8 = vpop.f32.mrb[203].mxu1  ;;  %v6140_v39 = vpop.f32.mrb[137].mxu0 }
 0x296   : > { %v5373_v11 = vrot.slane %v4119_v57, 9  ;;  %v4567_v59 = vmax.f32 %v4118_v16, %v5371_v9  ;;  %v4568_v38 = vmax.f32 %v4117_v1, %v5372_v31  ;;  %v4757_v28 = vrot.slane %v4566_v21, %v8095_v24  ;;  %v3865_v43 = vld [vmem:[#allocation2 + $0x70] sm:$0xff]  ;;  %v3199_v26 = vpop.f32.mrb[138].mxu0 }
 0x297   : > { %v4753_v54 = vrot.slane %v4565_v60, %v8095_v24  ;;  %v4951_v50 = vsel %vm4930_vm8, %v4745_v18, %v4741_v22  ;;  %v3935_v40 = vmax.f32 %v3903_v36, 0.0  ;;  %v3904_v49 = vadd.f32 %v7967_v19, %v3865_v43  ;;  %v6141_v0 = vpop.f32.mrb[139].mxu0  ;;  %v2811_v60 = vld [vmem:[#allocation2 + $0x80] sm:$0xff]  ;;  %v2812_v36 = vld [vmem:[#allocation2 + $0x88] sm:$0xff]  ;;  %v2813_v39 = vld [vmem:[#allocation2 + $0x90] sm:$0xff] }
 0x298   : > { %v4952_v5 = vsel %vm4932_vm9, %v4749_v45, %v4951_v50  ;;  %v4569_v47 = vmax.f32 %v4119_v57, %v5373_v11  ;;  %v4761_v16 = vrot.slane %v4567_v59, %v8095_v24  ;;  %v4765_v1 = vrot.slane %v4568_v38, %v8095_v24 }
 0x299   : > { %v4953_v44 = vsel %vm4934_vm10, %v4753_v54, %v4952_v5  ;;  %3967 = vst.msk [vmem:[%s7981_s25 + $0x68] sm:$0xff] %vm2038_vm7, %v3935_v40  ;;  %v3936_v48 = vmax.f32 %v3904_v49, 0.0  ;;  %v3866_v22 = vld [vmem:[#allocation2 + $0x78] sm:$0xff]  ;;  %v3444_v51 = vadd.f32 %v3373_v2, %v8065_v37  ;;  %v8135_v9 = vadd.f32 %v3196_v61, %v8004_v55 }
 0x29a   : > { %v4769_v31 = vrot.slane %v4569_v47, %v8095_v24  ;;  %v4954_v57 = vsel %vm4936_vm11, %v4757_v28, %v4953_v44  ;;  %v3905_v21 = vadd.f32 %v7967_v19, %v3866_v22  ;;  %v3445_v18 = vadd.f32 %v3376_v23, %v8070_v32  ;;  %v3381_v45 = vpop.f32.mrb[204].mxu1  ;;  %v2814_v47 = vld [vmem:[#allocation2 + $0x98] sm:$0xff] }
 0x29b   : > { %v4955_v37 = vsel %vm4938_vm12, %v4761_v16, %v4954_v57  ;;  %3968 = vst.msk [vmem:[%s7981_s25 + $0x70] sm:$0xff] %vm2038_vm7, %v3936_v48  ;;  %v3992_v55 = vmax.f32 %v3934_v10, %v3936_v48  ;;  %v3474_v2 = vadd.f32 %v3444_v51, %v2811_v60  ;;  %v8150_v61 = vadd.f32 %v3199_v26, %v8006_v53  ;;  %v6208_v8 = vpop.f32.mrb[205].mxu1 }
 0x29c   : > { %v4956_v32 = vsel %vm4940_vm13, %v4765_v1, %v4955_v37  ;;  %v3937_v23 = vmax.f32 %v3905_v21, 0.0  ;;  %v3475_v11 = vadd.f32 %v3445_v18, %v2812_v36  ;;  %v3446_v59 = vadd.f32 %v3381_v45, %v8081_v63  ;;  %v3384_v38 = vpop.f32.mrb[206].mxu1  ;;  %v3204_v54 = vpop.f32.mrb[140].mxu0 }
 0x29d   : > { %v4957_v28 = vsel %vm4942_vm14, %v4769_v31, %v4956_v32  ;;  %v4120_v43 = vcombine.high %v3992_v55, %v3992_v55  ;;  %v4127_v10 = vrot.slane %v3992_v55, %v8088_v29  ;;  %3504 = vst.msk [vmem:[#allocation2 + $0x80] sm:$0xff] %vm2038_vm7, %v3474_v2  ;;  %v3447_v53 = vadd.f32 %v3384_v38, %v8086_v30  ;;  %v6209_v50 = vpop.f32.mrb[207].mxu1  ;;  %v6144_v5 = vpop.f32.mrb[141].mxu0 }
 0x29e   : > { %5003 = vst.msk [vmem:[%s8144_s27 + $0x10] sm:$0xff] %vm2038_vm7, %v4957_v28  ;;  %3969 = vst.msk [vmem:[%s7981_s25 + $0x78] sm:$0xff] %vm2038_vm7, %v3937_v23  ;;  %v3993_v49 = vmax.f32 %v3935_v40, %v3937_v23  ;;  %v3476_v63 = vadd.f32 %v3446_v59, %v2813_v39  ;;  %v8164_v26 = vadd.f32 %v3204_v54, %v8014_v35  ;;  %v3207_v30 = vpop.f32.mrb[142].mxu0 }
 0x29f   : > { %3505 = vst.msk [vmem:[#allocation2 + $0x88] sm:$0xff] %vm2038_vm7, %v3475_v11  ;;  %v4134_v16 = vrot.slane %v4120_v43, %v8088_v29  ;;  %v4135_v1 = vcombine.high %v4127_v10, %v4127_v10  ;;  %v5374_v0 = vrot.slane %v4127_v10, 9  ;;  %v3477_v44 = vadd.f32 %v3447_v53, %v2814_v47  ;;  %v6145_v51 = vpop.f32.mrb[143].mxu0 }
 0x2a0   : > { %v4137_v48 = vcombine.high %v3993_v49, %v3993_v49  ;;  %v4144_v22 = vrot.slane %v3993_v49, %v8088_v29  ;;  %3506 = vst.msk [vmem:[#allocation2 + $0x90] sm:$0xff] %vm2038_vm7, %v3476_v63  ;;  %v8170_v40 = vadd.f32 %v3207_v30, %v8016_v52 }
 0x2a1   : > { %v4136_v31 = vcombine.high %v4134_v16, %v4134_v16  ;;  %v5375_v35 = vrot.slane %v4135_v1, 9  ;;  %v5376_v57 = vrot.slane %v4134_v16, 9  ;;  %v4570_v21 = vmax.f32 %v4127_v10, %v5374_v0  ;;  %3507 = vst.msk [vmem:[#allocation2 + $0x98] sm:$0xff] %vm2038_vm7, %v3477_v44 }
 0x2a2   : > { %v4151_v60 = vrot.slane %v4137_v48, %v8088_v29  ;;  %v4152_v18 = vcombine.high %v4144_v22, %v4144_v22  ;;  %v5378_v45 = vrot.slane %v4144_v22, 9  ;;  %v3389_v37 = vpop.f32.mrb[208].mxu1 }
 0x2a3   : > { %v5377_v55 = vrot.slane %v4136_v31, 9  ;;  %v4571_v2 = vmax.f32 %v4135_v1, %v5375_v35  ;;  %v4572_v36 = vmax.f32 %v4134_v16, %v5376_v57  ;;  %v4773_v8 = vrot.slane %v4570_v21, %v8095_v24  ;;  %v6212_v32 = vpop.f32.mrb[209].mxu1 }
 0x2a4   : > { %v4153_v52 = vcombine.high %v4151_v60, %v4151_v60  ;;  %v5379_v23 = vrot.slane %v4152_v18, 9  ;;  %v5380_v11 = vrot.slane %v4151_v60, 9  ;;  %v4574_v59 = vmax.f32 %v4144_v22, %v5378_v45  ;;  %v3867_v38 = vld [vmem:[#allocation2 + $0x80] sm:$0xff]  ;;  %v3392_v28 = vpop.f32.mrb[210].mxu1  ;;  %v3212_v50 = vpop.f32.mrb[144].mxu0 }
 0x2a5   : > { %v4573_v43 = vmax.f32 %v4136_v31, %v5377_v55  ;;  %v4777_v10 = vrot.slane %v4571_v2, %v8095_v24  ;;  %v4781_v39 = vrot.slane %v4572_v36, %v8095_v24  ;;  %v3906_v54 = vadd.f32 %v7967_v19, %v3867_v38  ;;  %v6213_v49 = vpop.f32.mrb[211].mxu1  ;;  %v6148_v1 = vpop.f32.mrb[145].mxu0 }
 0x2a6   : > { %v3868_v53 = vld [vmem:[#allocation2 + $0x88] sm:$0xff]  ;;  %v5381_v63 = vrot.slane %v4153_v52, 9  ;;  %v4575_v5 = vmax.f32 %v4152_v18, %v5379_v23  ;;  %v4576_v47 = vmax.f32 %v4151_v60, %v5380_v11  ;;  %v4789_v16 = vrot.slane %v4574_v59, %v8095_v24  ;;  %v3215_v51 = vpop.f32.mrb[146].mxu0 }
 0x2a7   : > { %v4785_v0 = vrot.slane %v4573_v43, %v8095_v24  ;;  %v4958_v44 = vsel %vm4930_vm8, %v4777_v10, %v4773_v8  ;;  %v3938_v30 = vmax.f32 %v3906_v54, 0.0  ;;  %v3907_v48 = vadd.f32 %v7967_v19, %v3868_v53  ;;  %v3869_v22 = vld [vmem:[#allocation2 + $0x90] sm:$0xff]  ;;  %v6149_v18 = vpop.f32.mrb[147].mxu0  ;;  %v2815_v10 = vld [vmem:[#allocation2 + $0xa0] sm:$0xff] }
 0x2a8   : > { %v4959_v31 = vsel %vm4932_vm9, %v4781_v39, %v4958_v44  ;;  %v4577_v35 = vmax.f32 %v4153_v52, %v5381_v63  ;;  %v4793_v57 = vrot.slane %v4575_v5, %v8095_v24  ;;  %v4797_v21 = vrot.slane %v4576_v47, %v8095_v24  ;;  %v3870_v60 = vld [vmem:[#allocation2 + $0x98] sm:$0xff]  ;;  %v2817_v47 = vld [vmem:[#allocation2 + $0xb0] sm:$0xff] }
 0x2a9   : > { %v4960_v45 = vsel %vm4934_vm10, %v4785_v0, %v4959_v31  ;;  %3970 = vst.msk [vmem:[%s7981_s25 + $0x80] sm:$0xff] %vm2038_vm7, %v3938_v30  ;;  %v3939_v55 = vmax.f32 %v3907_v48, 0.0  ;;  %v3908_v2 = vadd.f32 %v7967_v19, %v3869_v22  ;;  %v3909_v36 = vadd.f32 %v7967_v19, %v3870_v60  ;;  %v2818_v31 = vld [vmem:[#allocation2 + $0xb8] sm:$0xff] }
 0x2aa   : > { %v4801_v8 = vrot.slane %v4577_v35, %v8095_v24  ;;  %v4961_v32 = vsel %vm4936_vm11, %v4789_v16, %v4960_v45  ;;  %v3448_v52 = vadd.f32 %v3389_v37, %v8101_v20  ;;  %v8194_v23 = vadd.f32 %v3212_v50, %v8020_v34  ;;  %v3397_v11 = vpop.f32.mrb[212].mxu1  ;;  %v2816_v37 = vld [vmem:[#allocation2 + $0xa8] sm:$0xff] }
 0x2ab   : > { %v4962_v59 = vsel %vm4938_vm12, %v4793_v57, %v4961_v32  ;;  %3971 = vst.msk [vmem:[%s7981_s25 + $0x88] sm:$0xff] %vm2038_vm7, %v3939_v55  ;;  %v3940_v38 = vmax.f32 %v3908_v2, 0.0  ;;  %v3941_v43 = vmax.f32 %v3909_v36, 0.0  ;;  %v3449_v39 = vadd.f32 %v3392_v28, %v8111_v6  ;;  %v6216_v54 = vpop.f32.mrb[213].mxu1 }
 0x2ac   : > { %v4963_v53 = vsel %vm4940_vm13, %v4797_v21, %v4962_v59  ;;  %v3478_v20 = vadd.f32 %v3448_v52, %v2815_v10  ;;  %v8202_v34 = vadd.f32 %v3215_v51, %v8022_v12  ;;  %v3450_v50 = vadd.f32 %v3397_v11, %v8135_v9  ;;  %v3400_v49 = vpop.f32.mrb[214].mxu1  ;;  %v3220_v16 = vpop.f32.mrb[148].mxu0 }
 0x2ad   : > { %v4964_v63 = vsel %vm4942_vm14, %v4801_v8, %v4963_v53  ;;  %3972 = vst.msk [vmem:[%s7981_s25 + $0x90] sm:$0xff] %vm2038_vm7, %v3940_v38  ;;  %v3994_v5 = vmax.f32 %v3938_v30, %v3940_v38  ;;  %3973 = vst.msk [vmem:[%s7981_s25 + $0x98] sm:$0xff] %vm2038_vm7, %v3941_v43  ;;  %v3995_v6 = vmax.f32 %v3939_v55, %v3941_v43  ;;  %v6217_v1 = vpop.f32.mrb[215].mxu1  ;;  %v6152_v0 = vpop.f32.mrb[149].mxu0 }
 0x2ae   : > { %v3479_v28 = vadd.f32 %v3449_v39, %v2816_v37  ;;  %5004 = vst.msk [vmem:[%s8144_s27 + $0x18] sm:$0xff] %vm2038_vm7, %v4964_v63  ;;  %3508 = vst.msk [vmem:[#allocation2 + $0xa0] sm:$0xff] %vm2038_vm7, %v3478_v20  ;;  %v3480_v12 = vadd.f32 %v3450_v50, %v2817_v47  ;;  %v8214_v9 = vadd.f32 %v3220_v16, %v8026_v56  ;;  %v3223_v35 = vpop.f32.mrb[150].mxu0 }
 0x2af   : > { %v3451_v44 = vadd.f32 %v3400_v49, %v8150_v61  ;;  %v4154_v48 = vcombine.high %v3994_v5, %v3994_v5  ;;  %v4161_v30 = vrot.slane %v3994_v5, %v8088_v29  ;;  %v4171_v22 = vcombine.high %v3995_v6, %v3995_v6  ;;  %v6153_v56 = vpop.f32.mrb[151].mxu0 }
 0x2b0   : > { %v4178_v51 = vrot.slane %v3995_v6, %v8088_v29  ;;  %3509 = vst.msk [vmem:[#allocation2 + $0xa8] sm:$0xff] %vm2038_vm7, %v3479_v28  ;;  %3510 = vst.msk [vmem:[#allocation2 + $0xb0] sm:$0xff] %vm2038_vm7, %v3480_v12  ;;  %v8222_v21 = vadd.f32 %v3223_v35, %v8028_v3 }
 0x2b1   : > { %v3481_v57 = vadd.f32 %v3451_v44, %v2818_v31  ;;  %v4168_v60 = vrot.slane %v4154_v48, %v8088_v29  ;;  %v4169_v61 = vcombine.high %v4161_v30, %v4161_v30  ;;  %v5382_v18 = vrot.slane %v4161_v30, 9 }
 0x2b2   : > { %v4185_v45 = vrot.slane %v4171_v22, %v8088_v29  ;;  %v4186_v55 = vcombine.high %v4178_v51, %v4178_v51  ;;  %v5386_v2 = vrot.slane %v4178_v51, 9  ;;  %v3405_v36 = vpop.f32.mrb[216].mxu1 }
 0x2b3   : > { %3511 = vst.msk [vmem:[#allocation2 + $0xb8] sm:$0xff] %vm2038_vm7, %v3481_v57  ;;  %v4170_v8 = vcombine.high %v4168_v60, %v4168_v60  ;;  %v5383_v32 = vrot.slane %v4169_v61, 9  ;;  %v5384_v52 = vrot.slane %v4168_v60, 9  ;;  %v4578_v11 = vmax.f32 %v4161_v30, %v5382_v18  ;;  %v6220_v59 = vpop.f32.mrb[217].mxu1 }
 0x2b4   : > { %v4187_v38 = vcombine.high %v4185_v45, %v4185_v45  ;;  %v5387_v3 = vrot.slane %v4186_v55, 9  ;;  %v5388_v43 = vrot.slane %v4185_v45, 9  ;;  %v4582_v10 = vmax.f32 %v4178_v51, %v5386_v2  ;;  %v3408_v39 = vpop.f32.mrb[218].mxu1  ;;  %v3309_v49 = vpop.f32.mrb[152].mxu0 }
 0x2b5   : > { %v5385_v54 = vrot.slane %v4170_v8, 9  ;;  %v4579_v53 = vmax.f32 %v4169_v61, %v5383_v32  ;;  %v4580_v20 = vmax.f32 %v4168_v60, %v5384_v52  ;;  %v4805_v37 = vrot.slane %v4578_v11, %v8095_v24  ;;  %v3871_v50 = vld [vmem:[#allocation2 + $0xa0] sm:$0xff]  ;;  %v6221_v63 = vpop.f32.mrb[219].mxu1  ;;  %v6172_v1 = vpop.f32.mrb[153].mxu0 }
 0x2b6   : > { %v5389_v5 = vrot.slane %v4187_v38, 9  ;;  %v4583_v6 = vmax.f32 %v4186_v55, %v5387_v3  ;;  %v4584_v28 = vmax.f32 %v4185_v45, %v5388_v43  ;;  %v4821_v47 = vrot.slane %v4582_v10, %v8095_v24  ;;  %v3312_v22 = vpop.f32.mrb[154].mxu0 }
 0x2b7   : > { %v3872_v16 = vld [vmem:[#allocation2 + $0xa8] sm:$0xff]  ;;  %v4581_v12 = vmax.f32 %v4170_v8, %v5385_v54  ;;  %v4809_v0 = vrot.slane %v4579_v53, %v8095_v24  ;;  %v4813_v44 = vrot.slane %v4580_v20, %v8095_v24  ;;  %v3910_v48 = vadd.f32 %v7967_v19, %v3871_v50  ;;  %v3873_v30 = vld [vmem:[#allocation2 + $0xb0] sm:$0xff]  ;;  %v6173_v56 = vpop.f32.mrb[155].mxu0  ;;  %v2819_v20 = vld [vmem:[#allocation2 + $0xc0] sm:$0xff] }
 0x2b8   : > { %v4585_v51 = vmax.f32 %v4187_v38, %v5389_v5  ;;  %v4825_v31 = vrot.slane %v4583_v6, %v8095_v24  ;;  %v4829_v35 = vrot.slane %v4584_v28, %v8095_v24  ;;  %v3911_v57 = vadd.f32 %v7967_v19, %v3872_v16  ;;  %v2796_v6 = vld [vmem:[#allocation2 + $0x8] sm:$0xff] }
 0x2b9   : > { %v4817_v60 = vrot.slane %v4581_v12, %v8095_v24  ;;  %v4965_v61 = vsel %vm4930_vm8, %v4809_v0, %v4805_v37  ;;  %v3942_v18 = vmax.f32 %v3910_v48, 0.0  ;;  %v3912_v45 = vadd.f32 %v7967_v19, %v3873_v30 }
 0x2ba   : > { %v3874_v55 = vld [vmem:[#allocation2 + $0xb8] sm:$0xff]  ;;  %v4966_v2 = vsel %vm4932_vm9, %v4813_v44, %v4965_v61  ;;  %v4833_v8 = vrot.slane %v4585_v51, %v8095_v24  ;;  %v3943_v32 = vmax.f32 %v3911_v57, 0.0  ;;  %v3413_v11 = vpop.f32.mrb[220].mxu1  ;;  %v3452_v3 = vadd.f32 %v3405_v36, %v8164_v26 }
 0x2bb   : > { %v3913_v52 = vadd.f32 %v7967_v19, %v3874_v55  ;;  %v4967_v59 = vsel %vm4934_vm10, %v4817_v60, %v4966_v2  ;;  %3974 = vst.msk [vmem:[%s7981_s25 + $0xa0] sm:$0xff] %vm2038_vm7, %v3942_v18  ;;  %v3944_v38 = vmax.f32 %v3912_v45, 0.0  ;;  %v3428_v43 = vadd.f32 %v3309_v49, %v7962_v27  ;;  %v6224_v10 = vpop.f32.mrb[221].mxu1  ;;  %v2795_v19 = vld [vmem:[#allocation2] sm:$0xff]  ;;  %v2820_v49 = vld [vmem:[#allocation2 + $0xc8] sm:$0xff]  ;;  %v2797_v45 = vld [vmem:[#allocation2 + $0x10] sm:$0xff] }
 0x2bc   : > { %v4968_v54 = vsel %vm4936_vm11, %v4821_v47, %v4967_v59  ;;  %3975 = vst.msk [vmem:[%s7981_s25 + $0xa8] sm:$0xff] %vm2038_vm7, %v3943_v32  ;;  %v3453_v37 = vadd.f32 %v3408_v39, %v8170_v40  ;;  %v3429_v50 = vadd.f32 %v3312_v22, %v7971_v13  ;;  %v3416_v63 = vpop.f32.mrb[222].mxu1  ;;  %v3482_v27 = vadd.f32 %v3452_v3, %v2819_v20  ;;  %v3317_v28 = vpop.f32.mrb[156].mxu0 }
 0x2bd   : > { %v3945_v53 = vmax.f32 %v3913_v52, 0.0  ;;  %v4969_v5 = vsel %vm4938_vm12, %v4825_v31, %v4968_v54  ;;  %3976 = vst.msk [vmem:[%s7981_s25 + $0xb0] sm:$0xff] %vm2038_vm7, %v3944_v38  ;;  %v3996_v26 = vmax.f32 %v3942_v18, %v3944_v38  ;;  %v3458_v36 = vadd.f32 %v3428_v43, %v2795_v19  ;;  %v6225_v47 = vpop.f32.mrb[223].mxu1  ;;  %v6176_v1 = vpop.f32.mrb[157].mxu0  ;;  %v2821_v31 = vld [vmem:[#allocation2 + $0xd0] sm:$0xff] }
 0x2be   : > { %v4970_v16 = vsel %vm4940_vm13, %v4829_v35, %v4969_v5  ;;  %v3483_v39 = vadd.f32 %v3453_v37, %v2820_v49  ;;  %v3459_v13 = vadd.f32 %v3429_v50, %v2796_v6  ;;  %3512 = vst.msk [vmem:[#allocation2 + $0xc0] sm:$0xff] %vm2038_vm7, %v3482_v27  ;;  %v3454_v48 = vadd.f32 %v3413_v11, %v8194_v23  ;;  %v8262_v30 = vpop.f32.mrb[158].mxu0 }
 0x2bf   : > { %3977 = vst.msk [vmem:[%s7981_s25 + $0xb8] sm:$0xff] %vm2038_vm7, %v3945_v53  ;;  %v3997_v40 = vmax.f32 %v3943_v32, %v3945_v53  ;;  %v4971_v12 = vsel %vm4942_vm14, %v4833_v8, %v4970_v16  ;;  %v4188_v0 = vcombine.high %v3996_v26, %v3996_v26  ;;  %v4195_v44 = vrot.slane %v3996_v26, %v8088_v29  ;;  %v6177_v56 = vpop.f32.mrb[159].mxu0 }
 0x2c0   : > { %3488 = vst.msk [vmem:[#allocation2] sm:$0xff] %vm2038_vm7, %v3458_v36  ;;  %5005 = vst.msk [vmem:[%s8144_s27 + $0x20] sm:$0xff] %vm2038_vm7, %v4971_v12  ;;  %v3430_v35 = vadd.f32 %v3317_v28, %v7995_v62  ;;  %v8271_v57 = vadd.f32 %v3416_v63, %v8202_v34  ;;  %v3484_v18 = vadd.f32 %v3454_v48, %v2821_v31 }
 0x2c1   : > { %v4205_v22 = vcombine.high %v3997_v40, %v3997_v40  ;;  %v4212_v51 = vrot.slane %v3997_v40, %v8088_v29  ;;  %3513 = vst.msk [vmem:[#allocation2 + $0xc8] sm:$0xff] %vm2038_vm7, %v3483_v39  ;;  %3489 = vst.msk [vmem:[#allocation2 + $0x8] sm:$0xff] %vm2038_vm7, %v3459_v13  ;;  %v4202_v23 = vrot.slane %v4188_v0, %v8088_v29  ;;  %v5390_v61 = vrot.slane %v4195_v44, 9  ;;  %v8286_v13 = vld [vmem:[%s8476_s4] ss:$0 sm:$0xff] }
 0x2c2   : > { %v4203_v60 = vcombine.high %v4195_v44, %v4195_v44  ;;  %v3460_v32 = vadd.f32 %v3430_v35, %v2797_v45  ;;  %v8275_v52 = vpop.f32.mrb[224].mxu1  ;;  %3514 = vst.msk [vmem:[#allocation2 + $0xd0] sm:$0xff] %vm2038_vm7, %v3484_v18 }
 0x2c3   : > { %v4219_v55 = vrot.slane %v4205_v22, %v8088_v29  ;;  %v4220_v2 = vcombine.high %v4212_v51, %v4212_v51  ;;  %v5394_v8 = vrot.slane %v4212_v51, 9  ;;  %v4204_v11 = vcombine.high %v4202_v23, %v4202_v23  ;;  %v6228_v34 = vpop.f32.mrb[225].mxu1 }
 0x2c4   : > { %v5391_v59 = vrot.slane %v4203_v60, 9  ;;  %v5392_v62 = vrot.slane %v4202_v23, 9  ;;  %v4586_v38 = vmax.f32 %v4195_v44, %v5390_v61  ;;  %3490 = vst.msk [vmem:[#allocation2 + $0x10] sm:$0xff] %vm2038_vm7, %v3460_v32  ;;  %v3424_v53 = vpop.f32.mrb[226].mxu1  ;;  %v3325_v63 = vpop.f32.mrb[160].mxu0  ;;  %v2822_v32 = vld [vmem:[#allocation2 + $0xd8] sm:$0xff] }
 0x2c5   : > { %v4221_v3 = vcombine.high %v4219_v55, %v4219_v55  ;;  %v5395_v43 = vrot.slane %v4220_v2, 9  ;;  %v5396_v10 = vrot.slane %v4219_v55, 9  ;;  %v4590_v54 = vmax.f32 %v4212_v51, %v5394_v8  ;;  %v6229_v5 = vpop.f32.mrb[227].mxu1  ;;  %v3875_v6 = vld [vmem:[#allocation2 + $0xc0] sm:$0xff]  ;;  %v6180_v47 = vpop.f32.mrb[161].mxu0 }
 0x2c6   : > { %v5393_v20 = vrot.slane %v4204_v11, 9  ;;  %v4587_v19 = vmax.f32 %v4203_v60, %v5391_v59  ;;  %v4588_v37 = vmax.f32 %v4202_v23, %v5392_v62  ;;  %v4837_v50 = vrot.slane %v4586_v38, %v8095_v24  ;;  %v3328_v44 = vpop.f32.mrb[162].mxu0 }
 0x2c7   : > { %v5397_v26 = vrot.slane %v4221_v3, 9  ;;  %v4591_v27 = vmax.f32 %v4220_v2, %v5395_v43  ;;  %v4592_v36 = vmax.f32 %v4219_v55, %v5396_v10  ;;  %v4853_v49 = vrot.slane %v4590_v54, %v8095_v24  ;;  %v3851_v28 = vld [vmem:[#allocation2] sm:$0xff]  ;;  %v6181_v35 = vpop.f32.mrb[163].mxu0 }
 0x2c8   : > { %v4589_v16 = vmax.f32 %v4204_v11, %v5393_v20  ;;  %v4841_v40 = vrot.slane %v4587_v19, %v8095_v24  ;;  %v4845_v39 = vrot.slane %v4588_v37, %v8095_v24  ;;  %v3914_v1 = vadd.f32 %v8286_v13, %v3875_v6  ;;  %v3876_v12 = vld [vmem:[#allocation2 + $0xc8] sm:$0xff] }
 0x2c9   : > { %v3852_v0 = vld [vmem:[#allocation2 + $0x8] sm:$0xff]  ;;  %v4593_v48 = vmax.f32 %v4221_v3, %v5397_v26  ;;  %v4857_v22 = vrot.slane %v4591_v27, %v8095_v24  ;;  %v4861_v51 = vrot.slane %v4592_v36, %v8095_v24  ;;  %v3890_v31 = vadd.f32 %v8286_v13, %v3851_v28  ;;  %v3877_v8 = vld [vmem:[#allocation2 + $0xd0] sm:$0xff]  ;;  %v2823_v26 = vld [vmem:[#allocation2 + $0xe0] sm:$0xff] }
 0x2ca   : > { %v4849_v56 = vrot.slane %v4589_v16, %v8095_v24  ;;  %v4972_v23 = vsel %vm4930_vm8, %v4841_v40, %v4837_v50  ;;  %v3946_v60 = vmax.f32 %v3914_v1, 0.0  ;;  %v8295_v61 = vadd.f32 %v8286_v13, %v3876_v12  ;;  %v2799_v27 = vld [vmem:[#allocation2 + $0x20] sm:$0xff] }
 0x2cb   : > { %v4973_v18 = vsel %vm4932_vm9, %v4845_v39, %v4972_v23  ;;  %v4865_v45 = vrot.slane %v4593_v48, %v8095_v24  ;;  %v3922_v55 = vmax.f32 %v3890_v31, 0.0  ;;  %v8300_v2 = vadd.f32 %v8286_v13, %v3852_v0  ;;  %v3853_v38 = vld [vmem:[#allocation2 + $0x10] sm:$0xff] }
 0x2cc   : > { %v4974_v11 = vsel %vm4934_vm10, %v4849_v56, %v4973_v18  ;;  %3978 = vst.msk [vmem:[%s7981_s25 + $0xc0] sm:$0xff] %vm2038_vm7, %v3946_v60  ;;  %v3947_v59 = vmax.f32 %v8295_v61, 0.0  ;;  %v3916_v62 = vadd.f32 %v8286_v13, %v3877_v8  ;;  %v3485_v34 = vadd.f32 %v8271_v57, %v2822_v32  ;;  %v2798_v57 = vld [vmem:[#allocation2 + $0x18] sm:$0xff] }
 0x2cd   : > { %v4975_v3 = vsel %vm4936_vm11, %v4853_v49, %v4974_v11  ;;  %3954 = vst.msk [vmem:[%s7981_s25] sm:$0xff] %vm2038_vm7, %v3922_v55  ;;  %v3923_v43 = vmax.f32 %v8300_v2, 0.0  ;;  %v3892_v10 = vadd.f32 %v8286_v13, %v3853_v38  ;;  %v3431_v54 = vadd.f32 %v8262_v30, %v8002_v41 }
 0x2ce   : > { %v4976_v20 = vsel %vm4938_vm12, %v4857_v22, %v4975_v3  ;;  %3979 = vst.msk [vmem:[%s7981_s25 + $0xc8] sm:$0xff] %vm2038_vm7, %v3947_v59  ;;  %v3948_v19 = vmax.f32 %v3916_v62, 0.0  ;;  %3515 = vst.msk [vmem:[#allocation2 + $0xd8] sm:$0xff] %vm2038_vm7, %v3485_v34  ;;  %v3456_v37 = vadd.f32 %v8275_v52, %v8214_v9  ;;  %v3432_v50 = vadd.f32 %v3325_v63, %v8009_v17  ;;  %v2824_v17 = vld [vmem:[#allocation2 + $0xe8] sm:$0xff] }
 0x2cf   : > { %v4977_v41 = vsel %vm4940_vm13, %v4861_v51, %v4976_v20  ;;  %3955 = vst.msk [vmem:[%s7981_s25 + $0x8] sm:$0xff] %vm2038_vm7, %v3923_v43  ;;  %v3924_v30 = vmax.f32 %v3892_v10, 0.0  ;;  %v3461_v5 = vadd.f32 %v3431_v54, %v2798_v57  ;;  %v3457_v36 = vadd.f32 %v3424_v53, %v8222_v21  ;;  %v2800_v53 = vld [vmem:[#allocation2 + $0x28] sm:$0xff] }
 0x2d0   : > { %v4978_v49 = vsel %vm4942_vm14, %v4865_v45, %v4977_v41  ;;  %3980 = vst.msk [vmem:[%s7981_s25 + $0xd0] sm:$0xff] %vm2038_vm7, %v3948_v19  ;;  %v3998_v9 = vmax.f32 %v3946_v60, %v3948_v19  ;;  %v3486_v52 = vadd.f32 %v3456_v37, %v2823_v26  ;;  %v3462_v6 = vadd.f32 %v3432_v50, %v2799_v27 }
 0x2d1   : > { %5006 = vst.msk [vmem:[%s8144_s27 + $0x28] sm:$0xff] %vm2038_vm7, %v4978_v49  ;;  %3956 = vst.msk [vmem:[%s7981_s25 + $0x10] sm:$0xff] %vm2038_vm7, %v3924_v30  ;;  %v3986_v63 = vmax.f32 %v3922_v55, %v3924_v30  ;;  %v3487_v28 = vadd.f32 %v3457_v36, %v2824_v17  ;;  %v3433_v47 = vadd.f32 %v3328_v44, %v8012_v42 }
 0x2d2   : > { %3491 = vst.msk [vmem:[#allocation2 + $0x18] sm:$0xff] %vm2038_vm7, %v3461_v5  ;;  %v4222_v16 = vcombine.high %v3998_v9, %v3998_v9  ;;  %v4229_v21 = vrot.slane %v3998_v9, %v8088_v29  ;;  %3516 = vst.msk [vmem:[#allocation2 + $0xe0] sm:$0xff] %vm2038_vm7, %v3486_v52 }
 0x2d3   : > { %3492 = vst.msk [vmem:[#allocation2 + $0x20] sm:$0xff] %vm2038_vm7, %v3462_v6  ;;  %v4018_v40 = vcombine.high %v3986_v63, %v3986_v63  ;;  %v4025_v39 = vrot.slane %v3986_v63, %v8088_v29  ;;  %3517 = vst.msk [vmem:[#allocation2 + $0xe8] sm:$0xff] %vm2038_vm7, %v3487_v28  ;;  %v3463_v1 = vadd.f32 %v3433_v47, %v2800_v53 }
 0x2d4   : > { %v4236_v12 = vrot.slane %v4222_v16, %v8088_v29  ;;  %v4237_v0 = vcombine.high %v4229_v21, %v4229_v21  ;;  %v5398_v48 = vrot.slane %v4229_v21, 9 }
 0x2d5   : > { %v4032_v42 = vrot.slane %v4018_v40, %v8088_v29  ;;  %v4033_v44 = vcombine.high %v4025_v39, %v4025_v39  ;;  %v5350_v22 = vrot.slane %v4025_v39, 9  ;;  %3493 = vst.msk [vmem:[#allocation2 + $0x28] sm:$0xff] %vm2038_vm7, %v3463_v1  ;;  %v3878_v55 = vld [vmem:[#allocation2 + $0xd8] sm:$0xff] }
 0x2d6   : > { %v4238_v51 = vcombine.high %v4236_v12, %v4236_v12  ;;  %v5399_v31 = vrot.slane %v4237_v0, 9  ;;  %v5400_v35 = vrot.slane %v4236_v12, 9  ;;  %v4594_v56 = vmax.f32 %v4229_v21, %v5398_v48 }
 0x2d7   : > { %v4034_v23 = vcombine.high %v4032_v42, %v4032_v42  ;;  %v5351_v60 = vrot.slane %v4033_v44, 9  ;;  %v5352_v18 = vrot.slane %v4032_v42, 9  ;;  %v4546_v45 = vmax.f32 %v4025_v39, %v5350_v22 }
 0x2d8   : > { %v5401_v8 = vrot.slane %v4238_v51, 9  ;;  %v4595_v32 = vmax.f32 %v4237_v0, %v5399_v31  ;;  %v4596_v11 = vmax.f32 %v4236_v12, %v5400_v35  ;;  %v4869_v62 = vrot.slane %v4594_v56, %v8095_v24 }
 0x2d9   : > { %v3854_v38 = vld [vmem:[#allocation2 + $0x18] sm:$0xff]  ;;  %v5353_v34 = vrot.slane %v4034_v23, 9  ;;  %v4547_v3 = vmax.f32 %v4033_v44, %v5351_v60  ;;  %v4548_v10 = vmax.f32 %v4032_v42, %v5352_v18  ;;  %v4677_v54 = vrot.slane %v4546_v45, %v8095_v24  ;;  %v3879_v20 = vld [vmem:[#allocation2 + $0xe0] sm:$0xff] }
 0x2da   : > { %v4597_v19 = vmax.f32 %v4238_v51, %v5401_v8  ;;  %v4873_v57 = vrot.slane %v4595_v32, %v8095_v24  ;;  %v4877_v37 = vrot.slane %v4596_v11, %v8095_v24  ;;  %v3917_v50 = vadd.f32 %v8286_v13, %v3878_v55  ;;  %v3855_v52 = vld [vmem:[#allocation2 + $0x20] sm:$0xff]  ;;  %v3880_v6 = vld [vmem:[#allocation2 + $0xe8] sm:$0xff] }
 0x2db   : > { %v4549_v41 = vmax.f32 %v4034_v23, %v5353_v34  ;;  %v4681_v30 = vrot.slane %v4547_v3, %v8095_v24  ;;  %v4685_v5 = vrot.slane %v4548_v10, %v8095_v24  ;;  %v3893_v26 = vadd.f32 %v8286_v13, %v3854_v38 }
 0x2dc   : > { %v4881_v27 = vrot.slane %v4597_v19, %v8095_v24  ;;  %v4979_v36 = vsel %vm4930_vm8, %v4873_v57, %v4869_v62  ;;  %v3949_v49 = vmax.f32 %v3917_v50, 0.0  ;;  %v3918_v9 = vadd.f32 %v8286_v13, %v3879_v20  ;;  %v3856_v16 = vld [vmem:[#allocation2 + $0x28] sm:$0xff] }
 0x2dd   : > { %v4980_v17 = vsel %vm4932_vm9, %v4877_v37, %v4979_v36  ;;  %v4689_v63 = vrot.slane %v4549_v41, %v8095_v24  ;;  %v4931_v28 = vsel %vm4930_vm8, %v4681_v30, %v4677_v54  ;;  %v3925_v47 = vmax.f32 %v3893_v26, 0.0 }
 0x2de   : > { %v4933_v21 = vsel %vm4932_vm9, %v4685_v5, %v4931_v28  ;;  %3981 = vst.msk [vmem:[%s7981_s25 + $0xd8] sm:$0xff] %vm2038_vm7, %v3949_v49  ;;  %v3999_v53 = vmax.f32 %v3947_v59, %v3949_v49  ;;  %v4981_v40 = vsel %vm4934_vm10, %v4881_v27, %v4980_v17  ;;  %v3950_v39 = vmax.f32 %v3918_v9, 0.0 }
 0x2df   : > { %3957 = vst.msk [vmem:[%s7981_s25 + $0x18] sm:$0xff] %vm2038_vm7, %v3925_v47  ;;  %v3987_v1 = vmax.f32 %v3923_v43, %v3925_v47  ;;  %v4935_v12 = vsel %vm4934_vm10, %v4689_v63, %v4933_v21  ;;  %v3894_v0 = vadd.f32 %v8286_v13, %v3855_v52  ;;  %v8374_v48 = vadd.f32 %v8286_v13, %v3880_v6 }
 0x2e0   : > { %v4239_v42 = vcombine.high %v3999_v53, %v3999_v53  ;;  %v4246_v44 = vrot.slane %v3999_v53, %v8088_v29  ;;  %3982 = vst.msk [vmem:[%s7981_s25 + $0xe0] sm:$0xff] %vm2038_vm7, %v3950_v39  ;;  %v4000_v61 = vmax.f32 %v3950_v39, %v3952_v33  ;;  %v8382_v2 = vadd.f32 %v8286_v13, %v3856_v16 }
 0x2e1   : > { %v4035_v59 = vcombine.high %v3987_v1, %v3987_v1  ;;  %v4042_v43 = vrot.slane %v3987_v1, %v8088_v29  ;;  %v3926_v22 = vmax.f32 %v3894_v0, 0.0  ;;  %v3951_v51 = vmax.f32 %v8374_v48, 0.0 }
 0x2e2   : > { %v4253_v31 = vrot.slane %v4239_v42, %v8088_v29  ;;  %v4254_v35 = vcombine.high %v4246_v44, %v4246_v44  ;;  %v5402_v56 = vrot.slane %v4246_v44, 9  ;;  %v4256_v23 = vcombine.high %v4000_v61, %v4000_v61 }
 0x2e3   : > { %v4049_v60 = vrot.slane %v4035_v59, %v8088_v29  ;;  %v4050_v18 = vcombine.high %v4042_v43, %v4042_v43  ;;  %v5354_v7 = vrot.slane %v4042_v43, 9  ;;  %v4263_v33 = vrot.slane %v4000_v61, %v8088_v29  ;;  %3958 = vst.msk [vmem:[%s7981_s25 + $0x20] sm:$0xff] %vm2038_vm7, %v3926_v22  ;;  %3983 = vst.msk [vmem:[%s7981_s25 + $0xe8] sm:$0xff] %vm2038_vm7, %v3951_v51 }
 0x2e4   : > { %v4255_v13 = vcombine.high %v4253_v31, %v4253_v31  ;;  %v5403_v45 = vrot.slane %v4254_v35, 9  ;;  %v5404_v55 = vrot.slane %v4253_v31, 9  ;;  %v4598_v8 = vmax.f32 %v4246_v44, %v5402_v56 }
 0x2e5   : > { %v4051_v32 = vcombine.high %v4049_v60, %v4049_v60  ;;  %v5355_v11 = vrot.slane %v4050_v18, 9  ;;  %v5356_v62 = vrot.slane %v4049_v60, 9  ;;  %v4550_v38 = vmax.f32 %v4042_v43, %v5354_v7 }
 0x2e6   : > { %v5405_v34 = vrot.slane %v4255_v13, 9  ;;  %v4599_v3 = vmax.f32 %v4254_v35, %v5403_v45  ;;  %v4600_v10 = vmax.f32 %v4253_v31, %v5404_v55  ;;  %v4885_v54 = vrot.slane %v4598_v8, %v8095_v24 }
 0x2e7   : > { %v5357_v20 = vrot.slane %v4051_v32, 9  ;;  %v4551_v19 = vmax.f32 %v4050_v18, %v5355_v11  ;;  %v4552_v57 = vmax.f32 %v4049_v60, %v5356_v62  ;;  %v4693_v37 = vrot.slane %v4550_v38, %v8095_v24 }
 0x2e8   : > { %v4601_v50 = vmax.f32 %v4255_v13, %v5405_v34  ;;  %v4889_v41 = vrot.slane %v4599_v3, %v8095_v24  ;;  %v4893_v30 = vrot.slane %v4600_v10, %v8095_v24  ;;  %v4982_v5 = vsel %vm4936_vm11, %v4885_v54, %v4981_v40 }
 0x2e9   : > { %v4553_v26 = vmax.f32 %v4051_v32, %v5357_v20  ;;  %v4697_v27 = vrot.slane %v4551_v19, %v8095_v24  ;;  %v4701_v36 = vrot.slane %v4552_v57, %v8095_v24  ;;  %v4937_v49 = vsel %vm4936_vm11, %v4693_v37, %v4935_v12 }
 0x2ea   : > { %v4897_v9 = vrot.slane %v4601_v50, %v8095_v24  ;;  %v4983_v52 = vsel %vm4938_vm12, %v4889_v41, %v4982_v5  ;;  %v4270_v6 = vrot.slane %v4256_v23, %v8088_v29  ;;  %v4271_v17 = vcombine.high %v4263_v33, %v4263_v33 }
 0x2eb   : > { %v4984_v63 = vsel %vm4940_vm13, %v4893_v30, %v4983_v52  ;;  %v4705_v28 = vrot.slane %v4553_v26, %v8095_v24  ;;  %v4939_v47 = vsel %vm4938_vm12, %v4697_v27, %v4937_v49  ;;  %v5406_v16 = vrot.slane %v4263_v33, 9 }
 0x2ec   : > { %v4985_v21 = vsel %vm4942_vm14, %v4897_v9, %v4984_v63  ;;  %v4941_v53 = vsel %vm4940_vm13, %v4701_v36, %v4939_v47  ;;  %v4272_v40 = vcombine.high %v4270_v6, %v4270_v6  ;;  %v5407_v39 = vrot.slane %v4271_v17, 9 }
 0x2ed   : > { %5007 = vst.msk [vmem:[%s8144_s27 + $0x30] sm:$0xff] %vm2038_vm7, %v4985_v21  ;;  %v4943_v1 = vsel %vm4942_vm14, %v4705_v28, %v4941_v53  ;;  %v5408_v12 = vrot.slane %v4270_v6, 9  ;;  %v4602_v0 = vmax.f32 %v4263_v33, %v5406_v16  ;;  %v3988_v48 = vmax.f32 %v3926_v22, %v3928_v14 }
 0x2ee   : > { %5001 = vst.msk [vmem:[%s8144_s27] sm:$0xff] %vm2038_vm7, %v4943_v1  ;;  %v5409_v42 = vrot.slane %v4272_v40, 9  ;;  %v4603_v44 = vmax.f32 %v4271_v17, %v5407_v39  ;;  %v4001_v61 = vmax.f32 %v3951_v51, %v3953_v15  ;;  %v3927_v59 = vmax.f32 %v8382_v2, 0.0 }
 0x2ef   : > { %v4604_v43 = vmax.f32 %v4270_v6, %v5408_v12  ;;  %v4901_v31 = vrot.slane %v4602_v0, %v8095_v24  ;;  %v4052_v35 = vcombine.high %v3988_v48, %v3988_v48  ;;  %v4059_v56 = vrot.slane %v3988_v48, %v8088_v29 }
 0x2f0   : > { %v4605_v23 = vmax.f32 %v4272_v40, %v5409_v42  ;;  %v4905_v60 = vrot.slane %v4603_v44, %v8095_v24  ;;  %v4273_v4 = vcombine.high %v4001_v61, %v4001_v61  ;;  %v4280_v14 = vrot.slane %v4001_v61, %v8088_v29  ;;  %3959 = vst.msk [vmem:[%s7981_s25 + $0x28] sm:$0xff] %vm2038_vm7, %v3927_v59 }
 0x2f1   : > { %v4909_v22 = vrot.slane %v4604_v43, %v8095_v24  ;;  %v4066_v25 = vrot.slane %v4052_v35, %v8088_v29  ;;  %v4067_v15 = vcombine.high %v4059_v56, %v4059_v56  ;;  %v5358_v2 = vrot.slane %v4059_v56, 9 }
 0x2f2   : > { %v4913_v51 = vrot.slane %v4605_v23, %v8095_v24  ;;  %v4986_v18 = vsel %vm4930_vm8, %v4905_v60, %v4901_v31  ;;  %v4287_v7 = vrot.slane %v4273_v4, %v8088_v29  ;;  %v4288_v33 = vcombine.high %v4280_v14, %v4280_v14 }
 0x2f3   : > { %v4987_v13 = vsel %vm4932_vm9, %v4909_v22, %v4986_v18  ;;  %v4068_v45 = vcombine.high %v4066_v25, %v4066_v25  ;;  %v5359_v55 = vrot.slane %v4067_v15, 9  ;;  %v5360_v8 = vrot.slane %v4066_v25, 9 }
 0x2f4   : > { %v4554_v32 = vmax.f32 %v4059_v56, %v5358_v2  ;;  %v4289_v11 = vcombine.high %v4287_v7, %v4287_v7  ;;  %v5410_v62 = vrot.slane %v4280_v14, 9  ;;  %v5411_v38 = vrot.slane %v4288_v33, 9 }
 0x2f5   : > { %v5361_v34 = vrot.slane %v4068_v45, 9  ;;  %v4555_v3 = vmax.f32 %v4067_v15, %v5359_v55  ;;  %v4556_v10 = vmax.f32 %v4066_v25, %v5360_v8  ;;  %v5412_v54 = vrot.slane %v4287_v7, 9 }
 0x2f6   : > { %v5413_v20 = vrot.slane %v4289_v11, 9  ;;  %v4606_v19 = vmax.f32 %v4280_v14, %v5410_v62  ;;  %v4607_v57 = vmax.f32 %v4288_v33, %v5411_v38  ;;  %v4709_v50 = vrot.slane %v4554_v32, %v8095_v24 }
 0x2f7   : > { %v4557_v37 = vmax.f32 %v4068_v45, %v5361_v34  ;;  %v4713_v41 = vrot.slane %v4555_v3, %v8095_v24  ;;  %v4608_v30 = vmax.f32 %v4287_v7, %v5412_v54  ;;  %v4717_v5 = vrot.slane %v4556_v10, %v8095_v24 }
 0x2f8   : > { %v4609_v26 = vmax.f32 %v4289_v11, %v5413_v20  ;;  %v4917_v27 = vrot.slane %v4606_v19, %v8095_v24  ;;  %v4988_v36 = vsel %vm4934_vm10, %v4913_v51, %v4987_v13  ;;  %v4921_v9 = vrot.slane %v4607_v57, %v8095_v24 }
 0x2f9   : > { %v4944_v49 = vsel %vm4930_vm8, %v4713_v41, %v4709_v50  ;;  %v3989_v52 = vmax.f32 %v3927_v59, %v3929_v46  ;;  %v4925_v6 = vrot.slane %v4608_v30, %v8095_v24  ;;  %v4721_v21 = vrot.slane %v4557_v37, %v8095_v24 }
 0x2fa   : > { %v4989_v17 = vsel %vm4936_vm11, %v4917_v27, %v4988_v36  ;;  %v4929_v63 = vrot.slane %v4609_v26, %v8095_v24  ;;  %v4945_v53 = vsel %vm4932_vm9, %v4717_v5, %v4944_v49 }
 0x2fb   : > { %v4990_v28 = vsel %vm4938_vm12, %v4921_v9, %v4989_v17  ;;  %v4069_v47 = vcombine.high %v3989_v52, %v3989_v52  ;;  %v4076_v16 = vrot.slane %v3989_v52, %v8088_v29  ;;  %v4946_v44 = vsel %vm4934_vm10, %v4721_v21, %v4945_v53 }
 0x2fc   : > { %v4991_v40 = vsel %vm4940_vm13, %v4925_v6, %v4990_v28 }
 0x2fd   : > { %v4992_v58 = vsel %vm4942_vm14, %v4929_v63, %v4991_v40  ;;  %v4083_v46 = vrot.slane %v4069_v47, %v8088_v29  ;;  %v4084_v39 = vcombine.high %v4076_v16, %v4076_v16  ;;  %v5362_v1 = vrot.slane %v4076_v16, 9 }
 0x2fe   : > { %5008 = vst.msk [vmem:[%s8144_s27 + $0x38] sm:$0xff] %vm2038_vm7, %v4992_v58 }
 0x2ff   : > { %v4085_v12 = vcombine.high %v4083_v46, %v4083_v46  ;;  %v5363_v0 = vrot.slane %v4084_v39, 9  ;;  %v5364_v48 = vrot.slane %v4083_v46, 9  ;;  %v4558_v42 = vmax.f32 %v4076_v16, %v5362_v1 }
 0x301   : > { %v5365_v61 = vrot.slane %v4085_v12, 9  ;;  %v4559_v59 = vmax.f32 %v4084_v39, %v5363_v0  ;;  %v4560_v43 = vmax.f32 %v4083_v46, %v5364_v48  ;;  %v4725_v31 = vrot.slane %v4558_v42, %v8095_v24 }
 0x303   : > { %v4561_v35 = vmax.f32 %v4085_v12, %v5365_v61  ;;  %v4729_v56 = vrot.slane %v4559_v59, %v8095_v24  ;;  %v4947_v29 = vsel %vm4936_vm11, %v4725_v31, %v4946_v44  ;;  %v4733_v23 = vrot.slane %v4560_v43, %v8095_v24 }
 0x305   : > { %v4737_v60 = vrot.slane %v4561_v35, %v8095_v24  ;;  %v4948_v4 = vsel %vm4938_vm12, %v4729_v56, %v4947_v29 }
 0x306   : > { %v4949_v14 = vsel %vm4940_vm13, %v4733_v23, %v4948_v4 }
 0x307   : > { %v4950_v22 = vsel %vm4942_vm14, %v4737_v60, %v4949_v14 }
 0x308   : > { %5002 = vst.msk [vmem:[%s8144_s27 + $0x8] sm:$0xff] %vm2038_vm7, %v4950_v22 }
 0x309 PF: > { %s17_s1 = sadd.s32 1, %s6458_s1   ;;  %s8580_s21 = smov %s6454_s22 }
 0x30a   : > { %p14_p5 = scmp.ge.s32.totalorder %s17_s1, 4   ;;  %s8581_s22 = smov %s8583_s2 }
 0x30c   :  { %16 = sbr.rel (!%p14_p5) target bundleno = 2 (0x2), region = 98 }

</bundles_post_ra>
